<compile_context>
chip_gen: v7x
topology: tpu7x:2x2x1
jax: 0.10.0
libtpu: 0.0.40
codegen_flags: <defaults>
</compile_context>

<pallas_src>
import math
import functools

import jax
import jax.numpy as jnp
from jax.experimental import pallas as pl
from jax.experimental.pallas import tpu as pltpu


_INV_SQRT2 = 1.0 / math.sqrt(2.0)
_VMEM_LIMIT = 32 * 1024 * 1024  # safe on v5e/v6e (128 MiB) and v7x (64 MiB phys)


def _gelu(x):
    # exact GELU (PyTorch nn.GELU default): 0.5*x*(1+erf(x/sqrt(2)))
    return 0.5 * x * (1.0 + jax.lax.erf(x * _INV_SQRT2))


def _round_up(v, m):
    return ((v + m - 1) // m) * m


# ----------------------------------------------------------------------------
# Kernel 1: generic fused matmul  Y = X @ W + b [-> GELU] [-> scale*y+shift]
#   bf16 MXU inputs, f32 accumulation, gridded over M tiles ("parallel").
# ----------------------------------------------------------------------------
def _mm_kernel(*refs, apply_gelu, apply_affine):
    if apply_affine:
        x_ref, w_ref, b_ref, s_ref, sh_ref, o_ref = refs
    else:
        x_ref, w_ref, b_ref, o_ref = refs
    y = jnp.dot(x_ref[...], w_ref[...], preferred_element_type=jnp.float32)
    y = y + b_ref[...]
    if apply_gelu:
        y = _gelu(y)
    if apply_affine:
        y = y * s_ref[...] + sh_ref[...]
    o_ref[...] = y


def matmul_fused(x, w, b, scale=None, shift=None, *, apply_gelu=False):
    """x:(M,K) w:(K,N) b/scale/shift:(N,) -> (M,N) float32."""
    M, K = x.shape
    N = w.shape[1]
    apply_affine = scale is not None

    # M tile: 256 rows when M is large; otherwise a single sublane-padded tile.
    tm = 256 if M >= 256 else _round_up(max(M, 1), 8)
    Mp = _round_up(M, tm)
    if Mp != M:
        x = jnp.pad(x, ((0, Mp - M), (0, 0)))

    operands = [x.astype(jnp.bfloat16), w.astype(jnp.bfloat16),
                b.reshape(1, N).astype(jnp.float32)]
    in_specs = [
        pl.BlockSpec((tm, K), lambda i: (i, 0)),
        pl.BlockSpec((K, N), lambda i: (0, 0)),
        pl.BlockSpec((1, N), lambda i: (0, 0)),
    ]
    if apply_affine:
        operands += [scale.reshape(1, N).astype(jnp.float32),
                     shift.reshape(1, N).astype(jnp.float32)]
        in_specs += [pl.BlockSpec((1, N), lambda i: (0, 0)),
                     pl.BlockSpec((1, N), lambda i: (0, 0))]

    kern = functools.partial(_mm_kernel, apply_gelu=apply_gelu,
                             apply_affine=apply_affine)
    bytes_accessed = (Mp * K + K * N) * 2 + Mp * N * 4 + \
        (3 if apply_affine else 1) * N * 4
    out = pl.pallas_call(
        kern,
        out_shape=jax.ShapeDtypeStruct((Mp, N), jnp.float32),
        grid=(Mp // tm,),
        in_specs=in_specs,
        out_specs=pl.BlockSpec((tm, N), lambda i: (i, 0)),
        compiler_params=pltpu.CompilerParams(
            dimension_semantics=("parallel",),
            vmem_limit_bytes=_VMEM_LIMIT),
        cost_estimate=pl.CostEstimate(
            flops=int(2 * Mp * K * N),
            transcendentals=int(Mp * N) if apply_gelu else 0,
            bytes_accessed=int(bytes_accessed)),
    )(*operands)
    return out[:M] if Mp != M else out


# ----------------------------------------------------------------------------
# Kernel 2: fused 3x3 stride-1 pad-1 conv + GELU + eval-BN (stem conv2/conv3).
#   Input: padded image with rows flattened, (B, (H+2)*(W+2), Cin).
#   One matmul against (Cin, 9*Cout) tap-packed weights, then a 9-tap
#   shift-add over the row-flattened result (static 2-D slices only).
# ----------------------------------------------------------------------------
def _conv3x3_kernel(x_ref, w_ref, b_ref, s_ref, sh_ref, o_ref, *, w_pad, cout):
    L = o_ref.shape[1]
    # (R, Cin) @ (Cin, 9*Cout) -> (R, 9*Cout), f32 accumulation on the MXU.
    y = jnp.dot(x_ref[0], w_ref[...], preferred_element_type=jnp.float32)
    acc = jnp.zeros((L, cout), jnp.float32)
    for t in range(9):
        i, j = t // 3, t % 3
        d = i * w_pad + j                        # row shift in the flattened image
        acc = acc + y[d:d + L, t * cout:(t + 1) * cout]
    z = acc + b_ref[...]
    z = _gelu(z)
    z = z * s_ref[...] + sh_ref[...]             # folded eval-mode BatchNorm
    o_ref[0] = z


def conv3x3_s1_gelu_bn(x_nhwc, conv_p, bn_p):
    B, H, W, C = x_nhwc.shape
    w, b = conv_p["w"], conv_p["b"]              # w: (Cout, Cin, 3, 3)
    cout = w.shape[0]
    wp = W + 2
    R = (H + 2) * wp
    L = R - (2 * wp + 2)                         # == H*wp - 2 "wide" output rows

    x_pad = jnp.pad(x_nhwc, ((0, 0), (1, 1), (1, 1), (0, 0)))
    x_flat = x_pad.reshape(B, R, C).astype(jnp.bfloat16)
    # (Cin, 9*Cout); column index = (i*3 + j)*Cout + n
    w_mat = jnp.transpose(w, (1, 2, 3, 0)).reshape(C, 9 * cout).astype(jnp.bfloat16)

    eps = 1e-5
    scale = bn_p["gamma"] / jnp.sqrt(bn_p["var"] + eps)
    shift = bn_p["beta"] - bn_p["mean"] * scale

    kern = functools.partial(_conv3x3_kernel, w_pad=wp, cout=cout)
    bytes_accessed = B * R * C * 2 + C * 9 * cout * 2 + B * L * cout * 4 + 3 * cout * 4
    out_wide = pl.pallas_call(
        kern,
        out_shape=jax.ShapeDtypeStruct((B, L, cout), jnp.float32),
        grid=(B,),
        in_specs=[
            pl.BlockSpec((1, R, C), lambda bb: (bb, 0, 0)),
            pl.BlockSpec((C, 9 * cout), lambda bb: (0, 0)),
            pl.BlockSpec((1, cout), lambda bb: (0, 0)),
            pl.BlockSpec((1, cout), lambda bb: (0, 0)),
            pl.BlockSpec((1, cout), lambda bb: (0, 0)),
        ],
        out_specs=pl.BlockSpec((1, L, cout), lambda bb: (bb, 0, 0)),
        compiler_params=pltpu.CompilerParams(
            dimension_semantics=("parallel",),
            vmem_limit_bytes=_VMEM_LIMIT),
        cost_estimate=pl.CostEstimate(
            flops=int(2 * B * R * C * 9 * cout),
            transcendentals=int(B * L * cout),
            bytes_accessed=int(bytes_accessed)),
    )(x_flat, w_mat, b.reshape(1, cout).astype(jnp.float32),
      scale.reshape(1, cout).astype(jnp.float32),
      shift.reshape(1, cout).astype(jnp.float32))

    # Crop the "wide" rows (r = y*(W+2) + x) back to (B, H, W, Cout).
    out_wide = jnp.pad(out_wide, ((0, 0), (0, H * wp - L), (0, 0)))
    return out_wide.reshape(B, H, wp, cout)[:, :, :W, :]


# ----------------------------------------------------------------------------
# Kernel 3: fused classification head  fc1 -> GELU -> fc2 -> GELU -> fc3
#   Single pallas_call; intermediates stay in VMEM (latency/launch bound at B=2).
# ----------------------------------------------------------------------------
def _head_kernel(x_ref, w1_ref, b1_ref, w2_ref, b2_ref, w3_ref, b3_ref, o_ref):
    h = jnp.dot(x_ref[...], w1_ref[...], preferred_element_type=jnp.float32)
    h = _gelu(h + b1_ref[...]).astype(jnp.bfloat16)
    h = jnp.dot(h, w2_ref[...], preferred_element_type=jnp.float32)
    h = _gelu(h + b2_ref[...]).astype(jnp.bfloat16)
    o_ref[...] = jnp.dot(h, w3_ref[...],
                         preferred_element_type=jnp.float32) + b3_ref[...]


def head_fused(x, fc1, fc2, fc3):
    B, d0 = x.shape
    d1 = fc1["w"].shape[1]
    d2 = fc2["w"].shape[1]
    nc = fc3["w"].shape[1]
    operands = [
        x.astype(jnp.bfloat16),
        fc1["w"].astype(jnp.bfloat16), fc1["b"].reshape(1, d1).astype(jnp.float32),
        fc2["w"].astype(jnp.bfloat16), fc2["b"].reshape(1, d2).astype(jnp.float32),
        fc3["w"].astype(jnp.bfloat16), fc3["b"].reshape(1, nc).astype(jnp.float32),
    ]
    flops = 2 * B * (d0 * d1 + d1 * d2 + d2 * nc)
    bytes_accessed = (B * d0 + d0 * d1 + d1 * d2 + d2 * nc) * 2 \
        + (d1 + d2 + nc) * 4 + B * nc * 4
    return pl.pallas_call(
        _head_kernel,
        out_shape=jax.ShapeDtypeStruct((B, nc), jnp.float32),
        in_specs=[pl.BlockSpec(memory_space=pltpu.MemorySpace.VMEM)] * 7,
        out_specs=pl.BlockSpec(memory_space=pltpu.MemorySpace.VMEM),
        compiler_params=pltpu.CompilerParams(vmem_limit_bytes=_VMEM_LIMIT),
        cost_estimate=pl.CostEstimate(
            flops=int(flops),
            transcendentals=int(B * (d1 + d2)),
            bytes_accessed=int(bytes_accessed)),
    )(*operands)


# ----------------------------------------------------------------------------
# Conv-as-matmul glue for stride-2 convs (stem conv1: 2.25x; downsamplers: 1x).
# ----------------------------------------------------------------------------
def _im2col(x_nhwc, kh, kw, stride, pad):
    if pad:
        x_nhwc = jnp.pad(x_nhwc, ((0, 0), (pad, pad), (pad, pad), (0, 0)))
    B, H, W, C = x_nhwc.shape
    oh = (H - kh) // stride + 1
    ow = (W - kw) // stride + 1
    patches = []
    for i in range(kh):
        for j in range(kw):
            patches.append(
                x_nhwc[:, i:i + stride * oh:stride, j:j + stride * ow:stride, :])
    p = jnp.concatenate(patches, axis=-1)        # (B, oh, ow, kh*kw*C)
    return p.reshape(B * oh * ow, kh * kw * C), (B, oh, ow)


def conv2d_matmul(x_nhwc, conv_p, *, stride, pad, apply_gelu=False, bn=None):
    w, b = conv_p["w"], conv_p["b"]              # w: (Cout, Cin, kh, kw)
    cout, cin, kh, kw = w.shape
    w_mat = jnp.transpose(w, (2, 3, 1, 0)).reshape(kh * kw * cin, cout)
    # cast before im2col so the patch matrix moves as bf16
    x_mat, (B, oh, ow) = _im2col(x_nhwc.astype(jnp.bfloat16), kh, kw, stride, pad)
    if bn is not None:
        eps = 1e-5
        scale = bn["gamma"] / jnp.sqrt(bn["var"] + eps)
        shift = bn["beta"] - bn["mean"] * scale
        y = matmul_fused(x_mat, w_mat, b, scale, shift, apply_gelu=apply_gelu)
    else:
        y = matmul_fused(x_mat, w_mat, b, apply_gelu=apply_gelu)
    return y.reshape(B, oh, ow, cout)


# ----------------------------------------------------------------------------
# Deterministic parameter construction
# ----------------------------------------------------------------------------
def _conv_params(key, cout, cin, k):
    k1, k2 = jax.random.split(key)
    return {
        "w": 0.05 * jax.random.normal(k1, (cout, cin, k, k), jnp.float32),
        "b": 0.05 * jax.random.normal(k2, (cout,), jnp.float32),
    }


def _bn_params(key, c):
    k1, k2, k3, k4 = jax.random.split(key, 4)
    return {
        "gamma": 1.0 + 0.05 * jax.random.normal(k1, (c,), jnp.float32),
        "beta": 0.05 * jax.random.normal(k2, (c,), jnp.float32),
        "mean": 0.05 * jax.random.normal(k3, (c,), jnp.float32),
        "var": 0.5 + jnp.abs(jax.random.normal(k4, (c,), jnp.float32)),
    }


def _linear_params(key, fin, fout):
    k1, k2 = jax.random.split(key)
    return {
        "w": 0.05 * jax.random.normal(k1, (fin, fout), jnp.float32),
        "b": 0.05 * jax.random.normal(k2, (fout,), jnp.float32),
    }


def init_params(key, num_class):
    keys = jax.random.split(key, 32)
    p = {}
    # stem: three 3x3 convs, each followed by GELU + BatchNorm2d
    p["stem_conv1"] = _conv_params(keys[0], 32, 3, 3)
    p["stem_bn1"] = _bn_params(keys[1], 32)
    p["stem_conv2"] = _conv_params(keys[2], 32, 32, 3)
    p["stem_bn2"] = _bn_params(keys[3], 32)
    p["stem_conv3"] = _conv_params(keys[4], 32, 32, 3)
    p["stem_bn3"] = _bn_params(keys[5], 32)
    # downsamplers: 2x2 stride-2 convs
    p["ds1"] = _conv_params(keys[6], 64, 32, 2)
    p["ds2"] = _conv_params(keys[7], 128, 64, 2)
    p["ds3"] = _conv_params(keys[8], 256, 128, 2)
    p["ds4"] = _conv_params(keys[9], 512, 256, 2)
    # head
    p["fc1"] = _linear_params(keys[10], 512, 1280)
    p["fc2"] = _linear_params(keys[11], 1280, 1000)
    p["fc3"] = _linear_params(keys[12], 1000, num_class)
    return p


# ----------------------------------------------------------------------------
# Forward pass
# ----------------------------------------------------------------------------
def main_model_forward(params, x_nchw):
    x = jnp.transpose(x_nchw, (0, 2, 3, 1)).astype(jnp.float32)   # NHWC

    # stem
    x = conv2d_matmul(x, params["stem_conv1"], stride=2, pad=1,
                      apply_gelu=True, bn=params["stem_bn1"])
    x = conv3x3_s1_gelu_bn(x, params["stem_conv2"], params["stem_bn2"])
    x = conv3x3_s1_gelu_bn(x, params["stem_conv3"], params["stem_bn3"])

    # downsampler1..4 (2x2 stride-2 -> im2col is a pure space-to-depth)
    x = conv2d_matmul(x, params["ds1"], stride=2, pad=0)
    # TODO(synk): CMTBlock is not defined in the reference source; stage1-4 are left as identity.
    x = conv2d_matmul(x, params["ds2"], stride=2, pad=0)
    x = conv2d_matmul(x, params["ds3"], stride=2, pad=0)
    x = conv2d_matmul(x, params["ds4"], stride=2, pad=0)

    # out head: AvgPool2d(kernel_size=1) is identity; Flatten (spatial is 1x1);
    # fc1 -> GELU -> fc2 -> GELU -> fc3 fused into one kernel.
    B = x.shape[0]
    x = x.reshape(B, -1)                                          # (B, 512)
    return head_fused(x, params["fc1"], params["fc2"], params["fc3"])


if __name__ == "__main__":
    num_class = 10
    key = jax.random.PRNGKey(0)
    k_param, k_x = jax.random.split(key)
    params = init_params(k_param, num_class)

    # input must be 3x32x32 so spatial resolution reaches 1x1 before Flatten
    x = jax.random.normal(k_x, (2, 3, 32, 32), jnp.float32)       # NCHW like PyTorch

    fwd = jax.jit(main_model_forward)
    out = fwd(params, x)
    jax.block_until_ready(out)
    assert out.shape == (2, num_class), out.shape
    assert out.dtype == jnp.float32
    print("KERNEL_OK")
</pallas_src>

<mosaic_0001>
module attributes {stable_mosaic.version = 11 : i64} {
  func.func @_mm_kernel(%arg0: i32, %arg1: memref<256x27xbf16, #tpu.memory_space<vmem>>, %arg2: memref<27x32xbf16, #tpu.memory_space<vmem>>, %arg3: memref<1x32xf32, #tpu.memory_space<vmem>>, %arg4: memref<1x32xf32, #tpu.memory_space<vmem>>, %arg5: memref<1x32xf32, #tpu.memory_space<vmem>>, %arg6: memref<256x32xf32, #tpu.memory_space<vmem>>) attributes {dimension_semantics = [#tpu.dimension_semantics<parallel>], iteration_bounds = array<i64: 2>, scalar_prefetch = 0 : i64, scratch_operands = 0 : i64, tpu.core_type = #tpu.core_type<tc>, window_params = [{transform_indices = @transform_0, window_bounds = array<i64: 256, 27>}, {pipeline_mode = #tpu.pipeline_mode<synchronous>, transform_indices = @transform_1, window_bounds = array<i64: 27, 32>}, {pipeline_mode = #tpu.pipeline_mode<synchronous>, transform_indices = @transform_2, window_bounds = array<i64: 1, 32>}, {pipeline_mode = #tpu.pipeline_mode<synchronous>, transform_indices = @transform_3, window_bounds = array<i64: 1, 32>}, {pipeline_mode = #tpu.pipeline_mode<synchronous>, transform_indices = @transform_4, window_bounds = array<i64: 1, 32>}, {transform_indices = @transform_5, window_bounds = array<i64: 256, 32>}]} {
    %c0 = arith.constant 0 : index
    %c0_0 = arith.constant 0 : index
    %0 = vector.load %arg1[%c0, %c0_0] : memref<256x27xbf16, #tpu.memory_space<vmem>>, vector<256x27xbf16>
    %c0_1 = arith.constant 0 : index
    %c0_2 = arith.constant 0 : index
    %1 = vector.load %arg2[%c0_1, %c0_2] : memref<27x32xbf16, #tpu.memory_space<vmem>>, vector<27x32xbf16>
    %cst = arith.constant dense<0.000000e+00> : vector<256x32xf32>
    %2 = tpu.matmul %0, %1, %cst {dimension_numbers = #tpu.dot_dimension_numbers<[1], [0], [0], [1], [0, 0, 1, 1], [], []>} : vector<256x27xbf16>, vector<27x32xbf16>, vector<256x32xf32> -> vector<256x32xf32>
    %c0_3 = arith.constant 0 : index
    %c0_4 = arith.constant 0 : index
    %3 = vector.load %arg3[%c0_3, %c0_4] : memref<1x32xf32, #tpu.memory_space<vmem>>, vector<1x32xf32>
    %4 = vector.broadcast %3 : vector<1x32xf32> to vector<256x32xf32>
    %5 = arith.addf %2, %4 : vector<256x32xf32>
    %cst_5 = arith.constant 5.000000e-01 : f32
    %6 = vector.broadcast %cst_5 : f32 to vector<256x32xf32>
    %7 = arith.mulf %6, %5 : vector<256x32xf32>
    %cst_6 = arith.constant 0.707106769 : f32
    %8 = vector.broadcast %cst_6 : f32 to vector<256x32xf32>
    %9 = arith.mulf %5, %8 : vector<256x32xf32>
    %10 = math.erf %9 : vector<256x32xf32>
    %cst_7 = arith.constant 1.000000e+00 : f32
    %11 = vector.broadcast %cst_7 : f32 to vector<256x32xf32>
    %12 = arith.addf %11, %10 : vector<256x32xf32>
    %13 = arith.mulf %7, %12 : vector<256x32xf32>
    %c0_8 = arith.constant 0 : index
    %c0_9 = arith.constant 0 : index
    %14 = vector.load %arg4[%c0_8, %c0_9] : memref<1x32xf32, #tpu.memory_space<vmem>>, vector<1x32xf32>
    %15 = vector.broadcast %14 : vector<1x32xf32> to vector<256x32xf32>
    %16 = arith.mulf %13, %15 : vector<256x32xf32>
    %c0_10 = arith.constant 0 : index
    %c0_11 = arith.constant 0 : index
    %17 = vector.load %arg5[%c0_10, %c0_11] : memref<1x32xf32, #tpu.memory_space<vmem>>, vector<1x32xf32>
    %18 = vector.broadcast %17 : vector<1x32xf32> to vector<256x32xf32>
    %19 = arith.addf %16, %18 : vector<256x32xf32>
    %c0_12 = arith.constant 0 : index
    %c0_13 = arith.constant 0 : index
    %20 = vector.load %arg6[%c0_12, %c0_13] : memref<256x32xf32, #tpu.memory_space<vmem>>, vector<256x32xf32>
    tpu.vector_store %arg6[%c0_12, %c0_13], %19 {strides = array<i32>} : memref<256x32xf32, #tpu.memory_space<vmem>>, vector<256x32xf32>,
    return
  }
  func.func @transform_0(%arg0: i32) -> (i32, i32) {
    %c0_i32 = arith.constant 0 : i32
    %c0_i32_0 = arith.constant 0 : i32
    return %arg0, %c0_i32 : i32, i32
  }
  func.func @transform_1(%arg0: i32) -> (i32, i32) {
    %c0_i32 = arith.constant 0 : i32
    %c0_i32_0 = arith.constant 0 : i32
    %c0_i32_1 = arith.constant 0 : i32
    return %c0_i32, %c0_i32_0 : i32, i32
  }
  func.func @transform_2(%arg0: i32) -> (i32, i32) {
    %c0_i32 = arith.constant 0 : i32
    %c0_i32_0 = arith.constant 0 : i32
    %c0_i32_1 = arith.constant 0 : i32
    return %c0_i32, %c0_i32_0 : i32, i32
  }
  func.func @transform_3(%arg0: i32) -> (i32, i32) {
    %c0_i32 = arith.constant 0 : i32
    %c0_i32_0 = arith.constant 0 : i32
    %c0_i32_1 = arith.constant 0 : i32
    return %c0_i32, %c0_i32_0 : i32, i32
  }
  func.func @transform_4(%arg0: i32) -> (i32, i32) {
    %c0_i32 = arith.constant 0 : i32
    %c0_i32_0 = arith.constant 0 : i32
    %c0_i32_1 = arith.constant 0 : i32
    return %c0_i32, %c0_i32_0 : i32, i32
  }
  func.func @transform_5(%arg0: i32) -> (i32, i32) {
    %c0_i32 = arith.constant 0 : i32
    %c0_i32_0 = arith.constant 0 : i32
    return %arg0, %c0_i32 : i32, i32
  }
}

module attributes {stable_mosaic.version = 11 : i64} {
  func.func @_conv3x3_kernel(%arg0: i32, %arg1: memref<1x324x32xbf16, #tpu.memory_space<vmem>>, %arg2: memref<32x288xbf16, #tpu.memory_space<vmem>>, %arg3: memref<1x32xf32, #tpu.memory_space<vmem>>, %arg4: memref<1x32xf32, #tpu.memory_space<vmem>>, %arg5: memref<1x32xf32, #tpu.memory_space<vmem>>, %arg6: memref<1x286x32xf32, #tpu.memory_space<vmem>>) attributes {dimension_semantics = [#tpu.dimension_semantics<parallel>], iteration_bounds = array<i64: 2>, scalar_prefetch = 0 : i64, scratch_operands = 0 : i64, tpu.core_type = #tpu.core_type<tc>, window_params = [{transform_indices = @transform_0, window_bounds = array<i64: 1, 324, 32>}, {pipeline_mode = #tpu.pipeline_mode<synchronous>, transform_indices = @transform_1, window_bounds = array<i64: 32, 288>}, {pipeline_mode = #tpu.pipeline_mode<synchronous>, transform_indices = @transform_2, window_bounds = array<i64: 1, 32>}, {pipeline_mode = #tpu.pipeline_mode<synchronous>, transform_indices = @transform_3, window_bounds = array<i64: 1, 32>}, {pipeline_mode = #tpu.pipeline_mode<synchronous>, transform_indices = @transform_4, window_bounds = array<i64: 1, 32>}, {transform_indices = @transform_5, window_bounds = array<i64: 1, 286, 32>}]} {
    %c0 = arith.constant 0 : index
    %c0_0 = arith.constant 0 : index
    %c0_1 = arith.constant 0 : index
    %0 = vector.load %arg1[%c0, %c0_0, %c0_1] : memref<1x324x32xbf16, #tpu.memory_space<vmem>>, vector<1x324x32xbf16>
    %1 = vector.shape_cast %0 : vector<1x324x32xbf16> to vector<324x32xbf16>
    %c0_2 = arith.constant 0 : index
    %c0_3 = arith.constant 0 : index
    %2 = vector.load %arg2[%c0_2, %c0_3] : memref<32x288xbf16, #tpu.memory_space<vmem>>, vector<32x288xbf16>
    %cst = arith.constant dense<0.000000e+00> : vector<324x288xf32>
    %3 = tpu.matmul %1, %2, %cst {dimension_numbers = #tpu.dot_dimension_numbers<[1], [0], [0], [1], [0, 0, 1, 1], [], []>} : vector<324x32xbf16>, vector<32x288xbf16>, vector<324x288xf32> -> vector<324x288xf32>
    %cst_4 = arith.constant 0.000000e+00 : f32
    %4 = vector.broadcast %cst_4 : f32 to vector<286x32xf32>
    %5 = vector.extract_strided_slice %3 {offsets = [0, 0], sizes = [286, 32], strides = [1, 1]} : vector<324x288xf32> to vector<286x32xf32>
    %6 = arith.addf %4, %5 : vector<286x32xf32>
    %7 = vector.extract_strided_slice %3 {offsets = [1, 32], sizes = [286, 32], strides = [1, 1]} : vector<324x288xf32> to vector<286x32xf32>
    %8 = arith.addf %6, %7 : vector<286x32xf32>
    %9 = vector.extract_strided_slice %3 {offsets = [2, 64], sizes = [286, 32], strides = [1, 1]} : vector<324x288xf32> to vector<286x32xf32>
    %10 = arith.addf %8, %9 : vector<286x32xf32>
    %11 = vector.extract_strided_slice %3 {offsets = [18, 96], sizes = [286, 32], strides = [1, 1]} : vector<324x288xf32> to vector<286x32xf32>
    %12 = arith.addf %10, %11 : vector<286x32xf32>
    %13 = vector.extract_strided_slice %3 {offsets = [19, 128], sizes = [286, 32], strides = [1, 1]} : vector<324x288xf32> to vector<286x32xf32>
    %14 = arith.addf %12, %13 : vector<286x32xf32>
    %15 = vector.extract_strided_slice %3 {offsets = [20, 160], sizes = [286, 32], strides = [1, 1]} : vector<324x288xf32> to vector<286x32xf32>
    %16 = arith.addf %14, %15 : vector<286x32xf32>
    %17 = vector.extract_strided_slice %3 {offsets = [36, 192], sizes = [286, 32], strides = [1, 1]} : vector<324x288xf32> to vector<286x32xf32>
    %18 = arith.addf %16, %17 : vector<286x32xf32>
    %19 = vector.extract_strided_slice %3 {offsets = [37, 224], sizes = [286, 32], strides = [1, 1]} : vector<324x288xf32> to vector<286x32xf32>
    %20 = arith.addf %18, %19 : vector<286x32xf32>
    %21 = vector.extract_strided_slice %3 {offsets = [38, 256], sizes = [286, 32], strides = [1, 1]} : vector<324x288xf32> to vector<286x32xf32>
    %22 = arith.addf %20, %21 : vector<286x32xf32>
    %c0_5 = arith.constant 0 : index
    %c0_6 = arith.constant 0 : index
    %23 = vector.load %arg3[%c0_5, %c0_6] : memref<1x32xf32, #tpu.memory_space<vmem>>, vector<1x32xf32>
    %24 = vector.broadcast %23 : vector<1x32xf32> to vector<286x32xf32>
    %25 = arith.addf %22, %24 : vector<286x32xf32>
    %cst_7 = arith.constant 5.000000e-01 : f32
    %26 = vector.broadcast %cst_7 : f32 to vector<286x32xf32>
    %27 = arith.mulf %26, %25 : vector<286x32xf32>
    %cst_8 = arith.constant 0.707106769 : f32
    %28 = vector.broadcast %cst_8 : f32 to vector<286x32xf32>
    %29 = arith.mulf %25, %28 : vector<286x32xf32>
    %30 = math.erf %29 : vector<286x32xf32>
    %cst_9 = arith.constant 1.000000e+00 : f32
    %31 = vector.broadcast %cst_9 : f32 to vector<286x32xf32>
    %32 = arith.addf %31, %30 : vector<286x32xf32>
    %33 = arith.mulf %27, %32 : vector<286x32xf32>
    %c0_10 = arith.constant 0 : index
    %c0_11 = arith.constant 0 : index
    %34 = vector.load %arg4[%c0_10, %c0_11] : memref<1x32xf32, #tpu.memory_space<vmem>>, vector<1x32xf32>
    %35 = vector.broadcast %34 : vector<1x32xf32> to vector<286x32xf32>
    %36 = arith.mulf %33, %35 : vector<286x32xf32>
    %c0_12 = arith.constant 0 : index
    %c0_13 = arith.constant 0 : index
    %37 = vector.load %arg5[%c0_12, %c0_13] : memref<1x32xf32, #tpu.memory_space<vmem>>, vector<1x32xf32>
    %38 = vector.broadcast %37 : vector<1x32xf32> to vector<286x32xf32>
    %39 = arith.addf %36, %38 : vector<286x32xf32>
    %c0_14 = arith.constant 0 : index
    %c0_15 = arith.constant 0 : index
    %c0_16 = arith.constant 0 : index
    %40 = vector.load %arg6[%c0_14, %c0_15, %c0_16] : memref<1x286x32xf32, #tpu.memory_space<vmem>>, vector<1x286x32xf32>
    %41 = vector.shape_cast %40 : vector<1x286x32xf32> to vector<286x32xf32>
    %42 = vector.shape_cast %39 : vector<286x32xf32> to vector<1x286x32xf32>
    tpu.vector_store %arg6[%c0_14, %c0_15, %c0_16], %42 {strides = array<i32>} : memref<1x286x32xf32, #tpu.memory_space<vmem>>, vector<1x286x32xf32>,
    return
  }
  func.func @transform_0(%arg0: i32) -> (i32, i32, i32) {
    %c0_i32 = arith.constant 0 : i32
    %c0_i32_0 = arith.constant 0 : i32
    %c0_i32_1 = arith.constant 0 : i32
    return %arg0, %c0_i32, %c0_i32_0 : i32, i32, i32
  }
  func.func @transform_1(%arg0: i32) -> (i32, i32) {
    %c0_i32 = arith.constant 0 : i32
    %c0_i32_0 = arith.constant 0 : i32
    %c0_i32_1 = arith.constant 0 : i32
    return %c0_i32, %c0_i32_0 : i32, i32
  }
  func.func @transform_2(%arg0: i32) -> (i32, i32) {
    %c0_i32 = arith.constant 0 : i32
    %c0_i32_0 = arith.constant 0 : i32
    %c0_i32_1 = arith.constant 0 : i32
    return %c0_i32, %c0_i32_0 : i32, i32
  }
  func.func @transform_3(%arg0: i32) -> (i32, i32) {
    %c0_i32 = arith.constant 0 : i32
    %c0_i32_0 = arith.constant 0 : i32
    %c0_i32_1 = arith.constant 0 : i32
    return %c0_i32, %c0_i32_0 : i32, i32
  }
  func.func @transform_4(%arg0: i32) -> (i32, i32) {
    %c0_i32 = arith.constant 0 : i32
    %c0_i32_0 = arith.constant 0 : i32
    %c0_i32_1 = arith.constant 0 : i32
    return %c0_i32, %c0_i32_0 : i32, i32
  }
  func.func @transform_5(%arg0: i32) -> (i32, i32, i32) {
    %c0_i32 = arith.constant 0 : i32
    %c0_i32_0 = arith.constant 0 : i32
    %c0_i32_1 = arith.constant 0 : i32
    return %arg0, %c0_i32, %c0_i32_0 : i32, i32, i32
  }
}

module attributes {stable_mosaic.version = 11 : i64} {
  func.func @_mm_kernel(%arg0: i32, %arg1: memref<128x128xbf16, #tpu.memory_space<vmem>>, %arg2: memref<128x64xbf16, #tpu.memory_space<vmem>>, %arg3: memref<1x64xf32, #tpu.memory_space<vmem>>, %arg4: memref<128x64xf32, #tpu.memory_space<vmem>>) attributes {dimension_semantics = [#tpu.dimension_semantics<parallel>], iteration_bounds = array<i64: 1>, scalar_prefetch = 0 : i64, scratch_operands = 0 : i64, tpu.core_type = #tpu.core_type<tc>, window_params = [{transform_indices = @transform_0, window_bounds = array<i64: 128, 128>}, {pipeline_mode = #tpu.pipeline_mode<synchronous>, transform_indices = @transform_1, window_bounds = array<i64: 128, 64>}, {pipeline_mode = #tpu.pipeline_mode<synchronous>, transform_indices = @transform_2, window_bounds = array<i64: 1, 64>}, {transform_indices = @transform_3, window_bounds = array<i64: 128, 64>}]} {
    %c0 = arith.constant 0 : index
    %c0_0 = arith.constant 0 : index
    %0 = vector.load %arg1[%c0, %c0_0] : memref<128x128xbf16, #tpu.memory_space<vmem>>, vector<128x128xbf16>
    %c0_1 = arith.constant 0 : index
    %c0_2 = arith.constant 0 : index
    %1 = vector.load %arg2[%c0_1, %c0_2] : memref<128x64xbf16, #tpu.memory_space<vmem>>, vector<128x64xbf16>
    %cst = arith.constant dense<0.000000e+00> : vector<128x64xf32>
    %2 = tpu.matmul %0, %1, %cst {dimension_numbers = #tpu.dot_dimension_numbers<[1], [0], [0], [1], [0, 0, 1, 1], [], []>} : vector<128x128xbf16>, vector<128x64xbf16>, vector<128x64xf32> -> vector<128x64xf32>
    %c0_3 = arith.constant 0 : index
    %c0_4 = arith.constant 0 : index
    %3 = vector.load %arg3[%c0_3, %c0_4] : memref<1x64xf32, #tpu.memory_space<vmem>>, vector<1x64xf32>
    %4 = vector.broadcast %3 : vector<1x64xf32> to vector<128x64xf32>
    %5 = arith.addf %2, %4 : vector<128x64xf32>
    %c0_5 = arith.constant 0 : index
    %c0_6 = arith.constant 0 : index
    %6 = vector.load %arg4[%c0_5, %c0_6] : memref<128x64xf32, #tpu.memory_space<vmem>>, vector<128x64xf32>
    tpu.vector_store %arg4[%c0_5, %c0_6], %5 {strides = array<i32>} : memref<128x64xf32, #tpu.memory_space<vmem>>, vector<128x64xf32>,
    return
  }
  func.func @transform_0(%arg0: i32) -> (i32, i32) {
    %c0_i32 = arith.constant 0 : i32
    %c0_i32_0 = arith.constant 0 : i32
    return %arg0, %c0_i32 : i32, i32
  }
  func.func @transform_1(%arg0: i32) -> (i32, i32) {
    %c0_i32 = arith.constant 0 : i32
    %c0_i32_0 = arith.constant 0 : i32
    %c0_i32_1 = arith.constant 0 : i32
    return %c0_i32, %c0_i32_0 : i32, i32
  }
  func.func @transform_2(%arg0: i32) -> (i32, i32) {
    %c0_i32 = arith.constant 0 : i32
    %c0_i32_0 = arith.constant 0 : i32
    %c0_i32_1 = arith.constant 0 : i32
    return %c0_i32, %c0_i32_0 : i32, i32
  }
  func.func @transform_3(%arg0: i32) -> (i32, i32) {
    %c0_i32 = arith.constant 0 : i32
    %c0_i32_0 = arith.constant 0 : i32
    return %arg0, %c0_i32 : i32, i32
  }
}

module attributes {stable_mosaic.version = 11 : i64} {
  func.func @_mm_kernel(%arg0: i32, %arg1: memref<32x256xbf16, #tpu.memory_space<vmem>>, %arg2: memref<256x128xbf16, #tpu.memory_space<vmem>>, %arg3: memref<1x128xf32, #tpu.memory_space<vmem>>, %arg4: memref<32x128xf32, #tpu.memory_space<vmem>>) attributes {dimension_semantics = [#tpu.dimension_semantics<parallel>], iteration_bounds = array<i64: 1>, scalar_prefetch = 0 : i64, scratch_operands = 0 : i64, tpu.core_type = #tpu.core_type<tc>, window_params = [{transform_indices = @transform_0, window_bounds = array<i64: 32, 256>}, {pipeline_mode = #tpu.pipeline_mode<synchronous>, transform_indices = @transform_1, window_bounds = array<i64: 256, 128>}, {pipeline_mode = #tpu.pipeline_mode<synchronous>, transform_indices = @transform_2, window_bounds = array<i64: 1, 128>}, {transform_indices = @transform_3, window_bounds = array<i64: 32, 128>}]} {
    %c0 = arith.constant 0 : index
    %c0_0 = arith.constant 0 : index
    %0 = vector.load %arg1[%c0, %c0_0] : memref<32x256xbf16, #tpu.memory_space<vmem>>, vector<32x256xbf16>
    %c0_1 = arith.constant 0 : index
    %c0_2 = arith.constant 0 : index
    %1 = vector.load %arg2[%c0_1, %c0_2] : memref<256x128xbf16, #tpu.memory_space<vmem>>, vector<256x128xbf16>
    %cst = arith.constant dense<0.000000e+00> : vector<32x128xf32>
    %2 = tpu.matmul %0, %1, %cst {dimension_numbers = #tpu.dot_dimension_numbers<[1], [0], [0], [1], [0, 0, 1, 1], [], []>} : vector<32x256xbf16>, vector<256x128xbf16>, vector<32x128xf32> -> vector<32x128xf32>
    %c0_3 = arith.constant 0 : index
    %c0_4 = arith.constant 0 : index
    %3 = vector.load %arg3[%c0_3, %c0_4] : memref<1x128xf32, #tpu.memory_space<vmem>>, vector<1x128xf32>
    %4 = vector.broadcast %3 : vector<1x128xf32> to vector<32x128xf32>
    %5 = arith.addf %2, %4 : vector<32x128xf32>
    %c0_5 = arith.constant 0 : index
    %c0_6 = arith.constant 0 : index
    %6 = vector.load %arg4[%c0_5, %c0_6] : memref<32x128xf32, #tpu.memory_space<vmem>>, vector<32x128xf32>
    tpu.vector_store %arg4[%c0_5, %c0_6], %5 {strides = array<i32>} : memref<32x128xf32, #tpu.memory_space<vmem>>, vector<32x128xf32>,
    return
  }
  func.func @transform_0(%arg0: i32) -> (i32, i32) {
    %c0_i32 = arith.constant 0 : i32
    %c0_i32_0 = arith.constant 0 : i32
    return %arg0, %c0_i32 : i32, i32
  }
  func.func @transform_1(%arg0: i32) -> (i32, i32) {
    %c0_i32 = arith.constant 0 : i32
    %c0_i32_0 = arith.constant 0 : i32
    %c0_i32_1 = arith.constant 0 : i32
    return %c0_i32, %c0_i32_0 : i32, i32
  }
  func.func @transform_2(%arg0: i32) -> (i32, i32) {
    %c0_i32 = arith.constant 0 : i32
    %c0_i32_0 = arith.constant 0 : i32
    %c0_i32_1 = arith.constant 0 : i32
    return %c0_i32, %c0_i32_0 : i32, i32
  }
  func.func @transform_3(%arg0: i32) -> (i32, i32) {
    %c0_i32 = arith.constant 0 : i32
    %c0_i32_0 = arith.constant 0 : i32
    return %arg0, %c0_i32 : i32, i32
  }
}

module attributes {stable_mosaic.version = 11 : i64} {
  func.func @_mm_kernel(%arg0: i32, %arg1: memref<8x512xbf16, #tpu.memory_space<vmem>>, %arg2: memref<512x256xbf16, #tpu.memory_space<vmem>>, %arg3: memref<1x256xf32, #tpu.memory_space<vmem>>, %arg4: memref<8x256xf32, #tpu.memory_space<vmem>>) attributes {dimension_semantics = [#tpu.dimension_semantics<parallel>], iteration_bounds = array<i64: 1>, scalar_prefetch = 0 : i64, scratch_operands = 0 : i64, tpu.core_type = #tpu.core_type<tc>, window_params = [{transform_indices = @transform_0, window_bounds = array<i64: 8, 512>}, {pipeline_mode = #tpu.pipeline_mode<synchronous>, transform_indices = @transform_1, window_bounds = array<i64: 512, 256>}, {pipeline_mode = #tpu.pipeline_mode<synchronous>, transform_indices = @transform_2, window_bounds = array<i64: 1, 256>}, {transform_indices = @transform_3, window_bounds = array<i64: 8, 256>}]} {
    %c0 = arith.constant 0 : index
    %c0_0 = arith.constant 0 : index
    %0 = vector.load %arg1[%c0, %c0_0] : memref<8x512xbf16, #tpu.memory_space<vmem>>, vector<8x512xbf16>
    %c0_1 = arith.constant 0 : index
    %c0_2 = arith.constant 0 : index
    %1 = vector.load %arg2[%c0_1, %c0_2] : memref<512x256xbf16, #tpu.memory_space<vmem>>, vector<512x256xbf16>
    %cst = arith.constant dense<0.000000e+00> : vector<8x256xf32>
    %2 = tpu.matmul %0, %1, %cst {dimension_numbers = #tpu.dot_dimension_numbers<[1], [0], [0], [1], [0, 0, 1, 1], [], []>} : vector<8x512xbf16>, vector<512x256xbf16>, vector<8x256xf32> -> vector<8x256xf32>
    %c0_3 = arith.constant 0 : index
    %c0_4 = arith.constant 0 : index
    %3 = vector.load %arg3[%c0_3, %c0_4] : memref<1x256xf32, #tpu.memory_space<vmem>>, vector<1x256xf32>
    %4 = vector.broadcast %3 : vector<1x256xf32> to vector<8x256xf32>
    %5 = arith.addf %2, %4 : vector<8x256xf32>
    %c0_5 = arith.constant 0 : index
    %c0_6 = arith.constant 0 : index
    %6 = vector.load %arg4[%c0_5, %c0_6] : memref<8x256xf32, #tpu.memory_space<vmem>>, vector<8x256xf32>
    tpu.vector_store %arg4[%c0_5, %c0_6], %5 {strides = array<i32>} : memref<8x256xf32, #tpu.memory_space<vmem>>, vector<8x256xf32>,
    return
  }
  func.func @transform_0(%arg0: i32) -> (i32, i32) {
    %c0_i32 = arith.constant 0 : i32
    %c0_i32_0 = arith.constant 0 : i32
    return %arg0, %c0_i32 : i32, i32
  }
  func.func @transform_1(%arg0: i32) -> (i32, i32) {
    %c0_i32 = arith.constant 0 : i32
    %c0_i32_0 = arith.constant 0 : i32
    %c0_i32_1 = arith.constant 0 : i32
    return %c0_i32, %c0_i32_0 : i32, i32
  }
  func.func @transform_2(%arg0: i32) -> (i32, i32) {
    %c0_i32 = arith.constant 0 : i32
    %c0_i32_0 = arith.constant 0 : i32
    %c0_i32_1 = arith.constant 0 : i32
    return %c0_i32, %c0_i32_0 : i32, i32
  }
  func.func @transform_3(%arg0: i32) -> (i32, i32) {
    %c0_i32 = arith.constant 0 : i32
    %c0_i32_0 = arith.constant 0 : i32
    return %arg0, %c0_i32 : i32, i32
  }
}

module attributes {stable_mosaic.version = 11 : i64} {
  func.func @_mm_kernel(%arg0: i32, %arg1: memref<8x1024xbf16, #tpu.memory_space<vmem>>, %arg2: memref<1024x512xbf16, #tpu.memory_space<vmem>>, %arg3: memref<1x512xf32, #tpu.memory_space<vmem>>, %arg4: memref<8x512xf32, #tpu.memory_space<vmem>>) attributes {dimension_semantics = [#tpu.dimension_semantics<parallel>], iteration_bounds = array<i64: 1>, scalar_prefetch = 0 : i64, scratch_operands = 0 : i64, tpu.core_type = #tpu.core_type<tc>, window_params = [{transform_indices = @transform_0, window_bounds = array<i64: 8, 1024>}, {pipeline_mode = #tpu.pipeline_mode<synchronous>, transform_indices = @transform_1, window_bounds = array<i64: 1024, 512>}, {pipeline_mode = #tpu.pipeline_mode<synchronous>, transform_indices = @transform_2, window_bounds = array<i64: 1, 512>}, {transform_indices = @transform_3, window_bounds = array<i64: 8, 512>}]} {
    %c0 = arith.constant 0 : index
    %c0_0 = arith.constant 0 : index
    %0 = vector.load %arg1[%c0, %c0_0] : memref<8x1024xbf16, #tpu.memory_space<vmem>>, vector<8x1024xbf16>
    %c0_1 = arith.constant 0 : index
    %c0_2 = arith.constant 0 : index
    %1 = vector.load %arg2[%c0_1, %c0_2] : memref<1024x512xbf16, #tpu.memory_space<vmem>>, vector<1024x512xbf16>
    %cst = arith.constant dense<0.000000e+00> : vector<8x512xf32>
    %2 = tpu.matmul %0, %1, %cst {dimension_numbers = #tpu.dot_dimension_numbers<[1], [0], [0], [1], [0, 0, 1, 1], [], []>} : vector<8x1024xbf16>, vector<1024x512xbf16>, vector<8x512xf32> -> vector<8x512xf32>
    %c0_3 = arith.constant 0 : index
    %c0_4 = arith.constant 0 : index
    %3 = vector.load %arg3[%c0_3, %c0_4] : memref<1x512xf32, #tpu.memory_space<vmem>>, vector<1x512xf32>
    %4 = vector.broadcast %3 : vector<1x512xf32> to vector<8x512xf32>
    %5 = arith.addf %2, %4 : vector<8x512xf32>
    %c0_5 = arith.constant 0 : index
    %c0_6 = arith.constant 0 : index
    %6 = vector.load %arg4[%c0_5, %c0_6] : memref<8x512xf32, #tpu.memory_space<vmem>>, vector<8x512xf32>
    tpu.vector_store %arg4[%c0_5, %c0_6], %5 {strides = array<i32>} : memref<8x512xf32, #tpu.memory_space<vmem>>, vector<8x512xf32>,
    return
  }
  func.func @transform_0(%arg0: i32) -> (i32, i32) {
    %c0_i32 = arith.constant 0 : i32
    %c0_i32_0 = arith.constant 0 : i32
    return %arg0, %c0_i32 : i32, i32
  }
  func.func @transform_1(%arg0: i32) -> (i32, i32) {
    %c0_i32 = arith.constant 0 : i32
    %c0_i32_0 = arith.constant 0 : i32
    %c0_i32_1 = arith.constant 0 : i32
    return %c0_i32, %c0_i32_0 : i32, i32
  }
  func.func @transform_2(%arg0: i32) -> (i32, i32) {
    %c0_i32 = arith.constant 0 : i32
    %c0_i32_0 = arith.constant 0 : i32
    %c0_i32_1 = arith.constant 0 : i32
    return %c0_i32, %c0_i32_0 : i32, i32
  }
  func.func @transform_3(%arg0: i32) -> (i32, i32) {
    %c0_i32 = arith.constant 0 : i32
    %c0_i32_0 = arith.constant 0 : i32
    return %arg0, %c0_i32 : i32, i32
  }
}

module attributes {stable_mosaic.version = 11 : i64} {
  func.func @_head_kernel(%arg0: memref<2x512xbf16, #tpu.memory_space<vmem>>, %arg1: memref<512x1280xbf16, #tpu.memory_space<vmem>>, %arg2: memref<1x1280xf32, #tpu.memory_space<vmem>>, %arg3: memref<1280x1000xbf16, #tpu.memory_space<vmem>>, %arg4: memref<1x1000xf32, #tpu.memory_space<vmem>>, %arg5: memref<1000x10xbf16, #tpu.memory_space<vmem>>, %arg6: memref<1x10xf32, #tpu.memory_space<vmem>>, %arg7: memref<2x10xf32, #tpu.memory_space<vmem>>) attributes {dimension_semantics = [], scalar_prefetch = 0 : i64, scratch_operands = 0 : i64, tpu.core_type = #tpu.core_type<tc>} {
    %c0 = arith.constant 0 : index
    %c0_0 = arith.constant 0 : index
    %0 = vector.load %arg0[%c0, %c0_0] : memref<2x512xbf16, #tpu.memory_space<vmem>>, vector<2x512xbf16>
    %c0_1 = arith.constant 0 : index
    %c0_2 = arith.constant 0 : index
    %1 = vector.load %arg1[%c0_1, %c0_2] : memref<512x1280xbf16, #tpu.memory_space<vmem>>, vector<512x1280xbf16>
    %cst = arith.constant dense<0.000000e+00> : vector<2x1280xf32>
    %2 = tpu.matmul %0, %1, %cst {dimension_numbers = #tpu.dot_dimension_numbers<[1], [0], [0], [1], [0, 0, 1, 1], [], []>} : vector<2x512xbf16>, vector<512x1280xbf16>, vector<2x1280xf32> -> vector<2x1280xf32>
    %c0_3 = arith.constant 0 : index
    %c0_4 = arith.constant 0 : index
    %3 = vector.load %arg2[%c0_3, %c0_4] : memref<1x1280xf32, #tpu.memory_space<vmem>>, vector<1x1280xf32>
    %4 = vector.broadcast %3 : vector<1x1280xf32> to vector<2x1280xf32>
    %5 = arith.addf %2, %4 : vector<2x1280xf32>
    %cst_5 = arith.constant 5.000000e-01 : f32
    %6 = vector.broadcast %cst_5 : f32 to vector<2x1280xf32>
    %7 = arith.mulf %6, %5 : vector<2x1280xf32>
    %cst_6 = arith.constant 0.707106769 : f32
    %8 = vector.broadcast %cst_6 : f32 to vector<2x1280xf32>
    %9 = arith.mulf %5, %8 : vector<2x1280xf32>
    %10 = math.erf %9 : vector<2x1280xf32>
    %cst_7 = arith.constant 1.000000e+00 : f32
    %11 = vector.broadcast %cst_7 : f32 to vector<2x1280xf32>
    %12 = arith.addf %11, %10 : vector<2x1280xf32>
    %13 = arith.mulf %7, %12 : vector<2x1280xf32>
    %14 = arith.truncf %13 : vector<2x1280xf32> to vector<2x1280xbf16>
    %c0_8 = arith.constant 0 : index
    %c0_9 = arith.constant 0 : index
    %15 = vector.load %arg3[%c0_8, %c0_9] : memref<1280x1000xbf16, #tpu.memory_space<vmem>>, vector<1280x1000xbf16>
    %cst_10 = arith.constant dense<0.000000e+00> : vector<2x1000xf32>
    %16 = tpu.matmul %14, %15, %cst_10 {dimension_numbers = #tpu.dot_dimension_numbers<[1], [0], [0], [1], [0, 0, 1, 1], [], []>} : vector<2x1280xbf16>, vector<1280x1000xbf16>, vector<2x1000xf32> -> vector<2x1000xf32>
    %c0_11 = arith.constant 0 : index
    %c0_12 = arith.constant 0 : index
    %17 = vector.load %arg4[%c0_11, %c0_12] : memref<1x1000xf32, #tpu.memory_space<vmem>>, vector<1x1000xf32>
    %18 = vector.broadcast %17 : vector<1x1000xf32> to vector<2x1000xf32>
    %19 = arith.addf %16, %18 : vector<2x1000xf32>
    %cst_13 = arith.constant 5.000000e-01 : f32
    %20 = vector.broadcast %cst_13 : f32 to vector<2x1000xf32>
    %21 = arith.mulf %20, %19 : vector<2x1000xf32>
    %cst_14 = arith.constant 0.707106769 : f32
    %22 = vector.broadcast %cst_14 : f32 to vector<2x1000xf32>
    %23 = arith.mulf %19, %22 : vector<2x1000xf32>
    %24 = math.erf %23 : vector<2x1000xf32>
    %cst_15 = arith.constant 1.000000e+00 : f32
    %25 = vector.broadcast %cst_15 : f32 to vector<2x1000xf32>
    %26 = arith.addf %25, %24 : vector<2x1000xf32>
    %27 = arith.mulf %21, %26 : vector<2x1000xf32>
    %28 = arith.truncf %27 : vector<2x1000xf32> to vector<2x1000xbf16>
    %c0_16 = arith.constant 0 : index
    %c0_17 = arith.constant 0 : index
    %29 = vector.load %arg5[%c0_16, %c0_17] : memref<1000x10xbf16, #tpu.memory_space<vmem>>, vector<1000x10xbf16>
    %cst_18 = arith.constant dense<0.000000e+00> : vector<2x10xf32>
    %30 = tpu.matmul %28, %29, %cst_18 {dimension_numbers = #tpu.dot_dimension_numbers<[1], [0], [0], [1], [0, 0, 1, 1], [], []>} : vector<2x1000xbf16>, vector<1000x10xbf16>, vector<2x10xf32> -> vector<2x10xf32>
    %c0_19 = arith.constant 0 : index
    %c0_20 = arith.constant 0 : index
    %31 = vector.load %arg6[%c0_19, %c0_20] : memref<1x10xf32, #tpu.memory_space<vmem>>, vector<1x10xf32>
    %32 = vector.broadcast %31 : vector<1x10xf32> to vector<2x10xf32>
    %33 = arith.addf %30, %32 : vector<2x10xf32>
    %c0_21 = arith.constant 0 : index
    %c0_22 = arith.constant 0 : index
    %34 = vector.load %arg7[%c0_21, %c0_22] : memref<2x10xf32, #tpu.memory_space<vmem>>, vector<2x10xf32>
    tpu.vector_store %arg7[%c0_21, %c0_22], %33 {strides = array<i32>} : memref<2x10xf32, #tpu.memory_space<vmem>>, vector<2x10xf32>,
    return
  }
}

</mosaic_0001>

<bundles_post_ra>
// kernel: main_model_forward.8
= control target key start
LH: loop header
LB: loop body
LE: loop exit
PB: predicated region body
PF: predicated region fallthrough
CT: control target
= control target key end

     0   :  { %10 = vsyncpa [#allocation3], 0  ;;  %s1214_s18 = smov 0   ;;  %s1605_s0 = inlined_call_operand.vmem [shape: bf16[512,27], index: 0, kind: input, shape index: {}]   ;;  %s1606_s1 = inlined_call_operand.vmem [shape: bf16[27,32], index: 1, kind: input, shape index: {}]   ;;  %s1607_s2 = inlined_call_operand.hbm [shape: f32[1,32], index: 2, kind: input, shape index: {}]   ;;  %s1608_s3 = inlined_call_operand.vmem [shape: f32[1,32], index: 3, kind: input, shape index: {}]   ;;  %s1609_s4 = inlined_call_operand.vmem [shape: f32[1,32], index: 4, kind: input, shape index: {}]   ;;  %s1610_s5 = inlined_call_operand.vmem [shape: f32[512,32], index: 5, kind: output, shape index: {}]  }
   0x1 LB: > { %s932_s19 = sadd.s32 4294967295, %s1180_s18   ;;  %p934_p0 = scmp.ge.s32.totalorder %s1180_s18, 1  ;;  %s1180_s18 = sphi %s1214_s18, %s16_s18  }
   0x2   : > { %p157_p1 = scmp.lt.s32.totalorder %s1180_s18, 3  ;;  %p1228_p3 = scmp.eq.s32.totalorder %s932_s19, 0 }
   0x3   : > { %s1182_s22 = smov [#allocation2]   ;;  %s1142_s27 = scalar_lea.hbm %s1607_s2, 16 }
   0x4   : > { %p1222_p2 = pnand %p934_p0, %p157_p1  ;;  %s173_s23 = sshll.u32 %s1182_s22, 4  ;;  %s174_s23 = int_to_ptr.vmem [resolvable:$true] %s173_s23 }
   0x5   : > { %s1615_s21 = scalar_select %p1228_p3, 1, 0 }
   0x6   : > { %s1614_s20 = scalar_select %p1222_p2, 1, 0 }
   0x7   : > { %p1044_p4 = pneg %p1222_p2  ;;  %p1143_p6 = scmp.ne.s32.totalorder %s1607_s2, %s1142_s27 }
   0x8   : > { %p1149_p10 = scmp.lt.u32.totalorder %s1142_s27, %s1607_s2 }
   0x9   : > { %p1236_p5 = pnand %p1228_p3, %p1044_p4 }
   0xb   : > { %p1144_p7 = pneg %p1236_p5 }
   0xd   : > { %p1145_p8 = pnand %p1144_p7, %p1143_p6 }
   0xf   : > { %p1146_p9 = pneg %p1145_p8 }
  0x11   : > { %p1151_p11 = pnand %p1149_p10, %p1146_p9 }
  0x13   : > { %1154 = shalt.err (!%p1151_p11)
}
  0x14   : > { %s1155_s7 = scalar_lea.vmem %s174_s23, 16  ;;  %s1162_s8 = scalar_lea.vmem %s174_s23, 32 }
  0x15   : > { %p1156_p12 = scmp.ne.s32.totalorder %s174_s23, %s1155_s7  ;;  %p1163_p1 = scmp.lt.s32.totalorder %s174_s23, %s174_s23 }
  0x16   : > { %p1164_p4 = scmp.lt.s32.totalorder %s1162_s8, %s1155_s7 }
  0x17   : > { %p1158_p13 = pnand %p1156_p12, %p1144_p7 }
  0x18   : > { %p1165_p3 = por %p1164_p4, %p1163_p1 }
  0x19   : > { %p1159_p0 = pneg %p1158_p13 }
  0x1b   : > { %p1166_p2 = pnand %p1165_p3, %p1159_p0 }
  0x1d   : > { %1169 = shalt.err (!%p1166_p2)
}
  0x1e   : > { %1047 = dma.hbm_to_vmem [thread:$0]  (!%p1236_p5), %s1607_s2, 16, %s174_s23, [#allocation3]  }
  0x1f   : > { %p1617_p6 = scmp.ne.s32.totalorder %s1614_s20, 0 }
  0x20   : > { %p1618_p8 = scmp.ne.s32.totalorder (!%p1617_p6), %s1615_s21, 0 }
  0x21   : > { %201 = sbr.rel (%p1617_p6) target bundleno = 339 (0x153), region = 40 }
  0x28   : > { %1175 = dma.done.wait (%p1618_p8), [#allocation3], 16  }
  0x29   : > { %1177 = vsyncadd (%p1618_p8), [#allocation3], 4294967280  ;;  %s939_s11 = sshll.u32 %s932_s19, 5  ;;  %vm425_vm0 = vcmask 1044480   ;;  %vm426_vm1 = vcmask 1045504   ;;  %v1183_v0 = vmov 65535  }
  0x2a   : > { %p230_p2 = scmp.lt.s32.totalorder %s939_s11, 63  ;;  %v427_v1 = vsel %vm425_vm0, 4294967295, %v1183_v0  ;;  %vm376_vm2 = vcmask 220160   ;;  %v1060_v2 = vld [vmem:[%s1606_s1] sm:$0xff]   ;;  %v1061_v4 = vld [vmem:[%s1606_s1 + $0x8] sm:$0x3f]  }
  0x2b   : > { %v428_v3 = vsel %vm426_vm1, %v427_v1, 0  ;;  %1000 = vmatprep.subr.bf16.mxu0 %v1060_v2  ;;  %1036 = vmatprep.subr.bf16.mxu1 %v1060_v2  ;;  %v1310_v22 = vld [vmem:[#allocation2] ss:$0 sm:$0xff]  ;;  %vm831_vm3 = vcmask 261120  }
  0x2c   : > { %s1620_s11 = smov (!%p230_p2, %s939_s11), 63  ;;  %1001 = vmatpush3.bf16.msra.mxu0 %v1060_v2  ;;  %1038 = vmatpush3.bf16.msra.mxu1 %v1060_v2  ;;  %v430_v6 = vand.u32 %v1061_v4, %v428_v3 }
  0x2d   : > { %s940_s12 = sshll.u32 %s1620_s11, 2  ;;  %s942_s23 = sshll.u32 %s1620_s11, 3 }
  0x2e   : > { %s1270_s15 = scalar_lea.vmem %s1605_s0, %s940_s12  ;;  %1002 = vmatprep.subr.bf16.mxu0 %v430_v6  ;;  %1037 = vmatprep.subr.bf16.mxu1 %v430_v6  ;;  %s1391_s28 = scalar_lea.vmem %s1610_s5, %s942_s23 }
  0x2f   : > { %v1062_v5 = vld [vmem:[%s1270_s15] sm:$0xff]   ;;  %v1064_v8 = vld [vmem:[%s1270_s15 + $0x8] sm:$0xff]   ;;  %v1066_v10 = vld [vmem:[%s1270_s15 + $0x10] sm:$0xff]  }
  0x30   : > { %v1063_v7 = vld [vmem:[%s1270_s15 + $0x40] sm:$0xff]   ;;  %1004 = vmatprep.mubr.msk.bf16.mxu0 %vm376_vm2, %v1062_v5  ;;  %v1065_v9 = vld [vmem:[%s1270_s15 + $0x48] sm:$0xff]   ;;  %1003 = vmatpush3.bf16.msra.mxu0 %v430_v6  ;;  %v1067_v11 = vld [vmem:[%s1270_s15 + $0x50] sm:$0xff]  }
  0x31   : > { %1020 = vmatprep.mubr.msk.bf16.mxu1 %vm376_vm2, %v1063_v7  ;;  %1039 = vmatpush3.bf16.msra.mxu1 %v430_v6  ;;  %v1068_v12 = vld [vmem:[%s1270_s15 + $0x18] sm:$0xff]   ;;  %v1070_v14 = vld [vmem:[%s1270_s15 + $0x20] sm:$0xff]   ;;  %v1072_v16 = vld [vmem:[%s1270_s15 + $0x28] sm:$0xff]  }
  0x32   : > { %v1069_v13 = vld [vmem:[%s1270_s15 + $0x58] sm:$0xff]   ;;  %v1071_v15 = vld [vmem:[%s1270_s15 + $0x60] sm:$0xff]   ;;  %v1073_v17 = vld [vmem:[%s1270_s15 + $0x68] sm:$0xff]  }
  0x33   : > { %1005 = vmatmul.mubr.msk.bf16.vlgmr.msra.gmra.mrb[0].mxu0 %vm376_vm2, %v1064_v8  ;;  %v1074_v18 = vld [vmem:[%s1270_s15 + $0x30] sm:$0xff]   ;;  %v1076_v20 = vld [vmem:[%s1270_s15 + $0x38] sm:$0xff]  }
  0x34   : > { %1021 = vmatmul.mubr.msk.bf16.vlgmr.msra.gmra.mrb[0].mxu1 %vm376_vm2, %v1065_v9  ;;  %1008 = vmatprep.mubr.msk.bf16.mxu0 %vm376_vm2, %v1066_v10  ;;  %v1075_v19 = vld [vmem:[%s1270_s15 + $0x70] sm:$0xff]   ;;  %v1077_v21 = vld [vmem:[%s1270_s15 + $0x78] sm:$0xff]  }
  0x35   : > { %1024 = vmatprep.mubr.msk.bf16.mxu1 %vm376_vm2, %v1067_v11 }
  0x3b   : > { %1009 = vmatmul.mubr.msk.bf16.gmra.mrb[4].mxu0 %vm376_vm2, %v1068_v12  ;;  %v1346_v12 = vld [vmem:[%s1608_s3] ss:$0 sm:$0xff] }
  0x3c   : > { %1025 = vmatmul.mubr.msk.bf16.gmra.mrb[4].mxu1 %vm376_vm2, %v1069_v13  ;;  %1012 = vmatprep.mubr.msk.bf16.mxu0 %vm376_vm2, %v1070_v14 }
  0x3d   : > { %1028 = vmatprep.mubr.msk.bf16.mxu1 %vm376_vm2, %v1071_v15 }
  0x43   : > { %1013 = vmatmul.mubr.msk.bf16.gmra.mrb[8].mxu0 %vm376_vm2, %v1072_v16 }
  0x44   : > { %1029 = vmatmul.mubr.msk.bf16.gmra.mrb[8].mxu1 %vm376_vm2, %v1073_v17  ;;  %1016 = vmatprep.mubr.msk.bf16.mxu0 %vm376_vm2, %v1074_v18 }
  0x45   : > { %1032 = vmatprep.mubr.msk.bf16.mxu1 %vm376_vm2, %v1075_v19 }
  0x4b   : > { %1017 = vmatmul.mubr.msk.bf16.gmra.mrb[12].mxu0 %vm376_vm2, %v1076_v20 }
  0x4c   : > { %1033 = vmatmul.mubr.msk.bf16.gmra.mrb[12].mxu1 %vm376_vm2, %v1077_v21 }
 0x106   : > { %v1006_v23 = vpop.f32.mrb[0].mxu0 }
 0x107   : > { %v1022_v24 = vpop.f32.mrb[0].mxu1  ;;  %v475_v25 = vadd.f32 %v1006_v23, %v1310_v22  ;;  %v466_v27 = vpop.f32.mrb[1].mxu0 }
 0x108   : > { %v539_v26 = vadd.f32 %v1022_v24, %v1310_v22  ;;  %v530_v28 = vpop.f32.mrb[1].mxu1  ;;  %v467_v29 = vadd.f32 %v1310_v22, %v466_v27  ;;  %v1007_v31 = vpop.f32.mrb[2].mxu0 }
 0x109   : > { %v531_v30 = vadd.f32 %v1310_v22, %v530_v28  ;;  %v1023_v32 = vpop.f32.mrb[2].mxu1  ;;  %v627_v33 = vmul.f32 0.70710677, %v475_v25  ;;  %v478_v37 = vadd.f32 %v1007_v31, %v1310_v22  ;;  %v469_v39 = vpop.f32.mrb[3].mxu0  ;;  %v595_v43 = vmul.f32 0.5, %v475_v25 }
 0x10a   : > { %v643_v34 = vmul.f32 0.70710677, %v539_v26  ;;  %v625_v35 = vmul.f32 0.70710677, %v467_v29  ;;  %v542_v38 = vadd.f32 %v1023_v32, %v1310_v22  ;;  %v533_v40 = vpop.f32.mrb[3].mxu1  ;;  %v470_v41 = vadd.f32 %v1310_v22, %v469_v39 }
 0x10b   : > { %v641_v36 = vmul.f32 0.70710677, %v531_v30  ;;  %1078 = verf.f32 %v627_v33  ;;  %v534_v42 = vadd.f32 %v1310_v22, %v533_v40  ;;  %v1320_v44 = vmul.f32 0.5, %v539_v26 }
 0x10c   : > { %1080 = verf.f32 %v643_v34  ;;  %v628_v45 = vmul.f32 0.70710677, %v478_v37  ;;  %v1322_v46 = vmul.f32 0.5, %v467_v29  ;;  %v644_v47 = vmul.f32 0.70710677, %v542_v38 }
 0x10d   : > { %1082 = verf.f32 %v625_v35  ;;  %v626_v48 = vmul.f32 0.70710677, %v470_v41  ;;  %v1324_v50 = vmul.f32 0.5, %v531_v30  ;;  %v642_v51 = vmul.f32 0.70710677, %v534_v42 }
 0x10e   : > { %1084 = verf.f32 %v641_v36  ;;  %v1010_v49 = vpop.f32.mrb[4].mxu0  ;;  %v1327_v55 = vmul.f32 0.5, %v478_v37  ;;  %v1331_v60 = vmul.f32 0.5, %v542_v38  ;;  %v1334_v1 = vmul.f32 0.5, %v470_v41  ;;  %v1375_v36 = vld [vmem:[%s1609_s4] ss:$0 sm:$0xff] }
 0x10f   : > { %1086 = verf.f32 %v628_v45  ;;  %v491_v52 = vadd.f32 %v1010_v49, %v1310_v22  ;;  %v1026_v53 = vpop.f32.mrb[4].mxu1  ;;  %v482_v54 = vpop.f32.mrb[5].mxu0  ;;  %v1336_v2 = vmul.f32 0.5, %v534_v42 }
 0x110   : > { %1088 = verf.f32 %v644_v47  ;;  %v555_v56 = vadd.f32 %v1026_v53, %v1310_v22  ;;  %v483_v57 = vadd.f32 %v1310_v22, %v482_v54  ;;  %v546_v58 = vpop.f32.mrb[5].mxu1  ;;  %v1011_v59 = vpop.f32.mrb[6].mxu0 }
 0x111   : > { %1090 = verf.f32 %v626_v48  ;;  %v631_v61 = vmul.f32 0.70710677, %v491_v52  ;;  %v547_v62 = vadd.f32 %v1310_v22, %v546_v58  ;;  %v1027_v63 = vpop.f32.mrb[6].mxu1  ;;  %v485_v0 = vpop.f32.mrb[7].mxu0  ;;  %v1338_v5 = vmul.f32 0.5, %v491_v52 }
 0x112   : > { %1092 = verf.f32 %v642_v51  ;;  %v647_v3 = vmul.f32 0.70710677, %v555_v56  ;;  %v549_v4 = vpop.f32.mrb[7].mxu1  ;;  %v629_v6 = vmul.f32 0.70710677, %v483_v57  ;;  %v494_v8 = vadd.f32 %v1011_v59, %v1310_v22 }
 0x113   : > { %1094 = verf.f32 %v631_v61  ;;  %v645_v7 = vmul.f32 0.70710677, %v547_v62  ;;  %v558_v9 = vadd.f32 %v1027_v63, %v1310_v22  ;;  %v486_v10 = vadd.f32 %v1310_v22, %v485_v0 }
 0x114   : > { %1096 = verf.f32 %v647_v3  ;;  %v1348_v13 = vmul.f32 0.5, %v555_v56  ;;  %v1350_v14 = vmul.f32 0.5, %v483_v57  ;;  %v1352_v15 = vmul.f32 0.5, %v547_v62 }
 0x115   : > { %v1079_v11 = vpop.eup %1078  ;;  %1098 = verf.f32 %v629_v6  ;;  %v632_v18 = vmul.f32 0.70710677, %v494_v8  ;;  %v1355_v19 = vadd.f32 %v1310_v22, %v549_v4  ;;  %v1361_v25 = vmul.f32 0.5, %v494_v8 }
 0x116   : > { %v1081_v16 = vpop.eup %1080  ;;  %v691_v17 = vadd.f32 1.0, %v1079_v11  ;;  %1100 = verf.f32 %v645_v7  ;;  %v1357_v20 = vpop.f32.mrb[8].mxu0  ;;  %v1363_v26 = vmul.f32 0.5, %v558_v9  ;;  %v648_v27 = vmul.f32 0.70710677, %v558_v9 }
 0x117   : > { %v1359_v21 = vpop.f32.mrb[8].mxu1  ;;  %v1083_v23 = vpop.eup %1082  ;;  %v707_v24 = vadd.f32 1.0, %v1081_v16  ;;  %1102 = verf.f32 %v632_v18  ;;  %v630_v32 = vmul.f32 0.70710677, %v486_v10  ;;  %v1378_v39 = vmul.f32 0.5, %v486_v10 }
 0x118   : > { %v1365_v28 = vpop.f32.mrb[9].mxu0  ;;  %v1085_v29 = vpop.eup %1084  ;;  %v723_v30 = vmul.f32 %v691_v17, %v595_v43  ;;  %v689_v31 = vadd.f32 1.0, %v1083_v23  ;;  %1104 = verf.f32 %v648_v27  ;;  %v646_v53 = vmul.f32 0.70710677, %v1355_v19 }
 0x119   : > { %v1368_v33 = vpop.f32.mrb[9].mxu1  ;;  %v1370_v34 = vpop.f32.mrb[10].mxu0  ;;  %v739_v37 = vmul.f32 %v707_v24, %v1320_v44  ;;  %v705_v38 = vadd.f32 1.0, %v1085_v29  ;;  %1106 = verf.f32 %v630_v32 }
 0x11a   : > { %v1087_v35 = vpop.eup %1086  ;;  %v1380_v40 = vpop.f32.mrb[10].mxu1  ;;  %v762_v43 = vmul.f32 %v1346_v12, %v723_v30  ;;  %v721_v45 = vmul.f32 %v689_v31, %v1322_v46  ;;  %1108 = verf.f32 %v646_v53 }
 0x11b   : > { %v1382_v41 = vpop.f32.mrb[11].mxu0  ;;  %v1089_v42 = vpop.eup %1088  ;;  %v692_v47 = vadd.f32 1.0, %v1087_v35  ;;  %v778_v44 = vmul.f32 %v1346_v12, %v739_v37  ;;  %v737_v51 = vmul.f32 %v705_v38, %v1324_v50 }
 0x11c   : > { %v1386_v48 = vpop.f32.mrb[11].mxu1  ;;  %v1091_v49 = vpop.eup %1090  ;;  %v708_v52 = vadd.f32 1.0, %v1089_v42  ;;  %v801_v46 = vadd.f32 %v1375_v36, %v762_v43  ;;  %v760_v56 = vmul.f32 %v1346_v12, %v721_v45 }
 0x11d   : > { %v1093_v54 = vpop.eup %1092  ;;  %v724_v57 = vmul.f32 %v692_v47, %v1327_v55  ;;  %v690_v58 = vadd.f32 1.0, %v1091_v49  ;;  %v817_v61 = vadd.f32 %v1375_v36, %v778_v44  ;;  %v776_v62 = vmul.f32 %v1346_v12, %v737_v51 }
 0x11e   : > { %v1095_v59 = vpop.eup %1094  ;;  %v740_v63 = vmul.f32 %v708_v52, %v1331_v60  ;;  %v706_v50 = vadd.f32 1.0, %v1093_v54  ;;  %834 = vst.msk [vmem:[%s1391_s28 + $0x10] sm:$0xff] %vm831_vm3, %v801_v46  ;;  %v799_v3 = vadd.f32 %v1375_v36, %v760_v56  ;;  %v1407_v7 = vpop.f32.mrb[12].mxu0  ;;  %v507_v56 = vadd.f32 %v1357_v20, %v1310_v22 }
 0x11f   : > { %v1097_v0 = vpop.eup %1096  ;;  %v763_v4 = vmul.f32 %v1346_v12, %v724_v57  ;;  %v722_v55 = vmul.f32 %v690_v58, %v1334_v1  ;;  %v695_v6 = vadd.f32 1.0, %v1095_v59  ;;  %v1409_v8 = vpop.f32.mrb[12].mxu1  ;;  %850 = vst.msk [vmem:[%s1391_s28 + $0x90] sm:$0xff] %vm831_vm3, %v817_v61  ;;  %v815_v60 = vadd.f32 %v1375_v36, %v776_v62 }
 0x120   : > { %v1099_v9 = vpop.eup %1098  ;;  %v779_v10 = vmul.f32 %v1346_v12, %v740_v63  ;;  %v738_v11 = vmul.f32 %v706_v50, %v1336_v2  ;;  %v711_v16 = vadd.f32 1.0, %v1097_v0  ;;  %v1416_v17 = vpop.f32.mrb[13].mxu0  ;;  %832 = vst.msk [vmem:[%s1391_s28] sm:$0xff] %vm831_vm3, %v799_v3  ;;  %v635_v63 = vmul.f32 0.70710677, %v507_v56 }
 0x121   : > { %v1418_v18 = vpop.f32.mrb[13].mxu1  ;;  %v1101_v1 = vpop.eup %1100  ;;  %v802_v23 = vadd.f32 %v1375_v36, %v763_v4  ;;  %v761_v24 = vmul.f32 %v1346_v12, %v722_v55  ;;  %v727_v27 = vmul.f32 %v695_v6, %v1338_v5  ;;  %v693_v29 = vadd.f32 1.0, %v1099_v9  ;;  %848 = vst.msk [vmem:[%s1391_s28 + $0x80] sm:$0xff] %vm831_vm3, %v815_v60 }
 0x122   : > { %v1425_v30 = vpop.f32.mrb[14].mxu0  ;;  %v1427_v2 = vpop.f32.mrb[14].mxu1  ;;  %v818_v31 = vadd.f32 %v1375_v36, %v779_v10  ;;  %v777_v32 = vmul.f32 %v1346_v12, %v738_v11  ;;  %v743_v35 = vmul.f32 %v711_v16, %v1348_v13  ;;  %v709_v37 = vadd.f32 1.0, %v1101_v1 }
 0x123   : > { %v1434_v38 = vpop.f32.mrb[15].mxu0  ;;  %v1436_v42 = vpop.f32.mrb[15].mxu1  ;;  %835 = vst.msk [vmem:[%s1391_s28 + $0x18] sm:$0xff] %vm831_vm3, %v802_v23  ;;  %v800_v43 = vadd.f32 %v1375_v36, %v761_v24  ;;  %v766_v45 = vmul.f32 %v1346_v12, %v727_v27  ;;  %v725_v47 = vmul.f32 %v693_v29, %v1350_v14  ;;  %1110 = verf.f32 %v635_v63 }
 0x124   : > { %v1103_v5 = vpop.eup %1102  ;;  %851 = vst.msk [vmem:[%s1391_s28 + $0x98] sm:$0xff] %vm831_vm3, %v818_v31  ;;  %v816_v13 = vadd.f32 %v1375_v36, %v777_v32  ;;  %v782_v44 = vmul.f32 %v1346_v12, %v743_v35  ;;  %v741_v51 = vmul.f32 %v709_v37, %v1352_v15  ;;  %v563_v4 = vadd.f32 %v1310_v22, %v1368_v33 }
 0x125   : > { %v1105_v49 = vpop.eup %1104  ;;  %v696_v52 = vadd.f32 1.0, %v1103_v5  ;;  %833 = vst.msk [vmem:[%s1391_s28 + $0x8] sm:$0xff] %vm831_vm3, %v800_v43  ;;  %v805_v46 = vadd.f32 %v1375_v36, %v766_v45  ;;  %v764_v14 = vmul.f32 %v1346_v12, %v725_v47  ;;  %v510_v33 = vadd.f32 %v1370_v34, %v1310_v22 }
 0x126   : > { %v1107_v54 = vpop.eup %1106  ;;  %v712_v53 = vadd.f32 1.0, %v1105_v49  ;;  %849 = vst.msk [vmem:[%s1391_s28 + $0x88] sm:$0xff] %vm831_vm3, %v816_v13  ;;  %v821_v57 = vadd.f32 %v1375_v36, %v782_v44  ;;  %v780_v15 = vmul.f32 %v1346_v12, %v741_v51  ;;  %v574_v11 = vadd.f32 %v1380_v40, %v1310_v22 }
 0x127   : > { %v728_v58 = vmul.f32 %v696_v52, %v1361_v25  ;;  %v694_v59 = vadd.f32 1.0, %v1107_v54  ;;  %838 = vst.msk [vmem:[%s1391_s28 + $0x30] sm:$0xff] %vm831_vm3, %v805_v46  ;;  %v803_v61 = vadd.f32 %v1375_v36, %v764_v14  ;;  %v571_v25 = vadd.f32 %v1359_v21, %v1310_v22  ;;  %v1109_v10 = vpop.eup %1108 }
 0x128   : > { %v744_v62 = vmul.f32 %v712_v53, %v1363_v26  ;;  %854 = vst.msk [vmem:[%s1391_s28 + $0xb0] sm:$0xff] %vm831_vm3, %v821_v57  ;;  %v819_v20 = vadd.f32 %v1375_v36, %v780_v15  ;;  %v499_v26 = vadd.f32 %v1310_v22, %v1365_v28  ;;  %v649_v28 = vmul.f32 0.70710677, %v563_v4 }
 0x129   : > { %v767_v50 = vmul.f32 %v1346_v12, %v728_v58  ;;  %v726_v0 = vmul.f32 %v694_v59, %v1378_v39  ;;  %836 = vst.msk [vmem:[%s1391_s28 + $0x20] sm:$0xff] %vm831_vm3, %v803_v61  ;;  %v651_v21 = vmul.f32 0.70710677, %v571_v25  ;;  %v502_v16 = vadd.f32 %v1310_v22, %v1382_v41 }
 0x12a   : > { %v783_v3 = vmul.f32 %v1346_v12, %v744_v62  ;;  %852 = vst.msk [vmem:[%s1391_s28 + $0xa0] sm:$0xff] %vm831_vm3, %v819_v20  ;;  %v633_v9 = vmul.f32 0.70710677, %v499_v26  ;;  %v566_v1 = vadd.f32 %v1310_v22, %v1386_v48  ;;  %v614_v23 = vmul.f32 0.5, %v1355_v19 }
 0x12b   : > { %v806_v55 = vadd.f32 %v1375_v36, %v767_v50  ;;  %v765_v39 = vmul.f32 %v1346_v12, %v726_v0  ;;  %1112 = verf.f32 %v651_v21  ;;  %v710_v24 = vadd.f32 1.0, %v1109_v10 }
 0x12c   : > { %v822_v6 = vadd.f32 %v1375_v36, %v783_v3  ;;  %1114 = verf.f32 %v633_v9  ;;  %v636_v34 = vmul.f32 0.70710677, %v510_v33  ;;  %v603_v27 = vmul.f32 0.5, %v507_v56 }
 0x12d   : > { %839 = vst.msk [vmem:[%s1391_s28 + $0x38] sm:$0xff] %vm831_vm3, %v806_v55  ;;  %v804_v60 = vadd.f32 %v1375_v36, %v765_v39  ;;  %1116 = verf.f32 %v649_v28  ;;  %v619_v29 = vmul.f32 0.5, %v571_v25  ;;  %v652_v31 = vmul.f32 0.70710677, %v574_v11  ;;  %v1111_v47 = vpop.eup %1110 }
 0x12e   : > { %855 = vst.msk [vmem:[%s1391_s28 + $0xb8] sm:$0xff] %vm831_vm3, %v822_v6  ;;  %v634_v32 = vmul.f32 0.70710677, %v502_v16  ;;  %v742_v35 = vmul.f32 %v710_v24, %v614_v23  ;;  %v601_v37 = vmul.f32 0.5, %v499_v26  ;;  %1118 = verf.f32 %v636_v34 }
 0x12f   : > { %837 = vst.msk [vmem:[%s1391_s28 + $0x28] sm:$0xff] %vm831_vm3, %v804_v60  ;;  %v650_v40 = vmul.f32 0.70710677, %v566_v1  ;;  %1120 = verf.f32 %v652_v31  ;;  %v523_v41 = vadd.f32 %v1407_v7, %v1310_v22  ;;  %v587_v48 = vadd.f32 %v1409_v8, %v1310_v22 }
 0x130   : > { %v515_v19 = vadd.f32 %v1310_v22, %v1416_v17  ;;  %v781_v5 = vmul.f32 %v1346_v12, %v742_v35  ;;  %1122 = verf.f32 %v634_v32  ;;  %v1507_v43 = vadd.f32 %v1310_v22, %v1418_v18 }
 0x131   : > { %v1511_v45 = vadd.f32 %v1425_v30, %v1310_v22  ;;  %v617_v7 = vmul.f32 0.5, %v563_v4  ;;  %v604_v49 = vmul.f32 0.5, %v510_v33  ;;  %1124 = verf.f32 %v650_v40 }
 0x132   : > { %v639_v8 = vmul.f32 0.70710677, %v523_v41  ;;  %v820_v13 = vadd.f32 %v1375_v36, %v781_v5  ;;  %v699_v17 = vadd.f32 1.0, %v1111_v47  ;;  %v620_v44 = vmul.f32 0.5, %v574_v11 }
 0x133   : > { %v655_v51 = vmul.f32 0.70710677, %v587_v48  ;;  %v602_v52 = vmul.f32 0.5, %v502_v16  ;;  %v637_v54 = vmul.f32 0.70710677, %v515_v19  ;;  %v618_v14 = vmul.f32 0.5, %v566_v1 }
 0x134   : > { %1126 = verf.f32 %v639_v8  ;;  %v653_v18 = vmul.f32 0.70710677, %v1507_v43  ;;  %853 = vst.msk [vmem:[%s1391_s28 + $0xa8] sm:$0xff] %vm831_vm3, %v820_v13  ;;  %v731_v30 = vmul.f32 %v699_v17, %v603_v27  ;;  %v640_v53 = vmul.f32 0.70710677, %v1511_v45 }
 0x135   : > { %v1113_v46 = vpop.eup %1112  ;;  %1128 = verf.f32 %v655_v51  ;;  %v1520_v15 = vadd.f32 %v1427_v2, %v1310_v22  ;;  %v1524_v58 = vadd.f32 %v1310_v22, %v1434_v38  ;;  %v607_v63 = vmul.f32 0.5, %v523_v41 }
 0x136   : > { %v1115_v56 = vpop.eup %1114  ;;  %v715_v57 = vadd.f32 1.0, %v1113_v46  ;;  %1130 = verf.f32 %v637_v54  ;;  %v770_v61 = vmul.f32 %v1346_v12, %v731_v30  ;;  %v623_v0 = vmul.f32 0.5, %v587_v48 }
 0x137   : > { %v1117_v59 = vpop.eup %1116  ;;  %v697_v62 = vadd.f32 1.0, %v1115_v56  ;;  %1132 = verf.f32 %v653_v18  ;;  %v656_v26 = vmul.f32 0.70710677, %v1520_v15  ;;  %v1531_v38 = vadd.f32 %v1310_v22, %v1436_v42 }
 0x138   : > { %v747_v20 = vmul.f32 %v715_v57, %v619_v29  ;;  %v713_v50 = vadd.f32 1.0, %v1117_v59  ;;  %1134 = verf.f32 %v640_v53  ;;  %v1119_v25 = vpop.eup %1118  ;;  %v809_v3 = vadd.f32 %v1375_v36, %v770_v61 }
 0x139   : > { %v729_v2 = vmul.f32 %v697_v62, %v601_v37  ;;  %v1121_v4 = vpop.eup %1120  ;;  %v700_v21 = vadd.f32 1.0, %v1119_v25  ;;  %v638_v6 = vmul.f32 0.70710677, %v1524_v58  ;;  %v605_v33 = vmul.f32 0.5, %v515_v19 }
 0x13a   : > { %v786_v55 = vmul.f32 %v1346_v12, %v747_v20  ;;  %v745_v39 = vmul.f32 %v713_v50, %v617_v7  ;;  %v1123_v9 = vpop.eup %1122  ;;  %842 = vst.msk [vmem:[%s1391_s28 + $0x50] sm:$0xff] %vm831_vm3, %v809_v3  ;;  %v716_v28 = vadd.f32 1.0, %v1121_v4  ;;  %1136 = verf.f32 %v656_v26 }
 0x13b   : > { %v768_v60 = vmul.f32 %v1346_v12, %v729_v2  ;;  %v1125_v10 = vpop.eup %1124  ;;  %v732_v11 = vmul.f32 %v700_v21, %v604_v49  ;;  %v698_v16 = vadd.f32 1.0, %v1123_v9  ;;  %1138 = verf.f32 %v638_v6 }
 0x13c   : > { %v825_v22 = vadd.f32 %v1375_v36, %v786_v55  ;;  %v784_v42 = vmul.f32 %v1346_v12, %v745_v39  ;;  %v748_v23 = vmul.f32 %v716_v28, %v620_v44  ;;  %v714_v24 = vadd.f32 1.0, %v1125_v10 }
 0x13d   : > { %v807_v1 = vadd.f32 %v1375_v36, %v768_v60  ;;  %v771_v29 = vmul.f32 %v1346_v12, %v732_v11  ;;  %v730_v31 = vmul.f32 %v698_v16, %v602_v52  ;;  %v654_v32 = vmul.f32 0.70710677, %v1531_v38 }
 0x13e   : > { %v1127_v34 = vpop.eup %1126  ;;  %858 = vst.msk [vmem:[%s1391_s28 + $0xd0] sm:$0xff] %vm831_vm3, %v825_v22  ;;  %v823_v27 = vadd.f32 %v1375_v36, %v784_v42  ;;  %v787_v37 = vmul.f32 %v1346_v12, %v748_v23  ;;  %v746_v40 = vmul.f32 %v714_v24, %v618_v14  ;;  %v621_v48 = vmul.f32 0.5, %v1507_v43 }
 0x13f   : > { %v1129_v35 = vpop.eup %1128  ;;  %840 = vst.msk [vmem:[%s1391_s28 + $0x40] sm:$0xff] %vm831_vm3, %v807_v1  ;;  %v703_v41 = vadd.f32 1.0, %v1127_v34  ;;  %v810_v5 = vadd.f32 %v1375_v36, %v771_v29  ;;  %v769_v47 = vmul.f32 %v1346_v12, %v730_v31  ;;  %1140 = verf.f32 %v654_v32 }
 0x140   : > { %v1131_v19 = vpop.eup %1130  ;;  %856 = vst.msk [vmem:[%s1391_s28 + $0xc0] sm:$0xff] %vm831_vm3, %v823_v27  ;;  %v719_v7 = vadd.f32 1.0, %v1129_v35  ;;  %v826_v8 = vadd.f32 %v1375_v36, %v787_v37  ;;  %v785_v13 = vmul.f32 %v1346_v12, %v746_v40  ;;  %v608_v18 = vmul.f32 0.5, %v1511_v45 }
 0x141   : > { %v1133_v49 = vpop.eup %1132  ;;  %v735_v17 = vmul.f32 %v703_v41, %v607_v63  ;;  %v701_v44 = vadd.f32 1.0, %v1131_v19  ;;  %843 = vst.msk [vmem:[%s1391_s28 + $0x58] sm:$0xff] %vm831_vm3, %v810_v5  ;;  %v808_v51 = vadd.f32 %v1375_v36, %v769_v47  ;;  %v624_v50 = vmul.f32 0.5, %v1520_v15 }
 0x142   : > { %v1135_v43 = vpop.eup %1134  ;;  %v751_v52 = vmul.f32 %v719_v7, %v623_v0  ;;  %v717_v54 = vadd.f32 1.0, %v1133_v49  ;;  %859 = vst.msk [vmem:[%s1391_s28 + $0xd8] sm:$0xff] %vm831_vm3, %v826_v8  ;;  %v824_v46 = vadd.f32 %v1375_v36, %v785_v13  ;;  %v606_v55 = vmul.f32 0.5, %v1524_v58 }
 0x143   : > { %v774_v30 = vmul.f32 %v1346_v12, %v735_v17  ;;  %v733_v14 = vmul.f32 %v701_v44, %v605_v33  ;;  %v704_v53 = vadd.f32 1.0, %v1135_v43  ;;  %841 = vst.msk [vmem:[%s1391_s28 + $0x48] sm:$0xff] %vm831_vm3, %v808_v51  ;;  %v622_v60 = vmul.f32 0.5, %v1531_v38 }
 0x144   : > { %v790_v56 = vmul.f32 %v1346_v12, %v751_v52  ;;  %v749_v57 = vmul.f32 %v717_v54, %v621_v48  ;;  %v1137_v59 = vpop.eup %1136  ;;  %857 = vst.msk [vmem:[%s1391_s28 + $0xc8] sm:$0xff] %vm831_vm3, %v824_v46 }
 0x145   : > { %v813_v45 = vadd.f32 %v1375_v36, %v774_v30  ;;  %v772_v61 = vmul.f32 %v1346_v12, %v733_v14  ;;  %v736_v62 = vmul.f32 %v704_v53, %v608_v18  ;;  %v720_v0 = vadd.f32 1.0, %v1137_v59  ;;  %v1139_v25 = vpop.eup %1138 }
 0x146   : > { %v829_v63 = vadd.f32 %v1375_v36, %v790_v56  ;;  %v788_v20 = vmul.f32 %v1346_v12, %v749_v57  ;;  %v702_v39 = vadd.f32 1.0, %v1139_v25 }
 0x147   : > { %846 = vst.msk [vmem:[%s1391_s28 + $0x70] sm:$0xff] %vm831_vm3, %v813_v45  ;;  %v811_v3 = vadd.f32 %v1375_v36, %v772_v61  ;;  %v775_v2 = vmul.f32 %v1346_v12, %v736_v62  ;;  %v752_v4 = vmul.f32 %v720_v0, %v624_v50 }
 0x148   : > { %862 = vst.msk [vmem:[%s1391_s28 + $0xf0] sm:$0xff] %vm831_vm3, %v829_v63  ;;  %v827_v26 = vadd.f32 %v1375_v36, %v788_v20  ;;  %v734_v9 = vmul.f32 %v702_v39, %v606_v55 }
 0x149   : > { %844 = vst.msk [vmem:[%s1391_s28 + $0x60] sm:$0xff] %vm831_vm3, %v811_v3  ;;  %v814_v15 = vadd.f32 %v1375_v36, %v775_v2  ;;  %v1141_v21 = vpop.eup %1140  ;;  %v791_v6 = vmul.f32 %v1346_v12, %v752_v4 }
 0x14a   : > { %860 = vst.msk [vmem:[%s1391_s28 + $0xe0] sm:$0xff] %vm831_vm3, %v827_v26  ;;  %v718_v28 = vadd.f32 1.0, %v1141_v21  ;;  %v773_v33 = vmul.f32 %v1346_v12, %v734_v9 }
 0x14b   : > { %847 = vst.msk [vmem:[%s1391_s28 + $0x78] sm:$0xff] %vm831_vm3, %v814_v15  ;;  %v830_v58 = vadd.f32 %v1375_v36, %v791_v6 }
 0x14c   : > { %v750_v10 = vmul.f32 %v718_v28, %v622_v60  ;;  %v812_v22 = vadd.f32 %v1375_v36, %v773_v33 }
 0x14d   : > { %863 = vst.msk [vmem:[%s1391_s28 + $0xf8] sm:$0xff] %vm831_vm3, %v830_v58 }
 0x14e   : > { %v789_v42 = vmul.f32 %v1346_v12, %v750_v10  ;;  %845 = vst.msk [vmem:[%s1391_s28 + $0x68] sm:$0xff] %vm831_vm3, %v812_v22 }
 0x150   : > { %v828_v11 = vadd.f32 %v1375_v36, %v789_v42 }
 0x152   : > { %861 = vst.msk [vmem:[%s1391_s28 + $0xe8] sm:$0xff] %vm831_vm3, %v828_v11 }
 0x153 PF: > { %s16_s18 = sadd.s32 1, %s1180_s18  }
 0x154   : > { %p13_p3 = scmp.ge.s32.totalorder %s16_s18, 4  }
 0x156   :  { %15 = sbr.rel (!%p13_p3) target bundleno = 1 (0x1), region = 75 }
 0x15d   :  { %886 = vsyncpa [#allocation3], 1 }
 0x15e   :  { %888 = vsyncpa [#allocation3 + $0x1], 1 }

// kernel: main_model_forward.9
= control target key start
LH: loop header
LB: loop body
LE: loop exit
PB: predicated region body
PF: predicated region fallthrough
CT: control target
= control target key end

     0   :  { %s3269_s18 = smov 0   ;;  %s5467_s0 = inlined_call_operand.vmem [shape: bf16[2,324,32], index: 0, kind: input, shape index: {}]   ;;  %s5468_s1 = inlined_call_operand.vmem [shape: bf16[32,288], index: 1, kind: input, shape index: {}]   ;;  %s5469_s2 = inlined_call_operand.vmem [shape: f32[1,32], index: 2, kind: input, shape index: {}]   ;;  %s5470_s3 = inlined_call_operand.vmem [shape: f32[1,32], index: 3, kind: input, shape index: {}]   ;;  %s5471_s4 = inlined_call_operand.vmem [shape: f32[1,32], index: 4, kind: input, shape index: {}]   ;;  %s5472_s5 = inlined_call_operand.vmem [shape: f32[2,286,32], index: 5, kind: output, shape index: {}]  }
   0x1 LB: > { %s2913_s19 = sadd.s32 4294967295, %s3231_s18   ;;  %p2917_p0 = scmp.ge.s32.totalorder %s3231_s18, 1  ;;  %s3231_s18 = sphi %s3269_s18, %s15_s18  }
   0x2   : > { %p187_p1 = scmp.lt.s32.totalorder %s3231_s18, 3 }
   0x4   : > { %p188_p2 = pnand %p2917_p0, %p187_p1 }
   0x6   : > { %191 = sbr.rel (%p188_p2) target bundleno = 823 (0x337), region = 40 }
   0xd   : > { %v3121_v0 = vld [vmem:[%s5468_s1 + $0x4] ss:$12 sps:$4 sm:$0xff]   ;;  %p215_p3 = scmp.lt.s32.totalorder %s2913_s19, 1  ;;  %v3123_v1 = vld [vmem:[%s5468_s1] ss:$12 sps:$4 sm:$0xff]   ;;  %v3233_v2 = vmov 0  }
   0xe   : > { %506 = vmatprep.mubr.bf16.mxu0 %v3233_v2  ;;  %474 = vmatprep.subr.bf16.mxu0 %v3121_v0  ;;  %v3124_v3 = vld [vmem:[%s5468_s1 + $0x1c] ss:$12 sps:$4 sm:$0xff]   ;;  %v3126_v4 = vld [vmem:[%s5468_s1 + $0x18] ss:$12 sps:$4 sm:$0xff]   ;;  %v3234_v5 = vmov 0.0   ;;  %vm3235_vm0 = vmmov 0  }
   0xf   : > { %s5881_s19 = smov (!%p215_p3, %s2913_s19), 1  ;;  %3017 = vmatprep.subr.bf16.mxu1 %v3234_v5  ;;  %475 = vmatpush1.bf16.msra.mxu0 %v3123_v1  ;;  %v3136_v6 = vld [vmem:[%s5468_s1 + $0x8] ss:$12 sps:$4 sm:$0xff]   ;;  %v3137_v7 = vld [vmem:[%s5468_s1 + $0x20] ss:$12 sps:$4 sm:$0xff]   ;;  %vm410_vm1 = vcmask 261120  }
  0x10   : > { %3021 = vmatprep.mubr.msk.bf16.mxu1 %vm3235_vm0, %v3234_v5  ;;  %476 = vmatprep.subr.bf16.mxu0 %v3124_v3  ;;  %s3105_s30 = smul.u32 164, %s5881_s19  ;;  %vm978_vm2 = vcmask 1046528   ;;  %vm1194_vm3 = vcmask 1045504   ;;  %s3236_s11 = smov 96   ;;  %vm1743_vm4 = vcmask 1043456   ;;  %vm1597_vm5 = vcmask 1044480  }
  0x11   : > { %3018 = vmatpush3.bf16.msra.mxu1 %v3136_v6  ;;  %s3237_s12 = smov 64   ;;  %vm2111_vm6 = vcmask 1042432   ;;  %s3238_s13 = smov 32   ;;  %vm2366_vm7 = vcmask 1041408   ;;  %vm2856_vm8 = vcmask 259072  }
  0x12   : > { %s3305_s10 = scalar_lea.vmem %s5467_s0, %s3105_s30  ;;  %3019 = vmatprep.subr.bf16.mxu1 %v3234_v5  ;;  %s3106_s16 = smul.u32 288, %s5881_s19 }
  0x13   : > { %477 = vmatpush1.bf16.msra.mxu0 %v3126_v4  ;;  %v3127_v8 = vld [vmem:[%s3305_s10] sm:$0xff]   ;;  %v3128_v9 = vld [vmem:[%s3305_s10 + $0x8] sm:$0xff]   ;;  %v3129_v10 = vld [vmem:[%s3305_s10 + $0x10] sm:$0xff]  }
  0x14   : > { %v3130_v11 = vld [vmem:[%s3305_s10 + $0x18] sm:$0xff]   ;;  %v3131_v12 = vld [vmem:[%s3305_s10 + $0x20] sm:$0xff]   ;;  %v3132_v13 = vld [vmem:[%s3305_s10 + $0x28] sm:$0xff]   ;;  %s4373_s25 = scalar_lea.vmem %s5472_s5, %s3106_s16 }
  0x15   : > { %3020 = vmatpush3.bf16.msra.mxu1 %v3137_v7  ;;  %v3133_v14 = vld [vmem:[%s3305_s10 + $0x30] sm:$0xff]   ;;  %v3134_v15 = vld [vmem:[%s3305_s10 + $0x38] sm:$0xff]   ;;  %v3135_v16 = vld [vmem:[%s3305_s10 + $0x40] sm:$0xff]  }
  0x16   : > { %2947 = vmatmul.mubr.msk.bf16.vlgmr.msra.gmra.mrb[0].mxu0 %vm410_vm1, %v3127_v8  ;;  %v3138_v17 = vld [vmem:[%s3305_s10 + $0x48] sm:$0xff]   ;;  %v3139_v18 = vld [vmem:[%s3305_s10 + $0x50] sm:$0xff]   ;;  %v3140_v19 = vld [vmem:[%s3305_s10 + $0x58] sm:$0xff]  }
  0x17   : > { %514 = vmatprep.mubr.bf16.mxu0 %v3233_v2  ;;  %v3141_v20 = vld [vmem:[%s3305_s10 + $0x60] sm:$0xff]   ;;  %v3142_v21 = vld [vmem:[%s3305_s10 + $0x68] sm:$0xff]   ;;  %v3143_v22 = vld [vmem:[%s3305_s10 + $0x70] sm:$0xff]  }
  0x18   : > { %3022 = vmatmul.mubr.msk.bf16.vlgmr.msra.gmra.mrb[0].mxu1 %vm410_vm1, %v3127_v8  ;;  %v3144_v23 = vld [vmem:[%s3305_s10 + $0x78] sm:$0xff]   ;;  %v3145_v24 = vld [vmem:[%s3305_s10 + $0x80] sm:$0xff]   ;;  %v3146_v25 = vld [vmem:[%s3305_s10 + $0x88] sm:$0xff]  }
  0x19   : > { %3025 = vmatprep.mubr.msk.bf16.mxu1 %vm3235_vm0, %v3234_v5  ;;  %v3147_v26 = vld [vmem:[%s3305_s10 + $0x90] sm:$0xff]  }
  0x1e   : > { %2948 = vmatmul.mubr.msk.bf16.gmra.mrb[4].mxu0 %vm410_vm1, %v3128_v9 }
  0x1f   : > { %524 = vmatprep.mubr.bf16.mxu0 %v3233_v2 }
  0x20   : > { %3026 = vmatmul.mubr.msk.bf16.gmra.mrb[4].mxu1 %vm410_vm1, %v3128_v9 }
  0x21   : > { %3029 = vmatprep.mubr.msk.bf16.mxu1 %vm3235_vm0, %v3234_v5 }
  0x26   : > { %2949 = vmatmul.mubr.msk.bf16.gmra.mrb[8].mxu0 %vm410_vm1, %v3129_v10 }
  0x27   : > { %534 = vmatprep.mubr.bf16.mxu0 %v3233_v2 }
  0x28   : > { %3030 = vmatmul.mubr.msk.bf16.gmra.mrb[8].mxu1 %vm410_vm1, %v3129_v10 }
  0x29   : > { %3033 = vmatprep.mubr.msk.bf16.mxu1 %vm3235_vm0, %v3234_v5 }
  0x2e   : > { %2950 = vmatmul.mubr.msk.bf16.gmra.mrb[12].mxu0 %vm410_vm1, %v3130_v11 }
  0x2f   : > { %544 = vmatprep.mubr.bf16.mxu0 %v3233_v2 }
  0x30   : > { %3034 = vmatmul.mubr.msk.bf16.gmra.mrb[12].mxu1 %vm410_vm1, %v3130_v11 }
  0x31   : > { %3037 = vmatprep.mubr.msk.bf16.mxu1 %vm3235_vm0, %v3234_v5 }
  0x36   : > { %2951 = vmatmul.mubr.msk.bf16.gmra.mrb[16].mxu0 %vm410_vm1, %v3131_v12 }
  0x37   : > { %554 = vmatprep.mubr.bf16.mxu0 %v3233_v2 }
  0x38   : > { %3038 = vmatmul.mubr.msk.bf16.gmra.mrb[16].mxu1 %vm410_vm1, %v3131_v12 }
  0x39   : > { %3041 = vmatprep.mubr.msk.bf16.mxu1 %vm3235_vm0, %v3234_v5 }
  0x3e   : > { %2952 = vmatmul.mubr.msk.bf16.gmra.mrb[20].mxu0 %vm410_vm1, %v3132_v13 }
  0x3f   : > { %564 = vmatprep.mubr.bf16.mxu0 %v3233_v2 }
  0x40   : > { %3042 = vmatmul.mubr.msk.bf16.gmra.mrb[20].mxu1 %vm410_vm1, %v3132_v13 }
  0x41   : > { %3045 = vmatprep.mubr.msk.bf16.mxu1 %vm3235_vm0, %v3234_v5 }
  0x46   : > { %2953 = vmatmul.mubr.msk.bf16.gmra.mrb[24].mxu0 %vm410_vm1, %v3133_v14 }
  0x47   : > { %574 = vmatprep.mubr.bf16.mxu0 %v3233_v2 }
  0x48   : > { %3046 = vmatmul.mubr.msk.bf16.gmra.mrb[24].mxu1 %vm410_vm1, %v3133_v14  ;;  %v3148_v14 = vld [vmem:[%s3305_s10 + $0x98] sm:$0xff]  }
  0x49   : > { %3049 = vmatprep.mubr.msk.bf16.mxu1 %vm3235_vm0, %v3234_v5 }
  0x4e   : > { %2954 = vmatmul.mubr.msk.bf16.gmra.mrb[28].mxu0 %vm410_vm1, %v3134_v15 }
  0x4f   : > { %584 = vmatprep.mubr.bf16.mxu0 %v3233_v2 }
  0x50   : > { %3050 = vmatmul.mubr.msk.bf16.gmra.mrb[28].mxu1 %vm410_vm1, %v3134_v15 }
  0x51   : > { %3053 = vmatprep.mubr.msk.bf16.mxu1 %vm3235_vm0, %v3234_v5 }
  0x56   : > { %2955 = vmatmul.mubr.msk.bf16.gmra.mrb[32].mxu0 %vm410_vm1, %v3135_v16 }
  0x57   : > { %594 = vmatprep.mubr.bf16.mxu0 %v3233_v2 }
  0x58   : > { %3054 = vmatmul.mubr.msk.bf16.gmra.mrb[32].mxu1 %vm410_vm1, %v3135_v16 }
  0x59   : > { %3057 = vmatprep.mubr.msk.bf16.mxu1 %vm3235_vm0, %v3234_v5 }
  0x5e   : > { %2956 = vmatmul.mubr.msk.bf16.gmra.mrb[36].mxu0 %vm410_vm1, %v3138_v17 }
  0x5f   : > { %604 = vmatprep.mubr.bf16.mxu0 %v3233_v2 }
  0x60   : > { %3058 = vmatmul.mubr.msk.bf16.gmra.mrb[36].mxu1 %vm410_vm1, %v3138_v17 }
  0x61   : > { %3061 = vmatprep.mubr.msk.bf16.mxu1 %vm3235_vm0, %v3234_v5 }
  0x66   : > { %2957 = vmatmul.mubr.msk.bf16.gmra.mrb[40].mxu0 %vm410_vm1, %v3139_v18 }
  0x67   : > { %614 = vmatprep.mubr.bf16.mxu0 %v3233_v2 }
  0x68   : > { %3062 = vmatmul.mubr.msk.bf16.gmra.mrb[40].mxu1 %vm410_vm1, %v3139_v18 }
  0x69   : > { %3065 = vmatprep.mubr.msk.bf16.mxu1 %vm3235_vm0, %v3234_v5 }
  0x6e   : > { %2958 = vmatmul.mubr.msk.bf16.gmra.mrb[44].mxu0 %vm410_vm1, %v3140_v19 }
  0x6f   : > { %624 = vmatprep.mubr.bf16.mxu0 %v3233_v2 }
  0x70   : > { %3066 = vmatmul.mubr.msk.bf16.gmra.mrb[44].mxu1 %vm410_vm1, %v3140_v19 }
  0x71   : > { %3069 = vmatprep.mubr.msk.bf16.mxu1 %vm3235_vm0, %v3234_v5 }
  0x76   : > { %2959 = vmatmul.mubr.msk.bf16.gmra.mrb[48].mxu0 %vm410_vm1, %v3141_v20 }
  0x77   : > { %634 = vmatprep.mubr.bf16.mxu0 %v3233_v2 }
  0x78   : > { %3070 = vmatmul.mubr.msk.bf16.gmra.mrb[48].mxu1 %vm410_vm1, %v3141_v20 }
  0x79   : > { %3073 = vmatprep.mubr.msk.bf16.mxu1 %vm3235_vm0, %v3234_v5 }
  0x7e   : > { %2960 = vmatmul.mubr.msk.bf16.gmra.mrb[52].mxu0 %vm410_vm1, %v3142_v21 }
  0x7f   : > { %644 = vmatprep.mubr.bf16.mxu0 %v3233_v2 }
  0x80   : > { %3074 = vmatmul.mubr.msk.bf16.gmra.mrb[52].mxu1 %vm410_vm1, %v3142_v21 }
  0x81   : > { %3077 = vmatprep.mubr.msk.bf16.mxu1 %vm3235_vm0, %v3234_v5 }
  0x86   : > { %2961 = vmatmul.mubr.msk.bf16.gmra.mrb[56].mxu0 %vm410_vm1, %v3143_v22 }
  0x87   : > { %654 = vmatprep.mubr.bf16.mxu0 %v3233_v2 }
  0x88   : > { %3078 = vmatmul.mubr.msk.bf16.gmra.mrb[56].mxu1 %vm410_vm1, %v3143_v22 }
  0x89   : > { %3081 = vmatprep.mubr.msk.bf16.mxu1 %vm3235_vm0, %v3234_v5 }
  0x8e   : > { %2962 = vmatmul.mubr.msk.bf16.gmra.mrb[60].mxu0 %vm410_vm1, %v3144_v23 }
  0x8f   : > { %664 = vmatprep.mubr.bf16.mxu0 %v3233_v2 }
  0x90   : > { %3082 = vmatmul.mubr.msk.bf16.gmra.mrb[60].mxu1 %vm410_vm1, %v3144_v23 }
  0x91   : > { %3085 = vmatprep.mubr.msk.bf16.mxu1 %vm3235_vm0, %v3234_v5 }
  0x96   : > { %2963 = vmatmul.mubr.msk.bf16.gmra.mrb[64].mxu0 %vm410_vm1, %v3145_v24 }
  0x97   : > { %674 = vmatprep.mubr.bf16.mxu0 %v3233_v2 }
  0x98   : > { %3086 = vmatmul.mubr.msk.bf16.gmra.mrb[64].mxu1 %vm410_vm1, %v3145_v24 }
  0x99   : > { %3089 = vmatprep.mubr.msk.bf16.mxu1 %vm3235_vm0, %v3234_v5 }
  0x9e   : > { %2964 = vmatmul.mubr.msk.bf16.gmra.mrb[68].mxu0 %vm410_vm1, %v3146_v25 }
  0x9f   : > { %684 = vmatprep.mubr.bf16.mxu0 %v3233_v2 }
  0xa0   : > { %3090 = vmatmul.mubr.msk.bf16.gmra.mrb[68].mxu1 %vm410_vm1, %v3146_v25 }
  0xa1   : > { %3093 = vmatprep.mubr.msk.bf16.mxu1 %vm3235_vm0, %v3234_v5 }
  0xa6   : > { %2965 = vmatmul.mubr.msk.bf16.gmra.mrb[72].mxu0 %vm410_vm1, %v3147_v26 }
  0xa7   : > { %694 = vmatprep.mubr.bf16.mxu0 %v3233_v2 }
  0xa8   : > { %3094 = vmatmul.mubr.msk.bf16.gmra.mrb[72].mxu1 %vm410_vm1, %v3147_v26 }
  0xa9   : > { %3097 = vmatprep.mubr.msk.bf16.mxu1 %vm3235_vm0, %v3234_v5 }
  0xae   : > { %2966 = vmatmul.mubr.msk.bf16.gmra.mrb[76].mxu0 %vm410_vm1, %v3148_v14 }
  0xaf   : > { %702 = vmatprep.mubr.bf16.mxu0 %v3233_v2 }
  0xb0   : > { %3098 = vmatmul.mubr.msk.bf16.gmra.mrb[76].mxu1 %vm410_vm1, %v3148_v14 }
  0xb1   : > { %3101 = vmatprep.mubr.msk.bf16.mxu1 %vm3235_vm0, %v3234_v5 }
  0xe9   : > { %v3422_v27 = vpop.f32.mrb[0].mxu0 }
  0xea   : > { %v510_v28 = vpop.f32.mrb[1].mxu0  ;;  %v979_v31 = vrot.slane %v3422_v27, 1  ;;  %v1195_v32 = vrot.slane %v3422_v27, 2 }
  0xeb   : > { %v3424_v29 = vpop.f32.mrb[2].mxu0  ;;  %v744_v30 = vpop.f32.mrb[0].mxu1 }
  0xec   : > { %v980_v33 = vrot.slane %v3424_v29, 1  ;;  %v1196_v34 = vrot.slane %v3424_v29, 2  ;;  %v513_v35 = vpop.f32.mrb[3].mxu0  ;;  %v3023_v36 = vpop.f32.mrb[1].mxu1 }
  0xed   : > { %v746_v37 = vpop.f32.mrb[2].mxu1 }
  0xee   : > { %v981_v38 = vsel %vm978_vm2, %v979_v31, %v980_v33  ;;  %v1197_v39 = vsel %vm1194_vm3, %v1195_v32, %v1196_v34  ;;  %v3024_v40 = vpop.f32.mrb[3].mxu1 }
  0xef   : > { %1050 = vrot.lane.b32.xlu0 %v981_v38, %s3236_s11 }
  0xf1   : > { %v3433_v41 = vpop.f32.mrb[4].mxu0 }
  0xf2   : > { %v982_v42 = vrot.slane %v3433_v41, 1  ;;  %v1198_v43 = vrot.slane %v3433_v41, 2  ;;  %v518_v44 = vpop.f32.mrb[5].mxu0 }
  0xf3   : > { %1266 = vrot.lane.b32.xlu0 %v1197_v39, %s3237_s12  ;;  %v3438_v45 = vpop.f32.mrb[6].mxu0  ;;  %v750_v46 = vpop.f32.mrb[4].mxu1  ;;  %v1598_v53 = vrot.slane %v518_v44, 3  ;;  %v1744_v54 = vrot.slane %v518_v44, 4 }
  0xf4   : > { %v984_v47 = vrot.slane %v3438_v45, 1  ;;  %v1200_v48 = vrot.slane %v3438_v45, 2  ;;  %v522_v49 = vpop.f32.mrb[7].mxu0  ;;  %v1199_v50 = vsel %vm1194_vm3, %v1196_v34, %v1198_v43  ;;  %v983_v51 = vsel %vm978_vm2, %v980_v33, %v982_v42  ;;  %v3027_v52 = vpop.f32.mrb[5].mxu1 }
  0xf5   : > { %v1599_v55 = vrot.slane %v522_v49, 3  ;;  %v1745_v56 = vrot.slane %v522_v49, 4  ;;  %1268 = vrot.lane.b32.xlu1 %v1199_v50, %s3237_s12  ;;  %v752_v57 = vpop.f32.mrb[6].mxu1 }
  0xf6   : > { %v985_v58 = vsel %vm978_vm2, %v982_v42, %v984_v47  ;;  %v1201_v59 = vsel %vm1194_vm3, %v1198_v43, %v1200_v48  ;;  %v3028_v60 = vpop.f32.mrb[7].mxu1 }
  0xf7   : > { %1052 = vrot.lane.b32.xlu0 %v983_v51, %s3236_s11  ;;  %v1746_v61 = vsel %vm1743_vm4, %v1744_v54, %v1745_v56  ;;  %v3450_v62 = vsel %vm1597_vm5, %v1598_v53, %v1599_v55 }
  0xf9   : > { %1054 = vrot.lane.b32.xlu1 %v985_v58, %s3236_s11  ;;  %v3453_v63 = vpop.f32.mrb[8].mxu0 }
  0xfa   : > { %5541 = vst [vmem:[#allocation2_spill] sm:$0xff] %v3453_v63  ;;  %v986_v0 = vrot.slane %v3453_v63, 1  ;;  %v1202_v1 = vrot.slane %v3453_v63, 2  ;;  %v528_v3 = vpop.f32.mrb[9].mxu0 }
  0xfb   : > { %v1601_v4 = vrot.slane %v528_v3, 3  ;;  %v1747_v6 = vrot.slane %v528_v3, 4  ;;  %v2112_v7 = vrot.slane %v528_v3, 5  ;;  %1270 = vrot.lane.b32.xlu0 %v1201_v59, %s3237_s12  ;;  %v3458_v8 = vpop.f32.mrb[10].mxu0 }
  0xfc   : > { %5542 = vst [vmem:[#allocation3_spill] sm:$0xff] %v3458_v8  ;;  %v988_v9 = vrot.slane %v3458_v8, 1  ;;  %v1204_v10 = vrot.slane %v3458_v8, 2  ;;  %v532_v11 = vpop.f32.mrb[11].mxu0  ;;  %v987_v12 = vsel %vm978_vm2, %v984_v47, %v986_v0  ;;  %v1203_v13 = vsel %vm1194_vm3, %v1200_v48, %v1202_v1 }
  0xfd   : > { %v1603_v15 = vrot.slane %v532_v11, 3  ;;  %v1749_v16 = vrot.slane %v532_v11, 4  ;;  %v2113_v17 = vrot.slane %v532_v11, 5  ;;  %1056 = vrot.lane.b32.xlu1 %v987_v12, %s3236_s11  ;;  %v1748_v18 = vsel %vm1743_vm4, %v1745_v56, %v1747_v6 }
  0xfe   : > { %v989_v19 = vsel %vm978_vm2, %v986_v0, %v988_v9  ;;  %v3469_v20 = vsel %vm1194_vm3, %v1202_v1, %v1204_v10  ;;  %v3472_v21 = vsel %vm1597_vm5, %v1599_v55, %v1601_v4  ;;  %v756_v55 = vpop.f32.mrb[8].mxu1 }
  0xff   : > { %1416 = vrot.lane.b32.xlu0 %v1201_v59, %s3238_s13  ;;  %v3478_v22 = vsel %vm1743_vm4, %v1747_v6, %v1749_v16  ;;  %v3481_v23 = vsel %vm2111_vm6, %v2112_v7, %v2113_v17  ;;  %v3484_v24 = vsel %vm1597_vm5, %v1601_v4, %v1603_v15  ;;  %v2367_v60 = vrot.slane %v756_v55, 6 }
 0x101   : > { %1272 = vrot.lane.b32.xlu1 %v1203_v13, %s3237_s12  ;;  %v3490_v25 = vpop.f32.mrb[12].mxu0 }
 0x102   : > { %5543 = vst [vmem:[#allocation4_spill] sm:$0xff] %v3490_v25  ;;  %v990_v26 = vrot.slane %v3490_v25, 1  ;;  %v1206_v28 = vrot.slane %v3490_v25, 2  ;;  %v538_v30 = vpop.f32.mrb[13].mxu0 }
 0x103   : > { %v1605_v31 = vrot.slane %v538_v30, 3  ;;  %v1751_v32 = vrot.slane %v538_v30, 4  ;;  %v2115_v33 = vrot.slane %v538_v30, 5  ;;  %1817 = vrot.lane.b32.xlu0 %v1746_v61, %s3236_s11  ;;  %v3495_v34 = vpop.f32.mrb[14].mxu0  ;;  %v3031_v61 = vpop.f32.mrb[9].mxu1 }
 0x104   : > { %5544 = vst [vmem:[#allocation5_spill] sm:$0xff] %v3495_v34  ;;  %v992_v2 = vrot.slane %v3495_v34, 1  ;;  %v1208_v5 = vrot.slane %v3495_v34, 2  ;;  %v542_v35 = vpop.f32.mrb[15].mxu0  ;;  %v991_v36 = vsel %vm978_vm2, %v988_v9, %v990_v26  ;;  %v3501_v37 = vsel %vm1194_vm3, %v1204_v10, %v1206_v28  ;;  %v759_v7 = vpop.f32.mrb[10].mxu1 }
 0x105   : > { %1418 = vrot.lane.b32.xlu1 %v1203_v13, %s3238_s13  ;;  %v1607_v38 = vrot.slane %v542_v35, 3  ;;  %v1753_v39 = vrot.slane %v542_v35, 4  ;;  %v2117_v40 = vrot.slane %v542_v35, 5  ;;  %v3505_v42 = vsel %vm1743_vm4, %v1749_v16, %v1751_v32  ;;  %v3032_v13 = vpop.f32.mrb[11].mxu1 }
 0x106   : > { %v3508_v43 = vsel %vm978_vm2, %v990_v26, %v992_v2  ;;  %v3511_v44 = vsel %vm2111_vm6, %v2113_v17, %v2115_v33  ;;  %v3514_v46 = vsel %vm1194_vm3, %v1206_v28, %v1208_v5  ;;  %v3517_v47 = vsel %vm1597_vm5, %v1603_v15, %v1605_v31  ;;  %v3149_v26 = vld [vmem:[%s3305_s10 + $0xa0] ss:$0 sps:$4 sm:$0x33]  }
 0x107   : > { %1058 = vrot.lane.b32.xlu0 %v989_v19, %s3236_s11  ;;  %v3521_v48 = vsel %vm1743_vm4, %v1751_v32, %v1753_v39  ;;  %v3524_v49 = vsel %vm2111_vm6, %v2115_v33, %v2117_v40  ;;  %v3527_v50 = vsel %vm1597_vm5, %v1605_v31, %v1607_v38  ;;  %v2368_v17 = vrot.slane %v759_v7, 6  ;;  %2967 = vmatmul.mubr.msk.bf16.gmra.mrb[80].mxu0 %vm410_vm1, %v3149_v26 }
 0x108   : > { %5545 = vst [vmem:[#allocation6_spill] sm:$0xff] %v3527_v50  ;;  %3102 = vmatmul.mubr.msk.bf16.gmra.mrb[80].mxu1 %vm410_vm1, %v3149_v26 }
 0x109   : > { %1819 = vrot.lane.b32.xlu1 %v1748_v18, %s3236_s11  ;;  %v3530_v51 = vpop.f32.mrb[16].mxu0  ;;  %v3572_v30 = vsel %vm2366_vm7, %v2367_v60, %v2368_v17 }
 0x10a   : > { %5546 = vst [vmem:[#allocation7_spill] sm:$0xff] %v3530_v51  ;;  %v994_v52 = vrot.slane %v3530_v51, 1  ;;  %v1210_v53 = vrot.slane %v3530_v51, 2  ;;  %v548_v54 = vpop.f32.mrb[17].mxu0  ;;  %5549 = vst [vmem:[#allocation10_spill] sm:$0xff] %v3572_v30 }
 0x10b   : > { %v1609_v56 = vrot.slane %v548_v54, 3  ;;  %v1755_v57 = vrot.slane %v548_v54, 4  ;;  %v2119_v58 = vrot.slane %v548_v54, 5  ;;  %1274 = vrot.lane.b32.xlu0 %v3469_v20, %s3237_s12  ;;  %v3536_v59 = vpop.f32.mrb[18].mxu0 }
 0x10c   : > { %5547 = vst [vmem:[#allocation8_spill] sm:$0xff] %v3536_v59  ;;  %v996_v0 = vrot.slane %v3536_v59, 1  ;;  %v1212_v1 = vrot.slane %v3536_v59, 2  ;;  %v552_v3 = vpop.f32.mrb[19].mxu0  ;;  %v3541_v4 = vsel %vm978_vm2, %v992_v2, %v994_v52  ;;  %v3544_v6 = vsel %vm1194_vm3, %v1208_v5, %v1210_v53 }
 0x10d   : > { %1060 = vrot.lane.b32.xlu1 %v991_v36, %s3236_s11  ;;  %v1611_v9 = vrot.slane %v552_v3, 3  ;;  %v1757_v10 = vrot.slane %v552_v3, 4  ;;  %v2121_v11 = vrot.slane %v552_v3, 5  ;;  %v3548_v12 = vsel %vm1743_vm4, %v1753_v39, %v1755_v57  ;;  %v3589_v39 = vpop.f32.mrb[12].mxu1 }
 0x10e   : > { %v3551_v14 = vsel %vm978_vm2, %v994_v52, %v996_v0  ;;  %v3554_v15 = vsel %vm2111_vm6, %v2117_v40, %v2119_v58  ;;  %v3557_v16 = vsel %vm1194_vm3, %v1210_v53, %v1212_v1  ;;  %v3569_v28 = vsel %vm1597_vm5, %v1607_v38, %v1609_v56 }
 0x10f   : > { %1420 = vrot.lane.b32.xlu0 %v3469_v20, %s3238_s13  ;;  %v3562_v18 = vsel %vm1743_vm4, %v1755_v57, %v1757_v10  ;;  %v3565_v19 = vsel %vm2111_vm6, %v2119_v58, %v2121_v11  ;;  %5548 = vst [vmem:[#allocation9_spill] sm:$0xff] %v3569_v28  ;;  %v3575_v31 = vsel %vm1597_vm5, %v1609_v56, %v1611_v9  ;;  %v3035_v56 = vpop.f32.mrb[13].mxu1 }
 0x110   : > { %5550 = vst [vmem:[#allocation11_spill] sm:$0xff] %v3575_v31 }
 0x111   : > { %1276 = vrot.lane.b32.xlu1 %v3501_v37, %s3237_s12  ;;  %v3579_v20 = vpop.f32.mrb[20].mxu0 }
 0x112   : > { %5551 = vst [vmem:[#allocation12_spill] sm:$0xff] %v3579_v20  ;;  %v998_v32 = vrot.slane %v3579_v20, 1  ;;  %v1214_v33 = vrot.slane %v3579_v20, 2  ;;  %v558_v2 = vpop.f32.mrb[21].mxu0 }
 0x113   : > { %1821 = vrot.lane.b32.xlu0 %v3478_v22, %s3236_s11  ;;  %v1613_v5 = vrot.slane %v558_v2, 3  ;;  %v1759_v35 = vrot.slane %v558_v2, 4  ;;  %v2123_v36 = vrot.slane %v558_v2, 5  ;;  %v3587_v38 = vpop.f32.mrb[22].mxu0 }
 0x114   : > { %5552 = vst [vmem:[#allocation13_spill] sm:$0xff] %v3587_v38  ;;  %v1000_v40 = vrot.slane %v3587_v38, 1  ;;  %v1216_v52 = vrot.slane %v3587_v38, 2  ;;  %v562_v53 = vpop.f32.mrb[23].mxu0  ;;  %v3594_v54 = vsel %vm978_vm2, %v996_v0, %v998_v32  ;;  %v3597_v55 = vsel %vm1194_vm3, %v1212_v1, %v1214_v33 }
 0x115   : > { %1422 = vrot.lane.b32.xlu1 %v3501_v37, %s3238_s13  ;;  %v1615_v57 = vrot.slane %v562_v53, 3  ;;  %v1761_v58 = vrot.slane %v562_v53, 4  ;;  %v2125_v60 = vrot.slane %v562_v53, 5  ;;  %v3602_v61 = vsel %vm1743_vm4, %v1757_v10, %v1759_v35 }
 0x116   : > { %v3605_v3 = vsel %vm978_vm2, %v998_v32, %v1000_v40  ;;  %v3608_v7 = vsel %vm2111_vm6, %v2121_v11, %v2123_v36  ;;  %v3611_v0 = vsel %vm1194_vm3, %v1214_v33, %v1216_v52  ;;  %v5473_v1 = vrot.slane %v3589_v39, 6 }
 0x117   : > { %1967 = vrot.lane.b32.xlu0 %v3478_v22, %s3237_s12  ;;  %v3617_v37 = vsel %vm1743_vm4, %v1759_v35, %v1761_v58  ;;  %v3620_v10 = vsel %vm2111_vm6, %v2123_v36, %v2125_v60  ;;  %v3623_v13 = vsel %vm1597_vm5, %v1611_v9, %v1613_v5  ;;  %v3626_v11 = vsel %vm1597_vm5, %v1613_v5, %v1615_v57 }
 0x118   : > { %5553 = vst [vmem:[#allocation14_spill] sm:$0xff] %v3623_v13  ;;  %5554 = vst [vmem:[#allocation15_spill] sm:$0xff] %v3626_v11  ;;  %v3631_v26 = vsel %vm2366_vm7, %v2368_v17, %v5473_v1 }
 0x119   : > { %5555 = vst [vmem:[#allocation16_spill] sm:$0xff] %v3631_v26  ;;  %1823 = vrot.lane.b32.xlu1 %v3505_v42, %s3236_s11  ;;  %v3635_v22 = vpop.f32.mrb[24].mxu0 }
 0x11a   : > { %5556 = vst [vmem:[#allocation17_spill] sm:$0xff] %v3635_v22  ;;  %v1002_v32 = vrot.slane %v3635_v22, 1  ;;  %v1218_v33 = vrot.slane %v3635_v22, 2  ;;  %v568_v2 = vpop.f32.mrb[25].mxu0 }
 0x11b   : > { %2185 = vrot.lane.b32.xlu0 %v3481_v23, %s3238_s13  ;;  %v1617_v9 = vrot.slane %v568_v2, 3  ;;  %v1763_v5 = vrot.slane %v568_v2, 4  ;;  %v2127_v35 = vrot.slane %v568_v2, 5  ;;  %v3641_v36 = vpop.f32.mrb[26].mxu0 }
 0x11c   : > { %5557 = vst [vmem:[#allocation18_spill] sm:$0xff] %v3641_v36  ;;  %v1004_v17 = vrot.slane %v3641_v36, 1  ;;  %v1220_v53 = vrot.slane %v3641_v36, 2  ;;  %v572_v56 = vpop.f32.mrb[27].mxu0  ;;  %v3646_v1 = vsel %vm978_vm2, %v1000_v40, %v1002_v32  ;;  %v3649_v38 = vsel %vm1194_vm3, %v1216_v52, %v1218_v33 }
 0x11d   : > { %1969 = vrot.lane.b32.xlu1 %v3505_v42, %s3237_s12  ;;  %v1619_v23 = vrot.slane %v572_v56, 3  ;;  %v1765_v22 = vrot.slane %v572_v56, 4  ;;  %v2129_v20 = vrot.slane %v572_v56, 5  ;;  %v3654_v2 = vsel %vm1743_vm4, %v1761_v58, %v1763_v5 }
 0x11e   : > { %v3657_v11 = vsel %vm978_vm2, %v1002_v32, %v1004_v17  ;;  %v3660_v36 = vsel %vm2111_vm6, %v2125_v60, %v2127_v35  ;;  %v3663_v40 = vsel %vm1194_vm3, %v1218_v33, %v1220_v53  ;;  %v3666_v52 = vsel %vm1597_vm5, %v1615_v57, %v1617_v9 }
 0x11f   : > { %5558 = vst [vmem:[#allocation19_spill] sm:$0xff] %v3666_v52  ;;  %1062 = vrot.lane.b32.xlu0 %v3508_v43, %s3236_s11  ;;  %v3671_v42 = vsel %vm1743_vm4, %v1763_v5, %v1765_v22  ;;  %v3674_v58 = vsel %vm2111_vm6, %v2127_v35, %v2129_v20  ;;  %v3677_v32 = vsel %vm1597_vm5, %v1617_v9, %v1619_v23 }
 0x120   : > { %5559 = vst [vmem:[#allocation20_spill] sm:$0xff] %v3677_v32 }
 0x121   : > { %2187 = vrot.lane.b32.xlu1 %v3511_v44, %s3238_s13  ;;  %v3681_v60 = vpop.f32.mrb[28].mxu0 }
 0x122   : > { %5560 = vst [vmem:[#allocation21_spill] sm:$0xff] %v3681_v60  ;;  %v1006_v57 = vrot.slane %v3681_v60, 1  ;;  %v1222_v33 = vrot.slane %v3681_v60, 2  ;;  %v578_v56 = vpop.f32.mrb[29].mxu0 }
 0x123   : > { %1278 = vrot.lane.b32.xlu0 %v3514_v46, %s3237_s12  ;;  %v1621_v43 = vrot.slane %v578_v56, 3  ;;  %v1767_v5 = vrot.slane %v578_v56, 4  ;;  %v2131_v35 = vrot.slane %v578_v56, 5  ;;  %v3687_v52 = vpop.f32.mrb[30].mxu0 }
 0x124   : > { %5561 = vst [vmem:[#allocation22_spill] sm:$0xff] %v3687_v52  ;;  %v1008_v9 = vrot.slane %v3687_v52, 1  ;;  %v1224_v32 = vrot.slane %v3687_v52, 2  ;;  %v582_v44 = vpop.f32.mrb[31].mxu0  ;;  %v3692_v59 = vsel %vm978_vm2, %v1004_v17, %v1006_v57  ;;  %v3695_v51 = vsel %vm1194_vm3, %v1220_v53, %v1222_v33  ;;  %v767_v53 = vpop.f32.mrb[14].mxu1 }
 0x125   : > { %1064 = vrot.lane.b32.xlu1 %v3541_v4, %s3236_s11  ;;  %v1623_v60 = vrot.slane %v582_v44, 3  ;;  %v1769_v13 = vrot.slane %v582_v44, 4  ;;  %v2133_v31 = vrot.slane %v582_v44, 5  ;;  %v3700_v56 = vsel %vm1743_vm4, %v1765_v22, %v1767_v5  ;;  %v3036_v44 = vpop.f32.mrb[15].mxu1 }
 0x126   : > { %v3703_v34 = vsel %vm978_vm2, %v1006_v57, %v1008_v9  ;;  %v3706_v52 = vsel %vm2111_vm6, %v2129_v20, %v2131_v35  ;;  %v3709_v17 = vsel %vm1194_vm3, %v1222_v33, %v1224_v32  ;;  %v3712_v25 = vsel %vm1597_vm5, %v1619_v23, %v1621_v43 }
 0x127   : > { %5562 = vst [vmem:[#allocation23_spill] sm:$0xff] %v3712_v25  ;;  %1424 = vrot.lane.b32.xlu0 %v3514_v46, %s3238_s13  ;;  %v3717_v4 = vsel %vm1743_vm4, %v1767_v5, %v1769_v13  ;;  %v2372_v22 = vrot.slane %v767_v53, 6  ;;  %v3720_v57 = vsel %vm1597_vm5, %v1621_v43, %v1623_v60  ;;  %v3723_v20 = vsel %vm2111_vm6, %v2131_v35, %v2133_v31 }
 0x128   : > { %5563 = vst [vmem:[#allocation24_spill] sm:$0xff] %v3720_v57  ;;  %5564 = vst [vmem:[#allocation25_spill] sm:$0xff] %v3723_v20  ;;  %v5566_v23 = vrot.slane %v3589_v39, 6 }
 0x129   : > { %1280 = vrot.lane.b32.xlu1 %v3544_v6, %s3237_s12  ;;  %v3727_v33 = vpop.f32.mrb[32].mxu0 }
 0x12a   : > { %5565 = vst [vmem:[#allocation26_spill] sm:$0xff] %v3727_v33  ;;  %v3732_v46 = vsel %vm2366_vm7, %v5566_v23, %v2372_v22  ;;  %v1010_v5 = vrot.slane %v3727_v33, 1  ;;  %v1226_v53 = vrot.slane %v3727_v33, 2  ;;  %v588_v44 = vpop.f32.mrb[33].mxu0  ;;  %v3748_v33 = vpop.f32.mrb[16].mxu1 }
 0x12b   : > { %5567 = vst [vmem:[#allocation27_spill] sm:$0xff] %v3732_v46  ;;  %1825 = vrot.lane.b32.xlu0 %v3521_v48, %s3236_s11  ;;  %v1625_v43 = vrot.slane %v588_v44, 3  ;;  %v1771_v35 = vrot.slane %v588_v44, 4  ;;  %v2135_v20 = vrot.slane %v588_v44, 5  ;;  %v3738_v57 = vpop.f32.mrb[34].mxu0  ;;  %v3039_v63 = vpop.f32.mrb[17].mxu1 }
 0x12c   : > { %5568 = vst [vmem:[#allocation28_spill] sm:$0xff] %v3738_v57  ;;  %v1012_v25 = vrot.slane %v3738_v57, 1  ;;  %v1228_v39 = vrot.slane %v3738_v57, 2  ;;  %v592_v28 = vpop.f32.mrb[35].mxu0  ;;  %v3743_v23 = vsel %vm978_vm2, %v1008_v9, %v1010_v5  ;;  %v3746_v46 = vsel %vm1194_vm3, %v1224_v32, %v1226_v53 }
 0x12d   : > { %1426 = vrot.lane.b32.xlu1 %v3544_v6, %s3238_s13  ;;  %v1627_v50 = vrot.slane %v592_v28, 3  ;;  %v1773_v44 = vrot.slane %v592_v28, 4  ;;  %v2137_v8 = vrot.slane %v592_v28, 5  ;;  %v3753_v26 = vsel %vm1743_vm4, %v1769_v13, %v1771_v35 }
 0x12e   : > { %v3756_v57 = vsel %vm978_vm2, %v1010_v5, %v1012_v25  ;;  %v3759_v9 = vsel %vm1194_vm3, %v1226_v53, %v1228_v39  ;;  %v5488_v32 = vrot.slane %v3748_v33, 6  ;;  %v3763_v30 = vsel %vm1597_vm5, %v1623_v60, %v1625_v43 }
 0x12f   : > { %5569 = vst [vmem:[#allocation29_spill] sm:$0xff] %v3763_v30  ;;  %1971 = vrot.lane.b32.xlu0 %v3521_v48, %s3237_s12  ;;  %v3768_v6 = vsel %vm1743_vm4, %v1771_v35, %v1773_v44  ;;  %v3771_v28 = vsel %vm1597_vm5, %v1625_v43, %v1627_v50  ;;  %v3774_v63 = vsel %vm2111_vm6, %v2133_v31, %v2135_v20 }
 0x130   : > { %5570 = vst [vmem:[#allocation30_spill] sm:$0xff] %v3768_v6  ;;  %5571 = vst [vmem:[#allocation31_spill] sm:$0xff] %v3771_v28  ;;  %v3777_v13 = vsel %vm2111_vm6, %v2135_v20, %v2137_v8  ;;  %v3782_v60 = vsel %vm2366_vm7, %v2372_v22, %v5488_v32 }
 0x131   : > { %5572 = vst [vmem:[#allocation32_spill] sm:$0xff] %v3774_v63  ;;  %5573 = vst [vmem:[#allocation33_spill] sm:$0xff] %v3777_v13  ;;  %1827 = vrot.lane.b32.xlu1 %v3548_v12, %s3236_s11  ;;  %v3786_v48 = vpop.f32.mrb[36].mxu0 }
 0x132   : > { %5574 = vst [vmem:[#allocation34_spill] sm:$0xff] %v3782_v60  ;;  %5575 = vst [vmem:[#allocation35_spill] sm:$0xff] %v3786_v48  ;;  %v1014_v5 = vrot.slane %v3786_v48, 1  ;;  %v1230_v53 = vrot.slane %v3786_v48, 2  ;;  %v598_v43 = vpop.f32.mrb[37].mxu0 }
 0x133   : > { %2189 = vrot.lane.b32.xlu0 %v3524_v49, %s3238_s13  ;;  %v1629_v31 = vrot.slane %v598_v43, 3  ;;  %v1775_v20 = vrot.slane %v598_v43, 4  ;;  %v2139_v35 = vrot.slane %v598_v43, 5  ;;  %v3792_v13 = vpop.f32.mrb[38].mxu0 }
 0x134   : > { %5576 = vst [vmem:[#allocation36_spill] sm:$0xff] %v3792_v13  ;;  %v1016_v22 = vrot.slane %v3792_v13, 1  ;;  %v1232_v32 = vrot.slane %v3792_v13, 2  ;;  %v602_v63 = vpop.f32.mrb[39].mxu0  ;;  %v3797_v28 = vsel %vm978_vm2, %v1012_v25, %v1014_v5  ;;  %v3800_v30 = vsel %vm1194_vm3, %v1228_v39, %v1230_v53 }
 0x135   : > { %1973 = vrot.lane.b32.xlu1 %v3548_v12, %s3237_s12  ;;  %v1631_v49 = vrot.slane %v602_v63, 3  ;;  %v1777_v48 = vrot.slane %v602_v63, 4  ;;  %v2141_v60 = vrot.slane %v602_v63, 5  ;;  %v3805_v43 = vsel %vm1743_vm4, %v1773_v44, %v1775_v20 }
 0x136   : > { %5577 = vst [vmem:[#allocation37_spill] sm:$0xff] %v3805_v43  ;;  %v3808_v6 = vsel %vm978_vm2, %v1014_v5, %v1016_v22  ;;  %v3811_v13 = vsel %vm1194_vm3, %v1230_v53, %v1232_v32  ;;  %v3814_v25 = vsel %vm1597_vm5, %v1627_v50, %v1629_v31  ;;  %v3817_v39 = vsel %vm2111_vm6, %v2137_v8, %v2139_v35 }
 0x137   : > { %5578 = vst [vmem:[#allocation38_spill] sm:$0xff] %v3808_v6  ;;  %5579 = vst [vmem:[#allocation39_spill] sm:$0xff] %v3811_v13  ;;  %1066 = vrot.lane.b32.xlu0 %v3551_v14, %s3236_s11  ;;  %v3822_v12 = vsel %vm1743_vm4, %v1775_v20, %v1777_v48  ;;  %v3825_v44 = vsel %vm1597_vm5, %v1629_v31, %v1631_v49  ;;  %v3828_v63 = vsel %vm2111_vm6, %v2139_v35, %v2141_v60 }
 0x138   : > { %5580 = vst [vmem:[#allocation40_spill] sm:$0xff] %v3814_v25  ;;  %5581 = vst [vmem:[#allocation41_spill] sm:$0xff] %v3817_v39 }
 0x139   : > { %5582 = vst [vmem:[#allocation42_spill] sm:$0xff] %v3822_v12  ;;  %5583 = vst [vmem:[#allocation43_spill] sm:$0xff] %v3825_v44  ;;  %2191 = vrot.lane.b32.xlu1 %v3554_v15, %s3238_s13  ;;  %v3832_v50 = vpop.f32.mrb[40].mxu0 }
 0x13a   : > { %5584 = vst [vmem:[#allocation44_spill] sm:$0xff] %v3828_v63  ;;  %5585 = vst [vmem:[#allocation45_spill] sm:$0xff] %v3832_v50  ;;  %v1018_v8 = vrot.slane %v3832_v50, 1  ;;  %v1234_v5 = vrot.slane %v3832_v50, 2  ;;  %v608_v53 = vpop.f32.mrb[41].mxu0 }
 0x13b   : > { %1282 = vrot.lane.b32.xlu0 %v3557_v16, %s3237_s12  ;;  %v1633_v14 = vrot.slane %v608_v53, 3  ;;  %v1779_v20 = vrot.slane %v608_v53, 4  ;;  %v2143_v31 = vrot.slane %v608_v53, 5  ;;  %v3838_v39 = vpop.f32.mrb[42].mxu0 }
 0x13c   : > { %5586 = vst [vmem:[#allocation46_spill] sm:$0xff] %v3838_v39  ;;  %v1020_v35 = vrot.slane %v3838_v39, 1  ;;  %v1236_v63 = vrot.slane %v3838_v39, 2  ;;  %v612_v15 = vpop.f32.mrb[43].mxu0  ;;  %v3843_v44 = vsel %vm978_vm2, %v1016_v22, %v1018_v8  ;;  %v3846_v25 = vsel %vm1194_vm3, %v1232_v32, %v1234_v5  ;;  %v775_v39 = vpop.f32.mrb[18].mxu1 }
 0x13d   : > { %1068 = vrot.lane.b32.xlu1 %v3594_v54, %s3236_s11  ;;  %v1635_v50 = vrot.slane %v612_v15, 3  ;;  %v1781_v12 = vrot.slane %v612_v15, 4  ;;  %v2145_v13 = vrot.slane %v612_v15, 5  ;;  %v3851_v53 = vsel %vm1743_vm4, %v1777_v48, %v1779_v20  ;;  %v3040_v15 = vpop.f32.mrb[19].mxu1 }
 0x13e   : > { %5587 = vst [vmem:[#allocation47_spill] sm:$0xff] %v3851_v53  ;;  %v3854_v6 = vsel %vm978_vm2, %v1018_v8, %v1020_v35  ;;  %v3857_v43 = vsel %vm1194_vm3, %v1234_v5, %v1236_v63  ;;  %v3860_v22 = vsel %vm1597_vm5, %v1631_v49, %v1633_v14  ;;  %v3863_v32 = vsel %vm2111_vm6, %v2141_v60, %v2143_v31 }
 0x13f   : > { %5588 = vst [vmem:[#allocation48_spill] sm:$0xff] %v3854_v6  ;;  %5589 = vst [vmem:[#allocation49_spill] sm:$0xff] %v3857_v43  ;;  %1428 = vrot.lane.b32.xlu0 %v3557_v16, %s3238_s13  ;;  %v2376_v54 = vrot.slane %v775_v39, 6  ;;  %v3868_v48 = vsel %vm1743_vm4, %v1779_v20, %v1781_v12  ;;  %v3871_v8 = vsel %vm1597_vm5, %v1633_v14, %v1635_v50  ;;  %v5596_v60 = vrot.slane %v3748_v33, 6 }
 0x140   : > { %5590 = vst [vmem:[#allocation50_spill] sm:$0xff] %v3860_v22  ;;  %5591 = vst [vmem:[#allocation51_spill] sm:$0xff] %v3863_v32  ;;  %v3874_v5 = vsel %vm2111_vm6, %v2143_v31, %v2145_v13 }
 0x141   : > { %5592 = vst [vmem:[#allocation52_spill] sm:$0xff] %v3868_v48  ;;  %5593 = vst [vmem:[#allocation53_spill] sm:$0xff] %v3871_v8  ;;  %1284 = vrot.lane.b32.xlu1 %v3597_v55, %s3237_s12  ;;  %v3878_v49 = vpop.f32.mrb[44].mxu0  ;;  %v3883_v16 = vsel %vm2366_vm7, %v5596_v60, %v2376_v54  ;;  %v3896_v48 = vpop.f32.mrb[20].mxu1 }
 0x142   : > { %5594 = vst [vmem:[#allocation54_spill] sm:$0xff] %v3874_v5  ;;  %5595 = vst [vmem:[#allocation55_spill] sm:$0xff] %v3878_v49  ;;  %v1022_v39 = vrot.slane %v3878_v49, 1  ;;  %v1238_v20 = vrot.slane %v3878_v49, 2  ;;  %v618_v15 = vpop.f32.mrb[45].mxu0  ;;  %v2378_v6 = vrot.slane %v3896_v48, 6 }
 0x143   : > { %5597 = vst [vmem:[#allocation56_spill] sm:$0xff] %v3883_v16  ;;  %1829 = vrot.lane.b32.xlu0 %v3562_v18, %s3236_s11  ;;  %v1637_v14 = vrot.slane %v618_v15, 3  ;;  %v1783_v31 = vrot.slane %v618_v15, 4  ;;  %v2147_v32 = vrot.slane %v618_v15, 5  ;;  %v3889_v5 = vpop.f32.mrb[46].mxu0  ;;  %v3043_v53 = vpop.f32.mrb[21].mxu1 }
 0x144   : > { %5598 = vst [vmem:[#allocation57_spill] sm:$0xff] %v3889_v5  ;;  %v1024_v8 = vrot.slane %v3889_v5, 1  ;;  %v1240_v33 = vrot.slane %v3889_v5, 2  ;;  %v622_v22 = vpop.f32.mrb[47].mxu0  ;;  %v3894_v60 = vsel %vm978_vm2, %v1020_v35, %v1022_v39  ;;  %v3899_v49 = vsel %vm1194_vm3, %v1236_v63, %v1238_v20 }
 0x145   : > { %5599 = vst [vmem:[#allocation58_spill] sm:$0xff] %v3894_v60  ;;  %1430 = vrot.lane.b32.xlu1 %v3597_v55, %s3238_s13  ;;  %v1639_v16 = vrot.slane %v622_v22, 3  ;;  %v1785_v15 = vrot.slane %v622_v22, 4  ;;  %v2149_v43 = vrot.slane %v622_v22, 5  ;;  %v3905_v5 = vsel %vm1743_vm4, %v1781_v12, %v1783_v31 }
 0x146   : > { %v3908_v35 = vsel %vm978_vm2, %v1022_v39, %v1024_v8  ;;  %v3911_v60 = vsel %vm1194_vm3, %v1238_v20, %v1240_v33  ;;  %v3914_v63 = vsel %vm1597_vm5, %v1635_v50, %v1637_v14  ;;  %v3919_v55 = vsel %vm2366_vm7, %v2376_v54, %v2378_v6 }
 0x147   : > { %5600 = vst [vmem:[#allocation59_spill] sm:$0xff] %v3914_v63  ;;  %1975 = vrot.lane.b32.xlu0 %v3562_v18, %s3237_s12  ;;  %v3922_v53 = vsel %vm1743_vm4, %v1783_v31, %v1785_v15  ;;  %v3925_v12 = vsel %vm1597_vm5, %v1637_v14, %v1639_v16  ;;  %v3928_v22 = vsel %vm2111_vm6, %v2147_v32, %v2149_v43 }
 0x148   : > { %5601 = vst [vmem:[#allocation60_spill] sm:$0xff] %v3922_v53  ;;  %5602 = vst [vmem:[#allocation61_spill] sm:$0xff] %v3925_v12  ;;  %v3931_v48 = vsel %vm2111_vm6, %v2145_v13, %v2147_v32 }
 0x149   : > { %5603 = vst [vmem:[#allocation62_spill] sm:$0xff] %v3928_v22  ;;  %5604 = vst [vmem:[#allocation63_spill] sm:$0xff] %v3931_v48  ;;  %1831 = vrot.lane.b32.xlu1 %v3602_v61, %s3236_s11  ;;  %v3935_v50 = vpop.f32.mrb[48].mxu0 }
 0x14a   : > { %5605 = vst [vmem:[#allocation64_spill] sm:$0xff] %v3935_v50  ;;  %v1026_v18 = vrot.slane %v3935_v50, 1  ;;  %v1242_v54 = vrot.slane %v3935_v50, 2  ;;  %v628_v39 = vpop.f32.mrb[49].mxu0 }
 0x14b   : > { %2193 = vrot.lane.b32.xlu0 %v3565_v19, %s3238_s13  ;;  %v1641_v20 = vrot.slane %v628_v39, 3  ;;  %v1787_v14 = vrot.slane %v628_v39, 4  ;;  %v2151_v31 = vrot.slane %v628_v39, 5 }
 0x14c   : > { %v3942_v22 = vsel %vm978_vm2, %v1024_v8, %v1026_v18  ;;  %v3945_v13 = vsel %vm1194_vm3, %v1240_v33, %v1242_v54  ;;  %v3960_v8 = vpop.f32.mrb[50].mxu0 }
 0x14d   : > { %5606 = vst [vmem:[#allocation65_spill] sm:$0xff] %v3945_v13  ;;  %1977 = vrot.lane.b32.xlu1 %v3602_v61, %s3237_s12  ;;  %v3950_v32 = vsel %vm1743_vm4, %v1785_v15, %v1787_v14  ;;  %v3953_v48 = vsel %vm1597_vm5, %v1639_v16, %v1641_v20  ;;  %v3956_v19 = vsel %vm2111_vm6, %v2149_v43, %v2151_v31  ;;  %5610 = vst [vmem:[#allocation69_spill] sm:$0xff] %v3960_v8  ;;  %v632_v33 = vpop.f32.mrb[51].mxu0 }
 0x14e   : > { %5607 = vst [vmem:[#allocation66_spill] sm:$0xff] %v3950_v32  ;;  %5608 = vst [vmem:[#allocation67_spill] sm:$0xff] %v3953_v48  ;;  %v1028_v16 = vrot.slane %v3960_v8, 1  ;;  %v1244_v43 = vrot.slane %v3960_v8, 2  ;;  %v1643_v15 = vrot.slane %v632_v33, 3  ;;  %v783_v32 = vpop.f32.mrb[22].mxu1 }
 0x14f   : > { %5609 = vst [vmem:[#allocation68_spill] sm:$0xff] %v3956_v19  ;;  %1070 = vrot.lane.b32.xlu0 %v3605_v3, %s3236_s11  ;;  %v1789_v19 = vrot.slane %v632_v33, 4  ;;  %v2153_v3 = vrot.slane %v632_v33, 5  ;;  %v3044_v33 = vpop.f32.mrb[23].mxu1 }
 0x150   : > { %v3980_v53 = vsel %vm978_vm2, %v1026_v18, %v1028_v16  ;;  %v3983_v8 = vsel %vm1194_vm3, %v1242_v54, %v1244_v43  ;;  %v4000_v54 = vsel %vm1597_vm5, %v1641_v20, %v1643_v15  ;;  %v788_v20 = vpop.f32.mrb[24].mxu1 }
 0x151   : > { %2195 = vrot.lane.b32.xlu1 %v3608_v7, %s3238_s13  ;;  %v3964_v39 = vpop.f32.mrb[52].mxu0  ;;  %5612 = vst [vmem:[#allocation71_spill] sm:$0xff] %v3983_v8  ;;  %5615 = vst [vmem:[#allocation74_spill] sm:$0xff] %v4000_v54 }
 0x152   : > { %5611 = vst [vmem:[#allocation70_spill] sm:$0xff] %v3964_v39  ;;  %v3968_v61 = vpop.f32.mrb[53].mxu0  ;;  %v1030_v7 = vrot.slane %v3964_v39, 1  ;;  %v1246_v50 = vrot.slane %v3964_v39, 2 }
 0x153   : > { %1286 = vrot.lane.b32.xlu0 %v3611_v0, %s3237_s12  ;;  %v1645_v48 = vrot.slane %v3968_v61, 3  ;;  %v1791_v12 = vrot.slane %v3968_v61, 4  ;;  %v2155_v63 = vrot.slane %v3968_v61, 5  ;;  %v3994_v61 = vsel %vm1743_vm4, %v1787_v14, %v1789_v19 }
 0x154   : > { %v3988_v39 = vsel %vm978_vm2, %v1028_v16, %v1030_v7  ;;  %v3991_v13 = vsel %vm1194_vm3, %v1244_v43, %v1246_v50  ;;  %5613 = vst [vmem:[#allocation72_spill] sm:$0xff] %v3994_v61  ;;  %v3047_v16 = vpop.f32.mrb[25].mxu1  ;;  %v4029_v43 = vpop.f32.mrb[54].mxu0 }
 0x155   : > { %1072 = vrot.lane.b32.xlu1 %v3646_v1, %s3236_s11  ;;  %v2380_v1 = vrot.slane %v783_v32, 6  ;;  %v3997_v18 = vsel %vm1743_vm4, %v1789_v19, %v1791_v12  ;;  %v4003_v8 = vsel %vm1597_vm5, %v1643_v15, %v1645_v48  ;;  %v4014_v14 = vsel %vm2111_vm6, %v2153_v3, %v2155_v63  ;;  %5619 = vst [vmem:[#allocation78_spill] sm:$0xff] %v4029_v43 }
 0x156   : > { %5614 = vst [vmem:[#allocation73_spill] sm:$0xff] %v3997_v18  ;;  %5616 = vst [vmem:[#allocation75_spill] sm:$0xff] %v4003_v8  ;;  %v2382_v19 = vrot.slane %v788_v20, 6  ;;  %v1032_v33 = vrot.slane %v4029_v43, 1  ;;  %v1248_v20 = vrot.slane %v4029_v43, 2 }
 0x157   : > { %1432 = vrot.lane.b32.xlu0 %v3611_v0, %s3238_s13  ;;  %v4006_v0 = vsel %vm2111_vm6, %v2151_v31, %v2153_v3  ;;  %v4011_v32 = vsel %vm2366_vm7, %v2378_v6, %v2380_v1  ;;  %5618 = vst [vmem:[#allocation77_spill] sm:$0xff] %v4014_v14 }
 0x158   : > { %5617 = vst [vmem:[#allocation76_spill] sm:$0xff] %v4006_v0  ;;  %v4023_v31 = vsel %vm2366_vm7, %v2380_v1, %v2382_v19  ;;  %v4049_v61 = vsel %vm978_vm2, %v1030_v7, %v1032_v33 }
 0x159   : > { %1288 = vrot.lane.b32.xlu1 %v3649_v38, %s3237_s12 }
 0x15b   : > { %1833 = vrot.lane.b32.xlu0 %v3617_v37, %s3236_s11 }
 0x15d   : > { %1434 = vrot.lane.b32.xlu1 %v3649_v38, %s3238_s13  ;;  %v642_v38 = vpop.f32.mrb[55].mxu0 }
 0x15e   : > { %v4033_v3 = vpop.f32.mrb[56].mxu0  ;;  %v1793_v16 = vrot.slane %v642_v38, 4 }
 0x15f   : > { %1979 = vrot.lane.b32.xlu0 %v3617_v37, %s3237_s12  ;;  %5620 = vst [vmem:[#allocation79_spill] sm:$0xff] %v4033_v3  ;;  %v4037_v1 = vpop.f32.mrb[57].mxu0  ;;  %v5515_v0 = vrot.slane %v4033_v3, 1  ;;  %v5513_v8 = vrot.slane %v4033_v3, 2 }
 0x160   : > { %v4067_v7 = vsel %vm1743_vm4, %v1791_v12, %v1793_v16 }
 0x161   : > { %v1051_v6 = vpop.permute.xlu0 %1050  ;;  %1835 = vrot.lane.b32.xlu1 %v3654_v2, %s3236_s11  ;;  %v4064_v54 = vsel %vm1194_vm3, %v1248_v20, %v5513_v8  ;;  %v5626_v8 = vrot.slane %v4037_v1, 5 }
 0x163   : > { %2197 = vrot.lane.b32.xlu0 %v3620_v10, %s3238_s13  ;;  %v1647_v10 = vrot.slane %v642_v38, 3 }
 0x165   : > { %v1267_v15 = vpop.permute.xlu0 %1266  ;;  %1981 = vrot.lane.b32.xlu1 %v3654_v2, %s3237_s12  ;;  %v2157_v2 = vrot.slane %v642_v38, 5  ;;  %v4059_v38 = vsel %vm978_vm2, %v1032_v33, %v5515_v0  ;;  %v5623_v33 = vrot.slane %v4037_v1, 3 }
 0x167   : > { %v1269_v37 = vpop.permute.xlu1 %1268  ;;  %1074 = vrot.lane.b32.xlu0 %v3657_v11, %s3236_s11  ;;  %v5514_v11 = vrot.slane %v4037_v1, 4  ;;  %v4085_v12 = vsel %vm2111_vm6, %v2155_v63, %v2157_v2 }
 0x168   : > { %5625 = vst [vmem:[#allocation83_spill] sm:$0xff] %v4085_v12 }
 0x169   : > { %v1053_v14 = vpop.permute.xlu0 %1052  ;;  %2199 = vrot.lane.b32.xlu1 %v3660_v36, %s3238_s13  ;;  %v4054_v36 = vsel %vm1194_vm3, %v1246_v50, %v1248_v20  ;;  %v4072_v18 = vsel %vm1743_vm4, %v1793_v16, %v5514_v11  ;;  %v4075_v50 = vsel %vm1597_vm5, %v1645_v48, %v1647_v10  ;;  %v4082_v20 = vsel %vm1597_vm5, %v1647_v10, %v5623_v33  ;;  %v4093_v11 = vpop.f32.mrb[26].mxu1 }
 0x16a   : > { %5621 = vst [vmem:[#allocation80_spill] sm:$0xff] %v4054_v36  ;;  %5622 = vst [vmem:[#allocation81_spill] sm:$0xff] %v4075_v50  ;;  %v4090_v16 = vsel %vm2111_vm6, %v2157_v2, %v5626_v8  ;;  %v1158_v48 = vadd.f32 %v1051_v6, %v3422_v27  ;;  %v3048_v10 = vpop.f32.mrb[27].mxu1  ;;  %v1159_v27 = vadd.f32 %v1053_v14, %v3424_v29  ;;  %v4115_v14 = vpop.f32.mrb[58].mxu0  ;;  %v5634_v50 = vrot.slane %v4037_v1, 4 }
 0x16b   : > { %v1055_v43 = vpop.permute.xlu1 %1054  ;;  %1290 = vrot.lane.b32.xlu0 %v3663_v40, %s3237_s12  ;;  %5624 = vst [vmem:[#allocation82_spill] sm:$0xff] %v4082_v20  ;;  %5627 = vst [vmem:[#allocation84_spill] sm:$0xff] %v4090_v16  ;;  %v4109_v2 = vpop.f32.mrb[28].mxu1 }
 0x16c   : > { %v1374_v33 = vadd.f32 %v1267_v15, %v1158_v48  ;;  %v3051_v48 = vpop.f32.mrb[29].mxu1  ;;  %v1375_v10 = vadd.f32 %v1269_v37, %v1159_v27  ;;  %5628 = vst [vmem:[#allocation85_spill] sm:$0xff] %v4115_v14  ;;  %v1252_v27 = vrot.slane %v4115_v14, 2 }
 0x16d   : > { %v1271_v36 = vpop.permute.xlu0 %1270  ;;  %1076 = vrot.lane.b32.xlu1 %v3692_v59, %s3236_s11  ;;  %v5516_v59 = vrot.slane %v4093_v11, 6 }
 0x16f   : > { %v1057_v0 = vpop.permute.xlu1 %1056  ;;  %1436 = vrot.lane.b32.xlu0 %v3663_v40, %s3238_s13  ;;  %v4103_v63 = vsel %vm2366_vm7, %v2382_v19, %v5516_v59 }
 0x171   : > { %v1417_v20 = vpop.permute.xlu0 %1416  ;;  %1292 = vrot.lane.b32.xlu1 %v3695_v51, %s3237_s12 }
 0x172   : > { %v1524_v8 = vadd.f32 %v1417_v20, %v1374_v33 }
 0x173   : > { %v1273_v6 = vpop.permute.xlu1 %1272  ;;  %1837 = vrot.lane.b32.xlu0 %v3671_v42, %s3236_s11 }
 0x174   : > { %v1707_v40 = vadd.f32 %v3450_v62, %v1524_v8  ;;  %v652_v62 = vpop.f32.mrb[59].mxu0 }
 0x175   : > { %v1818_v15 = vpop.permute.xlu0 %1817  ;;  %1438 = vrot.lane.b32.xlu1 %v3695_v51, %s3238_s13  ;;  %v4122_v33 = vpop.f32.mrb[60].mxu0  ;;  %v1651_v8 = vrot.slane %v652_v62, 3 }
 0x176   : > { %5629 = vst [vmem:[#allocation86_spill] sm:$0xff] %v4122_v33  ;;  %v4126_v37 = vpop.f32.mrb[61].mxu0 }
 0x177   : > { %v1419_v16 = vpop.permute.xlu1 %1418  ;;  %1983 = vrot.lane.b32.xlu0 %v3671_v42, %s3237_s12  ;;  %v1160_v42 = vadd.f32 %v1055_v43, %v3433_v41  ;;  %v5633_v43 = vrot.slane %v4122_v33, 2 }
 0x178   : > { %v1525_v29 = vadd.f32 %v1419_v16, %v1375_v10  ;;  %v1036_v16 = vrot.slane %v4115_v14, 1  ;;  %v2161_v10 = vrot.slane %v652_v62, 5  ;;  %v5630_v14 = vrot.slane %v4033_v3, 1 }
 0x179   : > { %v4117_v19 = vpop.permute.xlu0 %1058  ;;  %1839 = vrot.lane.b32.xlu1 %v3700_v56, %s3236_s11  ;;  %v4162_v41 = vsel %vm1194_vm3, %v1252_v27, %v5633_v43 }
 0x17a   : > { %v1708_v20 = vadd.f32 %v3472_v21, %v1525_v29  ;;  %v1797_v21 = vrot.slane %v652_v62, 4  ;;  %v5520_v29 = vrot.slane %v4122_v33, 1  ;;  %v5631_v62 = vrot.slane %v4033_v3, 2 }
 0x17b   : > { %v1820_v51 = vpop.permute.xlu1 %1819  ;;  %2201 = vrot.lane.b32.xlu0 %v3674_v58, %s3238_s13  ;;  %v5635_v3 = vrot.slane %v4126_v37, 4 }
 0x17c   : > { %v4152_v58 = vsel %vm1194_vm3, %v5631_v62, %v1252_v27  ;;  %v4157_v59 = vsel %vm978_vm2, %v1036_v16, %v5520_v29 }
 0x17d   : > { %v4131_v48 = vpop.permute.xlu0 %1274  ;;  %1985 = vrot.lane.b32.xlu1 %v3700_v56, %s3237_s12  ;;  %v4147_v56 = vsel %vm978_vm2, %v5630_v14, %v1036_v16  ;;  %5632 = vst [vmem:[#allocation87_spill] sm:$0xff] %v4152_v58  ;;  %v4167_v14 = vsel %vm1743_vm4, %v5634_v50, %v1797_v21  ;;  %v4172_v62 = vsel %vm1743_vm4, %v1797_v21, %v5635_v3  ;;  %v5636_v58 = vrot.slane %v4037_v1, 5 }
 0x17e   : > { %v5640_v50 = vrot.slane %v4126_v37, 5  ;;  %v5642_v3 = vrot.slane %v4126_v37, 3 }
 0x17f   : > { %v4140_v12 = vpop.permute.xlu1 %1060  ;;  %1078 = vrot.lane.b32.xlu0 %v3703_v34, %s3236_s11  ;;  %v1376_v34 = vadd.f32 %v1271_v36, %v1160_v42  ;;  %v4177_v16 = vsel %vm2111_vm6, %v5636_v58, %v2161_v10  ;;  %v5638_v36 = vrot.slane %v4037_v1, 3 }
 0x180   : > { %5637 = vst [vmem:[#allocation88_spill] sm:$0xff] %v4177_v16  ;;  %v4189_v27 = vsel %vm2111_vm6, %v2161_v10, %v5640_v50  ;;  %v4194_v21 = vsel %vm1597_vm5, %v1651_v8, %v5642_v3 }
 0x181   : > { %v1421_v29 = vpop.permute.xlu0 %1420  ;;  %2203 = vrot.lane.b32.xlu1 %v3706_v52, %s3238_s13  ;;  %v4184_v42 = vsel %vm1597_vm5, %v5638_v36, %v1651_v8  ;;  %5641 = vst [vmem:[#allocation90_spill] sm:$0xff] %v4189_v27  ;;  %5643 = vst [vmem:[#allocation91_spill] sm:$0xff] %v4194_v21  ;;  %v1161_v52 = vadd.f32 %v1057_v0, %v3438_v45  ;;  %v4219_v0 = vpop.f32.mrb[62].mxu0 }
 0x182   : > { %5639 = vst [vmem:[#allocation89_spill] sm:$0xff] %v4184_v42  ;;  %v1526_v58 = vadd.f32 %v1421_v29, %v1376_v34  ;;  %v1925_v34 = vadd.f32 %v1818_v15, %v1707_v40  ;;  %5644 = vst [vmem:[#allocation92_spill] sm:$0xff] %v4219_v0  ;;  %v1926_v40 = vadd.f32 %v1820_v51, %v1708_v20  ;;  %v5649_v51 = vrot.slane %v4122_v33, 2 }
 0x183   : > { %v4196_v43 = vpop.permute.xlu1 %1276  ;;  %1294 = vrot.lane.b32.xlu0 %v3709_v17, %s3237_s12  ;;  %v1377_v10 = vadd.f32 %v1273_v6, %v1161_v52  ;;  %v1040_v52 = vrot.slane %v4219_v0, 1 }
 0x184   : > { %v4202_v1 = vadd.f32 %v3484_v24, %v1526_v58 }
 0x185   : > { %v4204_v36 = vpop.permute.xlu0 %1821  ;;  %1080 = vrot.lane.b32.xlu1 %v3743_v23, %s3236_s11 }
 0x187   : > { %v1423_v50 = vpop.permute.xlu1 %1422  ;;  %1440 = vrot.lane.b32.xlu0 %v3709_v17, %s3238_s13  ;;  %v662_v17 = vpop.f32.mrb[63].mxu0 }
 0x188   : > { %v1527_v8 = vadd.f32 %v1423_v50, %v1377_v10  ;;  %v4223_v58 = vpop.f32.mrb[64].mxu0  ;;  %v1256_v10 = vrot.slane %v4219_v0, 2  ;;  %v1801_v50 = vrot.slane %v662_v17, 4  ;;  %v2165_v20 = vrot.slane %v662_v17, 5 }
 0x189   : > { %v1968_v29 = vpop.permute.xlu0 %1967  ;;  %1296 = vrot.lane.b32.xlu1 %v3746_v46, %s3237_s12  ;;  %5645 = vst [vmem:[#allocation93_spill] sm:$0xff] %v4223_v58 }
 0x18a   : > { %v4213_v45 = vadd.f32 %v3517_v47, %v1527_v8  ;;  %v2075_v23 = vadd.f32 %v1968_v29, %v1925_v34  ;;  %v4228_v47 = vld [vmem:[%s5469_s2] ss:$0 sm:$0xff]  ;;  %v1655_v34 = vrot.slane %v662_v17, 3  ;;  %v5647_v17 = vrot.slane %v4122_v33, 1 }
 0x18b   : > { %v4215_v24 = vpop.permute.xlu1 %1823  ;;  %1841 = vrot.lane.b32.xlu0 %v3717_v4, %s3236_s11  ;;  %v5646_v8 = vld [vmem:[#allocation10_spill] sm:$0xff]  ;;  %v4255_v42 = vsel %vm1194_vm3, %v5649_v51, %v1256_v10 }
 0x18c   : > { %5650 = vst [vmem:[#allocation94_spill] sm:$0xff] %v4255_v42 }
 0x18d   : > { %v2186_v6 = vpop.permute.xlu0 %2185  ;;  %1442 = vrot.lane.b32.xlu1 %v3746_v46, %s3238_s13  ;;  %v4234_v46 = vpop.f32.mrb[65].mxu0 }
 0x18e   : > { %v2293_v3 = vadd.f32 %v2186_v6, %v2075_v23  ;;  %v5523_v0 = vrot.slane %v4234_v46, 4  ;;  %v5651_v6 = vrot.slane %v4223_v58, 1 }
 0x18f   : > { %v1970_v15 = vpop.permute.xlu1 %1969  ;;  %1987 = vrot.lane.b32.xlu0 %v3717_v4, %s3237_s12 }
 0x190   : > { %v2476_v29 = vadd.f32 %v5646_v8, %v2293_v3  ;;  %v2076_v3 = vadd.f32 %v1970_v15, %v1926_v40  ;;  %v4250_v8 = vsel %vm978_vm2, %v5647_v17, %v1040_v52  ;;  %v4262_v21 = vsel %vm978_vm2, %v1040_v52, %v5651_v6 }
 0x191   : > { %v4238_v23 = vpop.permute.xlu0 %1062  ;;  %1843 = vrot.lane.b32.xlu1 %v3753_v26, %s3236_s11  ;;  %5648 = vst [vmem:[#allocation10_spill] sm:$0xff] %v4250_v8  ;;  %5652 = vst [vmem:[#allocation95_spill] sm:$0xff] %v4262_v21  ;;  %v5653_v40 = vrot.slane %v4223_v58, 2  ;;  %v4277_v51 = vsel %vm1743_vm4, %v1801_v50, %v5523_v0  ;;  %v5658_v52 = vrot.slane %v4126_v37, 5 }
 0x192   : > { %v2519_v27 = vadd.f32 %v4228_v47, %v2476_v29  ;;  %v5655_v29 = vrot.slane %v4126_v37, 4  ;;  %5657 = vst [vmem:[#allocation98_spill] sm:$0xff] %v4277_v51 }
 0x193   : > { %v2188_v4 = vpop.permute.xlu1 %2187  ;;  %1082 = vrot.lane.b32.xlu0 %v3756_v57, %s3236_s11  ;;  %v4267_v15 = vsel %vm1194_vm3, %v1256_v10, %v5653_v40  ;;  %v4282_v6 = vsel %vm2111_vm6, %v5658_v52, %v2165_v20  ;;  %v5660_v10 = vrot.slane %v4234_v46, 5  ;;  %v5666_v52 = vld [vmem:[#allocation2_spill] sm:$0xff] }
 0x194   : > { %5654 = vst [vmem:[#allocation96_spill] sm:$0xff] %v4267_v15  ;;  %v4272_v17 = vsel %vm1743_vm4, %v5655_v29, %v1801_v50  ;;  %v2591_v57 = vmul.f32 0.70710677, %v2519_v27  ;;  %v2294_v33 = vadd.f32 %v2188_v4, %v2076_v3  ;;  %5659 = vst [vmem:[#allocation99_spill] sm:$0xff] %v4282_v6  ;;  %v5662_v50 = vrot.slane %v4126_v37, 3 }
 0x195   : > { %5656 = vst [vmem:[#allocation97_spill] sm:$0xff] %v4272_v17  ;;  %v4284_v16 = vpop.permute.xlu0 %1278  ;;  %1989 = vrot.lane.b32.xlu1 %v3753_v26, %s3237_s12  ;;  %v4291_v40 = vsel %vm2111_vm6, %v2165_v20, %v5660_v10  ;;  %v5664_v4 = vrot.slane %v4234_v46, 3  ;;  %v1162_v0 = vadd.f32 %v4117_v19, %v5666_v52  ;;  %v5667_v26 = vld [vmem:[#allocation16_spill] sm:$0xff]  ;;  %v5674_v17 = vld [vmem:[#allocation37_spill] sm:$0xff] }
 0x196   : > { %5661 = vst [vmem:[#allocation100_spill] sm:$0xff] %v4291_v40  ;;  %v4296_v29 = vsel %vm1597_vm5, %v5662_v50, %v1655_v34  ;;  %3150 = verf.f32 %v2591_v57  ;;  %v2477_v6 = vadd.f32 %v5667_v26, %v2294_v33  ;;  %v5668_v33 = vld [vmem:[#allocation3_spill] sm:$0xff]  ;;  %v5671_v26 = vld [vmem:[#allocation30_spill] sm:$0xff] }
 0x197   : > { %5663 = vst [vmem:[#allocation101_spill] sm:$0xff] %v4296_v29  ;;  %v4301_v3 = vsel %vm1597_vm5, %v1655_v34, %v5664_v4  ;;  %v4306_v51 = vpop.permute.xlu1 %1064  ;;  %1298 = vrot.lane.b32.xlu0 %v3759_v9, %s3237_s12  ;;  %v1378_v37 = vadd.f32 %v4131_v48, %v1162_v0  ;;  %v1163_v57 = vadd.f32 %v4140_v12, %v5668_v33  ;;  %v5669_v4 = vld [vmem:[#allocation6_spill] sm:$0xff] }
 0x198   : > { %5665 = vst [vmem:[#allocation102_spill] sm:$0xff] %v4301_v3  ;;  %v2520_v20 = vadd.f32 %v4228_v47, %v2477_v6  ;;  %v4328_v6 = vpop.f32.mrb[66].mxu0 }
 0x199   : > { %v1425_v10 = vpop.permute.xlu0 %1424  ;;  %1084 = vrot.lane.b32.xlu1 %v3797_v28, %s3236_s11  ;;  %v1379_v28 = vadd.f32 %v4196_v43, %v1163_v57  ;;  %5670 = vst [vmem:[#allocation2_spill] sm:$0xff] %v4328_v6  ;;  %v672_v12 = vpop.f32.mrb[67].mxu0  ;;  %v4342_v57 = vld [vmem:[%s5470_s3] ss:$0 sm:$0xff] }
 0x19a   : > { %v2592_v34 = vmul.f32 0.70710677, %v2520_v20  ;;  %v1528_v50 = vadd.f32 %v1425_v10, %v1378_v37  ;;  %v1927_v10 = vadd.f32 %v4204_v36, %v4202_v1  ;;  %v4337_v43 = vpop.f32.mrb[68].mxu0  ;;  %v1260_v1 = vrot.slane %v4328_v6, 2 }
 0x19b   : > { %v4314_v19 = vpop.permute.xlu1 %1280  ;;  %1444 = vrot.lane.b32.xlu0 %v3759_v9, %s3238_s13  ;;  %5672 = vst [vmem:[#allocation16_spill] sm:$0xff] %v4337_v43  ;;  %v4350_v36 = vpop.f32.mrb[69].mxu0  ;;  %v1805_v3 = vrot.slane %v672_v12, 4  ;;  %v5678_v15 = vrot.slane %v4337_v43, 1 }
 0x19c   : > { %3152 = verf.f32 %v2592_v34  ;;  %v4321_v48 = vadd.f32 %v5669_v4, %v1528_v50  ;;  %v2555_v34 = vmul.f32 0.5, %v2519_v27  ;;  %v5673_v4 = vld [vmem:[#allocation9_spill] sm:$0xff]  ;;  %v2169_v27 = vrot.slane %v672_v12, 5 }
 0x19d   : > { %v4323_v0 = vpop.permute.xlu0 %1825  ;;  %1300 = vrot.lane.b32.xlu1 %v3800_v30, %s3237_s12 }
 0x19f   : > { %v1427_v52 = vpop.permute.xlu1 %1426  ;;  %1845 = vrot.lane.b32.xlu0 %v5671_v26, %s3236_s11 }
 0x1a0   : > { %v3151_v9 = vpop.eup %3150  ;;  %v1529_v37 = vadd.f32 %v1427_v52, %v1379_v28  ;;  %v1044_v52 = vrot.slane %v4328_v6, 1 }
 0x1a1   : > { %v2663_v50 = vadd.f32 1.0, %v3151_v9  ;;  %v1972_v33 = vpop.permute.xlu0 %1971  ;;  %1446 = vrot.lane.b32.xlu1 %v3800_v30, %s3238_s13 }
 0x1a2   : > { %v4345_v28 = vadd.f32 %v5673_v4, %v1529_v37  ;;  %v4360_v37 = vld [vmem:[%s5471_s4] ss:$0 sm:$0xff]  ;;  %v2556_v4 = vmul.f32 0.5, %v2520_v20  ;;  %v2077_v6 = vadd.f32 %v1972_v33, %v1927_v10  ;;  %v5675_v10 = vrot.slane %v4223_v58, 1 }
 0x1a3   : > { %v2699_v9 = vmul.f32 %v2663_v50, %v2555_v34  ;;  %v4352_v30 = vpop.permute.xlu1 %1827  ;;  %1991 = vrot.lane.b32.xlu0 %v5671_v26, %s3237_s12  ;;  %v1659_v26 = vrot.slane %v672_v12, 3  ;;  %v5676_v12 = vrot.slane %v4223_v58, 2  ;;  %v4388_v29 = vsel %vm978_vm2, %v1044_v52, %v5678_v15 }
 0x1a4   : > { %v4378_v33 = vsel %vm978_vm2, %v5675_v10, %v1044_v52  ;;  %5679 = vst [vmem:[#allocation6_spill] sm:$0xff] %v4388_v29  ;;  %v1928_v15 = vadd.f32 %v4215_v24, %v4213_v45  ;;  %v5685_v52 = vld [vmem:[#allocation27_spill] sm:$0xff]  ;;  %v5690_v45 = vrot.slane %v4350_v36, 5 }
 0x1a5   : > { %v2742_v34 = vmul.f32 %v4342_v57, %v2699_v9  ;;  %v2190_v50 = vpop.permute.xlu0 %2189  ;;  %1847 = vrot.lane.b32.xlu1 %v5674_v17, %s3236_s11  ;;  %v4383_v9 = vsel %vm1194_vm3, %v5676_v12, %v1260_v1  ;;  %v5683_v12 = vrot.slane %v4234_v46, 4 }
 0x1a6   : > { %v3153_v21 = vpop.eup %3152  ;;  %v2295_v20 = vadd.f32 %v2190_v50, %v2077_v6  ;;  %5677 = vst [vmem:[#allocation3_spill] sm:$0xff] %v4383_v9  ;;  %v5680_v6 = vld [vmem:[#allocation38_spill] sm:$0xff]  ;;  %v5681_v50 = vrot.slane %v4337_v43, 2  ;;  %v4425_v24 = vsel %vm2111_vm6, %v2169_v27, %v5690_v45 }
 0x1a7   : > { %v2785_v40 = vadd.f32 %v4360_v37, %v2742_v34  ;;  %v2664_v42 = vadd.f32 1.0, %v3153_v21  ;;  %v1974_v8 = vpop.permute.xlu1 %1973  ;;  %1086 = vrot.lane.b32.xlu0 %v5680_v6, %s3236_s11  ;;  %v4401_v58 = vsel %vm1743_vm4, %v5683_v12, %v1805_v3  ;;  %v5686_v21 = vrot.slane %v4350_v36, 4  ;;  %5691 = vst [vmem:[#allocation27_spill] sm:$0xff] %v4425_v24 }
 0x1a8   : > { %v4396_v10 = vsel %vm1194_vm3, %v1260_v1, %v5681_v50  ;;  %5684 = vst [vmem:[#allocation9_spill] sm:$0xff] %v4401_v58  ;;  %v2478_v34 = vadd.f32 %v5685_v52, %v2295_v20  ;;  %v5688_v6 = vrot.slane %v4234_v46, 5  ;;  %v5694_v52 = vrot.slane %v4350_v36, 3  ;;  %v5702_v58 = vld [vmem:[#allocation47_spill] sm:$0xff] }
 0x1a9   : > { %5682 = vst [vmem:[#allocation30_spill] sm:$0xff] %v4396_v10  ;;  %v4409_v29 = vsel %vm1743_vm4, %v1805_v3, %v5686_v21  ;;  %2821 = vst.msk [vmem:[%s4373_s25] sm:$0xff] %vm410_vm1, %v2785_v40  ;;  %v2700_v50 = vmul.f32 %v2664_v42, %v2556_v4  ;;  %v4418_v12 = vpop.permute.xlu0 %1066  ;;  %1993 = vrot.lane.b32.xlu1 %v5674_v17, %s3237_s12  ;;  %v5692_v3 = vrot.slane %v4234_v46, 3 }
 0x1aa   : > { %5687 = vst [vmem:[#allocation37_spill] sm:$0xff] %v4409_v29  ;;  %v4414_v1 = vsel %vm2111_vm6, %v5688_v6, %v2169_v27  ;;  %v4435_v42 = vsel %vm1597_vm5, %v1659_v26, %v5694_v52  ;;  %v2521_v40 = vadd.f32 %v4228_v47, %v2478_v34  ;;  %v2078_v4 = vadd.f32 %v1974_v8, %v1928_v15  ;;  %v5696_v27 = vld [vmem:[#allocation39_spill] sm:$0xff]  ;;  %v5698_v8 = vld [vmem:[#allocation34_spill] sm:$0xff] }
 0x1ab   : > { %5689 = vst [vmem:[#allocation38_spill] sm:$0xff] %v4414_v1  ;;  %v4430_v20 = vsel %vm1597_vm5, %v5692_v3, %v1659_v26  ;;  %5695 = vst [vmem:[#allocation104_spill] sm:$0xff] %v4435_v42  ;;  %v2743_v17 = vmul.f32 %v4342_v57, %v2700_v50  ;;  %v2192_v21 = vpop.permute.xlu1 %2191  ;;  %1302 = vrot.lane.b32.xlu0 %v5696_v27, %s3237_s12  ;;  %v5697_v26 = vld [vmem:[#allocation4_spill] sm:$0xff] }
 0x1ac   : > { %5693 = vst [vmem:[#allocation103_spill] sm:$0xff] %v4430_v20  ;;  %v2593_v6 = vmul.f32 0.70710677, %v2521_v40  ;;  %v2296_v46 = vadd.f32 %v2192_v21, %v2078_v4  ;;  %v1164_v52 = vadd.f32 %v4238_v23, %v5697_v26  ;;  %v4459_v21 = vpop.f32.mrb[70].mxu0 }
 0x1ad   : > { %v2786_v45 = vadd.f32 %v4360_v37, %v2743_v17  ;;  %v4442_v3 = vpop.permute.xlu0 %1282  ;;  %1088 = vrot.lane.b32.xlu1 %v3843_v44, %s3236_s11  ;;  %v4479_v42 = vrot.slane %v4459_v21, 2 }
 0x1ae   : > { %3154 = verf.f32 %v2593_v6  ;;  %v2479_v15 = vadd.f32 %v5698_v8, %v2296_v46  ;;  %v1380_v50 = vadd.f32 %v4284_v16, %v1164_v52  ;;  %v5699_v46 = vld [vmem:[#allocation42_spill] sm:$0xff]  ;;  %v5701_v16 = vld [vmem:[#allocation11_spill] sm:$0xff]  ;;  %v682_v52 = vpop.f32.mrb[71].mxu0 }
 0x1af   : > { %2822 = vst.msk [vmem:[%s4373_s25 + $0x8] sm:$0xff] %vm410_vm1, %v2786_v45  ;;  %v4451_v34 = vpop.permute.xlu1 %1068  ;;  %1448 = vrot.lane.b32.xlu0 %v5696_v27, %s3238_s13  ;;  %v5700_v45 = vld [vmem:[#allocation5_spill] sm:$0xff]  ;;  %v1663_v24 = vrot.slane %v682_v52, 3 }
 0x1b0   : > { %v2522_v4 = vadd.f32 %v4228_v47, %v2479_v15  ;;  %v1165_v27 = vadd.f32 %v4306_v51, %v5700_v45  ;;  %v4474_v15 = vpop.f32.mrb[72].mxu0  ;;  %v5703_v45 = vld [vmem:[#allocation14_spill] sm:$0xff] }
 0x1b1   : > { %v1429_v17 = vpop.permute.xlu0 %1428  ;;  %1304 = vrot.lane.b32.xlu1 %v3846_v25, %s3237_s12  ;;  %v4481_v51 = vpop.f32.mrb[73].mxu0 }
 0x1b2   : > { %v2594_v44 = vmul.f32 0.70710677, %v2522_v4  ;;  %v1530_v23 = vadd.f32 %v1429_v17, %v1380_v50  ;;  %v1381_v50 = vadd.f32 %v4314_v19, %v1165_v27  ;;  %v2173_v19 = vrot.slane %v682_v52, 5 }
 0x1b3   : > { %v4461_v6 = vpop.permute.xlu1 %1284  ;;  %1849 = vrot.lane.b32.xlu0 %v5699_v46, %s3236_s11  ;;  %v2557_v17 = vmul.f32 0.5, %v2521_v40  ;;  %v5706_v40 = vrot.slane %v4337_v43, 2 }
 0x1b4   : > { %3156 = verf.f32 %v2594_v44  ;;  %v4468_v26 = vadd.f32 %v5701_v16, %v1530_v23  ;;  %v1809_v23 = vrot.slane %v682_v52, 4  ;;  %v5705_v52 = vrot.slane %v4337_v43, 1 }
 0x1b5   : > { %v4470_v8 = vpop.permute.xlu0 %1829  ;;  %1450 = vrot.lane.b32.xlu1 %v3846_v25, %s3238_s13  ;;  %v5535_v25 = vrot.slane %v4481_v51, 4 }
 0x1b7   : > { %v1431_v44 = vpop.permute.xlu1 %1430  ;;  %1995 = vrot.lane.b32.xlu0 %v5699_v46, %s3237_s12  ;;  %v1929_v46 = vadd.f32 %v4323_v0, %v4321_v48  ;;  %v5707_v48 = vld [vmem:[#allocation48_spill] sm:$0xff]  ;;  %v5708_v0 = vrot.slane %v4350_v36, 4 }
 0x1b8   : > { %v3155_v16 = vpop.eup %3154  ;;  %v1531_v20 = vadd.f32 %v1431_v44, %v1381_v50  ;;  %v5704_v50 = vrot.slane %v4459_v21, 1 }
 0x1b9   : > { %v2665_v1 = vadd.f32 1.0, %v3155_v16  ;;  %v1976_v29 = vpop.permute.xlu0 %1975  ;;  %1851 = vrot.lane.b32.xlu1 %v5702_v58, %s3236_s11  ;;  %v4507_v16 = vsel %vm1194_vm3, %v5706_v40, %v4479_v42 }
 0x1ba   : > { %v4494_v9 = vadd.f32 %v5703_v45, %v1531_v20  ;;  %v4501_v44 = vsel %vm978_vm2, %v5705_v52, %v5704_v50  ;;  %v4516_v20 = vsel %vm1743_vm4, %v5708_v0, %v1809_v23  ;;  %v5709_v45 = vrot.slane %v4474_v15, 2 }
 0x1bb   : > { %v2701_v10 = vmul.f32 %v2665_v1, %v2557_v17  ;;  %v4509_v27 = vpop.permute.xlu1 %1831  ;;  %1090 = vrot.lane.b32.xlu0 %v5707_v48, %s3236_s11  ;;  %v4527_v1 = vsel %vm1743_vm4, %v1809_v23, %v5535_v25  ;;  %v2079_v17 = vadd.f32 %v1976_v29, %v1929_v46  ;;  %v5711_v52 = vrot.slane %v4350_v36, 5 }
 0x1bc   : > { %v4522_v50 = vsel %vm1194_vm3, %v4479_v42, %v5709_v45  ;;  %5710 = vst [vmem:[#allocation39_spill] sm:$0xff] %v4527_v1  ;;  %v5713_v48 = vrot.slane %v4481_v51, 5  ;;  %v5715_v45 = vrot.slane %v4350_v36, 3  ;;  %v5717_v29 = vrot.slane %v4481_v51, 3 }
 0x1bd   : > { %v4532_v40 = vsel %vm2111_vm6, %v5711_v52, %v2173_v19  ;;  %v2744_v23 = vmul.f32 %v4342_v57, %v2701_v10  ;;  %v2194_v25 = vpop.permute.xlu0 %2193  ;;  %1997 = vrot.lane.b32.xlu1 %v5702_v58, %s3237_s12  ;;  %v1930_v10 = vadd.f32 %v4352_v30, %v4345_v28 }
 0x1be   : > { %5712 = vst [vmem:[#allocation4_spill] sm:$0xff] %v4532_v40  ;;  %v4537_v0 = vsel %vm2111_vm6, %v2173_v19, %v5713_v48  ;;  %v4542_v43 = vsel %vm1597_vm5, %v5715_v45, %v1663_v24  ;;  %v4550_v46 = vsel %vm1597_vm5, %v1663_v24, %v5717_v29  ;;  %v3157_v52 = vpop.eup %3156  ;;  %v2297_v40 = vadd.f32 %v2194_v25, %v2079_v17  ;;  %v5718_v45 = vld [vmem:[#allocation49_spill] sm:$0xff]  ;;  %v5720_v25 = vld [vmem:[#allocation58_spill] sm:$0xff] }
 0x1bf   : > { %5714 = vst [vmem:[#allocation34_spill] sm:$0xff] %v4537_v0  ;;  %5716 = vst [vmem:[#allocation42_spill] sm:$0xff] %v4542_v43  ;;  %v2787_v19 = vadd.f32 %v4360_v37, %v2744_v23  ;;  %v2558_v48 = vmul.f32 0.5, %v2522_v4  ;;  %v2666_v36 = vadd.f32 1.0, %v3157_v52  ;;  %v1978_v0 = vpop.permute.xlu1 %1977  ;;  %1306 = vrot.lane.b32.xlu0 %v5718_v45, %s3237_s12  ;;  %v5719_v43 = vld [vmem:[#allocation56_spill] sm:$0xff]  ;;  %v5721_v52 = vld [vmem:[#allocation7_spill] sm:$0xff] }
 0x1c0   : > { %v2480_v58 = vadd.f32 %v5719_v43, %v2297_v40  ;;  %v2080_v17 = vadd.f32 %v1978_v0, %v1930_v10 }
 0x1c1   : > { %2823 = vst.msk [vmem:[%s4373_s25 + $0x10] sm:$0xff] %vm410_vm1, %v2787_v19  ;;  %v2702_v1 = vmul.f32 %v2666_v36, %v2558_v48  ;;  %v4560_v24 = vpop.permute.xlu0 %1070  ;;  %1092 = vrot.lane.b32.xlu1 %v5720_v25, %s3236_s11  ;;  %v1166_v19 = vadd.f32 %v4418_v12, %v5721_v52  ;;  %v5722_v48 = vld [vmem:[#allocation52_spill] sm:$0xff] }
 0x1c2   : > { %v2523_v4 = vadd.f32 %v4228_v47, %v2480_v58 }
 0x1c3   : > { %v2745_v23 = vmul.f32 %v4342_v57, %v2702_v1  ;;  %v2196_v29 = vpop.permute.xlu1 %2195  ;;  %1452 = vrot.lane.b32.xlu0 %v5718_v45, %s3238_s13  ;;  %v1382_v36 = vadd.f32 %v4442_v3, %v1166_v19 }
 0x1c4   : > { %v2595_v28 = vmul.f32 0.70710677, %v2523_v4  ;;  %v2298_v43 = vadd.f32 %v2196_v29, %v2080_v17  ;;  %v2559_v19 = vmul.f32 0.5, %v2523_v4 }
 0x1c5   : > { %v2788_v30 = vadd.f32 %v4360_v37, %v2745_v23  ;;  %v4569_v40 = vpop.permute.xlu0 %1286  ;;  %1308 = vrot.lane.b32.xlu1 %v3899_v49, %s3237_s12  ;;  %v5724_v23 = vld [vmem:[#allocation15_spill] sm:$0xff] }
 0x1c6   : > { %3158 = verf.f32 %v2595_v28  ;;  %v2481_v0 = vadd.f32 %v3919_v55, %v2298_v43  ;;  %v5723_v55 = vld [vmem:[#allocation8_spill] sm:$0xff]  ;;  %v4600_v28 = vpop.f32.mrb[74].mxu0 }
 0x1c7   : > { %2824 = vst.msk [vmem:[%s4373_s25 + $0x18] sm:$0xff] %vm410_vm1, %v2788_v30  ;;  %v4578_v1 = vpop.permute.xlu1 %1072  ;;  %1853 = vrot.lane.b32.xlu0 %v5722_v48, %s3236_s11  ;;  %v1167_v17 = vadd.f32 %v4451_v34, %v5723_v55  ;;  %v692_v34 = vpop.f32.mrb[75].mxu0 }
 0x1c8   : > { %v2524_v45 = vadd.f32 %v4228_v47, %v2481_v0  ;;  %v1813_v55 = vrot.slane %v692_v34, 4  ;;  %v2177_v4 = vrot.slane %v692_v34, 5 }
 0x1c9   : > { %v1433_v10 = vpop.permute.xlu0 %1432  ;;  %1454 = vrot.lane.b32.xlu1 %v3899_v49, %s3238_s13  ;;  %v1383_v49 = vadd.f32 %v4461_v6, %v1167_v17  ;;  %v5725_v6 = vld [vmem:[#allocation19_spill] sm:$0xff] }
 0x1ca   : > { %v2596_v58 = vmul.f32 0.70710677, %v2524_v45  ;;  %v1532_v12 = vadd.f32 %v1433_v10, %v1382_v36  ;;  %v696_v36 = vpop.f32.mrb[76].mxu0  ;;  %v1931_v10 = vadd.f32 %v4470_v8, %v4468_v26 }
 0x1cb   : > { %v4586_v25 = vpop.permute.xlu1 %1288  ;;  %1999 = vrot.lane.b32.xlu0 %v5722_v48, %s3237_s12  ;;  %v2560_v36 = vmul.f32 0.5, %v2524_v45 }
 0x1cc   : > { %3160 = verf.f32 %v2596_v58  ;;  %v4593_v29 = vadd.f32 %v5724_v23, %v1532_v12  ;;  %v5537_v12 = vrot.slane %v4600_v28, 2 }
 0x1cd   : > { %v4595_v3 = vpop.permute.xlu0 %1833  ;;  %1855 = vrot.lane.b32.xlu1 %v3905_v5, %s3236_s11 }
 0x1cf   : > { %v1435_v43 = vpop.permute.xlu1 %1434  ;;  %1094 = vrot.lane.b32.xlu0 %v3908_v35, %s3236_s11  ;;  %v4612_v35 = vpop.f32.mrb[77].mxu0 }
 0x1d0   : > { %v3159_v30 = vpop.eup %3158  ;;  %v1533_v52 = vadd.f32 %v1435_v43, %v1383_v49  ;;  %v5538_v49 = vrot.slane %v4612_v35, 5  ;;  %v699_v26 = vpop.f32.mrb[78].mxu0  ;;  %v1667_v43 = vrot.slane %v692_v34, 3  ;;  %v5727_v34 = vrot.slane %v4481_v51, 4 }
 0x1d1   : > { %v2667_v0 = vadd.f32 1.0, %v3159_v30  ;;  %v1980_v48 = vpop.permute.xlu0 %1979  ;;  %2001 = vrot.lane.b32.xlu1 %v3905_v5, %s3237_s12  ;;  %v1669_v30 = vrot.slane %v4612_v35, 3  ;;  %v5726_v5 = vrot.slane %v4474_v15, 2  ;;  %v5728_v45 = vrot.slane %v4612_v35, 4 }
 0x1d2   : > { %v4609_v58 = vadd.f32 %v5725_v6, %v1533_v52  ;;  %v2081_v8 = vadd.f32 %v1980_v48, %v1931_v10  ;;  %v4634_v48 = vsel %vm1743_vm4, %v5727_v34, %v1813_v55  ;;  %v5729_v15 = vrot.slane %v4481_v51, 5 }
 0x1d3   : > { %v2703_v17 = vmul.f32 %v2667_v0, %v2559_v19  ;;  %v4614_v23 = vpop.permute.xlu1 %1835  ;;  %1310 = vrot.lane.b32.xlu0 %v3911_v60, %s3237_s12  ;;  %v4629_v26 = vsel %vm1194_vm3, %v5726_v5, %v5537_v12  ;;  %v4639_v10 = vsel %vm1743_vm4, %v1813_v55, %v5728_v45  ;;  %v1932_v55 = vadd.f32 %v4509_v27, %v4494_v9 }
 0x1d4   : > { %v4647_v5 = vsel %vm2111_vm6, %v5729_v15, %v2177_v4 }
 0x1d5   : > { %v2746_v52 = vmul.f32 %v4342_v57, %v2703_v17  ;;  %v2198_v6 = vpop.permute.xlu0 %2197  ;;  %1096 = vrot.lane.b32.xlu1 %v3942_v22, %s3236_s11 }
 0x1d6   : > { %v3161_v19 = vpop.eup %3160  ;;  %v2299_v0 = vadd.f32 %v2198_v6, %v2081_v8  ;;  %v4652_v6 = vsel %vm2111_vm6, %v2177_v4, %v5538_v49  ;;  %v5732_v4 = vld [vmem:[#allocation65_spill] sm:$0xff] }
 0x1d7   : > { %v2789_v22 = vadd.f32 %v4360_v37, %v2746_v52  ;;  %v2668_v17 = vadd.f32 1.0, %v3161_v19  ;;  %v1982_v8 = vpop.permute.xlu1 %1981  ;;  %1456 = vrot.lane.b32.xlu0 %v3911_v60, %s3238_s13  ;;  %v5730_v19 = vrot.slane %v4481_v51, 3  ;;  %v4663_v60 = vsel %vm1597_vm5, %v1667_v43, %v1669_v30 }
 0x1d8   : > { %v2482_v52 = vadd.f32 %v4011_v32, %v2299_v0  ;;  %v2082_v32 = vadd.f32 %v1982_v8, %v1932_v55  ;;  %v5733_v0 = vld [vmem:[#allocation60_spill] sm:$0xff] }
 0x1d9   : > { %v4660_v34 = vsel %vm1597_vm5, %v5730_v19, %v1667_v43  ;;  %2825 = vst.msk [vmem:[%s4373_s25 + $0x20] sm:$0xff] %vm410_vm1, %v2789_v22  ;;  %v2704_v45 = vmul.f32 %v2668_v17, %v2560_v36  ;;  %v4667_v15 = vpop.permute.xlu0 %1074  ;;  %1312 = vrot.lane.b32.xlu1 %v5732_v4, %s3237_s12  ;;  %v5734_v17 = vld [vmem:[#allocation12_spill] sm:$0xff] }
 0x1da   : > { %5731 = vst [vmem:[#allocation5_spill] sm:$0xff] %v4660_v34  ;;  %v2525_v9 = vadd.f32 %v4228_v47, %v2482_v52  ;;  %v1168_v19 = vadd.f32 %v4560_v24, %v5734_v17 }
 0x1db   : > { %v2747_v51 = vmul.f32 %v4342_v57, %v2704_v45  ;;  %v2200_v27 = vpop.permute.xlu1 %2199  ;;  %1857 = vrot.lane.b32.xlu0 %v5733_v0, %s3236_s11 }
 0x1dc   : > { %v2597_v43 = vmul.f32 0.70710677, %v2525_v9  ;;  %v2300_v30 = vadd.f32 %v2200_v27, %v2082_v32  ;;  %v1384_v52 = vadd.f32 %v4569_v40, %v1168_v19  ;;  %v700_v27 = vpop.f32.mrb[79].mxu0 }
 0x1dd   : > { %v2790_v22 = vadd.f32 %v4360_v37, %v2747_v51  ;;  %v4676_v36 = vpop.permute.xlu0 %1290  ;;  %1458 = vrot.lane.b32.xlu1 %v5732_v4, %s3238_s13  ;;  %v5735_v4 = vld [vmem:[#allocation66_spill] sm:$0xff]  ;;  %v1963_v19 = vrot.slane %v700_v27, 4 }
 0x1de   : > { %3162 = verf.f32 %v2597_v43  ;;  %v2483_v8 = vadd.f32 %v4023_v31, %v2300_v30  ;;  %v5736_v31 = vld [vmem:[#allocation13_spill] sm:$0xff] }
 0x1df   : > { %2826 = vst.msk [vmem:[%s4373_s25 + $0x28] sm:$0xff] %vm410_vm1, %v2790_v22  ;;  %v4685_v55 = vpop.permute.xlu1 %1076  ;;  %2003 = vrot.lane.b32.xlu0 %v5733_v0, %s3237_s12  ;;  %v1169_v30 = vadd.f32 %v4578_v1, %v5736_v31  ;;  %v5737_v0 = vld [vmem:[#allocation20_spill] sm:$0xff]  ;;  %v704_v22 = vpop.f32.mrb[80].mxu0  ;;  %v5739_v1 = vld [vmem:[#allocation71_spill] sm:$0xff]  ;;  %v2561_v31 = vmul.f32 0.5, %v2525_v9 }
 0x1e0   : > { %v2526_v45 = vadd.f32 %v4228_v47, %v2483_v8  ;;  %v2181_v8 = vrot.slane %v700_v27, 5  ;;  %v5741_v27 = vrot.slane %v4612_v35, 5  ;;  %v5742_v9 = vld [vmem:[#allocation23_spill] sm:$0xff] }
 0x1e1   : > { %v1437_v32 = vpop.permute.xlu0 %1436  ;;  %1859 = vrot.lane.b32.xlu1 %v5735_v4, %s3236_s11 }
 0x1e2   : > { %v2598_v51 = vmul.f32 0.70710677, %v2526_v45  ;;  %v1534_v24 = vadd.f32 %v1437_v32, %v1384_v52  ;;  %v705_v52 = vpop.f32.mrb[81].mxu0  ;;  %v1385_v32 = vadd.f32 %v4586_v25, %v1169_v30  ;;  %v4722_v30 = vsel %vm2111_vm6, %v5741_v27, %v2181_v8 }
 0x1e3   : > { %v4693_v43 = vpop.permute.xlu1 %1292  ;;  %1098 = vrot.lane.b32.xlu0 %v3980_v53, %s3236_s11  ;;  %v1965_v12 = vrot.slane %v705_v52, 4  ;;  %v2183_v53 = vrot.slane %v705_v52, 5  ;;  %v707_v49 = vpop.f32.mrb[82].mxu0 }
 0x1e4   : > { %3164 = verf.f32 %v2598_v51  ;;  %v4700_v40 = vadd.f32 %v5737_v0, %v1534_v24  ;;  %v708_v51 = vpop.f32.mrb[83].mxu0 }
 0x1e5   : > { %v4702_v17 = vpop.permute.xlu0 %1837  ;;  %2005 = vrot.lane.b32.xlu1 %v5735_v4, %s3237_s12  ;;  %v5740_v4 = vrot.slane %v4612_v35, 4  ;;  %v4717_v49 = vsel %vm1743_vm4, %v1963_v19, %v1965_v12 }
 0x1e6   : > { %5738 = vst [vmem:[#allocation11_spill] sm:$0xff] %v4702_v17 }
 0x1e7   : > { %v1439_v34 = vpop.permute.xlu1 %1438  ;;  %1314 = vrot.lane.b32.xlu0 %v5739_v1, %s3237_s12  ;;  %v4714_v25 = vsel %vm1743_vm4, %v5740_v4, %v1963_v19 }
 0x1e8   : > { %v3163_v24 = vpop.eup %3162  ;;  %v1535_v0 = vadd.f32 %v1439_v34, %v1385_v32  ;;  %v1933_v34 = vadd.f32 %v4595_v3, %v4593_v29 }
 0x1e9   : > { %v2669_v22 = vadd.f32 1.0, %v3163_v24  ;;  %v1984_v17 = vpop.permute.xlu0 %1983  ;;  %1100 = vrot.lane.b32.xlu1 %v3988_v39, %s3236_s11  ;;  %v4730_v39 = vsel %vm2111_vm6, %v2181_v8, %v2183_v53  ;;  %v2562_v8 = vmul.f32 0.5, %v2526_v45 }
 0x1ea   : > { %v4727_v52 = vadd.f32 %v5742_v9, %v1535_v0  ;;  %v2083_v12 = vadd.f32 %v1984_v17, %v1933_v34  ;;  %v5743_v0 = vld [vmem:[#allocation72_spill] sm:$0xff]  ;;  %v1934_v17 = vadd.f32 %v4614_v23, %v4609_v58 }
 0x1eb   : > { %v2705_v32 = vmul.f32 %v2669_v22, %v2561_v31  ;;  %v4732_v51 = vpop.permute.xlu1 %1839  ;;  %1460 = vrot.lane.b32.xlu0 %v5739_v1, %s3238_s13  ;;  %v5539_v22 = vrot.slane %v4109_v2, 6 }
 0x1ed   : > { %v2748_v35 = vmul.f32 %v4342_v57, %v2705_v32  ;;  %v2202_v19 = vpop.permute.xlu0 %2201  ;;  %1316 = vrot.lane.b32.xlu1 %v3991_v13, %s3237_s12  ;;  %v5744_v32 = vrot.slane %v4093_v11, 6 }
 0x1ee   : > { %v3165_v29 = vpop.eup %3164  ;;  %v2301_v3 = vadd.f32 %v2202_v19, %v2083_v12  ;;  %v5745_v19 = vld [vmem:[#allocation73_spill] sm:$0xff] }
 0x1ef   : > { %v2791_v24 = vadd.f32 %v4360_v37, %v2748_v35  ;;  %v2670_v53 = vadd.f32 1.0, %v3165_v29  ;;  %v1986_v31 = vpop.permute.xlu1 %1985  ;;  %1861 = vrot.lane.b32.xlu0 %v5743_v0, %s3236_s11  ;;  %v2387_v58 = vsel %vm2366_vm7, %v5744_v32, %v5539_v22  ;;  %v5746_v29 = vld [vmem:[#allocation17_spill] sm:$0xff] }
 0x1f0   : > { %v2484_v1 = vadd.f32 %v4103_v63, %v2301_v3  ;;  %v2084_v34 = vadd.f32 %v1986_v31, %v1934_v17  ;;  %v1170_v3 = vadd.f32 %v4667_v15, %v5746_v29  ;;  %v5747_v15 = vld [vmem:[#allocation80_spill] sm:$0xff] }
 0x1f1   : > { %2827 = vst.msk [vmem:[%s4373_s25 + $0x30] sm:$0xff] %vm410_vm1, %v2791_v24  ;;  %v2706_v4 = vmul.f32 %v2670_v53, %v2562_v8  ;;  %v1079_v27 = vpop.permute.xlu0 %1078  ;;  %1462 = vrot.lane.b32.xlu1 %v3991_v13, %s3238_s13 }
 0x1f2   : > { %v2527_v45 = vadd.f32 %v4228_v47, %v2484_v1  ;;  %v1386_v8 = vadd.f32 %v4676_v36, %v1170_v3 }
 0x1f3   : > { %v2749_v9 = vmul.f32 %v4342_v57, %v2706_v4  ;;  %v2204_v63 = vpop.permute.xlu1 %2203  ;;  %2007 = vrot.lane.b32.xlu0 %v5743_v0, %s3237_s12  ;;  %v5748_v4 = vld [vmem:[#allocation18_spill] sm:$0xff] }
 0x1f4   : > { %v2599_v23 = vmul.f32 0.70710677, %v2527_v45  ;;  %v2302_v12 = vadd.f32 %v2204_v63, %v2084_v34  ;;  %v1171_v34 = vadd.f32 %v4685_v55, %v5748_v4  ;;  %v5751_v4 = vld [vmem:[#allocation21_spill] sm:$0xff] }
 0x1f5   : > { %v2792_v35 = vadd.f32 %v4360_v37, %v2749_v9  ;;  %v1295_v13 = vpop.permute.xlu0 %1294  ;;  %1863 = vrot.lane.b32.xlu1 %v5745_v19, %s3236_s11  ;;  %v5749_v9 = vld [vmem:[#allocation24_spill] sm:$0xff] }
 0x1f6   : > { %3166 = verf.f32 %v2599_v23  ;;  %v2485_v24 = vadd.f32 %v2387_v58, %v2302_v12  ;;  %v2563_v23 = vmul.f32 0.5, %v2527_v45 }
 0x1f7   : > { %2828 = vst.msk [vmem:[%s4373_s25 + $0x38] sm:$0xff] %vm410_vm1, %v2792_v35  ;;  %v1081_v11 = vpop.permute.xlu1 %1080  ;;  %1102 = vrot.lane.b32.xlu0 %v4049_v61, %s3236_s11  ;;  %v5750_v35 = vld [vmem:[#allocation29_spill] sm:$0xff] }
 0x1f8   : > { %v2528_v53 = vadd.f32 %v4228_v47, %v2485_v24  ;;  %v1387_v47 = vadd.f32 %v4693_v43, %v1171_v34 }
 0x1f9   : > { %v1441_v31 = vpop.permute.xlu0 %1440  ;;  %2009 = vrot.lane.b32.xlu1 %v5745_v19, %s3237_s12 }
 0x1fa   : > { %v2600_v0 = vmul.f32 0.70710677, %v2528_v53  ;;  %v1536_v17 = vadd.f32 %v1441_v31, %v1386_v8  ;;  %v2564_v8 = vmul.f32 0.5, %v2528_v53 }
 0x1fb   : > { %v1297_v1 = vpop.permute.xlu1 %1296  ;;  %1318 = vrot.lane.b32.xlu0 %v5747_v15, %s3237_s12 }
 0x1fc   : > { %3168 = verf.f32 %v2600_v0  ;;  %v4777_v61 = vadd.f32 %v5749_v9, %v1536_v17 }
 0x1fd   : > { %v4779_v36 = vpop.permute.xlu0 %1841  ;;  %1104 = vrot.lane.b32.xlu1 %v4059_v38, %s3236_s11 }
 0x1ff   : > { %v1443_v32 = vpop.permute.xlu1 %1442  ;;  %1464 = vrot.lane.b32.xlu0 %v5747_v15, %s3238_s13 }
 0x200   : > { %v3167_v58 = vpop.eup %3166  ;;  %v1537_v63 = vadd.f32 %v1443_v32, %v1387_v47 }
 0x201   : > { %v2671_v12 = vadd.f32 1.0, %v3167_v58  ;;  %v4786_v55 = vpop.permute.xlu0 %1987  ;;  %1320 = vrot.lane.b32.xlu1 %v4064_v54, %s3237_s12 }
 0x202   : > { %v4791_v19 = vadd.f32 %v5750_v35, %v1537_v63  ;;  %v5752_v63 = vld [vmem:[#allocation87_spill] sm:$0xff] }
 0x203   : > { %v2707_v38 = vmul.f32 %v2671_v12, %v2563_v23  ;;  %v4793_v29 = vpop.permute.xlu1 %1843  ;;  %1865 = vrot.lane.b32.xlu0 %v4067_v7, %s3236_s11  ;;  %v5754_v23 = vld [vmem:[#allocation31_spill] sm:$0xff] }
 0x205   : > { %v2750_v43 = vmul.f32 %v4342_v57, %v2707_v38  ;;  %v1083_v3 = vpop.permute.xlu0 %1082  ;;  %1466 = vrot.lane.b32.xlu1 %v4064_v54, %s3238_s13  ;;  %v1172_v54 = vadd.f32 %v1079_v27, %v5751_v4  ;;  %v5753_v27 = vld [vmem:[#allocation22_spill] sm:$0xff] }
 0x206   : > { %v3169_v45 = vpop.eup %3168 }
 0x207   : > { %v2793_v24 = vadd.f32 %v4360_v37, %v2750_v43  ;;  %v2672_v31 = vadd.f32 1.0, %v3169_v45  ;;  %v4801_v0 = vpop.permute.xlu1 %1989  ;;  %2011 = vrot.lane.b32.xlu0 %v4067_v7, %s3237_s12  ;;  %v1388_v53 = vadd.f32 %v1295_v13, %v1172_v54 }
 0x209   : > { %2829 = vst.msk [vmem:[%s4373_s25 + $0x40] sm:$0xff] %vm410_vm1, %v2793_v24  ;;  %v2708_v17 = vmul.f32 %v2672_v31, %v2564_v8  ;;  %v1299_v15 = vpop.permute.xlu0 %1298  ;;  %1867 = vrot.lane.b32.xlu1 %v4072_v18, %s3236_s11  ;;  %v5758_v24 = vld [vmem:[#allocation26_spill] sm:$0xff] }
 0x20a   : > { %v1174_v8 = vadd.f32 %v1083_v3, %v5758_v24 }
 0x20b   : > { %v2751_v34 = vmul.f32 %v4342_v57, %v2708_v17  ;;  %v1085_v9 = vpop.permute.xlu1 %1084  ;;  %1106 = vrot.lane.b32.xlu0 %v4147_v56, %s3236_s11  ;;  %v1173_v57 = vadd.f32 %v1081_v11, %v5753_v27  ;;  %v5755_v11 = vld [vmem:[#allocation40_spill] sm:$0xff]  ;;  %v5759_v17 = vld [vmem:[#allocation10_spill] sm:$0xff] }
 0x20c   : > { %v1390_v4 = vadd.f32 %v1299_v15, %v1174_v8 }
 0x20d   : > { %v2794_v47 = vadd.f32 %v4360_v37, %v2751_v34  ;;  %v1445_v32 = vpop.permute.xlu0 %1444  ;;  %2013 = vrot.lane.b32.xlu1 %v4072_v18, %s3237_s12  ;;  %v1389_v37 = vadd.f32 %v1297_v1, %v1173_v57  ;;  %v4866_v57 = vpop.f32.mrb[30].mxu1 }
 0x20e   : > { %v1538_v7 = vadd.f32 %v1445_v32, %v1388_v53  ;;  %v5760_v53 = vld [vmem:[#allocation94_spill] sm:$0xff]  ;;  %v5762_v32 = vld [vmem:[#allocation43_spill] sm:$0xff]  ;;  %v5540_v8 = vrot.slane %v4866_v57, 6 }
 0x20f   : > { %2830 = vst.msk [vmem:[%s4373_s25 + $0x48] sm:$0xff] %vm410_vm1, %v2794_v47  ;;  %v1301_v58 = vpop.permute.xlu1 %1300  ;;  %1322 = vrot.lane.b32.xlu0 %v5752_v63, %s3237_s12 }
 0x210   : > { %v4822_v12 = vadd.f32 %v5754_v23, %v1538_v7 }
 0x211   : > { %v4824_v56 = vpop.permute.xlu0 %1845  ;;  %1108 = vrot.lane.b32.xlu1 %v4157_v59, %s3236_s11 }
 0x213   : > { %v1447_v13 = vpop.permute.xlu1 %1446  ;;  %1468 = vrot.lane.b32.xlu0 %v5752_v63, %s3238_s13  ;;  %v5763_v63 = vld [vmem:[#allocation95_spill] sm:$0xff] }
 0x214   : > { %v1539_v18 = vadd.f32 %v1447_v13, %v1389_v37  ;;  %v3052_v37 = vpop.f32.mrb[31].mxu1  ;;  %v5765_v13 = vld [vmem:[#allocation50_spill] sm:$0xff] }
 0x215   : > { %v4830_v35 = vpop.permute.xlu0 %1991  ;;  %1324 = vrot.lane.b32.xlu1 %v4162_v41, %s3237_s12 }
 0x216   : > { %v4835_v38 = vadd.f32 %v5755_v11, %v1539_v18  ;;  %v804_v11 = vpop.f32.mrb[32].mxu1 }
 0x217   : > { %v4837_v43 = vpop.permute.xlu1 %1847  ;;  %1869 = vrot.lane.b32.xlu0 %v4167_v14, %s3236_s11 }
 0x218   : > { %5756 = vst [vmem:[#allocation47_spill] sm:$0xff] %v4835_v38  ;;  %5757 = vst [vmem:[#allocation14_spill] sm:$0xff] %v4837_v43 }
 0x219   : > { %v1087_v59 = vpop.permute.xlu0 %1086  ;;  %1470 = vrot.lane.b32.xlu1 %v4162_v41, %s3238_s13 }
 0x21b   : > { %v4843_v1 = vpop.permute.xlu1 %1993  ;;  %2015 = vrot.lane.b32.xlu0 %v4167_v14, %s3237_s12  ;;  %v5761_v14 = vld [vmem:[#allocation28_spill] sm:$0xff] }
 0x21c   : > { %v1175_v47 = vadd.f32 %v1085_v9, %v5761_v14  ;;  %v5764_v9 = vld [vmem:[#allocation96_spill] sm:$0xff] }
 0x21d   : > { %v1303_v45 = vpop.permute.xlu0 %1302  ;;  %1871 = vrot.lane.b32.xlu1 %v4172_v62, %s3236_s11 }
 0x21e   : > { %v1391_v15 = vadd.f32 %v1301_v58, %v1175_v47  ;;  %v5768_v58 = vld [vmem:[#allocation97_spill] sm:$0xff] }
 0x21f   : > { %v1089_v31 = vpop.permute.xlu1 %1088  ;;  %1110 = vrot.lane.b32.xlu0 %v5759_v17, %s3236_s11  ;;  %v2390_v17 = vrot.slane %v804_v11, 6 }
 0x221   : > { %v1449_v54 = vpop.permute.xlu0 %1448  ;;  %2017 = vrot.lane.b32.xlu1 %v4172_v62, %s3237_s12 }
 0x222   : > { %v1540_v41 = vadd.f32 %v1449_v54, %v1390_v4  ;;  %v3055_v4 = vpop.f32.mrb[33].mxu1 }
 0x223   : > { %v1305_v34 = vpop.permute.xlu1 %1304  ;;  %1326 = vrot.lane.b32.xlu0 %v5760_v53, %s3237_s12  ;;  %v807_v14 = vpop.f32.mrb[34].mxu1 }
 0x224   : > { %v4858_v7 = vadd.f32 %v5762_v32, %v1540_v41  ;;  %v5770_v32 = vld [vmem:[#allocation98_spill] sm:$0xff]  ;;  %v2392_v37 = vrot.slane %v807_v14, 6 }
 0x225   : > { %v4860_v3 = vpop.permute.xlu0 %1849  ;;  %1112 = vrot.lane.b32.xlu1 %v5763_v63, %s3236_s11  ;;  %v3056_v63 = vpop.f32.mrb[35].mxu1 }
 0x226   : > { %v5772_v63 = vld [vmem:[#allocation3_spill] sm:$0xff] }
 0x227   : > { %v1451_v27 = vpop.permute.xlu1 %1450  ;;  %1472 = vrot.lane.b32.xlu0 %v5760_v53, %s3238_s13  ;;  %v4889_v53 = vsel %vm2366_vm7, %v5540_v8, %v2390_v17 }
 0x228   : > { %v1541_v62 = vadd.f32 %v1451_v27, %v1391_v15  ;;  %v5771_v15 = vld [vmem:[#allocation35_spill] sm:$0xff] }
 0x229   : > { %v4868_v23 = vpop.permute.xlu0 %1995  ;;  %1328 = vrot.lane.b32.xlu1 %v5764_v9, %s3237_s12  ;;  %v1176_v27 = vadd.f32 %v1087_v59, %v5771_v15  ;;  %v4903_v59 = vsel %vm2366_vm7, %v2390_v17, %v2392_v37 }
 0x22a   : > { %v4873_v18 = vadd.f32 %v5765_v13, %v1541_v62  ;;  %v812_v62 = vpop.f32.mrb[36].mxu1 }
 0x22b   : > { %v4875_v24 = vpop.permute.xlu1 %1851  ;;  %1873 = vrot.lane.b32.xlu0 %v5768_v58, %s3236_s11  ;;  %v2394_v13 = vrot.slane %v812_v62, 6  ;;  %v3059_v11 = vpop.f32.mrb[37].mxu1  ;;  %v5774_v62 = vld [vmem:[#allocation53_spill] sm:$0xff] }
 0x22c   : > { %5766 = vst [vmem:[#allocation48_spill] sm:$0xff] %v4873_v18  ;;  %5767 = vst [vmem:[#allocation49_spill] sm:$0xff] %v4875_v24  ;;  %v5775_v24 = vld [vmem:[#allocation6_spill] sm:$0xff] }
 0x22d   : > { %v1091_v54 = vpop.permute.xlu0 %1090  ;;  %1474 = vrot.lane.b32.xlu1 %v5764_v9, %s3238_s13  ;;  %v4906_v15 = vsel %vm2366_vm7, %v2392_v37, %v2394_v13 }
 0x22f   : > { %v4882_v41 = vpop.permute.xlu1 %1997  ;;  %2019 = vrot.lane.b32.xlu0 %v5768_v58, %s3237_s12  ;;  %v1392_v58 = vadd.f32 %v1303_v45, %v1176_v27  ;;  %v815_v45 = vpop.f32.mrb[38].mxu1 }
 0x230   : > { %5769 = vst [vmem:[#allocation56_spill] sm:$0xff] %v4882_v41  ;;  %v2396_v17 = vrot.slane %v815_v45, 6 }
 0x231   : > { %v1307_v47 = vpop.permute.xlu0 %1306  ;;  %1875 = vrot.lane.b32.xlu1 %v5770_v32, %s3236_s11 }
 0x233   : > { %v4894_v9 = vpop.permute.xlu1 %1092  ;;  %1114 = vrot.lane.b32.xlu0 %v4378_v33, %s3236_s11  ;;  %v5773_v33 = vld [vmem:[#allocation36_spill] sm:$0xff] }
 0x234   : > { %v1177_v14 = vadd.f32 %v1089_v31, %v5773_v33  ;;  %v5778_v31 = vld [vmem:[#allocation59_spill] sm:$0xff] }
 0x235   : > { %v1453_v4 = vpop.permute.xlu0 %1452  ;;  %2021 = vrot.lane.b32.xlu1 %v5770_v32, %s3237_s12  ;;  %v3060_v32 = vpop.f32.mrb[39].mxu1 }
 0x236   : > { %v1542_v22 = vadd.f32 %v1453_v4, %v1392_v58  ;;  %v1393_v58 = vadd.f32 %v1305_v34, %v1177_v14  ;;  %v820_v4 = vpop.f32.mrb[40].mxu1  ;;  %v4922_v34 = vsel %vm2366_vm7, %v2394_v13, %v2396_v17 }
 0x237   : > { %v1309_v8 = vpop.permute.xlu1 %1308  ;;  %1330 = vrot.lane.b32.xlu0 %v5772_v63, %s3237_s12  ;;  %v2398_v41 = vrot.slane %v820_v4, 6  ;;  %v3063_v37 = vpop.f32.mrb[41].mxu1  ;;  %5780 = vst [vmem:[#allocation7_spill] sm:$0xff] %v4922_v34  ;;  %v5789_v34 = vld [vmem:[#allocation37_spill] sm:$0xff] }
 0x238   : > { %v1725_v11 = vadd.f32 %v5774_v62, %v1542_v22  ;;  %v5777_v22 = vld [vmem:[#allocation30_spill] sm:$0xff]  ;;  %v823_v14 = vpop.f32.mrb[42].mxu1 }
 0x239   : > { %v1854_v27 = vpop.permute.xlu0 %1853  ;;  %1116 = vrot.lane.b32.xlu1 %v5775_v24, %s3236_s11  ;;  %v5779_v24 = vld [vmem:[#allocation9_spill] sm:$0xff] }
 0x23b   : > { %v1455_v18 = vpop.permute.xlu1 %1454  ;;  %1476 = vrot.lane.b32.xlu0 %v5772_v63, %s3238_s13  ;;  %v4925_v63 = vsel %vm2366_vm7, %v2396_v17, %v2398_v41  ;;  %v5783_v17 = vrot.slane %v4459_v21, 1 }
 0x23c   : > { %v1543_v43 = vadd.f32 %v1455_v18, %v1393_v58  ;;  %5781 = vst [vmem:[#allocation52_spill] sm:$0xff] %v4925_v63  ;;  %v3064_v18 = vpop.f32.mrb[43].mxu1 }
 0x23d   : > { %v4914_v38 = vpop.permute.xlu0 %1999  ;;  %1332 = vrot.lane.b32.xlu1 %v5777_v22, %s3237_s12  ;;  %v828_v32 = vpop.f32.mrb[44].mxu1 }
 0x23e   : > { %5776 = vst [vmem:[#allocation58_spill] sm:$0xff] %v4914_v38  ;;  %v1726_v33 = vadd.f32 %v5778_v31, %v1543_v43  ;;  %v2400_v43 = vrot.slane %v823_v14, 6  ;;  %v2402_v4 = vrot.slane %v828_v32, 6  ;;  %v3067_v13 = vpop.f32.mrb[45].mxu1  ;;  %v5784_v31 = vld [vmem:[#allocation45_spill] sm:$0xff] }
 0x23f   : > { %v1856_v62 = vpop.permute.xlu1 %1855  ;;  %1877 = vrot.lane.b32.xlu0 %v5779_v24, %s3236_s11  ;;  %v1178_v63 = vadd.f32 %v1091_v54, %v5784_v31  ;;  %v831_v18 = vpop.f32.mrb[46].mxu1 }
 0x240   : > { %v3068_v13 = vpop.f32.mrb[47].mxu1 }
 0x241   : > { %v4927_v45 = vpop.permute.xlu0 %1094  ;;  %1478 = vrot.lane.b32.xlu1 %v5777_v22, %s3238_s13  ;;  %v4944_v22 = vsel %vm2366_vm7, %v2398_v41, %v2400_v43  ;;  %v1394_v14 = vadd.f32 %v1307_v47, %v1178_v63  ;;  %v836_v54 = vpop.f32.mrb[48].mxu1  ;;  %v5788_v47 = vld [vmem:[#allocation61_spill] sm:$0xff] }
 0x242   : > { %5785 = vst [vmem:[#allocation15_spill] sm:$0xff] %v4944_v22  ;;  %v2406_v41 = vrot.slane %v836_v54, 6  ;;  %v5787_v22 = vld [vmem:[#allocation46_spill] sm:$0xff]  ;;  %v5790_v54 = vld [vmem:[#allocation67_spill] sm:$0xff] }
 0x243   : > { %v4931_v58 = vpop.permute.xlu1 %2001  ;;  %2023 = vrot.lane.b32.xlu0 %v5779_v24, %s3237_s12  ;;  %v4947_v24 = vsel %vm2366_vm7, %v2400_v43, %v2402_v4  ;;  %v1179_v43 = vadd.f32 %v4894_v9, %v5787_v22  ;;  %v1943_v9 = vadd.f32 %v1854_v27, %v1725_v11 }
 0x244   : > { %5782 = vst [vmem:[#allocation8_spill] sm:$0xff] %v4931_v58  ;;  %5786 = vst [vmem:[#allocation19_spill] sm:$0xff] %v4947_v24  ;;  %v3071_v58 = vpop.f32.mrb[49].mxu1 }
 0x245   : > { %v1311_v37 = vpop.permute.xlu0 %1310  ;;  %1120 = vrot.lane.b32.xlu1 %v5783_v17, %s3236_s11  ;;  %v839_v13 = vpop.f32.mrb[50].mxu1 }
 0x247   : > { %v4939_v38 = vpop.permute.xlu1 %1096  ;;  %1118 = vrot.lane.b32.xlu0 %v4501_v44, %s3236_s11  ;;  %v2404_v44 = vrot.slane %v831_v18, 6 }
 0x249   : > { %v1457_v32 = vpop.permute.xlu0 %1456  ;;  %1336 = vrot.lane.b32.xlu1 %v4479_v42, %s3237_s12  ;;  %v1395_v42 = vadd.f32 %v1309_v8, %v1179_v43  ;;  %v4965_v18 = vsel %vm2366_vm7, %v2402_v4, %v2404_v44  ;;  %v4968_v58 = vsel %vm2366_vm7, %v2404_v44, %v2406_v41  ;;  %v3072_v8 = vpop.f32.mrb[51].mxu1  ;;  %v2408_v4 = vrot.slane %v839_v13, 6 }
 0x24a   : > { %v1544_v17 = vadd.f32 %v1457_v32, %v1394_v14 }
 0x24b   : > { %v4951_v31 = vpop.permute.xlu1 %1312  ;;  %1334 = vrot.lane.b32.xlu0 %v4507_v16, %s3237_s12 }
 0x24c   : > { %v1727_v63 = vadd.f32 %v5788_v47, %v1544_v17  ;;  %v844_v47 = vpop.f32.mrb[52].mxu1 }
 0x24d   : > { %v1858_v24 = vpop.permute.xlu0 %1857  ;;  %1879 = vrot.lane.b32.xlu1 %v5789_v34, %s3236_s11  ;;  %v2410_v44 = vrot.slane %v844_v47, 6 }
 0x24e   : > { %v4960_v14 = vadd.f32 %v1858_v24, %v1727_v63  ;;  %v3075_v63 = vpop.f32.mrb[53].mxu1 }
 0x24f   : > { %v1459_v32 = vpop.permute.xlu1 %1458  ;;  %1480 = vrot.lane.b32.xlu0 %v4507_v16, %s3238_s13  ;;  %v4988_v13 = vsel %vm2366_vm7, %v2408_v4, %v2410_v44 }
 0x250   : > { %v1545_v22 = vadd.f32 %v1459_v32, %v1395_v42  ;;  %v5791_v42 = vld [vmem:[#allocation64_spill] sm:$0xff] }
 0x251   : > { %v2004_v17 = vpop.permute.xlu0 %2003  ;;  %2025 = vrot.lane.b32.xlu1 %v5789_v34, %s3237_s12  ;;  %v1944_v34 = vadd.f32 %v1856_v62, %v1726_v33 }
 0x252   : > { %v4972_v24 = vadd.f32 %v2004_v17, %v1943_v9  ;;  %v1728_v43 = vadd.f32 %v5790_v54, %v1545_v22  ;;  %v4985_v22 = vsel %vm2366_vm7, %v2406_v41, %v2408_v4  ;;  %v5792_v54 = vrot.slane %v4600_v28, 2 }
 0x253   : > { %v1860_v16 = vpop.permute.xlu1 %1859  ;;  %1881 = vrot.lane.b32.xlu0 %v4516_v20, %s3236_s11 }
 0x254   : > { %v4977_v11 = vadd.f32 %v1860_v16, %v1728_v43  ;;  %v847_v43 = vpop.f32.mrb[54].mxu1  ;;  %v5794_v16 = vld [vmem:[#allocation69_spill] sm:$0xff] }
 0x255   : > { %v1099_v27 = vpop.permute.xlu0 %1098  ;;  %1482 = vrot.lane.b32.xlu1 %v4522_v50, %s3238_s13  ;;  %v5793_v50 = vld [vmem:[#allocation55_spill] sm:$0xff]  ;;  %v3076_v41 = vpop.f32.mrb[55].mxu1  ;;  %v2412_v28 = vrot.slane %v847_v43, 6 }
 0x256   : > { %v1182_v32 = vadd.f32 %v1099_v27, %v5791_v42  ;;  %v1180_v33 = vadd.f32 %v4927_v45, %v5793_v50  ;;  %v852_v63 = vpop.f32.mrb[56].mxu1 }
 0x257   : > { %v2006_v9 = vpop.permute.xlu1 %2005  ;;  %2027 = vrot.lane.b32.xlu0 %v4516_v20, %s3237_s12  ;;  %v2414_v42 = vrot.slane %v852_v63, 6 }
 0x258   : > { %v4990_v17 = vadd.f32 %v2006_v9, %v1944_v34  ;;  %v1396_v47 = vadd.f32 %v1311_v37, %v1180_v33  ;;  %v5795_v34 = vld [vmem:[#allocation39_spill] sm:$0xff]  ;;  %v3079_v9 = vpop.f32.mrb[57].mxu1  ;;  %v5797_v37 = vld [vmem:[#allocation57_spill] sm:$0xff]  ;;  %v5798_v33 = vld [vmem:[#allocation74_spill] sm:$0xff] }
 0x259   : > { %v1315_v8 = vpop.permute.xlu0 %1314  ;;  %1486 = vrot.lane.b32.xlu1 %v5792_v54, %s3238_s13  ;;  %v1181_v54 = vadd.f32 %v4939_v38, %v5797_v37  ;;  %v5799_v38 = vld [vmem:[#allocation32_spill] sm:$0xff] }
 0x25a   : > { %v4997_v62 = vadd.f32 %v1315_v8, %v1182_v32  ;;  %v5007_v8 = vsel %vm2366_vm7, %v2410_v44, %v2412_v28 }
 0x25b   : > { %v1101_v20 = vpop.permute.xlu1 %1100  ;;  %1484 = vrot.lane.b32.xlu0 %v4629_v26, %s3238_s13  ;;  %v5010_v26 = vsel %vm2366_vm7, %v2412_v28, %v2414_v42  ;;  %v1397_v41 = vadd.f32 %v4951_v31, %v1181_v54  ;;  %v5800_v31 = vld [vmem:[#allocation75_spill] sm:$0xff] }
 0x25c   : > { %v1183_v4 = vadd.f32 %v1101_v20, %v5794_v16  ;;  %5796 = vst [vmem:[#allocation65_spill] sm:$0xff] %v5010_v26  ;;  %v855_v16 = vpop.f32.mrb[58].mxu1 }
 0x25d   : > { %v1461_v27 = vpop.permute.xlu0 %1460  ;;  %1883 = vrot.lane.b32.xlu1 %v5795_v34, %s3236_s11  ;;  %v3080_v44 = vpop.f32.mrb[59].mxu1 }
 0x25e   : > { %v1546_v45 = vadd.f32 %v1461_v27, %v1396_v47  ;;  %v860_v28 = vpop.f32.mrb[60].mxu1 }
 0x25f   : > { %v1317_v32 = vpop.permute.xlu1 %1316  ;;  %1885 = vrot.lane.b32.xlu0 %v4634_v48, %s3236_s11 }
 0x260   : > { %v1399_v50 = vadd.f32 %v1317_v32, %v1183_v4  ;;  %v1729_v20 = vadd.f32 %v5798_v33, %v1546_v45  ;;  %v2416_v4 = vrot.slane %v855_v16, 6  ;;  %v2418_v45 = vrot.slane %v860_v28, 6  ;;  %v3083_v32 = vpop.f32.mrb[61].mxu1  ;;  %v5801_v33 = vld [vmem:[#allocation25_spill] sm:$0xff]  ;;  %v5803_v16 = vld [vmem:[#allocation70_spill] sm:$0xff] }
 0x261   : > { %v1862_v43 = vpop.permute.xlu0 %1861  ;;  %2029 = vrot.lane.b32.xlu1 %v5795_v34, %s3237_s12 }
 0x262   : > { %v1947_v47 = vadd.f32 %v1862_v43, %v1729_v20 }
 0x263   : > { %v1463_v63 = vpop.permute.xlu1 %1462  ;;  %2031 = vrot.lane.b32.xlu0 %v4634_v48, %s3237_s12  ;;  %v5029_v48 = vsel %vm2366_vm7, %v2414_v42, %v2416_v4 }
 0x264   : > { %v1547_v27 = vadd.f32 %v1463_v63, %v1397_v41  ;;  %v5034_v41 = vsel %vm2366_vm7, %v2416_v4, %v2418_v45  ;;  %v863_v63 = vpop.f32.mrb[62].mxu1 }
 0x265   : > { %v2008_v9 = vpop.permute.xlu0 %2007  ;;  %2207 = vrot.lane.b32.xlu1 %v5799_v38, %s3238_s13  ;;  %5802 = vst [vmem:[#allocation60_spill] sm:$0xff] %v5034_v41  ;;  %v2420_v38 = vrot.slane %v863_v63, 6  ;;  %v5811_v41 = vld [vmem:[#allocation54_spill] sm:$0xff] }
 0x266   : > { %v5023_v34 = vadd.f32 %v2008_v9, %v4960_v14  ;;  %v1730_v37 = vadd.f32 %v5800_v31, %v1547_v27  ;;  %v3084_v27 = vpop.f32.mrb[63].mxu1 }
 0x267   : > { %v1864_v54 = vpop.permute.xlu1 %1863  ;;  %2205 = vrot.lane.b32.xlu0 %v5801_v33, %s3238_s13  ;;  %v868_v42 = vpop.f32.mrb[64].mxu1  ;;  %v5805_v33 = vld [vmem:[#allocation78_spill] sm:$0xff] }
 0x268   : > { %v1948_v20 = vadd.f32 %v1864_v54, %v1730_v37  ;;  %v3087_v32 = vpop.f32.mrb[65].mxu1  ;;  %v5804_v37 = vld [vmem:[#allocation33_spill] sm:$0xff]  ;;  %v2422_v54 = vrot.slane %v868_v42, 6 }
 0x269   : > { %v1103_v43 = vpop.permute.xlu0 %1102  ;;  %1887 = vrot.lane.b32.xlu1 %v4639_v10, %s3236_s11  ;;  %v5810_v32 = vld [vmem:[#allocation81_spill] sm:$0xff] }
 0x26a   : > { %v1184_v14 = vadd.f32 %v1103_v43, %v5803_v16  ;;  %v5806_v16 = vld [vmem:[#allocation41_spill] sm:$0xff] }
 0x26b   : > { %v2010_v44 = vpop.permute.xlu1 %2009  ;;  %2035 = vrot.lane.b32.xlu0 %v4714_v25, %s3237_s12 }
 0x26c   : > { %v5040_v28 = vadd.f32 %v2010_v44, %v4977_v11  ;;  %v5050_v11 = vsel %vm2366_vm7, %v2418_v45, %v2420_v38 }
 0x26d   : > { %v1319_v9 = vpop.permute.xlu0 %1318  ;;  %2033 = vrot.lane.b32.xlu1 %v4639_v10, %s3237_s12  ;;  %5807 = vst [vmem:[#allocation12_spill] sm:$0xff] %v5050_v11  ;;  %v871_v10 = vpop.f32.mrb[66].mxu1 }
 0x26e   : > { %v1400_v4 = vadd.f32 %v1319_v9, %v1184_v14  ;;  %v5808_v14 = vld [vmem:[#allocation44_spill] sm:$0xff]  ;;  %v3088_v27 = vpop.f32.mrb[67].mxu1  ;;  %v5056_v9 = vsel %vm2366_vm7, %v2420_v38, %v2422_v54  ;;  %v2424_v45 = vrot.slane %v871_v10, 6  ;;  %v5812_v38 = vld [vmem:[#allocation51_spill] sm:$0xff] }
 0x26f   : > { %v1105_v31 = vpop.permute.xlu1 %1104  ;;  %2209 = vrot.lane.b32.xlu0 %v5804_v37, %s3238_s13  ;;  %5809 = vst [vmem:[#allocation66_spill] sm:$0xff] %v5056_v9  ;;  %v876_v37 = vpop.f32.mrb[68].mxu1 }
 0x270   : > { %v1185_v43 = vadd.f32 %v1105_v31, %v5805_v33 }
 0x271   : > { %v1465_v25 = vpop.permute.xlu0 %1464  ;;  %2211 = vrot.lane.b32.xlu1 %v5806_v16, %s3238_s13  ;;  %v3091_v16 = vpop.f32.mrb[69].mxu1 }
 0x272   : > { %v1548_v44 = vadd.f32 %v1465_v25, %v4997_v62  ;;  %v879_v10 = vpop.f32.mrb[70].mxu1 }
 0x273   : > { %v1321_v63 = vpop.permute.xlu1 %1320  ;;  %2213 = vrot.lane.b32.xlu0 %v5808_v14, %s3238_s13  ;;  %v2426_v14 = vrot.slane %v876_v37, 6 }
 0x274   : > { %v1401_v42 = vadd.f32 %v1321_v63, %v1185_v43  ;;  %v1731_v31 = vadd.f32 %v5810_v32, %v1548_v44  ;;  %v5066_v43 = vsel %vm2366_vm7, %v2422_v54, %v2424_v45  ;;  %v5814_v63 = vld [vmem:[#allocation82_spill] sm:$0xff] }
 0x275   : > { %v1866_v33 = vpop.permute.xlu0 %1865  ;;  %2037 = vrot.lane.b32.xlu1 %v4717_v49, %s3237_s12  ;;  %5813 = vst [vmem:[#allocation13_spill] sm:$0xff] %v5066_v43 }
 0x276   : > { %v1949_v62 = vadd.f32 %v1866_v33, %v1731_v31  ;;  %v5815_v31 = vld [vmem:[#allocation62_spill] sm:$0xff]  ;;  %v3092_v33 = vpop.f32.mrb[71].mxu1 }
 0x277   : > { %v1467_v25 = vpop.permute.xlu1 %1466  ;;  %2217 = vrot.lane.b32.xlu0 %v5811_v41, %s3238_s13  ;;  %v5074_v41 = vsel %vm2366_vm7, %v2424_v45, %v2426_v14  ;;  %v884_v37 = vpop.f32.mrb[72].mxu1  ;;  %v5821_v45 = vld [vmem:[#allocation68_spill] sm:$0xff] }
 0x278   : > { %v1549_v27 = vadd.f32 %v1467_v25, %v1399_v50  ;;  %5816 = vst [vmem:[#allocation20_spill] sm:$0xff] %v5074_v41  ;;  %v5817_v25 = vld [vmem:[#allocation63_spill] sm:$0xff]  ;;  %v3095_v54 = vpop.f32.mrb[73].mxu1 }
 0x279   : > { %v2012_v11 = vpop.permute.xlu0 %2011  ;;  %2215 = vrot.lane.b32.xlu1 %v5812_v38, %s3238_s13  ;;  %v5822_v41 = vld [vmem:[#allocation83_spill] sm:$0xff] }
 0x27a   : > { %v5068_v44 = vadd.f32 %v2012_v11, %v1947_v47  ;;  %v1732_v49 = vadd.f32 %v5814_v63, %v1549_v27  ;;  %v5818_v47 = vld [vmem:[#allocation79_spill] sm:$0xff]  ;;  %v5819_v27 = vld [vmem:[#allocation76_spill] sm:$0xff]  ;;  %v2428_v63 = vrot.slane %v879_v10, 6 }
 0x27b   : > { %v1868_v32 = vpop.permute.xlu1 %1867  ;;  %2221 = vrot.lane.b32.xlu0 %v5815_v31, %s3238_s13  ;;  %v2430_v31 = vrot.slane %v884_v37, 6  ;;  %v5826_v37 = vld [vmem:[#allocation77_spill] sm:$0xff] }
 0x27c   : > { %v1950_v50 = vadd.f32 %v1868_v32, %v1732_v49 }
 0x27d   : > { %v1107_v16 = vpop.permute.xlu0 %1106  ;;  %2219 = vrot.lane.b32.xlu1 %v5817_v25, %s3238_s13  ;;  %v5088_v25 = vsel %vm2366_vm7, %v2426_v14, %v2428_v63  ;;  %v5092_v10 = vsel %vm2366_vm7, %v2428_v63, %v2430_v31  ;;  %v5828_v14 = vld [vmem:[#allocation89_spill] sm:$0xff] }
 0x27e   : > { %v1186_v11 = vadd.f32 %v1107_v16, %v5818_v47  ;;  %5823 = vst [vmem:[#allocation23_spill] sm:$0xff] %v5088_v25  ;;  %v5824_v16 = vld [vmem:[#allocation85_spill] sm:$0xff]  ;;  %v887_v47 = vpop.f32.mrb[74].mxu1  ;;  %5825 = vst [vmem:[#allocation72_spill] sm:$0xff] %v5092_v10 }
 0x27f   : > { %v2014_v38 = vpop.permute.xlu1 %2013  ;;  %2225 = vrot.lane.b32.xlu0 %v5819_v27, %s3238_s13 }
 0x280   : > { %v5081_v9 = vadd.f32 %v2014_v38, %v1948_v20  ;;  %v3096_v38 = vpop.f32.mrb[75].mxu1 }
 0x281   : > { %v1323_v33 = vpop.permute.xlu0 %1322  ;;  %2223 = vrot.lane.b32.xlu1 %v5821_v45, %s3238_s13  ;;  %v892_v43 = vpop.f32.mrb[76].mxu1 }
 0x282   : > { %5820 = vst [vmem:[#allocation71_spill] sm:$0xff] %v5081_v9  ;;  %v1402_v49 = vadd.f32 %v1323_v33, %v1186_v11  ;;  %v5827_v33 = vld [vmem:[#allocation88_spill] sm:$0xff]  ;;  %v2434_v63 = vrot.slane %v892_v43, 6  ;;  %v3099_v10 = vpop.f32.mrb[77].mxu1  ;;  %v5834_v43 = vld [vmem:[#allocation91_spill] sm:$0xff] }
 0x283   : > { %v1109_v32 = vpop.permute.xlu1 %1108  ;;  %2229 = vrot.lane.b32.xlu0 %v5822_v41, %s3238_s13  ;;  %v2432_v41 = vrot.slane %v887_v47, 6 }
 0x284   : > { %v1187_v54 = vadd.f32 %v1109_v32, %v5824_v16  ;;  %v5829_v16 = vld [vmem:[#allocation84_spill] sm:$0xff] }
 0x285   : > { %v1469_v20 = vpop.permute.xlu0 %1468  ;;  %2227 = vrot.lane.b32.xlu1 %v5826_v37, %s3238_s13  ;;  %v5830_v37 = vld [vmem:[#allocation99_spill] sm:$0xff]  ;;  %v5109_v38 = vsel %vm2366_vm7, %v2432_v41, %v2434_v63 }
 0x286   : > { %v1550_v27 = vadd.f32 %v1469_v20, %v1400_v4  ;;  %v5104_v4 = vsel %vm2366_vm7, %v2430_v31, %v2432_v41  ;;  %5833 = vst [vmem:[#allocation17_spill] sm:$0xff] %v5109_v38 }
 0x287   : > { %v1325_v11 = vpop.permute.xlu1 %1324  ;;  %2233 = vrot.lane.b32.xlu0 %v5827_v33, %s3238_s13  ;;  %5831 = vst [vmem:[#allocation73_spill] sm:$0xff] %v5104_v4  ;;  %v5835_v33 = vld [vmem:[#allocation38_spill] sm:$0xff] }
 0x288   : > { %v1403_v45 = vadd.f32 %v1325_v11, %v1187_v54  ;;  %v1733_v25 = vadd.f32 %v5828_v14, %v1550_v27  ;;  %v5832_v54 = vld [vmem:[#allocation90_spill] sm:$0xff] }
 0x289   : > { %v1870_v32 = vpop.permute.xlu0 %1869  ;;  %2231 = vrot.lane.b32.xlu1 %v5829_v16, %s3238_s13 }
 0x28a   : > { %v1951_v26 = vadd.f32 %v1870_v32, %v1733_v25  ;;  %v895_v25 = vpop.f32.mrb[78].mxu1 }
 0x28b   : > { %v1471_v9 = vpop.permute.xlu1 %1470  ;;  %2237 = vrot.lane.b32.xlu0 %v5830_v37, %s3238_s13  ;;  %v3100_v14 = vpop.f32.mrb[79].mxu1  ;;  %v5837_v37 = vld [vmem:[#allocation86_spill] sm:$0xff] }
 0x28c   : > { %v1551_v20 = vadd.f32 %v1471_v9, %v1401_v42  ;;  %v5836_v9 = vld [vmem:[#allocation100_spill] sm:$0xff]  ;;  %v2436_v42 = vrot.slane %v895_v25, 6  ;;  %v900_v16 = vpop.f32.mrb[80].mxu1  ;;  %v5840_v14 = vld [vmem:[#allocation27_spill] sm:$0xff] }
 0x28d   : > { %v2016_v47 = vpop.permute.xlu0 %2015  ;;  %2235 = vrot.lane.b32.xlu1 %v5832_v54, %s3238_s13  ;;  %v2438_v54 = vrot.slane %v900_v16, 6  ;;  %v5842_v16 = vld [vmem:[#allocation92_spill] sm:$0xff] }
 0x28e   : > { %v5111_v27 = vadd.f32 %v2016_v47, %v1949_v62  ;;  %v1734_v10 = vadd.f32 %v5834_v43, %v1551_v20  ;;  %v3103_v62 = vpop.f32.mrb[81].mxu1  ;;  %v5838_v20 = vld [vmem:[#allocation4_spill] sm:$0xff] }
 0x28f   : > { %v1872_v11 = vpop.permute.xlu1 %1871  ;;  %2241 = vrot.lane.b32.xlu0 %v5835_v33, %s3238_s13  ;;  %v903_v43 = vpop.f32.mrb[82].mxu1  ;;  %v5124_v33 = vsel %vm2366_vm7, %v2434_v63, %v2436_v42  ;;  %v5843_v62 = vld [vmem:[#allocation34_spill] sm:$0xff] }
 0x290   : > { %v1952_v31 = vadd.f32 %v1872_v11, %v1734_v10  ;;  %5839 = vst [vmem:[#allocation80_spill] sm:$0xff] %v5124_v33  ;;  %v3104_v10 = vpop.f32.mrb[83].mxu1 }
 0x291   : > { %v1111_v32 = vpop.permute.xlu0 %1110  ;;  %2239 = vrot.lane.b32.xlu1 %v5836_v9, %s3238_s13 }
 0x292   : > { %v1188_v41 = vadd.f32 %v1111_v32, %v5837_v37  ;;  %v5129_v32 = vsel %vm2366_vm7, %v2436_v42, %v2438_v54 }
 0x293   : > { %v2018_v47 = vpop.permute.xlu1 %2017  ;;  %2245 = vrot.lane.b32.xlu0 %v5838_v20, %s3238_s13  ;;  %5841 = vst [vmem:[#allocation18_spill] sm:$0xff] %v5129_v32 }
 0x294   : > { %v5121_v38 = vadd.f32 %v2018_v47, %v1950_v50 }
 0x295   : > { %v1327_v11 = vpop.permute.xlu0 %1326  ;;  %2243 = vrot.lane.b32.xlu1 %v5840_v14, %s3238_s13 }
 0x296   : > { %v1404_v25 = vadd.f32 %v1327_v11, %v1188_v41  ;;  %v5844_v41 = vld [vmem:[#allocation101_spill] sm:$0xff] }
 0x297   : > { %v1113_v9 = vpop.permute.xlu1 %1112  ;;  %2249 = vrot.lane.b32.xlu0 %v4647_v5, %s3238_s13 }
 0x298   : > { %v1189_v37 = vadd.f32 %v1113_v9, %v5842_v16 }
 0x299   : > { %v1473_v50 = vpop.permute.xlu0 %1472  ;;  %2247 = vrot.lane.b32.xlu1 %v5843_v62, %s3238_s13 }
 0x29a   : > { %v1552_v63 = vadd.f32 %v1473_v50, %v1402_v49  ;;  %v5845_v49 = vld [vmem:[#allocation102_spill] sm:$0xff]  ;;  %v5846_v50 = vld [vmem:[#allocation93_spill] sm:$0xff] }
 0x29b   : > { %v1329_v47 = vpop.permute.xlu1 %1328  ;;  %2253 = vrot.lane.b32.xlu0 %v4722_v30, %s3238_s13 }
 0x29c   : > { %v1405_v20 = vadd.f32 %v1329_v47, %v1189_v37  ;;  %v1735_v43 = vadd.f32 %v5844_v41, %v1552_v63 }
 0x29d   : > { %v1874_v42 = vpop.permute.xlu0 %1873  ;;  %2251 = vrot.lane.b32.xlu1 %v4652_v6, %s3238_s13 }
 0x29e   : > { %v1953_v54 = vadd.f32 %v1874_v42, %v1735_v43 }
 0x29f   : > { %v1475_v5 = vpop.permute.xlu1 %1474 }
 0x2a0   : > { %v1553_v10 = vadd.f32 %v1475_v5, %v1403_v45  ;;  %v5847_v45 = vld [vmem:[#allocation2_spill] sm:$0xff] }
 0x2a1   : > { %v2020_v11 = vpop.permute.xlu0 %2019  ;;  %2255 = vrot.lane.b32.xlu1 %v4730_v39, %s3238_s13 }
 0x2a2   : > { %v5143_v14 = vadd.f32 %v2020_v11, %v1951_v26  ;;  %v1736_v9 = vadd.f32 %v5845_v49, %v1553_v10  ;;  %v5848_v11 = vld [vmem:[#allocation103_spill] sm:$0xff] }
 0x2a3   : > { %v1876_v16 = vpop.permute.xlu1 %1875 }
 0x2a4   : > { %v1954_v30 = vadd.f32 %v1876_v16, %v1736_v9 }
 0x2a5   : > { %v1115_v37 = vpop.permute.xlu0 %1114 }
 0x2a6   : > { %v1190_v62 = vadd.f32 %v1115_v37, %v5846_v50 }
 0x2a7   : > { %v2022_v63 = vpop.permute.xlu1 %2021 }
 0x2a8   : > { %v5147_v47 = vadd.f32 %v2022_v63, %v1952_v31  ;;  %v5849_v31 = vld [vmem:[#allocation104_spill] sm:$0xff] }
 0x2a9   : > { %v1331_v6 = vpop.permute.xlu0 %1330 }
 0x2aa   : > { %v1406_v41 = vadd.f32 %v1331_v6, %v1190_v62 }
 0x2ab   : > { %v1117_v43 = vpop.permute.xlu1 %1116 }
 0x2ac   : > { %v1191_v42 = vadd.f32 %v1117_v43, %v5847_v45  ;;  %v5850_v43 = vld [vmem:[#allocation16_spill] sm:$0xff] }
 0x2ad   : > { %v1477_v5 = vpop.permute.xlu0 %1476 }
 0x2ae   : > { %v1554_v32 = vadd.f32 %v1477_v5, %v1404_v25 }
 0x2af   : > { %v1333_v39 = vpop.permute.xlu1 %1332 }
 0x2b0   : > { %v1407_v26 = vadd.f32 %v1333_v39, %v1191_v42  ;;  %v1737_v33 = vadd.f32 %v5848_v11, %v1554_v32 }
 0x2b1   : > { %v1878_v10 = vpop.permute.xlu0 %1877 }
 0x2b2   : > { %v1955_v49 = vadd.f32 %v1878_v10, %v1737_v33 }
 0x2b3   : > { %v1479_v9 = vpop.permute.xlu1 %1478 }
 0x2b4   : > { %v1555_v16 = vadd.f32 %v1479_v9, %v1405_v20 }
 0x2b5   : > { %v2024_v4 = vpop.permute.xlu0 %2023 }
 0x2b6   : > { %v5151_v37 = vadd.f32 %v2024_v4, %v1953_v54  ;;  %v1738_v50 = vadd.f32 %v5849_v31, %v1555_v16  ;;  %v5851_v54 = vld [vmem:[#allocation42_spill] sm:$0xff] }
 0x2b7   : > { %v1121_v63 = vpop.permute.xlu1 %1120 }
 0x2b8   : > { %v1193_v62 = vadd.f32 %v1121_v63, %v4459_v21 }
 0x2b9   : > { %v1119_v6 = vpop.permute.xlu0 %1118 }
 0x2ba   : > { %v1192_v45 = vadd.f32 %v1119_v6, %v5850_v43 }
 0x2bb   : > { %v1337_v25 = vpop.permute.xlu1 %1336 }
 0x2bc   : > { %v1409_v5 = vadd.f32 %v1337_v25, %v1193_v62 }
 0x2bd   : > { %v1335_v42 = vpop.permute.xlu0 %1334 }
 0x2be   : > { %v1408_v39 = vadd.f32 %v1335_v42, %v1192_v45 }
 0x2bf   : > { %v1880_v32 = vpop.permute.xlu1 %1879 }
 0x2c0   : > { %v5156_v11 = vadd.f32 %v1880_v32, %v1738_v50 }
 0x2c1   : > { %v1481_v33 = vpop.permute.xlu0 %1480 }
 0x2c2   : > { %v1556_v20 = vadd.f32 %v1481_v33, %v1406_v41  ;;  %v5852_v33 = vld [vmem:[#allocation5_spill] sm:$0xff] }
 0x2c3   : > { %v2026_v10 = vpop.permute.xlu1 %2025 }
 0x2c4   : > { %v5158_v4 = vadd.f32 %v2026_v10, %v1954_v30  ;;  %v1739_v9 = vadd.f32 %v5851_v54, %v1556_v20 }
 0x2c5   : > { %v1882_v16 = vpop.permute.xlu0 %1881 }
 0x2c6   : > { %v5161_v31 = vadd.f32 %v1882_v16, %v1739_v9 }
 0x2c7   : > { %v1483_v21 = vpop.permute.xlu1 %1482 }
 0x2c8   : > { %v1557_v63 = vadd.f32 %v1483_v21, %v1407_v26 }
 0x2c9   : > { %v2028_v6 = vpop.permute.xlu0 %2027 }
 0x2ca   : > { %v5163_v43 = vadd.f32 %v2028_v6, %v1955_v49  ;;  %v1740_v62 = vadd.f32 %v4550_v46, %v1557_v63  ;;  %v1936_v46 = vadd.f32 %v4732_v51, %v4727_v52 }
 0x2cb   : > { %v1487_v45 = vpop.permute.xlu1 %1486 }
 0x2cc   : > { %v1559_v50 = vadd.f32 %v1487_v45, %v1409_v5  ;;  %v5853_v5 = vld [vmem:[#allocation11_spill] sm:$0xff]  ;;  %v5854_v45 = vrot.slane %v4866_v57, 6 }
 0x2cd   : > { %v1485_v25 = vpop.permute.xlu0 %1484 }
 0x2ce   : > { %v1558_v42 = vadd.f32 %v1485_v25, %v1408_v39  ;;  %v5167_v41 = vadd.f32 %v4663_v60, %v1559_v50  ;;  %v1935_v39 = vadd.f32 %v5853_v5, %v4700_v40  ;;  %v2086_v60 = vadd.f32 %v4801_v0, %v1936_v46  ;;  %v5195_v40 = vld [vmem:[%s5469_s2] ss:$0 sm:$0xff] }
 0x2cf   : > { %v1884_v30 = vpop.permute.xlu1 %1883  ;;  %v5855_v50 = vrot.slane %v4109_v2, 6  ;;  %v1939_v46 = vadd.f32 %v4824_v56, %v4822_v12  ;;  %v1941_v12 = vadd.f32 %v4860_v3, %v4858_v7 }
 0x2d0   : > { %v5169_v32 = vadd.f32 %v1884_v30, %v1740_v62  ;;  %v1741_v20 = vadd.f32 %v5852_v33, %v1558_v42  ;;  %v2085_v16 = vadd.f32 %v4786_v55, %v1935_v39  ;;  %v1938_v30 = vadd.f32 %v4793_v29, %v4791_v19 }
 0x2d1   : > { %v1886_v10 = vpop.permute.xlu0 %1885  ;;  %v2389_v52 = vsel %vm2366_vm7, %v5855_v50, %v5854_v45  ;;  %v2089_v39 = vadd.f32 %v4868_v23, %v1939_v46  ;;  %v5859_v45 = vld [vmem:[#allocation58_spill] sm:$0xff]  ;;  %v5861_v46 = vld [vmem:[#allocation48_spill] sm:$0xff] }
 0x2d2   : > { %v5172_v54 = vadd.f32 %v1886_v10, %v1741_v20  ;;  %v2088_v5 = vadd.f32 %v4843_v1, %v1938_v30  ;;  %v5856_v1 = vld [vmem:[#allocation47_spill] sm:$0xff]  ;;  %v2091_v50 = vadd.f32 %v5859_v45, %v1941_v12 }
 0x2d3   : > { %v5174_v26 = vpop.permute.xlu1 %2029 }
 0x2d5   : > { %v5178_v49 = vpop.permute.xlu0 %2031 }
 0x2d7   : > { %v2208_v9 = vpop.permute.xlu1 %2207 }
 0x2d8   : > { %v2304_v21 = vadd.f32 %v2208_v9, %v2086_v60 }
 0x2d9   : > { %v2206_v63 = vpop.permute.xlu0 %2205 }
 0x2da   : > { %v2487_v6 = vadd.f32 %v4889_v53, %v2304_v21  ;;  %v2303_v62 = vadd.f32 %v2206_v63, %v2085_v16  ;;  %v1937_v53 = vadd.f32 %v4779_v36, %v4777_v61  ;;  %v5857_v21 = vld [vmem:[#allocation14_spill] sm:$0xff] }
 0x2db   : > { %v5190_v51 = vpop.permute.xlu1 %1887  ;;  %v1940_v63 = vadd.f32 %v5857_v21, %v5856_v1  ;;  %v5864_v1 = vld [vmem:[#allocation8_spill] sm:$0xff] }
 0x2dc   : > { %v2530_v55 = vadd.f32 %v5195_v40, %v2487_v6  ;;  %v2486_v0 = vadd.f32 %v2389_v52, %v2303_v62  ;;  %v2087_v33 = vadd.f32 %v4830_v35, %v1937_v53  ;;  %v5858_v6 = vld [vmem:[#allocation7_spill] sm:$0xff] }
 0x2dd   : > { %v5198_v25 = vpop.permute.xlu0 %2035 }
 0x2de   : > { %v2602_v57 = vmul.f32 0.70710677, %v2530_v55  ;;  %v2529_v2 = vadd.f32 %v5195_v40, %v2486_v0  ;;  %v2566_v3 = vmul.f32 0.5, %v2530_v55  ;;  %v5865_v55 = vld [vmem:[#allocation52_spill] sm:$0xff] }
 0x2df   : > { %v5203_v42 = vpop.permute.xlu1 %2033 }
 0x2e0   : > { %3170 = verf.f32 %v2602_v57  ;;  %v2601_v20 = vmul.f32 0.70710677, %v2529_v2 }
 0x2e1   : > { %v2210_v10 = vpop.permute.xlu0 %2209 }
 0x2e2   : > { %3172 = verf.f32 %v2601_v20  ;;  %v2305_v61 = vadd.f32 %v2210_v10, %v2087_v33 }
 0x2e3   : > { %v2212_v36 = vpop.permute.xlu1 %2211 }
 0x2e4   : > { %v2488_v60 = vadd.f32 %v4903_v59, %v2305_v61  ;;  %v2306_v9 = vadd.f32 %v2212_v36, %v2088_v5  ;;  %v5862_v5 = vld [vmem:[#allocation49_spill] sm:$0xff] }
 0x2e5   : > { %v2214_v16 = vpop.permute.xlu0 %2213  ;;  %v1942_v61 = vadd.f32 %v5862_v5, %v5861_v46  ;;  %v5269_v5 = vadd.f32 %v5190_v51, %v5167_v41 }
 0x2e6   : > { %v5214_v19 = vadd.f32 %v5195_v40, %v2488_v60  ;;  %v2489_v29 = vadd.f32 %v4906_v15, %v2306_v9  ;;  %v2307_v35 = vadd.f32 %v2214_v16, %v2089_v39  ;;  %v5860_v15 = vld [vmem:[#allocation56_spill] sm:$0xff]  ;;  %v2565_v9 = vmul.f32 0.5, %v2529_v2 }
 0x2e7   : > { %v5219_v56 = vpop.permute.xlu1 %2037  ;;  %v2090_v53 = vadd.f32 %v5860_v15, %v1940_v63  ;;  %v2092_v21 = vadd.f32 %v5864_v1, %v1942_v61 }
 0x2e8   : > { %v2603_v23 = vmul.f32 0.70710677, %v5214_v19  ;;  %v2532_v59 = vadd.f32 %v5195_v40, %v2489_v29  ;;  %v2490_v62 = vadd.f32 %v5858_v6, %v2307_v35  ;;  %v5863_v29 = vld [vmem:[#allocation15_spill] sm:$0xff]  ;;  %v5241_v6 = vld [vmem:[%s5470_s3] ss:$0 sm:$0xff] }
 0x2e9   : > { %v2218_v52 = vpop.permute.xlu0 %2217 }
 0x2ea   : > { %v3171_v0 = vpop.eup %3170  ;;  %3174 = verf.f32 %v2603_v23  ;;  %v2604_v57 = vmul.f32 0.70710677, %v2532_v59  ;;  %v5229_v7 = vadd.f32 %v5195_v40, %v2490_v62  ;;  %v2309_v33 = vadd.f32 %v2218_v52, %v2091_v50 }
 0x2eb   : > { %v2674_v30 = vadd.f32 1.0, %v3171_v0  ;;  %v2216_v20 = vpop.permute.xlu1 %2215 }
 0x2ec   : > { %v3173_v10 = vpop.eup %3172  ;;  %3176 = verf.f32 %v2604_v57  ;;  %v2605_v36 = vmul.f32 0.70710677, %v5229_v7  ;;  %v2308_v39 = vadd.f32 %v2216_v20, %v2090_v53  ;;  %v2492_v35 = vadd.f32 %v5863_v29, %v2309_v33  ;;  %v5254_v53 = vld [vmem:[%s5471_s4] ss:$0 sm:$0xff] }
 0x2ed   : > { %v2710_v60 = vmul.f32 %v2674_v30, %v2566_v3  ;;  %v2673_v16 = vadd.f32 1.0, %v3173_v10  ;;  %v2222_v12 = vpop.permute.xlu0 %2221 }
 0x2ee   : > { %3178 = verf.f32 %v2605_v36  ;;  %v2491_v63 = vadd.f32 %v5865_v55, %v2308_v39  ;;  %v2311_v23 = vadd.f32 %v2222_v12, %v4972_v24  ;;  %v2535_v2 = vadd.f32 %v5195_v40, %v2492_v35 }
 0x2ef   : > { %v2753_v62 = vmul.f32 %v5241_v6, %v2710_v60  ;;  %v2709_v45 = vmul.f32 %v2673_v16, %v2565_v9  ;;  %v2220_v50 = vpop.permute.xlu1 %2219  ;;  %v5249_v24 = vadd.f32 %v5174_v26, %v5156_v11  ;;  %v5866_v26 = vld [vmem:[#allocation19_spill] sm:$0xff]  ;;  %v2567_v9 = vmul.f32 0.5, %v5214_v19 }
 0x2f0   : > { %v2534_v52 = vadd.f32 %v5195_v40, %v2491_v63  ;;  %v2494_v0 = vadd.f32 %v4965_v18, %v2311_v23  ;;  %v2310_v15 = vadd.f32 %v2220_v50, %v2092_v21  ;;  %v2607_v30 = vmul.f32 0.70710677, %v2535_v2 }
 0x2f1   : > { %v2796_v57 = vadd.f32 %v5254_v53, %v2753_v62  ;;  %v2752_v3 = vmul.f32 %v5241_v6, %v2709_v45  ;;  %v2226_v33 = vpop.permute.xlu0 %2225  ;;  %v5260_v18 = vadd.f32 %v5178_v49, %v5161_v31  ;;  %v5274_v31 = vadd.f32 %v5198_v25, %v5172_v54 }
 0x2f2   : > { %v2606_v20 = vmul.f32 0.70710677, %v2534_v52  ;;  %v2537_v11 = vadd.f32 %v5195_v40, %v2494_v0  ;;  %v2493_v10 = vadd.f32 %v5866_v26, %v2310_v15  ;;  %3180 = verf.f32 %v2607_v30 }
 0x2f3   : > { %2832 = vst.msk [vmem:[%s4373_s25 + $0x58] sm:$0xff] %vm410_vm1, %v2796_v57  ;;  %v2795_v46 = vadd.f32 %v5254_v53, %v2752_v3  ;;  %v2313_v61 = vadd.f32 %v2226_v33, %v5023_v34  ;;  %v2224_v36 = vpop.permute.xlu1 %2223  ;;  %v2568_v35 = vmul.f32 0.5, %v2532_v59  ;;  %v2569_v23 = vmul.f32 0.5, %v5229_v7 }
 0x2f4   : > { %v3175_v39 = vpop.eup %3174  ;;  %3182 = verf.f32 %v2606_v20  ;;  %v2609_v49 = vmul.f32 0.70710677, %v2537_v11  ;;  %v2536_v60 = vadd.f32 %v5195_v40, %v2493_v10  ;;  %v2312_v51 = vadd.f32 %v2224_v36, %v4990_v17 }
 0x2f5   : > { %2831 = vst.msk [vmem:[%s4373_s25 + $0x50] sm:$0xff] %vm410_vm1, %v2795_v46  ;;  %v2675_v16 = vadd.f32 1.0, %v3175_v39  ;;  %v2496_v41 = vadd.f32 %v4985_v22, %v2313_v61  ;;  %v2230_v34 = vpop.permute.xlu0 %2229  ;;  %v2570_v33 = vmul.f32 0.5, %v2534_v52 }
 0x2f6   : > { %v3177_v29 = vpop.eup %3176  ;;  %3184 = verf.f32 %v2609_v49  ;;  %v2608_v12 = vmul.f32 0.70710677, %v2536_v60  ;;  %v2315_v54 = vadd.f32 %v2230_v34, %v5068_v44  ;;  %v2495_v55 = vadd.f32 %v4968_v58, %v2312_v51 }
 0x2f7   : > { %v2711_v25 = vmul.f32 %v2675_v16, %v2567_v9  ;;  %v2676_v1 = vadd.f32 1.0, %v3177_v29  ;;  %v2539_v21 = vadd.f32 %v5195_v40, %v2496_v41  ;;  %v2228_v63 = vpop.permute.xlu1 %2227  ;;  %v2571_v44 = vmul.f32 0.5, %v2535_v2 }
 0x2f8   : > { %v3179_v19 = vpop.eup %3178  ;;  %3186 = verf.f32 %v2608_v12  ;;  %v2498_v22 = vadd.f32 %v5007_v8, %v2315_v54  ;;  %v2314_v17 = vadd.f32 %v2228_v63, %v5040_v28  ;;  %v2538_v15 = vadd.f32 %v5195_v40, %v2495_v55  ;;  %v5868_v54 = vld [vmem:[#allocation65_spill] sm:$0xff] }
 0x2f9   : > { %v2754_v59 = vmul.f32 %v5241_v6, %v2711_v25  ;;  %v2712_v62 = vmul.f32 %v2676_v1, %v2568_v35  ;;  %v2677_v45 = vadd.f32 1.0, %v3179_v19  ;;  %v2234_v50 = vpop.permute.xlu0 %2233  ;;  %v2611_v0 = vmul.f32 0.70710677, %v2539_v21 }
 0x2fa   : > { %v5291_v58 = vadd.f32 %v5195_v40, %v2498_v22  ;;  %v2497_v7 = vadd.f32 %v4988_v13, %v2314_v17  ;;  %v2317_v3 = vadd.f32 %v2234_v50, %v5111_v27  ;;  %v2573_v2 = vmul.f32 0.5, %v2537_v11  ;;  %v5867_v11 = vld [vmem:[#allocation71_spill] sm:$0xff] }
 0x2fb   : > { %v2797_v57 = vadd.f32 %v5254_v53, %v2754_v59  ;;  %v2755_v8 = vmul.f32 %v5241_v6, %v2712_v62  ;;  %v2713_v28 = vmul.f32 %v2677_v45, %v2569_v23  ;;  %v2232_v30 = vpop.permute.xlu1 %2231  ;;  %3188 = verf.f32 %v2611_v0 }
 0x2fc   : > { %v2610_v20 = vmul.f32 0.70710677, %v2538_v15  ;;  %v3181_v26 = vpop.eup %3180  ;;  %v2613_v46 = vmul.f32 0.70710677, %v5291_v58  ;;  %v2540_v61 = vadd.f32 %v5195_v40, %v2497_v7  ;;  %v2500_v52 = vadd.f32 %v5029_v48, %v2317_v3  ;;  %v5870_v7 = vld [vmem:[#allocation60_spill] sm:$0xff] }
 0x2fd   : > { %2833 = vst.msk [vmem:[%s4373_s25 + $0x60] sm:$0xff] %vm410_vm1, %v2797_v57  ;;  %v2798_v10 = vadd.f32 %v5254_v53, %v2755_v8  ;;  %v2756_v13 = vmul.f32 %v5241_v6, %v2713_v28  ;;  %v2238_v36 = vpop.permute.xlu0 %2237  ;;  %v2679_v27 = vadd.f32 1.0, %v3181_v26  ;;  %v2316_v49 = vadd.f32 %v2232_v30, %v5867_v11 }
 0x2fe   : > { %v3183_v39 = vpop.eup %3182  ;;  %3190 = verf.f32 %v2610_v20  ;;  %v2572_v41 = vmul.f32 0.5, %v2536_v60  ;;  %v2612_v35 = vmul.f32 0.70710677, %v2540_v61  ;;  %v5309_v12 = vadd.f32 %v5195_v40, %v2500_v52 }
 0x2ff   : > { %2834 = vst.msk [vmem:[%s4373_s25 + $0x68] sm:$0xff] %vm410_vm1, %v2798_v10  ;;  %v2799_v9 = vadd.f32 %v5254_v53, %v2756_v13  ;;  %v2678_v16 = vadd.f32 1.0, %v3183_v39  ;;  %3192 = verf.f32 %v2613_v46  ;;  %v2236_v51 = vpop.permute.xlu1 %2235  ;;  %v2715_v29 = vmul.f32 %v2679_v27, %v2571_v44 }
 0x300   : > { %v3185_v34 = vpop.eup %3184  ;;  %v2499_v25 = vadd.f32 %v5868_v54, %v2316_v49  ;;  %v2319_v55 = vadd.f32 %v2238_v36, %v5143_v14  ;;  %v2318_v63 = vadd.f32 %v2236_v51, %v5121_v38  ;;  %v2575_v22 = vmul.f32 0.5, %v2539_v21  ;;  %v5869_v38 = vld [vmem:[#allocation12_spill] sm:$0xff] }
 0x301   : > { %2835 = vst.msk [vmem:[%s4373_s25 + $0x70] sm:$0xff] %vm410_vm1, %v2799_v9  ;;  %v2714_v48 = vmul.f32 %v2678_v16, %v2570_v33  ;;  %v2681_v1 = vadd.f32 1.0, %v3185_v34  ;;  %v2242_v19 = vpop.permute.xlu0 %2241  ;;  %v2758_v23 = vmul.f32 %v5241_v6, %v2715_v29  ;;  %3194 = verf.f32 %v2612_v35  ;;  %v5871_v34 = vld [vmem:[#allocation13_spill] sm:$0xff]  ;;  %v5872_v35 = vld [vmem:[#allocation66_spill] sm:$0xff] }
 0x302   : > { %v3187_v60 = vpop.eup %3186  ;;  %v2615_v17 = vmul.f32 0.70710677, %v5309_v12  ;;  %v2542_v44 = vadd.f32 %v5195_v40, %v2499_v25  ;;  %v2502_v0 = vadd.f32 %v5869_v38, %v2319_v55  ;;  %v2501_v57 = vadd.f32 %v5870_v7, %v2318_v63 }
 0x303   : > { %v2757_v59 = vmul.f32 %v5241_v6, %v2714_v48  ;;  %v2717_v62 = vmul.f32 %v2681_v1, %v2573_v2  ;;  %v2680_v45 = vadd.f32 1.0, %v3187_v60  ;;  %v2240_v50 = vpop.permute.xlu1 %2239  ;;  %v2801_v14 = vadd.f32 %v5254_v53, %v2758_v23 }
 0x304   : > { %3196 = verf.f32 %v2615_v17  ;;  %v2574_v3 = vmul.f32 0.5, %v2538_v15  ;;  %v2614_v33 = vmul.f32 0.70710677, %v2542_v44  ;;  %v5328_v2 = vadd.f32 %v5195_v40, %v2502_v0 }
 0x305   : > { %v2800_v21 = vadd.f32 %v5254_v53, %v2757_v59  ;;  %v2760_v8 = vmul.f32 %v5241_v6, %v2717_v62  ;;  %v2716_v28 = vmul.f32 %v2680_v45, %v2572_v41  ;;  %v3189_v30 = vpop.eup %3188  ;;  %2837 = vst.msk [vmem:[%s4373_s25 + $0x80] sm:$0xff] %vm410_vm1, %v2801_v14  ;;  %v5331_v20 = vadd.f32 %v5195_v40, %v2501_v57  ;;  %v2246_v36 = vpop.permute.xlu0 %2245  ;;  %v5873_v59 = vld [vmem:[#allocation23_spill] sm:$0xff] }
 0x306   : > { %v2321_v26 = vadd.f32 %v2242_v19, %v5151_v37  ;;  %v2683_v15 = vadd.f32 1.0, %v3189_v30  ;;  %v2320_v46 = vadd.f32 %v2240_v50, %v5147_v47  ;;  %v2577_v52 = vmul.f32 0.5, %v5291_v58 }
 0x307   : > { %2836 = vst.msk [vmem:[%s4373_s25 + $0x78] sm:$0xff] %vm410_vm1, %v2800_v21  ;;  %v2803_v10 = vadd.f32 %v5254_v53, %v2760_v8  ;;  %v2759_v13 = vmul.f32 %v5241_v6, %v2716_v28  ;;  %v2244_v39 = vpop.permute.xlu1 %2243  ;;  %v2576_v11 = vmul.f32 0.5, %v2540_v61  ;;  %3198 = verf.f32 %v2614_v33 }
 0x308   : > { %v3191_v27 = vpop.eup %3190  ;;  %v2617_v49 = vmul.f32 0.70710677, %v5328_v2  ;;  %v2719_v16 = vmul.f32 %v2683_v15, %v2575_v22  ;;  %v2616_v51 = vmul.f32 0.70710677, %v5331_v20  ;;  %v2504_v29 = vadd.f32 %v5871_v34, %v2321_v26 }
 0x309   : > { %v3193_v37 = vpop.eup %3192  ;;  %2839 = vst.msk [vmem:[%s4373_s25 + $0x90] sm:$0xff] %vm410_vm1, %v2803_v10  ;;  %v2802_v9 = vadd.f32 %v5254_v53, %v2759_v13  ;;  %v2682_v41 = vadd.f32 1.0, %v3191_v27  ;;  %v2503_v54 = vadd.f32 %v5872_v35, %v2320_v46  ;;  %v2323_v25 = vadd.f32 %v2246_v36, %v5163_v43  ;;  %v2250_v43 = vpop.permute.xlu0 %2249 }
 0x30a   : > { %v2685_v47 = vadd.f32 1.0, %v3193_v37  ;;  %3200 = verf.f32 %v2617_v49  ;;  %v2762_v58 = vmul.f32 %v5241_v6, %v2719_v16  ;;  %v5352_v63 = vadd.f32 %v5195_v40, %v2504_v29  ;;  %v5876_v16 = vld [vmem:[#allocation72_spill] sm:$0xff] }
 0x30b   : > { %2838 = vst.msk [vmem:[%s4373_s25 + $0x88] sm:$0xff] %vm410_vm1, %v2802_v9  ;;  %v2718_v61 = vmul.f32 %v2682_v41, %v2574_v3  ;;  %3202 = verf.f32 %v2616_v51  ;;  %v2248_v48 = vpop.permute.xlu1 %2247  ;;  %v3195_v1 = vpop.eup %3194  ;;  %v5355_v19 = vadd.f32 %v5195_v40, %v2503_v54  ;;  %v2322_v60 = vadd.f32 %v2244_v39, %v5158_v4  ;;  %v5874_v3 = vld [vmem:[#allocation20_spill] sm:$0xff] }
 0x30c   : > { %v2721_v55 = vmul.f32 %v2685_v47, %v2577_v52  ;;  %v2805_v23 = vadd.f32 %v5254_v53, %v2762_v58  ;;  %v2684_v17 = vadd.f32 1.0, %v3195_v1  ;;  %v2506_v62 = vadd.f32 %v5873_v59, %v2323_v25 }
 0x30d   : > { %v2761_v22 = vmul.f32 %v5241_v6, %v2718_v61  ;;  %v2579_v14 = vmul.f32 0.5, %v5309_v12  ;;  %v2578_v38 = vmul.f32 0.5, %v2542_v44  ;;  %v2619_v0 = vmul.f32 0.70710677, %v5352_v63  ;;  %v2254_v49 = vpop.permute.xlu0 %2253 }
 0x30e   : > { %v3197_v45 = vpop.eup %3196  ;;  %v2764_v50 = vmul.f32 %v5241_v6, %v2721_v55  ;;  %2841 = vst.msk [vmem:[%s4373_s25 + $0xa0] sm:$0xff] %vm410_vm1, %v2805_v23  ;;  %v2720_v7 = vmul.f32 %v2684_v17, %v2576_v11  ;;  %v2618_v21 = vmul.f32 0.70710677, %v5355_v19  ;;  %v5370_v28 = vadd.f32 %v5195_v40, %v2506_v62 }
 0x30f   : > { %v2804_v4 = vadd.f32 %v5254_v53, %v2761_v22  ;;  %v2687_v57 = vadd.f32 1.0, %v3197_v45  ;;  %3204 = verf.f32 %v2619_v0  ;;  %v2505_v12 = vadd.f32 %v5874_v3, %v2322_v60  ;;  %v2252_v26 = vpop.permute.xlu1 %2251  ;;  %v5877_v22 = vld [vmem:[#allocation80_spill] sm:$0xff] }
 0x310   : > { %v2807_v8 = vadd.f32 %v5254_v53, %v2764_v50  ;;  %v2763_v44 = vmul.f32 %v5241_v6, %v2720_v7  ;;  %3206 = verf.f32 %v2618_v21  ;;  %v2325_v33 = vadd.f32 %v2250_v43, %v5260_v18  ;;  %v5875_v18 = vld [vmem:[#allocation73_spill] sm:$0xff] }
 0x311   : > { %2840 = vst.msk [vmem:[%s4373_s25 + $0x98] sm:$0xff] %vm410_vm1, %v2804_v4  ;;  %v2723_v30 = vmul.f32 %v2687_v57, %v2579_v14  ;;  %v3199_v10 = vpop.eup %3198  ;;  %v2581_v13 = vmul.f32 0.5, %v5328_v2  ;;  %v2621_v15 = vmul.f32 0.70710677, %v5370_v28  ;;  %v5382_v46 = vadd.f32 %v5195_v40, %v2505_v12  ;;  %v5879_v12 = vld [vmem:[#allocation18_spill] sm:$0xff] }
 0x312   : > { %2843 = vst.msk [vmem:[%s4373_s25 + $0xb0] sm:$0xff] %vm410_vm1, %v2807_v8  ;;  %v2324_v36 = vadd.f32 %v2248_v48, %v5249_v24  ;;  %v2806_v39 = vadd.f32 %v5254_v53, %v2763_v44  ;;  %v2686_v52 = vadd.f32 1.0, %v3199_v10  ;;  %v2508_v11 = vadd.f32 %v5875_v18, %v2325_v33 }
 0x313   : > { %v2766_v27 = vmul.f32 %v5241_v6, %v2723_v30  ;;  %v2580_v9 = vmul.f32 0.5, %v5331_v20  ;;  %3208 = verf.f32 %v2621_v15  ;;  %v2620_v2 = vmul.f32 0.70710677, %v5382_v46  ;;  %v2256_v1 = vpop.permute.xlu1 %2255 }
 0x314   : > { %v3201_v37 = vpop.eup %3200  ;;  %v2507_v41 = vadd.f32 %v5876_v16, %v2324_v36  ;;  %2842 = vst.msk [vmem:[%s4373_s25 + $0xa8] sm:$0xff] %vm410_vm1, %v2806_v39  ;;  %v2722_v47 = vmul.f32 %v2686_v52, %v2578_v38  ;;  %v2551_v29 = vadd.f32 %v5195_v40, %v2508_v11  ;;  %v2327_v20 = vadd.f32 %v2254_v49, %v5274_v31  ;;  %v5878_v38 = vld [vmem:[#allocation17_spill] sm:$0xff] }
 0x315   : > { %v3203_v51 = vpop.eup %3202  ;;  %v2809_v24 = vadd.f32 %v5254_v53, %v2766_v27  ;;  %v2689_v34 = vadd.f32 1.0, %v3201_v37  ;;  %3210 = verf.f32 %v2620_v2  ;;  %v2108_v58 = vadd.f32 %v5203_v42, %v5169_v32 }
 0x316   : > { %v2688_v35 = vadd.f32 1.0, %v3203_v51  ;;  %v5396_v54 = vadd.f32 %v5195_v40, %v2507_v41  ;;  %v2765_v61 = vmul.f32 %v5241_v6, %v2722_v47  ;;  %v2623_v48 = vmul.f32 0.70710677, %v2551_v29 }
 0x317   : > { %2845 = vst.msk [vmem:[%s4373_s25 + $0xc0] sm:$0xff] %vm410_vm1, %v2809_v24  ;;  %v2725_v25 = vmul.f32 %v2689_v34, %v2581_v13  ;;  %v2110_v55 = vadd.f32 %v5219_v56, %v5269_v5  ;;  %v2510_v17 = vadd.f32 %v5877_v22, %v2327_v20  ;;  %v2326_v42 = vadd.f32 %v2252_v26, %v2108_v58 }
 0x318   : > { %v2724_v60 = vmul.f32 %v2688_v35, %v2580_v9  ;;  %v2622_v23 = vmul.f32 0.70710677, %v5396_v54  ;;  %v2808_v31 = vadd.f32 %v5254_v53, %v2765_v61  ;;  %3212 = verf.f32 %v2623_v48 }
 0x319   : > { %v2768_v32 = vmul.f32 %v5241_v6, %v2725_v25  ;;  %v3205_v59 = vpop.eup %3204  ;;  %v2553_v43 = vadd.f32 %v5195_v40, %v2510_v17  ;;  %v2328_v45 = vadd.f32 %v2256_v1, %v2110_v55  ;;  %v2583_v50 = vmul.f32 0.5, %v5352_v63 }
 0x31a   : > { %v2767_v62 = vmul.f32 %v5241_v6, %v2724_v60  ;;  %3214 = verf.f32 %v2622_v23  ;;  %v3207_v56 = vpop.eup %3206  ;;  %2844 = vst.msk [vmem:[%s4373_s25 + $0xb8] sm:$0xff] %vm410_vm1, %v2808_v31  ;;  %v2691_v14 = vadd.f32 1.0, %v3205_v59  ;;  %v2509_v0 = vadd.f32 %v5878_v38, %v2326_v42 }
 0x31b   : > { %v2811_v5 = vadd.f32 %v5254_v53, %v2768_v32  ;;  %v2582_v7 = vmul.f32 0.5, %v5355_v19  ;;  %v2690_v57 = vadd.f32 1.0, %v3207_v56  ;;  %v2625_v21 = vmul.f32 0.70710677, %v2553_v43 }
 0x31c   : > { %v2810_v4 = vadd.f32 %v5254_v53, %v2767_v62  ;;  %v2727_v8 = vmul.f32 %v2691_v14, %v2583_v50  ;;  %v2552_v3 = vadd.f32 %v5195_v40, %v2509_v0  ;;  %v2511_v44 = vadd.f32 %v5879_v12, %v2328_v45 }
 0x31d   : > { %2847 = vst.msk [vmem:[%s4373_s25 + $0xd0] sm:$0xff] %vm410_vm1, %v2811_v5  ;;  %v3209_v30 = vpop.eup %3208  ;;  %v2726_v63 = vmul.f32 %v2690_v57, %v2582_v7  ;;  %3216 = verf.f32 %v2625_v21  ;;  %v2585_v26 = vmul.f32 0.5, %v5370_v28  ;;  %v2584_v36 = vmul.f32 0.5, %v5382_v46 }
 0x31e   : > { %2846 = vst.msk [vmem:[%s4373_s25 + $0xc8] sm:$0xff] %vm410_vm1, %v2810_v4  ;;  %v2770_v33 = vmul.f32 %v5241_v6, %v2727_v8  ;;  %v2693_v19 = vadd.f32 1.0, %v3209_v30  ;;  %v2624_v10 = vmul.f32 0.70710677, %v2552_v3  ;;  %v2554_v39 = vadd.f32 %v5195_v40, %v2511_v44 }
 0x31f   : > { %v3211_v13 = vpop.eup %3210  ;;  %v2769_v15 = vmul.f32 %v5241_v6, %v2726_v63  ;;  %v2587_v40 = vmul.f32 0.5, %v2551_v29  ;;  %v2586_v51 = vmul.f32 0.5, %v5396_v54  ;;  %v2589_v61 = vmul.f32 0.5, %v2553_v43 }
 0x320   : > { %v2813_v27 = vadd.f32 %v5254_v53, %v2770_v33  ;;  %v2729_v52 = vmul.f32 %v2693_v19, %v2585_v26  ;;  %v2692_v18 = vadd.f32 1.0, %v3211_v13  ;;  %3218 = verf.f32 %v2624_v10 }
 0x321   : > { %v2812_v11 = vadd.f32 %v5254_v53, %v2769_v15  ;;  %v2626_v49 = vmul.f32 0.70710677, %v2554_v39  ;;  %v2588_v60 = vmul.f32 0.5, %v2552_v3  ;;  %v2590_v42 = vmul.f32 0.5, %v2554_v39 }
 0x322   : > { %v3213_v28 = vpop.eup %3212  ;;  %2849 = vst.msk [vmem:[%s4373_s25 + $0xe0] sm:$0xff] %vm410_vm1, %v2813_v27  ;;  %v2772_v37 = vmul.f32 %v5241_v6, %v2729_v52  ;;  %v2728_v9 = vmul.f32 %v2692_v18, %v2584_v36 }
 0x323   : > { %2848 = vst.msk [vmem:[%s4373_s25 + $0xd8] sm:$0xff] %vm410_vm1, %v2812_v11  ;;  %v2695_v46 = vadd.f32 1.0, %v3213_v28  ;;  %3220 = verf.f32 %v2626_v49 }
 0x324   : > { %v3215_v2 = vpop.eup %3214  ;;  %v2815_v16 = vadd.f32 %v5254_v53, %v2772_v37  ;;  %v2771_v41 = vmul.f32 %v5241_v6, %v2728_v9 }
 0x325   : > { %v2694_v24 = vadd.f32 1.0, %v3215_v2  ;;  %v2731_v47 = vmul.f32 %v2695_v46, %v2587_v40 }
 0x326   : > { %2851 = vst.msk [vmem:[%s4373_s25 + $0xf0] sm:$0xff] %vm410_vm1, %v2815_v16  ;;  %v2814_v34 = vadd.f32 %v5254_v53, %v2771_v41 }
 0x327   : > { %v2730_v35 = vmul.f32 %v2694_v24, %v2586_v51  ;;  %v3217_v20 = vpop.eup %3216  ;;  %v2774_v29 = vmul.f32 %v5241_v6, %v2731_v47 }
 0x328   : > { %2850 = vst.msk [vmem:[%s4373_s25 + $0xe8] sm:$0xff] %vm410_vm1, %v2814_v34  ;;  %v2697_v25 = vadd.f32 1.0, %v3217_v20 }
 0x329   : > { %v2773_v58 = vmul.f32 %v5241_v6, %v2730_v35  ;;  %v2817_v54 = vadd.f32 %v5254_v53, %v2774_v29 }
 0x32a   : > { %v3219_v48 = vpop.eup %3218  ;;  %v2733_v55 = vmul.f32 %v2697_v25, %v2589_v61 }
 0x32b   : > { %v2816_v1 = vadd.f32 %v5254_v53, %v2773_v58  ;;  %2853 = vst.msk [vmem:[%s4373_s25 + $0x100] sm:$0xff] %vm410_vm1, %v2817_v54  ;;  %v2696_v23 = vadd.f32 1.0, %v3219_v48 }
 0x32c   : > { %v2776_v22 = vmul.f32 %v5241_v6, %v2733_v55 }
 0x32d   : > { %2852 = vst.msk [vmem:[%s4373_s25 + $0xf8] sm:$0xff] %vm410_vm1, %v2816_v1  ;;  %v3221_v17 = vpop.eup %3220  ;;  %v2732_v31 = vmul.f32 %v2696_v23, %v2588_v60 }
 0x32e   : > { %v2819_v32 = vadd.f32 %v5254_v53, %v2776_v22  ;;  %v2698_v59 = vadd.f32 1.0, %v3221_v17 }
 0x32f   : > { %v2775_v62 = vmul.f32 %v5241_v6, %v2732_v31 }
 0x330   : > { %2855 = vst.msk [vmem:[%s4373_s25 + $0x110] sm:$0xff] %vm410_vm1, %v2819_v32  ;;  %v2734_v43 = vmul.f32 %v2698_v59, %v2590_v42 }
 0x331   : > { %v2818_v45 = vadd.f32 %v5254_v53, %v2775_v62 }
 0x332   : > { %v2777_v56 = vmul.f32 %v5241_v6, %v2734_v43 }
 0x333   : > { %2854 = vst.msk [vmem:[%s4373_s25 + $0x108] sm:$0xff] %vm410_vm1, %v2818_v45 }
 0x334   : > { %v2820_v5 = vadd.f32 %v5254_v53, %v2777_v56 }
 0x336   : > { %2857 = vst.msk [vmem:[%s4373_s25 + $0x118] sm:$0x3f] %vm2856_vm8, %v2820_v5 }
 0x337 PF: > { %s15_s18 = sadd.s32 1, %s3231_s18  }
 0x338   : > { %p12_p4 = scmp.ge.s32.totalorder %s15_s18, 4  }
 0x33a   :  { %14 = sbr.rel (!%p12_p4) target bundleno = 1 (0x1), region = 70 }

// kernel: main_model_forward.11
= control target key start
LH: loop header
LB: loop body
LE: loop exit
PB: predicated region body
PF: predicated region fallthrough
CT: control target
= control target key end

     0   :  { %vm247_vm0 = vcmask 523264   ;;  %s500_s1 = inlined_call_operand.vmem [shape: bf16[128,64], index: 1, kind: input, shape index: {}]   ;;  %s501_s0 = inlined_call_operand.vmem [shape: bf16[128,128], index: 0, kind: input, shape index: {}]   ;;  %s502_s2 = inlined_call_operand.vmem [shape: f32[1,64], index: 2, kind: input, shape index: {}]   ;;  %s503_s3 = inlined_call_operand.vmem [shape: f32[128,64], index: 3, kind: output, shape index: {}]  }
   0x1   :  { %v349_v0 = vld [vmem:[%s500_s1] sm:$0xff]   ;;  %v350_v1 = vld [vmem:[%s500_s1 + $0x8] sm:$0xff]   ;;  %v351_v2 = vld [vmem:[%s500_s1 + $0x10] sm:$0xff]  }
   0x2   :  { %301 = vmatprep.subr.bf16.mxu0 %v349_v0  ;;  %333 = vmatprep.subr.bf16.mxu1 %v349_v0  ;;  %v352_v3 = vld [vmem:[%s500_s1 + $0x18] sm:$0xff]   ;;  %v357_v4 = vld [vmem:[%s501_s0] sm:$0xff]   ;;  %v354_v7 = vld [vmem:[%s500_s1 + $0x28] sm:$0xff]  }
   0x3   :  { %302 = vmatpush3.bf16.msra.mxu0 %v349_v0  ;;  %341 = vmatpush3.bf16.msra.mxu1 %v349_v0  ;;  %v358_v5 = vld [vmem:[%s501_s0 + $0x20] sm:$0xff]   ;;  %v355_v8 = vld [vmem:[%s500_s1 + $0x30] sm:$0xff]   ;;  %v356_v9 = vld [vmem:[%s500_s1 + $0x38] sm:$0xff]  }
   0x4   :  { %303 = vmatprep.subr.bf16.mxu0 %v350_v1  ;;  %334 = vmatprep.subr.bf16.mxu1 %v350_v1  ;;  %v353_v6 = vld [vmem:[%s500_s1 + $0x20] sm:$0xff]   ;;  %v359_v10 = vld [vmem:[%s501_s0 + $0x8] sm:$0xff]   ;;  %v361_v12 = vld [vmem:[%s501_s0 + $0x10] sm:$0xff]  }
   0x5   :  { %317 = vmatprep.mubr.bf16.mxu0 %v357_v4  ;;  %325 = vmatprep.mubr.bf16.mxu1 %v358_v5  ;;  %v360_v11 = vld [vmem:[%s501_s0 + $0x28] sm:$0xff]   ;;  %v362_v13 = vld [vmem:[%s501_s0 + $0x30] sm:$0xff]   ;;  %v363_v14 = vld [vmem:[%s501_s0 + $0x18] sm:$0xff]  }
   0x6   :  { %v364_v15 = vld [vmem:[%s501_s0 + $0x38] sm:$0xff]   ;;  %v268_v16 = vld [vmem:[%s502_s2] ss:$0 sm:$0xff] }
   0x7   :  { %304 = vmatpush3.bf16.msra.mxu0 %v350_v1  ;;  %342 = vmatpush3.bf16.msra.mxu1 %v350_v1 }
   0x8   :  { %305 = vmatprep.subr.bf16.mxu0 %v351_v2  ;;  %335 = vmatprep.subr.bf16.mxu1 %v351_v2 }
   0xb   :  { %306 = vmatpush3.bf16.msra.mxu0 %v351_v2  ;;  %343 = vmatpush3.bf16.msra.mxu1 %v351_v2 }
   0xc   :  { %307 = vmatprep.subr.bf16.mxu0 %v352_v3  ;;  %336 = vmatprep.subr.bf16.mxu1 %v352_v3 }
   0xf   :  { %308 = vmatpush3.bf16.msra.mxu0 %v352_v3  ;;  %344 = vmatpush3.bf16.msra.mxu1 %v352_v3 }
  0x10   :  { %309 = vmatprep.subr.bf16.mxu0 %v353_v6  ;;  %337 = vmatprep.subr.bf16.mxu1 %v353_v6 }
  0x13   :  { %310 = vmatpush3.bf16.msra.mxu0 %v353_v6  ;;  %345 = vmatpush3.bf16.msra.mxu1 %v353_v6 }
  0x14   :  { %311 = vmatprep.subr.bf16.mxu0 %v354_v7  ;;  %338 = vmatprep.subr.bf16.mxu1 %v354_v7 }
  0x17   :  { %312 = vmatpush3.bf16.msra.mxu0 %v354_v7  ;;  %346 = vmatpush3.bf16.msra.mxu1 %v354_v7 }
  0x18   :  { %313 = vmatprep.subr.bf16.mxu0 %v355_v8  ;;  %339 = vmatprep.subr.bf16.mxu1 %v355_v8 }
  0x1b   :  { %314 = vmatpush3.bf16.msra.mxu0 %v355_v8  ;;  %347 = vmatpush3.bf16.msra.mxu1 %v355_v8 }
  0x1c   :  { %315 = vmatprep.subr.bf16.mxu0 %v356_v9  ;;  %340 = vmatprep.subr.bf16.mxu1 %v356_v9 }
  0x1f   :  { %316 = vmatpush3.bf16.msra.mxu0 %v356_v9  ;;  %348 = vmatpush3.bf16.msra.mxu1 %v356_v9 }
  0x22   :  { %318 = vmatmul.mubr.bf16.vlgmr.msra.gmra.mrb[0].mxu0 %v359_v10  ;;  %326 = vmatmul.mubr.bf16.vlgmr.msra.gmra.mrb[0].mxu1 %v360_v11 }
  0x23   :  { %321 = vmatprep.mubr.bf16.mxu0 %v361_v12  ;;  %329 = vmatprep.mubr.bf16.mxu1 %v362_v13 }
  0x2a   :  { %322 = vmatmul.mubr.bf16.gmra.mrb[4].mxu0 %v363_v14  ;;  %330 = vmatmul.mubr.bf16.gmra.mrb[4].mxu1 %v364_v15 }
  0xf5   :  { %v319_v17 = vpop.f32.mrb[0].mxu0  ;;  %v327_v18 = vpop.f32.mrb[0].mxu1 }
  0xf6   :  { %v193_v19 = vadd.f32 %v319_v17, %v268_v16  ;;  %v225_v20 = vadd.f32 %v327_v18, %v268_v16  ;;  %v184_v21 = vpop.f32.mrb[1].mxu0  ;;  %v216_v22 = vpop.f32.mrb[1].mxu1 }
  0xf7   :  { %v185_v23 = vadd.f32 %v268_v16, %v184_v21  ;;  %v217_v24 = vadd.f32 %v268_v16, %v216_v22  ;;  %v320_v25 = vpop.f32.mrb[2].mxu0  ;;  %v328_v26 = vpop.f32.mrb[2].mxu1 }
  0xf8   :  { %250 = vst.msk [vmem:[%s503_s3 + $0x10] sm:$0xff] %vm247_vm0, %v193_v19  ;;  %258 = vst.msk [vmem:[%s503_s3 + $0x50] sm:$0xff] %vm247_vm0, %v225_v20  ;;  %v196_v27 = vadd.f32 %v320_v25, %v268_v16  ;;  %v228_v28 = vadd.f32 %v328_v26, %v268_v16  ;;  %v187_v29 = vpop.f32.mrb[3].mxu0  ;;  %v219_v30 = vpop.f32.mrb[3].mxu1 }
  0xf9   :  { %248 = vst.msk [vmem:[%s503_s3] sm:$0xff] %vm247_vm0, %v185_v23  ;;  %256 = vst.msk [vmem:[%s503_s3 + $0x40] sm:$0xff] %vm247_vm0, %v217_v24  ;;  %v188_v31 = vadd.f32 %v268_v16, %v187_v29  ;;  %v220_v32 = vadd.f32 %v268_v16, %v219_v30 }
  0xfa   :  { %251 = vst.msk [vmem:[%s503_s3 + $0x18] sm:$0xff] %vm247_vm0, %v196_v27  ;;  %259 = vst.msk [vmem:[%s503_s3 + $0x58] sm:$0xff] %vm247_vm0, %v228_v28 }
  0xfb   :  { %249 = vst.msk [vmem:[%s503_s3 + $0x8] sm:$0xff] %vm247_vm0, %v188_v31  ;;  %257 = vst.msk [vmem:[%s503_s3 + $0x48] sm:$0xff] %vm247_vm0, %v220_v32 }
  0xfd   :  { %v323_v33 = vpop.f32.mrb[4].mxu0  ;;  %v331_v34 = vpop.f32.mrb[4].mxu1 }
  0xfe   :  { %v209_v35 = vadd.f32 %v323_v33, %v268_v16  ;;  %v241_v36 = vadd.f32 %v331_v34, %v268_v16  ;;  %v200_v37 = vpop.f32.mrb[5].mxu0  ;;  %v232_v38 = vpop.f32.mrb[5].mxu1 }
  0xff   :  { %v201_v39 = vadd.f32 %v268_v16, %v200_v37  ;;  %v233_v40 = vadd.f32 %v268_v16, %v232_v38  ;;  %v324_v41 = vpop.f32.mrb[6].mxu0  ;;  %v332_v42 = vpop.f32.mrb[6].mxu1 }
 0x100   :  { %254 = vst.msk [vmem:[%s503_s3 + $0x30] sm:$0xff] %vm247_vm0, %v209_v35  ;;  %262 = vst.msk [vmem:[%s503_s3 + $0x70] sm:$0xff] %vm247_vm0, %v241_v36  ;;  %v212_v43 = vadd.f32 %v324_v41, %v268_v16  ;;  %v244_v44 = vadd.f32 %v332_v42, %v268_v16  ;;  %v203_v45 = vpop.f32.mrb[7].mxu0  ;;  %v235_v46 = vpop.f32.mrb[7].mxu1 }
 0x101   :  { %252 = vst.msk [vmem:[%s503_s3 + $0x20] sm:$0xff] %vm247_vm0, %v201_v39  ;;  %260 = vst.msk [vmem:[%s503_s3 + $0x60] sm:$0xff] %vm247_vm0, %v233_v40  ;;  %v204_v47 = vadd.f32 %v268_v16, %v203_v45  ;;  %v236_v48 = vadd.f32 %v268_v16, %v235_v46 }
 0x102   :  { %255 = vst.msk [vmem:[%s503_s3 + $0x38] sm:$0xff] %vm247_vm0, %v212_v43  ;;  %263 = vst.msk [vmem:[%s503_s3 + $0x78] sm:$0xff] %vm247_vm0, %v244_v44 }
 0x103   :  { %253 = vst.msk [vmem:[%s503_s3 + $0x28] sm:$0xff] %vm247_vm0, %v204_v47  ;;  %261 = vst.msk [vmem:[%s503_s3 + $0x68] sm:$0xff] %vm247_vm0, %v236_v48 }

// kernel: main_model_forward.12
= control target key start
LH: loop header
LB: loop body
LE: loop exit
PB: predicated region body
PF: predicated region fallthrough
CT: control target
= control target key end

     0   :  { %s413_s1 = inlined_call_operand.vmem [shape: bf16[256,128], index: 1, kind: input, shape index: {}]   ;;  %s414_s0 = inlined_call_operand.vmem [shape: bf16[32,256], index: 0, kind: input, shape index: {}]   ;;  %s415_s2 = inlined_call_operand.vmem [shape: f32[1,128], index: 2, kind: input, shape index: {}]   ;;  %s416_s3 = inlined_call_operand.vmem [shape: f32[32,128], index: 3, kind: output, shape index: {}]  }
   0x1   :  { %v296_v0 = vld [vmem:[%s413_s1 + $0x40] sm:$0xff]   ;;  %v298_v2 = vld [vmem:[%s413_s1 + $0x48] sm:$0xff]   ;;  %v300_v4 = vld [vmem:[%s413_s1 + $0x50] sm:$0xff]  }
   0x2   :  { %v297_v1 = vld [vmem:[%s413_s1] sm:$0xff]   ;;  %252 = vmatprep.subr.bf16.mxu0 %v296_v0  ;;  %280 = vmatprep.subr.bf16.mxu1 %v296_v0  ;;  %v299_v3 = vld [vmem:[%s413_s1 + $0x8] sm:$0xff]   ;;  %v301_v5 = vld [vmem:[%s413_s1 + $0x10] sm:$0xff]  }
   0x3   :  { %253 = vmatpush3.bf16.msra.mxu0 %v297_v1  ;;  %288 = vmatpush3.bf16.msra.mxu1 %v297_v1  ;;  %v302_v6 = vld [vmem:[%s413_s1 + $0x58] sm:$0xff]   ;;  %v304_v8 = vld [vmem:[%s413_s1 + $0x60] sm:$0xff]   ;;  %v306_v10 = vld [vmem:[%s413_s1 + $0x68] sm:$0xff]  }
   0x4   :  { %254 = vmatprep.subr.bf16.mxu0 %v298_v2  ;;  %281 = vmatprep.subr.bf16.mxu1 %v298_v2  ;;  %v303_v7 = vld [vmem:[%s413_s1 + $0x18] sm:$0xff]   ;;  %v305_v9 = vld [vmem:[%s413_s1 + $0x20] sm:$0xff]   ;;  %v307_v13 = vld [vmem:[%s413_s1 + $0x28] sm:$0xff]  }
   0x5   :  { %v314_v11 = vld [vmem:[%s414_s0 + $0x4] ss:$8 sps:$4 sm:$0xff]   ;;  %v317_v12 = vld [vmem:[%s414_s0 + $0x14] ss:$8 sps:$4 sm:$0xff]   ;;  %v312_v18 = vld [vmem:[%s414_s0] ss:$8 sps:$4 sm:$0xff]  }
   0x6   :  { %v308_v14 = vld [vmem:[%s413_s1 + $0x70] sm:$0xff]   ;;  %206 = vmatprep.mubr.bf16.mxu0 %v314_v11  ;;  %214 = vmatprep.mubr.bf16.mxu1 %v317_v12  ;;  %v310_v16 = vld [vmem:[%s413_s1 + $0x78] sm:$0xff]   ;;  %v231_v22 = vld [vmem:[%s415_s2] ss:$0 sm:$0xff] }
   0x7   :  { %255 = vmatpush3.bf16.msra.mxu0 %v299_v3  ;;  %289 = vmatpush3.bf16.msra.mxu1 %v299_v3  ;;  %v309_v15 = vld [vmem:[%s413_s1 + $0x30] sm:$0xff]   ;;  %v311_v17 = vld [vmem:[%s413_s1 + $0x38] sm:$0xff]  }
   0x8   :  { %256 = vmatprep.subr.bf16.mxu0 %v300_v4  ;;  %282 = vmatprep.subr.bf16.mxu1 %v300_v4  ;;  %v315_v19 = vld [vmem:[%s414_s0 + $0x10] ss:$8 sps:$4 sm:$0xff]  }
   0xb   :  { %257 = vmatpush3.bf16.msra.mxu0 %v301_v5  ;;  %290 = vmatpush3.bf16.msra.mxu1 %v301_v5 }
   0xc   :  { %258 = vmatprep.subr.bf16.mxu0 %v302_v6  ;;  %283 = vmatprep.subr.bf16.mxu1 %v302_v6 }
   0xf   :  { %259 = vmatpush3.bf16.msra.mxu0 %v303_v7  ;;  %291 = vmatpush3.bf16.msra.mxu1 %v303_v7 }
  0x10   :  { %260 = vmatprep.subr.bf16.mxu0 %v304_v8  ;;  %284 = vmatprep.subr.bf16.mxu1 %v304_v8 }
  0x13   :  { %261 = vmatpush3.bf16.msra.mxu0 %v305_v9  ;;  %292 = vmatpush3.bf16.msra.mxu1 %v305_v9 }
  0x14   :  { %262 = vmatprep.subr.bf16.mxu0 %v306_v10  ;;  %285 = vmatprep.subr.bf16.mxu1 %v306_v10 }
  0x17   :  { %263 = vmatpush3.bf16.msra.mxu0 %v307_v13  ;;  %293 = vmatpush3.bf16.msra.mxu1 %v307_v13 }
  0x18   :  { %264 = vmatprep.subr.bf16.mxu0 %v308_v14  ;;  %286 = vmatprep.subr.bf16.mxu1 %v308_v14 }
  0x1b   :  { %265 = vmatpush3.bf16.msra.mxu0 %v309_v15  ;;  %294 = vmatpush3.bf16.msra.mxu1 %v309_v15 }
  0x1c   :  { %266 = vmatprep.subr.bf16.mxu0 %v310_v16  ;;  %287 = vmatprep.subr.bf16.mxu1 %v310_v16 }
  0x1f   :  { %267 = vmatpush3.bf16.msra.mxu0 %v311_v17  ;;  %295 = vmatpush3.bf16.msra.mxu1 %v311_v17 }
  0x22   :  { %207 = vmatmul.mubr.bf16.vlgmr.msra.gmra.mrb[0].mxu0 %v312_v18  ;;  %215 = vmatmul.mubr.bf16.vlgmr.msra.gmra.mrb[0].mxu1 %v315_v19 }
  0xf5   :  { %v268_v20 = vpop.f32.mrb[0].mxu0  ;;  %v274_v21 = vpop.f32.mrb[0].mxu1 }
  0xf6   :  { %v269_v23 = vpop.f32.mrb[1].mxu0  ;;  %v275_v24 = vpop.f32.mrb[1].mxu1 }
  0xf7   :  { %v270_v25 = vadd.f32 %v269_v23, %v268_v20  ;;  %v276_v26 = vadd.f32 %v275_v24, %v274_v21  ;;  %v271_v27 = vpop.f32.mrb[2].mxu0  ;;  %v277_v28 = vpop.f32.mrb[2].mxu1 }
  0xf8   :  { %v272_v29 = vpop.f32.mrb[3].mxu0  ;;  %v278_v30 = vpop.f32.mrb[3].mxu1 }
  0xf9   :  { %v209_v31 = vadd.f32 %v270_v25, %v231_v22  ;;  %v217_v32 = vadd.f32 %v276_v26, %v231_v22  ;;  %v273_v33 = vadd.f32 %v272_v29, %v271_v27  ;;  %v279_v34 = vadd.f32 %v278_v30, %v277_v28 }
  0xfb   :  { %223 = vst [vmem:[%s416_s3] sm:$0xff] %v209_v31  ;;  %225 = vst [vmem:[%s416_s3 + $0x10] sm:$0xff] %v217_v32  ;;  %v212_v35 = vadd.f32 %v273_v33, %v231_v22  ;;  %v220_v36 = vadd.f32 %v279_v34, %v231_v22 }
  0xfd   :  { %224 = vst [vmem:[%s416_s3 + $0x8] sm:$0xff] %v212_v35  ;;  %226 = vst [vmem:[%s416_s3 + $0x18] sm:$0xff] %v220_v36 }

// kernel: main_model_forward.13
= control target key start
LH: loop header
LB: loop body
LE: loop exit
PB: predicated region body
PF: predicated region fallthrough
CT: control target
= control target key end

     0   :  { %s913_s1 = inlined_call_operand.vmem [shape: bf16[512,256], index: 1, kind: input, shape index: {}]   ;;  %s914_s0 = inlined_call_operand.vmem [shape: bf16[8,512], index: 0, kind: input, shape index: {}]   ;;  %s915_s2 = inlined_call_operand.vmem [shape: f32[1,256], index: 2, kind: input, shape index: {}]   ;;  %s916_s3 = inlined_call_operand.vmem [shape: f32[8,256], index: 3, kind: output, shape index: {}]  }
   0x1   :  { %v586_v0 = vld [vmem:[%s913_s1 + $0x4] ss:$8 sps:$4 sm:$0xff]   ;;  %v590_v2 = vld [vmem:[%s913_s1] ss:$8 sps:$4 sm:$0xff]   ;;  %v592_v4 = vld [vmem:[%s913_s1 + $0x14] ss:$8 sps:$4 sm:$0xff]  }
   0x2   :  { %v588_v1 = vld [vmem:[%s913_s1 + $0x104] ss:$8 sps:$4 sm:$0xff]   ;;  %426 = vmatprep.subr.bf16.mxu1 %v586_v0  ;;  %v591_v3 = vld [vmem:[%s913_s1 + $0x100] ss:$8 sps:$4 sm:$0xff]   ;;  %v594_v5 = vld [vmem:[%s913_s1 + $0x114] ss:$8 sps:$4 sm:$0xff]  }
   0x3   :  { %467 = vmatprep.subr.bf16.mxu0 %v588_v1  ;;  %427 = vmatpush1.bf16.msra.mxu1 %v590_v2  ;;  %v596_v6 = vld [vmem:[%s913_s1 + $0x10] ss:$8 sps:$4 sm:$0xff]   ;;  %v598_v8 = vld [vmem:[%s913_s1 + $0x24] ss:$8 sps:$4 sm:$0xff]   ;;  %v602_v10 = vld [vmem:[%s913_s1 + $0x20] ss:$8 sps:$4 sm:$0xff]  }
   0x4   :  { %468 = vmatpush1.bf16.msra.mxu0 %v591_v3  ;;  %428 = vmatprep.subr.bf16.mxu1 %v592_v4  ;;  %v597_v7 = vld [vmem:[%s913_s1 + $0x110] ss:$8 sps:$4 sm:$0xff]   ;;  %v600_v9 = vld [vmem:[%s913_s1 + $0x124] ss:$8 sps:$4 sm:$0xff]   ;;  %v603_v11 = vld [vmem:[%s913_s1 + $0x120] ss:$8 sps:$4 sm:$0xff]  }
   0x5   :  { %469 = vmatprep.subr.bf16.mxu0 %v594_v5  ;;  %v604_v12 = vld [vmem:[%s913_s1 + $0x34] ss:$8 sps:$4 sm:$0xff]   ;;  %v608_v14 = vld [vmem:[%s913_s1 + $0x30] ss:$8 sps:$4 sm:$0xff]   ;;  %v610_v16 = vld [vmem:[%s913_s1 + $0x44] ss:$8 sps:$4 sm:$0xff]  }
   0x6   :  { %v606_v13 = vld [vmem:[%s913_s1 + $0x134] ss:$8 sps:$4 sm:$0xff]   ;;  %v609_v15 = vld [vmem:[%s913_s1 + $0x130] ss:$8 sps:$4 sm:$0xff]   ;;  %v612_v17 = vld [vmem:[%s913_s1 + $0x144] ss:$8 sps:$4 sm:$0xff]  }
   0x7   :  { %429 = vmatpush1.bf16.msra.mxu1 %v596_v6  ;;  %v614_v18 = vld [vmem:[%s913_s1 + $0x40] ss:$8 sps:$4 sm:$0xff]   ;;  %v616_v20 = vld [vmem:[%s913_s1 + $0x54] ss:$8 sps:$4 sm:$0xff]   ;;  %v620_v22 = vld [vmem:[%s913_s1 + $0x50] ss:$8 sps:$4 sm:$0xff]   ;;  %v82_v6 = vlaneseq }
   0x8   :  { %470 = vmatpush1.bf16.msra.mxu0 %v597_v7  ;;  %430 = vmatprep.subr.bf16.mxu1 %v598_v8  ;;  %v615_v19 = vld [vmem:[%s913_s1 + $0x140] ss:$8 sps:$4 sm:$0xff]   ;;  %v618_v21 = vld [vmem:[%s913_s1 + $0x154] ss:$8 sps:$4 sm:$0xff]   ;;  %v621_v23 = vld [vmem:[%s913_s1 + $0x150] ss:$8 sps:$4 sm:$0xff]  }
   0x9   :  { %471 = vmatprep.subr.bf16.mxu0 %v600_v9  ;;  %v622_v24 = vld [vmem:[%s913_s1 + $0x64] ss:$8 sps:$4 sm:$0xff]   ;;  %v626_v26 = vld [vmem:[%s913_s1 + $0x60] ss:$8 sps:$4 sm:$0xff]   ;;  %v628_v28 = vld [vmem:[%s913_s1 + $0x74] ss:$8 sps:$4 sm:$0xff]  }
   0xa   :  { %v624_v25 = vld [vmem:[%s913_s1 + $0x164] ss:$8 sps:$4 sm:$0xff]   ;;  %v627_v27 = vld [vmem:[%s913_s1 + $0x160] ss:$8 sps:$4 sm:$0xff]   ;;  %v630_v29 = vld [vmem:[%s913_s1 + $0x174] ss:$8 sps:$4 sm:$0xff]  }
   0xb   :  { %431 = vmatpush1.bf16.msra.mxu1 %v602_v10  ;;  %v632_v30 = vld [vmem:[%s913_s1 + $0x70] ss:$8 sps:$4 sm:$0xff]   ;;  %v634_v32 = vld [vmem:[%s913_s1 + $0x84] ss:$8 sps:$4 sm:$0xff]   ;;  %v638_v34 = vld [vmem:[%s913_s1 + $0x80] ss:$8 sps:$4 sm:$0xff]  }
   0xc   :  { %472 = vmatpush1.bf16.msra.mxu0 %v603_v11  ;;  %432 = vmatprep.subr.bf16.mxu1 %v604_v12  ;;  %v633_v31 = vld [vmem:[%s913_s1 + $0x170] ss:$8 sps:$4 sm:$0xff]   ;;  %v636_v33 = vld [vmem:[%s913_s1 + $0x184] ss:$8 sps:$4 sm:$0xff]   ;;  %v639_v35 = vld [vmem:[%s913_s1 + $0x180] ss:$8 sps:$4 sm:$0xff]  }
   0xd   :  { %473 = vmatprep.subr.bf16.mxu0 %v606_v13  ;;  %v640_v36 = vld [vmem:[%s913_s1 + $0x94] ss:$8 sps:$4 sm:$0xff]   ;;  %v644_v38 = vld [vmem:[%s913_s1 + $0x90] ss:$8 sps:$4 sm:$0xff]   ;;  %v646_v40 = vld [vmem:[%s913_s1 + $0xa4] ss:$8 sps:$4 sm:$0xff]  }
   0xe   :  { %v642_v37 = vld [vmem:[%s913_s1 + $0x194] ss:$8 sps:$4 sm:$0xff]   ;;  %v645_v39 = vld [vmem:[%s913_s1 + $0x190] ss:$8 sps:$4 sm:$0xff]   ;;  %v648_v41 = vld [vmem:[%s913_s1 + $0x1a4] ss:$8 sps:$4 sm:$0xff]  }
   0xf   :  { %433 = vmatpush1.bf16.msra.mxu1 %v608_v14  ;;  %v650_v42 = vld [vmem:[%s913_s1 + $0xa0] ss:$8 sps:$4 sm:$0xff]   ;;  %v652_v44 = vld [vmem:[%s913_s1 + $0xb4] ss:$8 sps:$4 sm:$0xff]   ;;  %v656_v49 = vld [vmem:[%s913_s1 + $0xb0] ss:$8 sps:$4 sm:$0xff]  }
  0x10   :  { %474 = vmatpush1.bf16.msra.mxu0 %v609_v15  ;;  %434 = vmatprep.subr.bf16.mxu1 %v610_v16  ;;  %v651_v43 = vld [vmem:[%s913_s1 + $0x1a0] ss:$8 sps:$4 sm:$0xff]   ;;  %v654_v45 = vld [vmem:[%s913_s1 + $0x1b4] ss:$8 sps:$4 sm:$0xff]   ;;  %v657_v50 = vld [vmem:[%s913_s1 + $0x1b0] ss:$8 sps:$4 sm:$0xff]  }
  0x11   :  { %475 = vmatprep.subr.bf16.mxu0 %v612_v17  ;;  %v14_v46 = vld [vmem:[%s914_s0] sm:$0xff]  ;;  %v15_v48 = vld [vmem:[%s914_s0 + $0x8] sm:$0xff]  ;;  %v664_v56 = vld [vmem:[%s913_s1 + $0xd4] ss:$8 sps:$4 sm:$0xff]   ;;  %v83_v7 = vshrl.u32 %v82_v6, 7 }
  0x12   :  { %v515_v47 = vcombine.high %v14_v46, %v14_v46  ;;  %v517_v51 = vcombine.high %v15_v48, %v15_v48  ;;  %v658_v52 = vld [vmem:[%s913_s1 + $0xc4] ss:$8 sps:$4 sm:$0xff]   ;;  %v662_v54 = vld [vmem:[%s913_s1 + $0xc0] ss:$8 sps:$4 sm:$0xff]   ;;  %v666_v57 = vld [vmem:[%s913_s1 + $0x1d4] ss:$8 sps:$4 sm:$0xff]   ;;  %v514_v4 = vcombine.low %v14_v46, %v14_v46  ;;  %v516_v5 = vcombine.low %v15_v48, %v15_v48 }
  0x13   :  { %435 = vmatpush1.bf16.msra.mxu1 %v614_v18  ;;  %v660_v53 = vld [vmem:[%s913_s1 + $0x1c4] ss:$8 sps:$4 sm:$0xff]   ;;  %v663_v55 = vld [vmem:[%s913_s1 + $0x1c0] ss:$8 sps:$4 sm:$0xff]   ;;  %v668_v58 = vld [vmem:[%s913_s1 + $0xd0] ss:$8 sps:$4 sm:$0xff]  }
  0x14   :  { %476 = vmatpush1.bf16.msra.mxu0 %v615_v19  ;;  %436 = vmatprep.subr.bf16.mxu1 %v616_v20  ;;  %v669_v59 = vld [vmem:[%s913_s1 + $0x1d0] ss:$8 sps:$4 sm:$0xff]   ;;  %v670_v60 = vld [vmem:[%s913_s1 + $0xe4] ss:$8 sps:$4 sm:$0xff]   ;;  %v674_v62 = vld [vmem:[%s913_s1 + $0xe0] ss:$8 sps:$4 sm:$0xff]  }
  0x15   :  { %477 = vmatprep.subr.bf16.mxu0 %v618_v21  ;;  %458 = vmatprep.mubr.bf16.mxu1 %v515_v47  ;;  %v672_v61 = vld [vmem:[%s913_s1 + $0x1e4] ss:$8 sps:$4 sm:$0xff]   ;;  %v675_v63 = vld [vmem:[%s913_s1 + $0x1e0] ss:$8 sps:$4 sm:$0xff]   ;;  %v676_v0 = vld [vmem:[%s913_s1 + $0xf4] ss:$8 sps:$4 sm:$0xff]  }
  0x16   :  { %499 = vmatprep.mubr.bf16.mxu0 %v517_v51  ;;  %v678_v1 = vld [vmem:[%s913_s1 + $0x1f4] ss:$8 sps:$4 sm:$0xff]   ;;  %v680_v2 = vld [vmem:[%s913_s1 + $0xf0] ss:$8 sps:$4 sm:$0xff]   ;;  %v84_v8 = vsub.s32 0, %v83_v7  ;;  %v88_v10 = vsub.s32 1, %v83_v7 }
  0x17   :  { %437 = vmatpush1.bf16.msra.mxu1 %v620_v22  ;;  %v681_v3 = vld [vmem:[%s913_s1 + $0x1f0] ss:$8 sps:$4 sm:$0xff]   ;;  %v80_v9 = vld [vmem:[%s915_s2] sm:$0x3] }
  0x18   :  { %478 = vmatpush1.bf16.msra.mxu0 %v621_v23  ;;  %438 = vmatprep.subr.bf16.mxu1 %v622_v24  ;;  %v85_v11 = vrot.slane %v80_v9, %v84_v8  ;;  %v89_v12 = vrot.slane %v80_v9, %v88_v10 }
  0x19   :  { %479 = vmatprep.subr.bf16.mxu0 %v624_v25 }
  0x1b   :  { %439 = vmatpush1.bf16.msra.mxu1 %v626_v26 }
  0x1c   :  { %480 = vmatpush1.bf16.msra.mxu0 %v627_v27  ;;  %440 = vmatprep.subr.bf16.mxu1 %v628_v28 }
  0x1d   :  { %481 = vmatprep.subr.bf16.mxu0 %v630_v29 }
  0x1f   :  { %441 = vmatpush1.bf16.msra.mxu1 %v632_v30 }
  0x20   :  { %482 = vmatpush1.bf16.msra.mxu0 %v633_v31  ;;  %442 = vmatprep.subr.bf16.mxu1 %v634_v32 }
  0x21   :  { %483 = vmatprep.subr.bf16.mxu0 %v636_v33 }
  0x23   :  { %443 = vmatpush1.bf16.msra.mxu1 %v638_v34 }
  0x24   :  { %484 = vmatpush1.bf16.msra.mxu0 %v639_v35  ;;  %444 = vmatprep.subr.bf16.mxu1 %v640_v36 }
  0x25   :  { %485 = vmatprep.subr.bf16.mxu0 %v642_v37 }
  0x27   :  { %445 = vmatpush1.bf16.msra.mxu1 %v644_v38 }
  0x28   :  { %486 = vmatpush1.bf16.msra.mxu0 %v645_v39  ;;  %446 = vmatprep.subr.bf16.mxu1 %v646_v40 }
  0x29   :  { %487 = vmatprep.subr.bf16.mxu0 %v648_v41 }
  0x2b   :  { %447 = vmatpush1.bf16.msra.mxu1 %v650_v42 }
  0x2c   :  { %488 = vmatpush1.bf16.msra.mxu0 %v651_v43  ;;  %448 = vmatprep.subr.bf16.mxu1 %v652_v44 }
  0x2d   :  { %489 = vmatprep.subr.bf16.mxu0 %v654_v45 }
  0x2f   :  { %449 = vmatpush1.bf16.msra.mxu1 %v656_v49 }
  0x30   :  { %490 = vmatpush1.bf16.msra.mxu0 %v657_v50  ;;  %450 = vmatprep.subr.bf16.mxu1 %v658_v52 }
  0x31   :  { %491 = vmatprep.subr.bf16.mxu0 %v660_v53 }
  0x33   :  { %451 = vmatpush1.bf16.msra.mxu1 %v662_v54 }
  0x34   :  { %492 = vmatpush1.bf16.msra.mxu0 %v663_v55  ;;  %452 = vmatprep.subr.bf16.mxu1 %v664_v56 }
  0x35   :  { %493 = vmatprep.subr.bf16.mxu0 %v666_v57 }
  0x37   :  { %453 = vmatpush1.bf16.msra.mxu1 %v668_v58 }
  0x38   :  { %494 = vmatpush1.bf16.msra.mxu0 %v669_v59  ;;  %454 = vmatprep.subr.bf16.mxu1 %v670_v60 }
  0x39   :  { %495 = vmatprep.subr.bf16.mxu0 %v672_v61 }
  0x3b   :  { %455 = vmatpush1.bf16.msra.mxu1 %v674_v62 }
  0x3c   :  { %496 = vmatpush1.bf16.msra.mxu0 %v675_v63  ;;  %456 = vmatprep.subr.bf16.mxu1 %v676_v0 }
  0x3d   :  { %497 = vmatprep.subr.bf16.mxu0 %v678_v1 }
  0x3f   :  { %457 = vmatpush1.bf16.msra.mxu1 %v680_v2 }
  0x40   :  { %498 = vmatpush1.bf16.msra.mxu0 %v681_v3 }
  0x42   :  { %459 = vmatmul.mubr.bf16.vlgmr.msra.gmra.mrb[0].mxu1 %v514_v4 }
  0x43   :  { %500 = vmatmul.mubr.bf16.vlgmr.msra.gmra.mrb[0].mxu0 %v516_v5 }
 0x115   :  { %v460_v13 = vpop.f32.mrb[0].mxu1 }
 0x116   :  { %v501_v14 = vpop.f32.mrb[0].mxu0  ;;  %v461_v15 = vadd.f32 %v460_v13, %v85_v11  ;;  %v462_v16 = vpop.f32.mrb[1].mxu1 }
 0x117   :  { %v503_v17 = vpop.f32.mrb[1].mxu0  ;;  %v463_v18 = vadd.f32 %v462_v16, %v89_v12  ;;  %v464_v19 = vpop.f32.mrb[2].mxu1 }
 0x118   :  { %v505_v20 = vpop.f32.mrb[2].mxu0  ;;  %v502_v21 = vadd.f32 %v501_v14, %v461_v15  ;;  %v465_v22 = vpop.f32.mrb[3].mxu1 }
 0x119   :  { %v506_v23 = vpop.f32.mrb[3].mxu0  ;;  %v504_v24 = vadd.f32 %v503_v17, %v463_v18 }
 0x11a   :  { %508 = vst [vmem:[%s916_s3] sm:$0xff] %v502_v21 }
 0x11b   :  { %509 = vst [vmem:[%s916_s3 + $0x8] sm:$0xff] %v504_v24 }

// kernel: main_model_forward.14
= control target key start
LH: loop header
LB: loop body
LE: loop exit
PB: predicated region body
PF: predicated region fallthrough
CT: control target
= control target key end

     0   :  { %s3457_s1 = inlined_call_operand.vmem [shape: bf16[1024,512], index: 1, kind: input, shape index: {}]   ;;  %s3458_s0 = inlined_call_operand.vmem [shape: bf16[8,1024], index: 0, kind: input, shape index: {}]   ;;  %s3459_s2 = inlined_call_operand.vmem [shape: f32[1,512], index: 2, kind: input, shape index: {}]   ;;  %s3460_s3 = inlined_call_operand.vmem [shape: f32[8,512], index: 3, kind: output, shape index: {}]  }
   0x1   :  { %v2232_v0 = vld [vmem:[%s3457_s1 + $0x4] ss:$16 sps:$4 sm:$0xff]   ;;  %v2234_v1 = vld [vmem:[%s3457_s1 + $0xc] ss:$16 sps:$4 sm:$0xff]   ;;  %v2236_v2 = vld [vmem:[%s3457_s1] ss:$16 sps:$4 sm:$0xff]  }
   0x2   :  { %1604 = vmatprep.subr.bf16.mxu0 %v2232_v0  ;;  %v2237_v3 = vld [vmem:[%s3457_s1 + $0x8] ss:$16 sps:$4 sm:$0xff]   ;;  %1768 = vmatprep.subr.bf16.mxu1 %v2234_v1  ;;  %v2238_v4 = vld [vmem:[%s3457_s1 + $0x24] ss:$16 sps:$4 sm:$0xff]   ;;  %v2240_v5 = vld [vmem:[%s3457_s1 + $0x2c] ss:$16 sps:$4 sm:$0xff]  }
   0x3   :  { %1605 = vmatpush1.bf16.msra.mxu0 %v2236_v2  ;;  %1769 = vmatpush1.bf16.msra.mxu1 %v2237_v3  ;;  %v2242_v6 = vld [vmem:[%s3457_s1 + $0x20] ss:$16 sps:$4 sm:$0xff]   ;;  %v2243_v7 = vld [vmem:[%s3457_s1 + $0x28] ss:$16 sps:$4 sm:$0xff]   ;;  %v2244_v8 = vld [vmem:[%s3457_s1 + $0x44] ss:$16 sps:$4 sm:$0xff]  }
   0x4   :  { %1606 = vmatprep.subr.bf16.mxu0 %v2238_v4  ;;  %1770 = vmatprep.subr.bf16.mxu1 %v2240_v5  ;;  %v2246_v9 = vld [vmem:[%s3457_s1 + $0x4c] ss:$16 sps:$4 sm:$0xff]   ;;  %v2248_v10 = vld [vmem:[%s3457_s1 + $0x40] ss:$16 sps:$4 sm:$0xff]   ;;  %v2249_v11 = vld [vmem:[%s3457_s1 + $0x48] ss:$16 sps:$4 sm:$0xff]  }
   0x5   :  { %v2250_v12 = vld [vmem:[%s3457_s1 + $0x64] ss:$16 sps:$4 sm:$0xff]   ;;  %v2252_v13 = vld [vmem:[%s3457_s1 + $0x6c] ss:$16 sps:$4 sm:$0xff]   ;;  %v2254_v14 = vld [vmem:[%s3457_s1 + $0x60] ss:$16 sps:$4 sm:$0xff]  }
   0x6   :  { %v2255_v15 = vld [vmem:[%s3457_s1 + $0x68] ss:$16 sps:$4 sm:$0xff]   ;;  %v2256_v16 = vld [vmem:[%s3457_s1 + $0x84] ss:$16 sps:$4 sm:$0xff]   ;;  %v2258_v17 = vld [vmem:[%s3457_s1 + $0x8c] ss:$16 sps:$4 sm:$0xff]  }
   0x7   :  { %1607 = vmatpush1.bf16.msra.mxu0 %v2242_v6  ;;  %1771 = vmatpush1.bf16.msra.mxu1 %v2243_v7  ;;  %v2260_v18 = vld [vmem:[%s3457_s1 + $0x80] ss:$16 sps:$4 sm:$0xff]   ;;  %v2261_v19 = vld [vmem:[%s3457_s1 + $0x88] ss:$16 sps:$4 sm:$0xff]   ;;  %v2262_v20 = vld [vmem:[%s3457_s1 + $0xa4] ss:$16 sps:$4 sm:$0xff]  }
   0x8   :  { %1608 = vmatprep.subr.bf16.mxu0 %v2244_v8  ;;  %1772 = vmatprep.subr.bf16.mxu1 %v2246_v9  ;;  %v2264_v21 = vld [vmem:[%s3457_s1 + $0xac] ss:$16 sps:$4 sm:$0xff]   ;;  %v2266_v22 = vld [vmem:[%s3457_s1 + $0xa0] ss:$16 sps:$4 sm:$0xff]   ;;  %v2267_v23 = vld [vmem:[%s3457_s1 + $0xa8] ss:$16 sps:$4 sm:$0xff]  }
   0x9   :  { %v2268_v24 = vld [vmem:[%s3457_s1 + $0xc4] ss:$16 sps:$4 sm:$0xff]   ;;  %v2270_v25 = vld [vmem:[%s3457_s1 + $0xcc] ss:$16 sps:$4 sm:$0xff]   ;;  %v2272_v26 = vld [vmem:[%s3457_s1 + $0xc0] ss:$16 sps:$4 sm:$0xff]  }
   0xa   :  { %v2273_v27 = vld [vmem:[%s3457_s1 + $0xc8] ss:$16 sps:$4 sm:$0xff]   ;;  %v2274_v28 = vld [vmem:[%s3457_s1 + $0xe4] ss:$16 sps:$4 sm:$0xff]   ;;  %v2276_v29 = vld [vmem:[%s3457_s1 + $0xec] ss:$16 sps:$4 sm:$0xff]  }
   0xb   :  { %1609 = vmatpush1.bf16.msra.mxu0 %v2248_v10  ;;  %1773 = vmatpush1.bf16.msra.mxu1 %v2249_v11  ;;  %v2278_v30 = vld [vmem:[%s3457_s1 + $0xe0] ss:$16 sps:$4 sm:$0xff]   ;;  %v2279_v31 = vld [vmem:[%s3457_s1 + $0xe8] ss:$16 sps:$4 sm:$0xff]   ;;  %v2280_v32 = vld [vmem:[%s3457_s1 + $0x104] ss:$16 sps:$4 sm:$0xff]  }
   0xc   :  { %1610 = vmatprep.subr.bf16.mxu0 %v2250_v12  ;;  %1774 = vmatprep.subr.bf16.mxu1 %v2252_v13  ;;  %v2282_v33 = vld [vmem:[%s3457_s1 + $0x10c] ss:$16 sps:$4 sm:$0xff]   ;;  %v2284_v34 = vld [vmem:[%s3457_s1 + $0x100] ss:$16 sps:$4 sm:$0xff]   ;;  %v2285_v35 = vld [vmem:[%s3457_s1 + $0x108] ss:$16 sps:$4 sm:$0xff]  }
   0xd   :  { %v2286_v36 = vld [vmem:[%s3457_s1 + $0x124] ss:$16 sps:$4 sm:$0xff]   ;;  %v2288_v37 = vld [vmem:[%s3457_s1 + $0x12c] ss:$16 sps:$4 sm:$0xff]   ;;  %v2290_v38 = vld [vmem:[%s3457_s1 + $0x120] ss:$16 sps:$4 sm:$0xff]  }
   0xe   :  { %v2291_v39 = vld [vmem:[%s3457_s1 + $0x128] ss:$16 sps:$4 sm:$0xff]   ;;  %v2292_v40 = vld [vmem:[%s3457_s1 + $0x144] ss:$16 sps:$4 sm:$0xff]   ;;  %v2294_v41 = vld [vmem:[%s3457_s1 + $0x14c] ss:$16 sps:$4 sm:$0xff]  }
   0xf   :  { %1611 = vmatpush1.bf16.msra.mxu0 %v2254_v14  ;;  %1775 = vmatpush1.bf16.msra.mxu1 %v2255_v15  ;;  %v2296_v42 = vld [vmem:[%s3457_s1 + $0x140] ss:$16 sps:$4 sm:$0xff]   ;;  %v2297_v43 = vld [vmem:[%s3457_s1 + $0x148] ss:$16 sps:$4 sm:$0xff]   ;;  %v2298_v44 = vld [vmem:[%s3457_s1 + $0x164] ss:$16 sps:$4 sm:$0xff]  }
  0x10   :  { %1612 = vmatprep.subr.bf16.mxu0 %v2256_v16  ;;  %1776 = vmatprep.subr.bf16.mxu1 %v2258_v17  ;;  %v2300_v45 = vld [vmem:[%s3457_s1 + $0x16c] ss:$16 sps:$4 sm:$0xff]   ;;  %v14_v46 = vld [vmem:[%s3458_s0] sm:$0xff]  ;;  %v2303_v49 = vld [vmem:[%s3457_s1 + $0x168] ss:$16 sps:$4 sm:$0xff]  }
  0x11   :  { %v2302_v47 = vld [vmem:[%s3457_s1 + $0x160] ss:$16 sps:$4 sm:$0xff]   ;;  %v1941_v48 = vcombine.high %v14_v46, %v14_v46  ;;  %v2304_v50 = vld [vmem:[%s3457_s1 + $0x184] ss:$16 sps:$4 sm:$0xff]   ;;  %v2306_v51 = vld [vmem:[%s3457_s1 + $0x18c] ss:$16 sps:$4 sm:$0xff]   ;;  %v1940_v4 = vcombine.low %v14_v46, %v14_v46 }
  0x12   :  { %v2308_v52 = vld [vmem:[%s3457_s1 + $0x180] ss:$16 sps:$4 sm:$0xff]   ;;  %v2309_v53 = vld [vmem:[%s3457_s1 + $0x188] ss:$16 sps:$4 sm:$0xff]   ;;  %v2310_v54 = vld [vmem:[%s3457_s1 + $0x1a4] ss:$16 sps:$4 sm:$0xff]  }
  0x13   :  { %1613 = vmatpush1.bf16.msra.mxu0 %v2260_v18  ;;  %1777 = vmatpush1.bf16.msra.mxu1 %v2261_v19  ;;  %v2312_v55 = vld [vmem:[%s3457_s1 + $0x1ac] ss:$16 sps:$4 sm:$0xff]   ;;  %v2314_v56 = vld [vmem:[%s3457_s1 + $0x1a0] ss:$16 sps:$4 sm:$0xff]   ;;  %v2315_v57 = vld [vmem:[%s3457_s1 + $0x1a8] ss:$16 sps:$4 sm:$0xff]  }
  0x14   :  { %1614 = vmatprep.subr.bf16.mxu0 %v2262_v20  ;;  %1778 = vmatprep.subr.bf16.mxu1 %v2264_v21  ;;  %v2316_v58 = vld [vmem:[%s3457_s1 + $0x1c4] ss:$16 sps:$4 sm:$0xff]   ;;  %v2318_v59 = vld [vmem:[%s3457_s1 + $0x1cc] ss:$16 sps:$4 sm:$0xff]   ;;  %v2320_v60 = vld [vmem:[%s3457_s1 + $0x1c0] ss:$16 sps:$4 sm:$0xff]  }
  0x15   :  { %1636 = vmatprep.mubr.bf16.mxu0 %v1941_v48  ;;  %1800 = vmatprep.mubr.bf16.mxu1 %v1941_v48  ;;  %v2321_v61 = vld [vmem:[%s3457_s1 + $0x1c8] ss:$16 sps:$4 sm:$0xff]   ;;  %v2322_v62 = vld [vmem:[%s3457_s1 + $0x1e4] ss:$16 sps:$4 sm:$0xff]   ;;  %v2324_v63 = vld [vmem:[%s3457_s1 + $0x1ec] ss:$16 sps:$4 sm:$0xff]  }
  0x16   :  { %v2326_v0 = vld [vmem:[%s3457_s1 + $0x1e0] ss:$16 sps:$4 sm:$0xff]   ;;  %v2327_v1 = vld [vmem:[%s3457_s1 + $0x1e8] ss:$16 sps:$4 sm:$0xff]   ;;  %v2332_v2 = vld [vmem:[%s3457_s1 + $0x204] ss:$16 sps:$4 sm:$0xff]  }
  0x17   :  { %1615 = vmatpush1.bf16.msra.mxu0 %v2266_v22  ;;  %1779 = vmatpush1.bf16.msra.mxu1 %v2267_v23  ;;  %v2335_v3 = vld [vmem:[%s3457_s1 + $0x20c] ss:$16 sps:$4 sm:$0xff]   ;;  %v2330_v5 = vld [vmem:[%s3457_s1 + $0x200] ss:$16 sps:$4 sm:$0xff]   ;;  %v2333_v6 = vld [vmem:[%s3457_s1 + $0x208] ss:$16 sps:$4 sm:$0xff]  }
  0x18   :  { %1616 = vmatprep.subr.bf16.mxu0 %v2268_v24  ;;  %1780 = vmatprep.subr.bf16.mxu1 %v2270_v25  ;;  %v2338_v7 = vld [vmem:[%s3457_s1 + $0x224] ss:$16 sps:$4 sm:$0xff]   ;;  %v2341_v8 = vld [vmem:[%s3457_s1 + $0x22c] ss:$16 sps:$4 sm:$0xff]   ;;  %v2336_v9 = vld [vmem:[%s3457_s1 + $0x220] ss:$16 sps:$4 sm:$0xff]  }
  0x19   :  { %v2339_v10 = vld [vmem:[%s3457_s1 + $0x228] ss:$16 sps:$4 sm:$0xff]   ;;  %v2344_v11 = vld [vmem:[%s3457_s1 + $0x244] ss:$16 sps:$4 sm:$0xff]   ;;  %v2347_v12 = vld [vmem:[%s3457_s1 + $0x24c] ss:$16 sps:$4 sm:$0xff]  }
  0x1a   :  { %v2342_v13 = vld [vmem:[%s3457_s1 + $0x240] ss:$16 sps:$4 sm:$0xff]   ;;  %v2345_v14 = vld [vmem:[%s3457_s1 + $0x248] ss:$16 sps:$4 sm:$0xff]   ;;  %v2350_v15 = vld [vmem:[%s3457_s1 + $0x264] ss:$16 sps:$4 sm:$0xff]  }
  0x1b   :  { %1617 = vmatpush1.bf16.msra.mxu0 %v2272_v26  ;;  %1781 = vmatpush1.bf16.msra.mxu1 %v2273_v27  ;;  %v2353_v16 = vld [vmem:[%s3457_s1 + $0x26c] ss:$16 sps:$4 sm:$0xff]   ;;  %v2348_v17 = vld [vmem:[%s3457_s1 + $0x260] ss:$16 sps:$4 sm:$0xff]   ;;  %v2351_v18 = vld [vmem:[%s3457_s1 + $0x268] ss:$16 sps:$4 sm:$0xff]  }
  0x1c   :  { %1618 = vmatprep.subr.bf16.mxu0 %v2274_v28  ;;  %1782 = vmatprep.subr.bf16.mxu1 %v2276_v29  ;;  %v2356_v19 = vld [vmem:[%s3457_s1 + $0x284] ss:$16 sps:$4 sm:$0xff]   ;;  %v2359_v20 = vld [vmem:[%s3457_s1 + $0x28c] ss:$16 sps:$4 sm:$0xff]   ;;  %v2354_v21 = vld [vmem:[%s3457_s1 + $0x280] ss:$16 sps:$4 sm:$0xff]  }
  0x1d   :  { %v2357_v22 = vld [vmem:[%s3457_s1 + $0x288] ss:$16 sps:$4 sm:$0xff]   ;;  %v2362_v23 = vld [vmem:[%s3457_s1 + $0x2a4] ss:$16 sps:$4 sm:$0xff]   ;;  %v2365_v24 = vld [vmem:[%s3457_s1 + $0x2ac] ss:$16 sps:$4 sm:$0xff]  }
  0x1e   :  { %v2360_v25 = vld [vmem:[%s3457_s1 + $0x2a0] ss:$16 sps:$4 sm:$0xff]   ;;  %v2363_v26 = vld [vmem:[%s3457_s1 + $0x2a8] ss:$16 sps:$4 sm:$0xff]   ;;  %v2368_v27 = vld [vmem:[%s3457_s1 + $0x2c4] ss:$16 sps:$4 sm:$0xff]  }
  0x1f   :  { %1619 = vmatpush1.bf16.msra.mxu0 %v2278_v30  ;;  %1783 = vmatpush1.bf16.msra.mxu1 %v2279_v31  ;;  %v2371_v28 = vld [vmem:[%s3457_s1 + $0x2cc] ss:$16 sps:$4 sm:$0xff]   ;;  %v2366_v31 = vld [vmem:[%s3457_s1 + $0x2c0] ss:$16 sps:$4 sm:$0xff]   ;;  %v2393_v48 = vld [vmem:[%s3457_s1 + $0x348] ss:$16 sps:$4 sm:$0xff]  }
  0x20   :  { %1620 = vmatprep.subr.bf16.mxu0 %v2280_v32  ;;  %1784 = vmatprep.subr.bf16.mxu1 %v2282_v33  ;;  %v2920_v29 = vld [vmem:[%s3458_s0 + $0x8] sm:$0xff]  ;;  %v2374_v33 = vld [vmem:[%s3457_s1 + $0x2e4] ss:$16 sps:$4 sm:$0xff]  }
  0x21   :  { %v1943_v30 = vcombine.high %v2920_v29, %v2920_v29  ;;  %v2369_v32 = vld [vmem:[%s3457_s1 + $0x2c8] ss:$16 sps:$4 sm:$0xff]   ;;  %v2395_v46 = vld [vmem:[%s3457_s1 + $0x34c] ss:$16 sps:$4 sm:$0xff]  }
  0x23   :  { %1621 = vmatpush1.bf16.msra.mxu0 %v2284_v34  ;;  %1785 = vmatpush1.bf16.msra.mxu1 %v2285_v35  ;;  %v2377_v34 = vld [vmem:[%s3457_s1 + $0x2ec] ss:$16 sps:$4 sm:$0xff]   ;;  %v2372_v35 = vld [vmem:[%s3457_s1 + $0x2e0] ss:$16 sps:$4 sm:$0xff]  }
  0x24   :  { %1622 = vmatprep.subr.bf16.mxu0 %v2286_v36  ;;  %1786 = vmatprep.subr.bf16.mxu1 %v2288_v37  ;;  %v2375_v36 = vld [vmem:[%s3457_s1 + $0x2e8] ss:$16 sps:$4 sm:$0xff]   ;;  %v2380_v37 = vld [vmem:[%s3457_s1 + $0x304] ss:$16 sps:$4 sm:$0xff]  }
  0x27   :  { %1623 = vmatpush1.bf16.msra.mxu0 %v2290_v38  ;;  %1787 = vmatpush1.bf16.msra.mxu1 %v2291_v39  ;;  %v2383_v38 = vld [vmem:[%s3457_s1 + $0x30c] ss:$16 sps:$4 sm:$0xff]   ;;  %v2378_v39 = vld [vmem:[%s3457_s1 + $0x300] ss:$16 sps:$4 sm:$0xff]  }
  0x28   :  { %1624 = vmatprep.subr.bf16.mxu0 %v2292_v40  ;;  %1788 = vmatprep.subr.bf16.mxu1 %v2294_v41  ;;  %v2381_v40 = vld [vmem:[%s3457_s1 + $0x308] ss:$16 sps:$4 sm:$0xff]   ;;  %v2386_v41 = vld [vmem:[%s3457_s1 + $0x324] ss:$16 sps:$4 sm:$0xff]  }
  0x2b   :  { %1625 = vmatpush1.bf16.msra.mxu0 %v2296_v42  ;;  %1789 = vmatpush1.bf16.msra.mxu1 %v2297_v43  ;;  %v2389_v42 = vld [vmem:[%s3457_s1 + $0x32c] ss:$16 sps:$4 sm:$0xff]   ;;  %v2384_v43 = vld [vmem:[%s3457_s1 + $0x320] ss:$16 sps:$4 sm:$0xff]  }
  0x2c   :  { %1626 = vmatprep.subr.bf16.mxu0 %v2298_v44  ;;  %1790 = vmatprep.subr.bf16.mxu1 %v2300_v45  ;;  %v2387_v44 = vld [vmem:[%s3457_s1 + $0x328] ss:$16 sps:$4 sm:$0xff]   ;;  %v2392_v45 = vld [vmem:[%s3457_s1 + $0x344] ss:$16 sps:$4 sm:$0xff]  }
  0x2f   :  { %1627 = vmatpush1.bf16.msra.mxu0 %v2302_v47  ;;  %1791 = vmatpush1.bf16.msra.mxu1 %v2303_v49  ;;  %v2390_v47 = vld [vmem:[%s3457_s1 + $0x340] ss:$16 sps:$4 sm:$0xff]   ;;  %v2398_v49 = vld [vmem:[%s3457_s1 + $0x364] ss:$16 sps:$4 sm:$0xff]  }
  0x30   :  { %1628 = vmatprep.subr.bf16.mxu0 %v2304_v50  ;;  %1792 = vmatprep.subr.bf16.mxu1 %v2306_v51  ;;  %v2401_v50 = vld [vmem:[%s3457_s1 + $0x36c] ss:$16 sps:$4 sm:$0xff]   ;;  %v2396_v51 = vld [vmem:[%s3457_s1 + $0x360] ss:$16 sps:$4 sm:$0xff]  }
  0x33   :  { %1629 = vmatpush1.bf16.msra.mxu0 %v2308_v52  ;;  %1793 = vmatpush1.bf16.msra.mxu1 %v2309_v53  ;;  %v2399_v52 = vld [vmem:[%s3457_s1 + $0x368] ss:$16 sps:$4 sm:$0xff]   ;;  %v2404_v53 = vld [vmem:[%s3457_s1 + $0x384] ss:$16 sps:$4 sm:$0xff]  }
  0x34   :  { %1630 = vmatprep.subr.bf16.mxu0 %v2310_v54  ;;  %1794 = vmatprep.subr.bf16.mxu1 %v2312_v55  ;;  %v2407_v54 = vld [vmem:[%s3457_s1 + $0x38c] ss:$16 sps:$4 sm:$0xff]   ;;  %v2402_v55 = vld [vmem:[%s3457_s1 + $0x380] ss:$16 sps:$4 sm:$0xff]  }
  0x37   :  { %1631 = vmatpush1.bf16.msra.mxu0 %v2314_v56  ;;  %1795 = vmatpush1.bf16.msra.mxu1 %v2315_v57  ;;  %v2405_v56 = vld [vmem:[%s3457_s1 + $0x388] ss:$16 sps:$4 sm:$0xff]   ;;  %v2410_v57 = vld [vmem:[%s3457_s1 + $0x3a4] ss:$16 sps:$4 sm:$0xff]  }
  0x38   :  { %1632 = vmatprep.subr.bf16.mxu0 %v2316_v58  ;;  %1796 = vmatprep.subr.bf16.mxu1 %v2318_v59  ;;  %v2413_v58 = vld [vmem:[%s3457_s1 + $0x3ac] ss:$16 sps:$4 sm:$0xff]   ;;  %v2408_v59 = vld [vmem:[%s3457_s1 + $0x3a0] ss:$16 sps:$4 sm:$0xff]  }
  0x3b   :  { %1633 = vmatpush1.bf16.msra.mxu0 %v2320_v60  ;;  %1797 = vmatpush1.bf16.msra.mxu1 %v2321_v61  ;;  %v2411_v60 = vld [vmem:[%s3457_s1 + $0x3a8] ss:$16 sps:$4 sm:$0xff]   ;;  %v2416_v61 = vld [vmem:[%s3457_s1 + $0x3c4] ss:$16 sps:$4 sm:$0xff]  }
  0x3c   :  { %1634 = vmatprep.subr.bf16.mxu0 %v2322_v62  ;;  %1798 = vmatprep.subr.bf16.mxu1 %v2324_v63  ;;  %v2419_v62 = vld [vmem:[%s3457_s1 + $0x3cc] ss:$16 sps:$4 sm:$0xff]   ;;  %v2414_v63 = vld [vmem:[%s3457_s1 + $0x3c0] ss:$16 sps:$4 sm:$0xff]  }
  0x3f   :  { %1635 = vmatpush1.bf16.msra.mxu0 %v2326_v0  ;;  %1799 = vmatpush1.bf16.msra.mxu1 %v2327_v1  ;;  %v2417_v0 = vld [vmem:[%s3457_s1 + $0x3c8] ss:$16 sps:$4 sm:$0xff]   ;;  %v2422_v1 = vld [vmem:[%s3457_s1 + $0x3e4] ss:$16 sps:$4 sm:$0xff]  }
  0x40   :  { %1645 = vmatprep.subr.bf16.mxu0 %v2332_v2  ;;  %1809 = vmatprep.subr.bf16.mxu1 %v2335_v3  ;;  %v2425_v2 = vld [vmem:[%s3457_s1 + $0x3ec] ss:$16 sps:$4 sm:$0xff]   ;;  %v2420_v3 = vld [vmem:[%s3457_s1 + $0x3e0] ss:$16 sps:$4 sm:$0xff]  }
  0x42   :  { %1637 = vmatmul.mubr.bf16.vlgmr.msra.gmra.mrb[0].mxu0 %v1940_v4  ;;  %1801 = vmatmul.mubr.bf16.vlgmr.msra.gmra.mrb[0].mxu1 %v1940_v4  ;;  %v2423_v4 = vld [vmem:[%s3457_s1 + $0x3e8] ss:$16 sps:$4 sm:$0xff]  }
  0x43   :  { %1646 = vmatpush1.bf16.msra.mxu0 %v2330_v5  ;;  %1810 = vmatpush1.bf16.msra.mxu1 %v2333_v6  ;;  %v2430_v5 = vld [vmem:[%s3457_s1 + $0x404] ss:$16 sps:$4 sm:$0xff]   ;;  %v2433_v6 = vld [vmem:[%s3457_s1 + $0x40c] ss:$16 sps:$4 sm:$0xff]  }
  0x44   :  { %1647 = vmatprep.subr.bf16.mxu0 %v2338_v7  ;;  %1811 = vmatprep.subr.bf16.mxu1 %v2341_v8  ;;  %v1942_v7 = vcombine.low %v2920_v29, %v2920_v29  ;;  %v2428_v8 = vld [vmem:[%s3457_s1 + $0x400] ss:$16 sps:$4 sm:$0xff]   ;;  %v2463_v29 = vld [vmem:[%s3457_s1 + $0x4ac] ss:$16 sps:$4 sm:$0xff]  }
  0x45   :  { %1677 = vmatprep.mubr.bf16.mxu0 %v1943_v30  ;;  %1841 = vmatprep.mubr.bf16.mxu1 %v1943_v30  ;;  %v2458_v30 = vld [vmem:[%s3457_s1 + $0x4a0] ss:$16 sps:$4 sm:$0xff]  }
  0x47   :  { %1648 = vmatpush1.bf16.msra.mxu0 %v2336_v9  ;;  %1812 = vmatpush1.bf16.msra.mxu1 %v2339_v10  ;;  %v2431_v9 = vld [vmem:[%s3457_s1 + $0x408] ss:$16 sps:$4 sm:$0xff]   ;;  %v2436_v10 = vld [vmem:[%s3457_s1 + $0x424] ss:$16 sps:$4 sm:$0xff]  }
  0x48   :  { %1649 = vmatprep.subr.bf16.mxu0 %v2344_v11  ;;  %1813 = vmatprep.subr.bf16.mxu1 %v2347_v12  ;;  %v3058_v11 = vld [vmem:[%s3458_s0 + $0x10] sm:$0xff]  ;;  %v2439_v12 = vld [vmem:[%s3457_s1 + $0x42c] ss:$16 sps:$4 sm:$0xff]  }
  0x4b   :  { %1650 = vmatpush1.bf16.msra.mxu0 %v2342_v13  ;;  %1814 = vmatpush1.bf16.msra.mxu1 %v2345_v14  ;;  %v1945_v13 = vcombine.high %v3058_v11, %v3058_v11  ;;  %v2434_v14 = vld [vmem:[%s3457_s1 + $0x420] ss:$16 sps:$4 sm:$0xff]  }
  0x4c   :  { %1651 = vmatprep.subr.bf16.mxu0 %v2350_v15  ;;  %1815 = vmatprep.subr.bf16.mxu1 %v2353_v16  ;;  %v2437_v15 = vld [vmem:[%s3457_s1 + $0x428] ss:$16 sps:$4 sm:$0xff]   ;;  %v2442_v16 = vld [vmem:[%s3457_s1 + $0x444] ss:$16 sps:$4 sm:$0xff]  }
  0x4f   :  { %1652 = vmatpush1.bf16.msra.mxu0 %v2348_v17  ;;  %1816 = vmatpush1.bf16.msra.mxu1 %v2351_v18  ;;  %v2445_v17 = vld [vmem:[%s3457_s1 + $0x44c] ss:$16 sps:$4 sm:$0xff]   ;;  %v2440_v18 = vld [vmem:[%s3457_s1 + $0x440] ss:$16 sps:$4 sm:$0xff]  }
  0x50   :  { %1653 = vmatprep.subr.bf16.mxu0 %v2356_v19  ;;  %1817 = vmatprep.subr.bf16.mxu1 %v2359_v20  ;;  %v2443_v19 = vld [vmem:[%s3457_s1 + $0x448] ss:$16 sps:$4 sm:$0xff]   ;;  %v2448_v20 = vld [vmem:[%s3457_s1 + $0x464] ss:$16 sps:$4 sm:$0xff]  }
  0x53   :  { %1654 = vmatpush1.bf16.msra.mxu0 %v2354_v21  ;;  %1818 = vmatpush1.bf16.msra.mxu1 %v2357_v22  ;;  %v2451_v21 = vld [vmem:[%s3457_s1 + $0x46c] ss:$16 sps:$4 sm:$0xff]   ;;  %v2446_v22 = vld [vmem:[%s3457_s1 + $0x460] ss:$16 sps:$4 sm:$0xff]  }
  0x54   :  { %1655 = vmatprep.subr.bf16.mxu0 %v2362_v23  ;;  %1819 = vmatprep.subr.bf16.mxu1 %v2365_v24  ;;  %v2449_v23 = vld [vmem:[%s3457_s1 + $0x468] ss:$16 sps:$4 sm:$0xff]   ;;  %v2454_v24 = vld [vmem:[%s3457_s1 + $0x484] ss:$16 sps:$4 sm:$0xff]  }
  0x57   :  { %1656 = vmatpush1.bf16.msra.mxu0 %v2360_v25  ;;  %1820 = vmatpush1.bf16.msra.mxu1 %v2363_v26  ;;  %v2457_v25 = vld [vmem:[%s3457_s1 + $0x48c] ss:$16 sps:$4 sm:$0xff]   ;;  %v2452_v26 = vld [vmem:[%s3457_s1 + $0x480] ss:$16 sps:$4 sm:$0xff]  }
  0x58   :  { %1657 = vmatprep.subr.bf16.mxu0 %v2368_v27  ;;  %1821 = vmatprep.subr.bf16.mxu1 %v2371_v28  ;;  %v2455_v27 = vld [vmem:[%s3457_s1 + $0x488] ss:$16 sps:$4 sm:$0xff]   ;;  %v2460_v28 = vld [vmem:[%s3457_s1 + $0x4a4] ss:$16 sps:$4 sm:$0xff]  }
  0x5b   :  { %1658 = vmatpush1.bf16.msra.mxu0 %v2366_v31  ;;  %1822 = vmatpush1.bf16.msra.mxu1 %v2369_v32  ;;  %v2461_v31 = vld [vmem:[%s3457_s1 + $0x4a8] ss:$16 sps:$4 sm:$0xff]   ;;  %v2466_v32 = vld [vmem:[%s3457_s1 + $0x4c4] ss:$16 sps:$4 sm:$0xff]  }
  0x5c   :  { %1659 = vmatprep.subr.bf16.mxu0 %v2374_v33  ;;  %1823 = vmatprep.subr.bf16.mxu1 %v2377_v34  ;;  %v2469_v33 = vld [vmem:[%s3457_s1 + $0x4cc] ss:$16 sps:$4 sm:$0xff]   ;;  %v2464_v34 = vld [vmem:[%s3457_s1 + $0x4c0] ss:$16 sps:$4 sm:$0xff]  }
  0x5f   :  { %1660 = vmatpush1.bf16.msra.mxu0 %v2372_v35  ;;  %1824 = vmatpush1.bf16.msra.mxu1 %v2375_v36  ;;  %v2467_v35 = vld [vmem:[%s3457_s1 + $0x4c8] ss:$16 sps:$4 sm:$0xff]   ;;  %v2472_v36 = vld [vmem:[%s3457_s1 + $0x4e4] ss:$16 sps:$4 sm:$0xff]  }
  0x60   :  { %1661 = vmatprep.subr.bf16.mxu0 %v2380_v37  ;;  %1825 = vmatprep.subr.bf16.mxu1 %v2383_v38  ;;  %v2475_v37 = vld [vmem:[%s3457_s1 + $0x4ec] ss:$16 sps:$4 sm:$0xff]   ;;  %v2470_v38 = vld [vmem:[%s3457_s1 + $0x4e0] ss:$16 sps:$4 sm:$0xff]  }
  0x63   :  { %1662 = vmatpush1.bf16.msra.mxu0 %v2378_v39  ;;  %1826 = vmatpush1.bf16.msra.mxu1 %v2381_v40  ;;  %v2473_v39 = vld [vmem:[%s3457_s1 + $0x4e8] ss:$16 sps:$4 sm:$0xff]   ;;  %v2478_v40 = vld [vmem:[%s3457_s1 + $0x504] ss:$16 sps:$4 sm:$0xff]  }
  0x64   :  { %1663 = vmatprep.subr.bf16.mxu0 %v2386_v41  ;;  %1827 = vmatprep.subr.bf16.mxu1 %v2389_v42  ;;  %v2481_v41 = vld [vmem:[%s3457_s1 + $0x50c] ss:$16 sps:$4 sm:$0xff]   ;;  %v2476_v42 = vld [vmem:[%s3457_s1 + $0x500] ss:$16 sps:$4 sm:$0xff]  }
  0x67   :  { %1664 = vmatpush1.bf16.msra.mxu0 %v2384_v43  ;;  %1828 = vmatpush1.bf16.msra.mxu1 %v2387_v44  ;;  %v2479_v43 = vld [vmem:[%s3457_s1 + $0x508] ss:$16 sps:$4 sm:$0xff]   ;;  %v2484_v44 = vld [vmem:[%s3457_s1 + $0x524] ss:$16 sps:$4 sm:$0xff]  }
  0x68   :  { %1665 = vmatprep.subr.bf16.mxu0 %v2392_v45  ;;  %1829 = vmatprep.subr.bf16.mxu1 %v2395_v46  ;;  %v2487_v45 = vld [vmem:[%s3457_s1 + $0x52c] ss:$16 sps:$4 sm:$0xff]   ;;  %v2482_v46 = vld [vmem:[%s3457_s1 + $0x520] ss:$16 sps:$4 sm:$0xff]  }
  0x6b   :  { %1666 = vmatpush1.bf16.msra.mxu0 %v2390_v47  ;;  %1830 = vmatpush1.bf16.msra.mxu1 %v2393_v48  ;;  %v2485_v47 = vld [vmem:[%s3457_s1 + $0x528] ss:$16 sps:$4 sm:$0xff]   ;;  %v2490_v48 = vld [vmem:[%s3457_s1 + $0x544] ss:$16 sps:$4 sm:$0xff]  }
  0x6c   :  { %1667 = vmatprep.subr.bf16.mxu0 %v2398_v49  ;;  %1831 = vmatprep.subr.bf16.mxu1 %v2401_v50  ;;  %v2493_v49 = vld [vmem:[%s3457_s1 + $0x54c] ss:$16 sps:$4 sm:$0xff]   ;;  %v2488_v50 = vld [vmem:[%s3457_s1 + $0x540] ss:$16 sps:$4 sm:$0xff]  }
  0x6f   :  { %1668 = vmatpush1.bf16.msra.mxu0 %v2396_v51  ;;  %1832 = vmatpush1.bf16.msra.mxu1 %v2399_v52  ;;  %v2491_v51 = vld [vmem:[%s3457_s1 + $0x548] ss:$16 sps:$4 sm:$0xff]   ;;  %v2496_v52 = vld [vmem:[%s3457_s1 + $0x564] ss:$16 sps:$4 sm:$0xff]  }
  0x70   :  { %1669 = vmatprep.subr.bf16.mxu0 %v2404_v53  ;;  %1833 = vmatprep.subr.bf16.mxu1 %v2407_v54  ;;  %v2499_v53 = vld [vmem:[%s3457_s1 + $0x56c] ss:$16 sps:$4 sm:$0xff]   ;;  %v2494_v54 = vld [vmem:[%s3457_s1 + $0x560] ss:$16 sps:$4 sm:$0xff]  }
  0x73   :  { %1670 = vmatpush1.bf16.msra.mxu0 %v2402_v55  ;;  %1834 = vmatpush1.bf16.msra.mxu1 %v2405_v56  ;;  %v2497_v55 = vld [vmem:[%s3457_s1 + $0x568] ss:$16 sps:$4 sm:$0xff]   ;;  %v2502_v56 = vld [vmem:[%s3457_s1 + $0x584] ss:$16 sps:$4 sm:$0xff]  }
  0x74   :  { %1671 = vmatprep.subr.bf16.mxu0 %v2410_v57  ;;  %1835 = vmatprep.subr.bf16.mxu1 %v2413_v58  ;;  %v2505_v57 = vld [vmem:[%s3457_s1 + $0x58c] ss:$16 sps:$4 sm:$0xff]   ;;  %v2500_v58 = vld [vmem:[%s3457_s1 + $0x580] ss:$16 sps:$4 sm:$0xff]  }
  0x77   :  { %1672 = vmatpush1.bf16.msra.mxu0 %v2408_v59  ;;  %1836 = vmatpush1.bf16.msra.mxu1 %v2411_v60  ;;  %v2503_v59 = vld [vmem:[%s3457_s1 + $0x588] ss:$16 sps:$4 sm:$0xff]   ;;  %v2508_v60 = vld [vmem:[%s3457_s1 + $0x5a4] ss:$16 sps:$4 sm:$0xff]  }
  0x78   :  { %1673 = vmatprep.subr.bf16.mxu0 %v2416_v61  ;;  %1837 = vmatprep.subr.bf16.mxu1 %v2419_v62  ;;  %v2511_v61 = vld [vmem:[%s3457_s1 + $0x5ac] ss:$16 sps:$4 sm:$0xff]   ;;  %v2506_v62 = vld [vmem:[%s3457_s1 + $0x5a0] ss:$16 sps:$4 sm:$0xff]  }
  0x7b   :  { %1674 = vmatpush1.bf16.msra.mxu0 %v2414_v63  ;;  %1838 = vmatpush1.bf16.msra.mxu1 %v2417_v0  ;;  %v2509_v63 = vld [vmem:[%s3457_s1 + $0x5a8] ss:$16 sps:$4 sm:$0xff]   ;;  %v2514_v0 = vld [vmem:[%s3457_s1 + $0x5c4] ss:$16 sps:$4 sm:$0xff]  }
  0x7c   :  { %1675 = vmatprep.subr.bf16.mxu0 %v2422_v1  ;;  %1839 = vmatprep.subr.bf16.mxu1 %v2425_v2  ;;  %v2517_v1 = vld [vmem:[%s3457_s1 + $0x5cc] ss:$16 sps:$4 sm:$0xff]   ;;  %v2512_v2 = vld [vmem:[%s3457_s1 + $0x5c0] ss:$16 sps:$4 sm:$0xff]  }
  0x7f   :  { %1676 = vmatpush1.bf16.msra.mxu0 %v2420_v3  ;;  %1840 = vmatpush1.bf16.msra.mxu1 %v2423_v4  ;;  %v2515_v3 = vld [vmem:[%s3457_s1 + $0x5c8] ss:$16 sps:$4 sm:$0xff]   ;;  %v2520_v4 = vld [vmem:[%s3457_s1 + $0x5e4] ss:$16 sps:$4 sm:$0xff]  }
  0x80   :  { %1686 = vmatprep.subr.bf16.mxu0 %v2430_v5  ;;  %1850 = vmatprep.subr.bf16.mxu1 %v2433_v6  ;;  %v2523_v5 = vld [vmem:[%s3457_s1 + $0x5ec] ss:$16 sps:$4 sm:$0xff]   ;;  %v2518_v6 = vld [vmem:[%s3457_s1 + $0x5e0] ss:$16 sps:$4 sm:$0xff]  }
  0x82   :  { %1678 = vmatmul.mubr.bf16.vlgmr.msra.gmra.mrb[0].mxu0 %v1942_v7  ;;  %1842 = vmatmul.mubr.bf16.vlgmr.msra.gmra.mrb[0].mxu1 %v1942_v7  ;;  %v2521_v7 = vld [vmem:[%s3457_s1 + $0x5e8] ss:$16 sps:$4 sm:$0xff]  }
  0x83   :  { %1687 = vmatpush1.bf16.msra.mxu0 %v2428_v8  ;;  %1851 = vmatpush1.bf16.msra.mxu1 %v2431_v9  ;;  %v2528_v8 = vld [vmem:[%s3457_s1 + $0x604] ss:$16 sps:$4 sm:$0xff]   ;;  %v2531_v9 = vld [vmem:[%s3457_s1 + $0x60c] ss:$16 sps:$4 sm:$0xff]  }
  0x84   :  { %1688 = vmatprep.subr.bf16.mxu0 %v2436_v10  ;;  %1852 = vmatprep.subr.bf16.mxu1 %v2439_v12  ;;  %v1944_v10 = vcombine.low %v3058_v11, %v3058_v11  ;;  %v3250_v12 = vld [vmem:[%s3458_s0 + $0x18] sm:$0xff]  ;;  %v2534_v11 = vld [vmem:[%s3457_s1 + $0x624] ss:$16 sps:$4 sm:$0xff]  }
  0x85   :  { %1718 = vmatprep.mubr.bf16.mxu0 %v1945_v13  ;;  %1882 = vmatprep.mubr.bf16.mxu1 %v1945_v13  ;;  %v2526_v13 = vld [vmem:[%s3457_s1 + $0x600] ss:$16 sps:$4 sm:$0xff]  }
  0x87   :  { %1689 = vmatpush1.bf16.msra.mxu0 %v2434_v14  ;;  %1853 = vmatpush1.bf16.msra.mxu1 %v2437_v15  ;;  %v2529_v14 = vld [vmem:[%s3457_s1 + $0x608] ss:$16 sps:$4 sm:$0xff]   ;;  %v2537_v15 = vld [vmem:[%s3457_s1 + $0x62c] ss:$16 sps:$4 sm:$0xff]  }
  0x88   :  { %1690 = vmatprep.subr.bf16.mxu0 %v2442_v16  ;;  %1854 = vmatprep.subr.bf16.mxu1 %v2445_v17  ;;  %v1947_v16 = vcombine.high %v3250_v12, %v3250_v12  ;;  %v2532_v17 = vld [vmem:[%s3457_s1 + $0x620] ss:$16 sps:$4 sm:$0xff]  }
  0x8b   :  { %1691 = vmatpush1.bf16.msra.mxu0 %v2440_v18  ;;  %1855 = vmatpush1.bf16.msra.mxu1 %v2443_v19  ;;  %v2535_v18 = vld [vmem:[%s3457_s1 + $0x628] ss:$16 sps:$4 sm:$0xff]   ;;  %v2540_v19 = vld [vmem:[%s3457_s1 + $0x644] ss:$16 sps:$4 sm:$0xff]  }
  0x8c   :  { %1692 = vmatprep.subr.bf16.mxu0 %v2448_v20  ;;  %1856 = vmatprep.subr.bf16.mxu1 %v2451_v21  ;;  %v2543_v20 = vld [vmem:[%s3457_s1 + $0x64c] ss:$16 sps:$4 sm:$0xff]   ;;  %v2538_v21 = vld [vmem:[%s3457_s1 + $0x640] ss:$16 sps:$4 sm:$0xff]  }
  0x8f   :  { %1693 = vmatpush1.bf16.msra.mxu0 %v2446_v22  ;;  %1857 = vmatpush1.bf16.msra.mxu1 %v2449_v23  ;;  %v2541_v22 = vld [vmem:[%s3457_s1 + $0x648] ss:$16 sps:$4 sm:$0xff]   ;;  %v2546_v23 = vld [vmem:[%s3457_s1 + $0x664] ss:$16 sps:$4 sm:$0xff]  }
  0x90   :  { %1694 = vmatprep.subr.bf16.mxu0 %v2454_v24  ;;  %1858 = vmatprep.subr.bf16.mxu1 %v2457_v25  ;;  %v2549_v24 = vld [vmem:[%s3457_s1 + $0x66c] ss:$16 sps:$4 sm:$0xff]   ;;  %v2544_v25 = vld [vmem:[%s3457_s1 + $0x660] ss:$16 sps:$4 sm:$0xff]  }
  0x93   :  { %1695 = vmatpush1.bf16.msra.mxu0 %v2452_v26  ;;  %1859 = vmatpush1.bf16.msra.mxu1 %v2455_v27  ;;  %v2547_v26 = vld [vmem:[%s3457_s1 + $0x668] ss:$16 sps:$4 sm:$0xff]   ;;  %v2552_v27 = vld [vmem:[%s3457_s1 + $0x684] ss:$16 sps:$4 sm:$0xff]  }
  0x94   :  { %1696 = vmatprep.subr.bf16.mxu0 %v2460_v28  ;;  %1860 = vmatprep.subr.bf16.mxu1 %v2463_v29  ;;  %v2555_v28 = vld [vmem:[%s3457_s1 + $0x68c] ss:$16 sps:$4 sm:$0xff]   ;;  %v2550_v29 = vld [vmem:[%s3457_s1 + $0x680] ss:$16 sps:$4 sm:$0xff]  }
  0x97   :  { %1697 = vmatpush1.bf16.msra.mxu0 %v2458_v30  ;;  %1861 = vmatpush1.bf16.msra.mxu1 %v2461_v31  ;;  %v2553_v30 = vld [vmem:[%s3457_s1 + $0x688] ss:$16 sps:$4 sm:$0xff]   ;;  %v2558_v31 = vld [vmem:[%s3457_s1 + $0x6a4] ss:$16 sps:$4 sm:$0xff]  }
  0x98   :  { %1698 = vmatprep.subr.bf16.mxu0 %v2466_v32  ;;  %1862 = vmatprep.subr.bf16.mxu1 %v2469_v33  ;;  %v2561_v32 = vld [vmem:[%s3457_s1 + $0x6ac] ss:$16 sps:$4 sm:$0xff]   ;;  %v2556_v33 = vld [vmem:[%s3457_s1 + $0x6a0] ss:$16 sps:$4 sm:$0xff]  }
  0x9b   :  { %1699 = vmatpush1.bf16.msra.mxu0 %v2464_v34  ;;  %1863 = vmatpush1.bf16.msra.mxu1 %v2467_v35  ;;  %v2559_v34 = vld [vmem:[%s3457_s1 + $0x6a8] ss:$16 sps:$4 sm:$0xff]   ;;  %v2564_v35 = vld [vmem:[%s3457_s1 + $0x6c4] ss:$16 sps:$4 sm:$0xff]  }
  0x9c   :  { %1700 = vmatprep.subr.bf16.mxu0 %v2472_v36  ;;  %1864 = vmatprep.subr.bf16.mxu1 %v2475_v37  ;;  %v2567_v36 = vld [vmem:[%s3457_s1 + $0x6cc] ss:$16 sps:$4 sm:$0xff]   ;;  %v2562_v37 = vld [vmem:[%s3457_s1 + $0x6c0] ss:$16 sps:$4 sm:$0xff]  }
  0x9f   :  { %1701 = vmatpush1.bf16.msra.mxu0 %v2470_v38  ;;  %1865 = vmatpush1.bf16.msra.mxu1 %v2473_v39  ;;  %v2565_v38 = vld [vmem:[%s3457_s1 + $0x6c8] ss:$16 sps:$4 sm:$0xff]   ;;  %v2570_v39 = vld [vmem:[%s3457_s1 + $0x6e4] ss:$16 sps:$4 sm:$0xff]  }
  0xa0   :  { %1702 = vmatprep.subr.bf16.mxu0 %v2478_v40  ;;  %1866 = vmatprep.subr.bf16.mxu1 %v2481_v41  ;;  %v2573_v40 = vld [vmem:[%s3457_s1 + $0x6ec] ss:$16 sps:$4 sm:$0xff]   ;;  %v2568_v41 = vld [vmem:[%s3457_s1 + $0x6e0] ss:$16 sps:$4 sm:$0xff]  }
  0xa3   :  { %1703 = vmatpush1.bf16.msra.mxu0 %v2476_v42  ;;  %1867 = vmatpush1.bf16.msra.mxu1 %v2479_v43  ;;  %v2571_v42 = vld [vmem:[%s3457_s1 + $0x6e8] ss:$16 sps:$4 sm:$0xff]   ;;  %v2576_v43 = vld [vmem:[%s3457_s1 + $0x704] ss:$16 sps:$4 sm:$0xff]  }
  0xa4   :  { %1704 = vmatprep.subr.bf16.mxu0 %v2484_v44  ;;  %1868 = vmatprep.subr.bf16.mxu1 %v2487_v45  ;;  %v2579_v44 = vld [vmem:[%s3457_s1 + $0x70c] ss:$16 sps:$4 sm:$0xff]   ;;  %v2574_v45 = vld [vmem:[%s3457_s1 + $0x700] ss:$16 sps:$4 sm:$0xff]  }
  0xa7   :  { %1705 = vmatpush1.bf16.msra.mxu0 %v2482_v46  ;;  %1869 = vmatpush1.bf16.msra.mxu1 %v2485_v47  ;;  %v2577_v46 = vld [vmem:[%s3457_s1 + $0x708] ss:$16 sps:$4 sm:$0xff]   ;;  %v2582_v47 = vld [vmem:[%s3457_s1 + $0x724] ss:$16 sps:$4 sm:$0xff]  }
  0xa8   :  { %1706 = vmatprep.subr.bf16.mxu0 %v2490_v48  ;;  %1870 = vmatprep.subr.bf16.mxu1 %v2493_v49  ;;  %v2585_v48 = vld [vmem:[%s3457_s1 + $0x72c] ss:$16 sps:$4 sm:$0xff]   ;;  %v2580_v49 = vld [vmem:[%s3457_s1 + $0x720] ss:$16 sps:$4 sm:$0xff]  }
  0xab   :  { %1707 = vmatpush1.bf16.msra.mxu0 %v2488_v50  ;;  %1871 = vmatpush1.bf16.msra.mxu1 %v2491_v51  ;;  %v2583_v50 = vld [vmem:[%s3457_s1 + $0x728] ss:$16 sps:$4 sm:$0xff]   ;;  %v2588_v51 = vld [vmem:[%s3457_s1 + $0x744] ss:$16 sps:$4 sm:$0xff]  }
  0xac   :  { %1708 = vmatprep.subr.bf16.mxu0 %v2496_v52  ;;  %1872 = vmatprep.subr.bf16.mxu1 %v2499_v53  ;;  %v2591_v52 = vld [vmem:[%s3457_s1 + $0x74c] ss:$16 sps:$4 sm:$0xff]   ;;  %v2586_v53 = vld [vmem:[%s3457_s1 + $0x740] ss:$16 sps:$4 sm:$0xff]  }
  0xaf   :  { %1709 = vmatpush1.bf16.msra.mxu0 %v2494_v54  ;;  %1873 = vmatpush1.bf16.msra.mxu1 %v2497_v55  ;;  %v2589_v54 = vld [vmem:[%s3457_s1 + $0x748] ss:$16 sps:$4 sm:$0xff]   ;;  %v2594_v55 = vld [vmem:[%s3457_s1 + $0x764] ss:$16 sps:$4 sm:$0xff]  }
  0xb0   :  { %1710 = vmatprep.subr.bf16.mxu0 %v2502_v56  ;;  %1874 = vmatprep.subr.bf16.mxu1 %v2505_v57  ;;  %v2597_v56 = vld [vmem:[%s3457_s1 + $0x76c] ss:$16 sps:$4 sm:$0xff]   ;;  %v2592_v57 = vld [vmem:[%s3457_s1 + $0x760] ss:$16 sps:$4 sm:$0xff]  }
  0xb3   :  { %1711 = vmatpush1.bf16.msra.mxu0 %v2500_v58  ;;  %1875 = vmatpush1.bf16.msra.mxu1 %v2503_v59  ;;  %v2595_v58 = vld [vmem:[%s3457_s1 + $0x768] ss:$16 sps:$4 sm:$0xff]   ;;  %v2600_v59 = vld [vmem:[%s3457_s1 + $0x784] ss:$16 sps:$4 sm:$0xff]  }
  0xb4   :  { %1712 = vmatprep.subr.bf16.mxu0 %v2508_v60  ;;  %1876 = vmatprep.subr.bf16.mxu1 %v2511_v61  ;;  %v2603_v60 = vld [vmem:[%s3457_s1 + $0x78c] ss:$16 sps:$4 sm:$0xff]   ;;  %v2598_v61 = vld [vmem:[%s3457_s1 + $0x780] ss:$16 sps:$4 sm:$0xff]  }
  0xb7   :  { %1713 = vmatpush1.bf16.msra.mxu0 %v2506_v62  ;;  %1877 = vmatpush1.bf16.msra.mxu1 %v2509_v63  ;;  %v2601_v62 = vld [vmem:[%s3457_s1 + $0x788] ss:$16 sps:$4 sm:$0xff]   ;;  %v2606_v63 = vld [vmem:[%s3457_s1 + $0x7a4] ss:$16 sps:$4 sm:$0xff]  }
  0xb8   :  { %1714 = vmatprep.subr.bf16.mxu0 %v2514_v0  ;;  %1878 = vmatprep.subr.bf16.mxu1 %v2517_v1  ;;  %v2609_v0 = vld [vmem:[%s3457_s1 + $0x7ac] ss:$16 sps:$4 sm:$0xff]   ;;  %v2604_v1 = vld [vmem:[%s3457_s1 + $0x7a0] ss:$16 sps:$4 sm:$0xff]  }
  0xbb   :  { %1715 = vmatpush1.bf16.msra.mxu0 %v2512_v2  ;;  %1879 = vmatpush1.bf16.msra.mxu1 %v2515_v3  ;;  %v2607_v2 = vld [vmem:[%s3457_s1 + $0x7a8] ss:$16 sps:$4 sm:$0xff]   ;;  %v2612_v3 = vld [vmem:[%s3457_s1 + $0x7c4] ss:$16 sps:$4 sm:$0xff]  }
  0xbc   :  { %1716 = vmatprep.subr.bf16.mxu0 %v2520_v4  ;;  %1880 = vmatprep.subr.bf16.mxu1 %v2523_v5  ;;  %v2615_v4 = vld [vmem:[%s3457_s1 + $0x7cc] ss:$16 sps:$4 sm:$0xff]   ;;  %v2610_v5 = vld [vmem:[%s3457_s1 + $0x7c0] ss:$16 sps:$4 sm:$0xff]  }
  0xbf   :  { %1717 = vmatpush1.bf16.msra.mxu0 %v2518_v6  ;;  %1881 = vmatpush1.bf16.msra.mxu1 %v2521_v7  ;;  %v2613_v6 = vld [vmem:[%s3457_s1 + $0x7c8] ss:$16 sps:$4 sm:$0xff]   ;;  %v2618_v7 = vld [vmem:[%s3457_s1 + $0x7e4] ss:$16 sps:$4 sm:$0xff]  }
  0xc0   :  { %1727 = vmatprep.subr.bf16.mxu0 %v2528_v8  ;;  %1891 = vmatprep.subr.bf16.mxu1 %v2531_v9  ;;  %v2621_v8 = vld [vmem:[%s3457_s1 + $0x7ec] ss:$16 sps:$4 sm:$0xff]   ;;  %v2616_v9 = vld [vmem:[%s3457_s1 + $0x7e0] ss:$16 sps:$4 sm:$0xff]  }
  0xc2   :  { %1719 = vmatmul.mubr.bf16.vlgmr.msra.gmra.mrb[0].mxu0 %v1944_v10  ;;  %1883 = vmatmul.mubr.bf16.vlgmr.msra.gmra.mrb[0].mxu1 %v1944_v10  ;;  %v2619_v10 = vld [vmem:[%s3457_s1 + $0x7e8] ss:$16 sps:$4 sm:$0xff]  }
  0xc3   :  { %1728 = vmatpush1.bf16.msra.mxu0 %v2526_v13  ;;  %1892 = vmatpush1.bf16.msra.mxu1 %v2529_v14  ;;  %v1946_v13 = vcombine.low %v3250_v12, %v3250_v12  ;;  %v276_v14 = vlaneseq }
  0xc4   :  { %1729 = vmatprep.subr.bf16.mxu0 %v2534_v11  ;;  %1893 = vmatprep.subr.bf16.mxu1 %v2537_v15 }
  0xc5   :  { %1759 = vmatprep.mubr.bf16.mxu0 %v1947_v16  ;;  %1923 = vmatprep.mubr.bf16.mxu1 %v1947_v16  ;;  %v277_v11 = vshrl.u32 %v276_v14, 7 }
  0xc7   :  { %1730 = vmatpush1.bf16.msra.mxu0 %v2532_v17  ;;  %1894 = vmatpush1.bf16.msra.mxu1 %v2535_v18  ;;  %v278_v15 = vsub.s32 0, %v277_v11  ;;  %v286_v16 = vsub.s32 2, %v277_v11  ;;  %v274_v17 = vld [vmem:[%s3459_s2] sm:$0xf]  ;;  %v282_v18 = vsub.s32 1, %v277_v11 }
  0xc8   :  { %1731 = vmatprep.subr.bf16.mxu0 %v2540_v19  ;;  %1895 = vmatprep.subr.bf16.mxu1 %v2543_v20  ;;  %v290_v19 = vsub.s32 3, %v277_v11 }
  0xc9   :  { %v279_v20 = vrot.slane %v274_v17, %v278_v15 }
  0xcb   :  { %1732 = vmatpush1.bf16.msra.mxu0 %v2538_v21  ;;  %1896 = vmatpush1.bf16.msra.mxu1 %v2541_v22  ;;  %v287_v21 = vrot.slane %v274_v17, %v286_v16  ;;  %v283_v22 = vrot.slane %v274_v17, %v282_v18 }
  0xcc   :  { %1733 = vmatprep.subr.bf16.mxu0 %v2546_v23  ;;  %1897 = vmatprep.subr.bf16.mxu1 %v2549_v24  ;;  %v291_v23 = vrot.slane %v274_v17, %v290_v19 }
  0xcf   :  { %1734 = vmatpush1.bf16.msra.mxu0 %v2544_v25  ;;  %1898 = vmatpush1.bf16.msra.mxu1 %v2547_v26 }
  0xd0   :  { %1735 = vmatprep.subr.bf16.mxu0 %v2552_v27  ;;  %1899 = vmatprep.subr.bf16.mxu1 %v2555_v28 }
  0xd3   :  { %1736 = vmatpush1.bf16.msra.mxu0 %v2550_v29  ;;  %1900 = vmatpush1.bf16.msra.mxu1 %v2553_v30 }
  0xd4   :  { %1737 = vmatprep.subr.bf16.mxu0 %v2558_v31  ;;  %1901 = vmatprep.subr.bf16.mxu1 %v2561_v32 }
  0xd7   :  { %1738 = vmatpush1.bf16.msra.mxu0 %v2556_v33  ;;  %1902 = vmatpush1.bf16.msra.mxu1 %v2559_v34 }
  0xd8   :  { %1739 = vmatprep.subr.bf16.mxu0 %v2564_v35  ;;  %1903 = vmatprep.subr.bf16.mxu1 %v2567_v36 }
  0xdb   :  { %1740 = vmatpush1.bf16.msra.mxu0 %v2562_v37  ;;  %1904 = vmatpush1.bf16.msra.mxu1 %v2565_v38 }
  0xdc   :  { %1741 = vmatprep.subr.bf16.mxu0 %v2570_v39  ;;  %1905 = vmatprep.subr.bf16.mxu1 %v2573_v40 }
  0xdf   :  { %1742 = vmatpush1.bf16.msra.mxu0 %v2568_v41  ;;  %1906 = vmatpush1.bf16.msra.mxu1 %v2571_v42 }
  0xe0   :  { %1743 = vmatprep.subr.bf16.mxu0 %v2576_v43  ;;  %1907 = vmatprep.subr.bf16.mxu1 %v2579_v44 }
  0xe3   :  { %1744 = vmatpush1.bf16.msra.mxu0 %v2574_v45  ;;  %1908 = vmatpush1.bf16.msra.mxu1 %v2577_v46 }
  0xe4   :  { %1745 = vmatprep.subr.bf16.mxu0 %v2582_v47  ;;  %1909 = vmatprep.subr.bf16.mxu1 %v2585_v48 }
  0xe7   :  { %1746 = vmatpush1.bf16.msra.mxu0 %v2580_v49  ;;  %1910 = vmatpush1.bf16.msra.mxu1 %v2583_v50 }
  0xe8   :  { %1747 = vmatprep.subr.bf16.mxu0 %v2588_v51  ;;  %1911 = vmatprep.subr.bf16.mxu1 %v2591_v52 }
  0xeb   :  { %1748 = vmatpush1.bf16.msra.mxu0 %v2586_v53  ;;  %1912 = vmatpush1.bf16.msra.mxu1 %v2589_v54 }
  0xec   :  { %1749 = vmatprep.subr.bf16.mxu0 %v2594_v55  ;;  %1913 = vmatprep.subr.bf16.mxu1 %v2597_v56 }
  0xef   :  { %1750 = vmatpush1.bf16.msra.mxu0 %v2592_v57  ;;  %1914 = vmatpush1.bf16.msra.mxu1 %v2595_v58 }
  0xf0   :  { %1751 = vmatprep.subr.bf16.mxu0 %v2600_v59  ;;  %1915 = vmatprep.subr.bf16.mxu1 %v2603_v60 }
  0xf3   :  { %1752 = vmatpush1.bf16.msra.mxu0 %v2598_v61  ;;  %1916 = vmatpush1.bf16.msra.mxu1 %v2601_v62 }
  0xf4   :  { %1753 = vmatprep.subr.bf16.mxu0 %v2606_v63  ;;  %1917 = vmatprep.subr.bf16.mxu1 %v2609_v0 }
  0xf7   :  { %1754 = vmatpush1.bf16.msra.mxu0 %v2604_v1  ;;  %1918 = vmatpush1.bf16.msra.mxu1 %v2607_v2 }
  0xf8   :  { %1755 = vmatprep.subr.bf16.mxu0 %v2612_v3  ;;  %1919 = vmatprep.subr.bf16.mxu1 %v2615_v4 }
  0xfb   :  { %1756 = vmatpush1.bf16.msra.mxu0 %v2610_v5  ;;  %1920 = vmatpush1.bf16.msra.mxu1 %v2613_v6 }
  0xfc   :  { %1757 = vmatprep.subr.bf16.mxu0 %v2618_v7  ;;  %1921 = vmatprep.subr.bf16.mxu1 %v2621_v8 }
  0xff   :  { %1758 = vmatpush1.bf16.msra.mxu0 %v2616_v9  ;;  %1922 = vmatpush1.bf16.msra.mxu1 %v2619_v10 }
 0x102   :  { %1760 = vmatmul.mubr.bf16.vlgmr.msra.gmra.mrb[0].mxu0 %v1946_v13  ;;  %1924 = vmatmul.mubr.bf16.vlgmr.msra.gmra.mrb[0].mxu1 %v1946_v13 }
 0x1d5   :  { %v1761_v24 = vpop.f32.mrb[0].mxu0  ;;  %v1925_v12 = vpop.f32.mrb[0].mxu1 }
 0x1d6   :  { %v2204_v25 = vadd.f32 %v1761_v24, %v279_v20  ;;  %v2206_v26 = vadd.f32 %v1925_v12, %v287_v21  ;;  %v1763_v27 = vpop.f32.mrb[1].mxu0  ;;  %v1927_v28 = vpop.f32.mrb[1].mxu1 }
 0x1d7   :  { %v2205_v29 = vadd.f32 %v1763_v27, %v283_v22  ;;  %v2207_v30 = vadd.f32 %v1927_v28, %v291_v23  ;;  %v1765_v31 = vpop.f32.mrb[2].mxu0  ;;  %v1929_v32 = vpop.f32.mrb[2].mxu1 }
 0x1d8   :  { %1932 = vst [vmem:[%s3460_s3] sm:$0xff] %v2204_v25  ;;  %1934 = vst [vmem:[%s3460_s3 + $0x10] sm:$0xff] %v2206_v26  ;;  %v1766_v33 = vpop.f32.mrb[3].mxu0  ;;  %v1930_v34 = vpop.f32.mrb[3].mxu1 }
 0x1d9   :  { %1933 = vst [vmem:[%s3460_s3 + $0x8] sm:$0xff] %v2205_v29  ;;  %1935 = vst [vmem:[%s3460_s3 + $0x18] sm:$0xff] %v2207_v30 }

// kernel: main_model_forward.15
= control target key start
LH: loop header
LB: loop body
LE: loop exit
PB: predicated region body
PF: predicated region fallthrough
CT: control target
= control target key end

     0   :  { %v353_v38 = vlaneseq  ;;  %v9744_v39 = vmov 1966171168   ;;  %s13119_s0 = inlined_call_operand.vmem [shape: bf16[2,512], index: 0, kind: input, shape index: {}]   ;;  %s13120_s1 = inlined_call_operand.vmem [shape: bf16[512,1280], index: 1, kind: input, shape index: {}]   ;;  %s13121_s2 = inlined_call_operand.vmem [shape: f32[1,1280], index: 2, kind: input, shape index: {}]   ;;  %s13122_s3 = inlined_call_operand.vmem [shape: bf16[1280,1000], index: 3, kind: input, shape index: {}]   ;;  %s13123_s4 = inlined_call_operand.vmem [shape: f32[1,1000], index: 4, kind: input, shape index: {}]   ;;  %s13124_s5 = inlined_call_operand.vmem [shape: bf16[1000,10], index: 5, kind: input, shape index: {}]   ;;  %s13125_s6 = inlined_call_operand.vmem [shape: f32[1,10], index: 6, kind: input, shape index: {}]   ;;  %s13126_s7 = inlined_call_operand.hbm [shape: f32[2,10], index: 7, kind: output, shape index: {}]  }
   0x1   :  { %v9140_v0 = vld [vmem:[%s13120_s1 + $0x4] ss:$40 sps:$4 sm:$0xff]   ;;  %v9144_v2 = vld [vmem:[%s13120_s1] ss:$40 sps:$4 sm:$0xff]   ;;  %v9146_v4 = vld [vmem:[%s13120_s1 + $0x54] ss:$40 sps:$4 sm:$0xff]   ;;  %v413_v40 = vunpack.c.l.s4 %v9744_v39 }
   0x2   :  { %v9142_v1 = vld [vmem:[%s13120_s1 + $0xc] ss:$40 sps:$4 sm:$0xff]   ;;  %2032 = vmatprep.subr.bf16.mxu0 %v9140_v0  ;;  %v9145_v3 = vld [vmem:[%s13120_s1 + $0x8] ss:$40 sps:$4 sm:$0xff]   ;;  %v9148_v5 = vld [vmem:[%s13120_s1 + $0x5c] ss:$40 sps:$4 sm:$0xff]  }
   0x3   :  { %2114 = vmatprep.subr.bf16.mxu1 %v9142_v1  ;;  %2033 = vmatpush1.bf16.msra.mxu0 %v9144_v2  ;;  %v9150_v6 = vld [vmem:[%s13120_s1 + $0x50] ss:$40 sps:$4 sm:$0xff]   ;;  %v9152_v8 = vld [vmem:[%s13120_s1 + $0xa4] ss:$40 sps:$4 sm:$0xff]   ;;  %v9156_v10 = vld [vmem:[%s13120_s1 + $0xa0] ss:$40 sps:$4 sm:$0xff]   ;;  %v414_v46 = vunpack.c.0.s8 %v413_v40 }
   0x4   :  { %2115 = vmatpush1.bf16.msra.mxu1 %v9145_v3  ;;  %2034 = vmatprep.subr.bf16.mxu0 %v9146_v4  ;;  %v9151_v7 = vld [vmem:[%s13120_s1 + $0x58] ss:$40 sps:$4 sm:$0xff]   ;;  %v9154_v9 = vld [vmem:[%s13120_s1 + $0xac] ss:$40 sps:$4 sm:$0xff]   ;;  %v9157_v11 = vld [vmem:[%s13120_s1 + $0xa8] ss:$40 sps:$4 sm:$0xff]  }
   0x5   :  { %2116 = vmatprep.subr.bf16.mxu1 %v9148_v5  ;;  %v9158_v12 = vld [vmem:[%s13120_s1 + $0xf4] ss:$40 sps:$4 sm:$0xff]   ;;  %v9162_v14 = vld [vmem:[%s13120_s1 + $0xf0] ss:$40 sps:$4 sm:$0xff]   ;;  %v9164_v16 = vld [vmem:[%s13120_s1 + $0x144] ss:$40 sps:$4 sm:$0xff]  }
   0x6   :  { %v9160_v13 = vld [vmem:[%s13120_s1 + $0xfc] ss:$40 sps:$4 sm:$0xff]   ;;  %v9163_v15 = vld [vmem:[%s13120_s1 + $0xf8] ss:$40 sps:$4 sm:$0xff]   ;;  %v9166_v17 = vld [vmem:[%s13120_s1 + $0x14c] ss:$40 sps:$4 sm:$0xff]  }
   0x7   :  { %2035 = vmatpush1.bf16.msra.mxu0 %v9150_v6  ;;  %v9168_v18 = vld [vmem:[%s13120_s1 + $0x140] ss:$40 sps:$4 sm:$0xff]   ;;  %v9170_v20 = vld [vmem:[%s13120_s1 + $0x194] ss:$40 sps:$4 sm:$0xff]   ;;  %v9174_v22 = vld [vmem:[%s13120_s1 + $0x190] ss:$40 sps:$4 sm:$0xff]  }
   0x8   :  { %2117 = vmatpush1.bf16.msra.mxu1 %v9151_v7  ;;  %2036 = vmatprep.subr.bf16.mxu0 %v9152_v8  ;;  %v9169_v19 = vld [vmem:[%s13120_s1 + $0x148] ss:$40 sps:$4 sm:$0xff]   ;;  %v9172_v21 = vld [vmem:[%s13120_s1 + $0x19c] ss:$40 sps:$4 sm:$0xff]   ;;  %v9175_v23 = vld [vmem:[%s13120_s1 + $0x198] ss:$40 sps:$4 sm:$0xff]  }
   0x9   :  { %2118 = vmatprep.subr.bf16.mxu1 %v9154_v9  ;;  %v9176_v24 = vld [vmem:[%s13120_s1 + $0x1e4] ss:$40 sps:$4 sm:$0xff]   ;;  %v9180_v26 = vld [vmem:[%s13120_s1 + $0x1e0] ss:$40 sps:$4 sm:$0xff]   ;;  %v9182_v28 = vld [vmem:[%s13120_s1 + $0x234] ss:$40 sps:$4 sm:$0xff]  }
   0xa   :  { %v9178_v25 = vld [vmem:[%s13120_s1 + $0x1ec] ss:$40 sps:$4 sm:$0xff]   ;;  %v9181_v27 = vld [vmem:[%s13120_s1 + $0x1e8] ss:$40 sps:$4 sm:$0xff]   ;;  %v9184_v29 = vld [vmem:[%s13120_s1 + $0x23c] ss:$40 sps:$4 sm:$0xff]  }
   0xb   :  { %2037 = vmatpush1.bf16.msra.mxu0 %v9156_v10  ;;  %v9186_v30 = vld [vmem:[%s13120_s1 + $0x230] ss:$40 sps:$4 sm:$0xff]   ;;  %v9188_v32 = vld [vmem:[%s13120_s1 + $0x284] ss:$40 sps:$4 sm:$0xff]   ;;  %v9192_v34 = vld [vmem:[%s13120_s1 + $0x280] ss:$40 sps:$4 sm:$0xff]  }
   0xc   :  { %2119 = vmatpush1.bf16.msra.mxu1 %v9157_v11  ;;  %2038 = vmatprep.subr.bf16.mxu0 %v9158_v12  ;;  %v9187_v31 = vld [vmem:[%s13120_s1 + $0x238] ss:$40 sps:$4 sm:$0xff]   ;;  %v9190_v33 = vld [vmem:[%s13120_s1 + $0x28c] ss:$40 sps:$4 sm:$0xff]   ;;  %v9193_v35 = vld [vmem:[%s13120_s1 + $0x288] ss:$40 sps:$4 sm:$0xff]  }
   0xd   :  { %2120 = vmatprep.subr.bf16.mxu1 %v9160_v13  ;;  %v9194_v36 = vld [vmem:[%s13120_s1 + $0x2d4] ss:$40 sps:$4 sm:$0xff]   ;;  %v9198_v41 = vld [vmem:[%s13120_s1 + $0x2d0] ss:$40 sps:$4 sm:$0xff]   ;;  %v9200_v43 = vld [vmem:[%s13120_s1 + $0x324] ss:$40 sps:$4 sm:$0xff]  }
   0xe   :  { %v9196_v37 = vld [vmem:[%s13120_s1 + $0x2dc] ss:$40 sps:$4 sm:$0xff]   ;;  %v9199_v42 = vld [vmem:[%s13120_s1 + $0x2d8] ss:$40 sps:$4 sm:$0xff]   ;;  %v9202_v44 = vld [vmem:[%s13120_s1 + $0x32c] ss:$40 sps:$4 sm:$0xff]  }
   0xf   :  { %2039 = vmatpush1.bf16.msra.mxu0 %v9162_v14  ;;  %v9913_v45 = vshrl.u32 %v353_v38, 7  ;;  %v9204_v47 = vld [vmem:[%s13120_s1 + $0x320] ss:$40 sps:$4 sm:$0xff]   ;;  %v9206_v49 = vld [vmem:[%s13120_s1 + $0x374] ss:$40 sps:$4 sm:$0xff]  }
  0x10   :  { %2121 = vmatpush1.bf16.msra.mxu1 %v9163_v15  ;;  %2040 = vmatprep.subr.bf16.mxu0 %v9164_v16  ;;  %v9205_v48 = vld [vmem:[%s13120_s1 + $0x328] ss:$40 sps:$4 sm:$0xff]   ;;  %v9208_v50 = vld [vmem:[%s13120_s1 + $0x37c] ss:$40 sps:$4 sm:$0xff]   ;;  %v9211_v54 = vld [vmem:[%s13120_s1 + $0x378] ss:$40 sps:$4 sm:$0xff]  }
  0x11   :  { %2122 = vmatprep.subr.bf16.mxu1 %v9166_v17  ;;  %v417_v51 = vsub.s32 %v414_v46, %v9913_v45  ;;  %v7943_v52 = vld.sshfl [vmem:[%s13119_s0] sm:$0x33 pattern:$0x75316420]  ;;  %v9210_v53 = vld [vmem:[%s13120_s1 + $0x370] ss:$40 sps:$4 sm:$0xff]  }
  0x12   :  { %v411_v55 = vcombine.high %v7943_v52, %v7943_v52  ;;  %v9212_v56 = vld [vmem:[%s13120_s1 + $0x3c4] ss:$40 sps:$4 sm:$0xff]   ;;  %v9216_v59 = vld [vmem:[%s13120_s1 + $0x3c0] ss:$40 sps:$4 sm:$0xff]   ;;  %v9218_v61 = vld [vmem:[%s13120_s1 + $0x414] ss:$40 sps:$4 sm:$0xff]  }
  0x13   :  { %2041 = vmatpush1.bf16.msra.mxu0 %v9168_v18  ;;  %v9214_v57 = vld [vmem:[%s13120_s1 + $0x3cc] ss:$40 sps:$4 sm:$0xff]   ;;  %v9217_v60 = vld [vmem:[%s13120_s1 + $0x3c8] ss:$40 sps:$4 sm:$0xff]   ;;  %v9220_v62 = vld [vmem:[%s13120_s1 + $0x41c] ss:$40 sps:$4 sm:$0xff]   ;;  %v9998_v12 = vrot.slane %v7943_v52, %v417_v51 }
  0x14   :  { %2123 = vmatpush1.bf16.msra.mxu1 %v9169_v19  ;;  %2042 = vmatprep.subr.bf16.mxu0 %v9170_v20  ;;  %v9943_v58 = vrot.slane %v411_v55, %v417_v51  ;;  %v9222_v63 = vld [vmem:[%s13120_s1 + $0x410] ss:$40 sps:$4 sm:$0xff]   ;;  %v9224_v1 = vld [vmem:[%s13120_s1 + $0x464] ss:$40 sps:$4 sm:$0xff]   ;;  %v9228_v3 = vld [vmem:[%s13120_s1 + $0x460] ss:$40 sps:$4 sm:$0xff]  }
  0x15   :  { %2124 = vmatprep.subr.bf16.mxu1 %v9172_v21  ;;  %v9223_v0 = vld [vmem:[%s13120_s1 + $0x418] ss:$40 sps:$4 sm:$0xff]   ;;  %v9226_v2 = vld [vmem:[%s13120_s1 + $0x46c] ss:$40 sps:$4 sm:$0xff]   ;;  %v9229_v4 = vld [vmem:[%s13120_s1 + $0x468] ss:$40 sps:$4 sm:$0xff]  }
  0x16   :  { %2064 = vmatprep.mubr.bf16.mxu0 %v9943_v58  ;;  %2146 = vmatprep.mubr.bf16.mxu1 %v9943_v58  ;;  %v9230_v5 = vld [vmem:[%s13120_s1 + $0x4b4] ss:$40 sps:$4 sm:$0xff]   ;;  %v9234_v7 = vld [vmem:[%s13120_s1 + $0x4b0] ss:$40 sps:$4 sm:$0xff]   ;;  %v9238_v9 = vld [vmem:[%s13120_s1 + $0x504] ss:$40 sps:$4 sm:$0xff]   ;;  %v10011_v16 = vcombine.high %v9943_v58, %v9943_v58 }
  0x17   :  { %2043 = vmatpush1.bf16.msra.mxu0 %v9174_v22  ;;  %v9232_v6 = vld [vmem:[%s13120_s1 + $0x4bc] ss:$40 sps:$4 sm:$0xff]   ;;  %v9235_v8 = vld [vmem:[%s13120_s1 + $0x4b8] ss:$40 sps:$4 sm:$0xff]   ;;  %v9241_v10 = vld [vmem:[%s13120_s1 + $0x50c] ss:$40 sps:$4 sm:$0xff]  }
  0x18   :  { %2125 = vmatpush1.bf16.msra.mxu1 %v9175_v23  ;;  %2044 = vmatprep.subr.bf16.mxu0 %v9176_v24  ;;  %v9236_v11 = vld [vmem:[%s13120_s1 + $0x500] ss:$40 sps:$4 sm:$0xff]   ;;  %v9244_v14 = vld [vmem:[%s13120_s1 + $0x554] ss:$40 sps:$4 sm:$0xff]   ;;  %v9242_v17 = vld [vmem:[%s13120_s1 + $0x550] ss:$40 sps:$4 sm:$0xff]  }
  0x19   :  { %2126 = vmatprep.subr.bf16.mxu1 %v9178_v25  ;;  %v9239_v13 = vld [vmem:[%s13120_s1 + $0x508] ss:$40 sps:$4 sm:$0xff]   ;;  %v9247_v15 = vld [vmem:[%s13120_s1 + $0x55c] ss:$40 sps:$4 sm:$0xff]   ;;  %v9245_v18 = vld [vmem:[%s13120_s1 + $0x558] ss:$40 sps:$4 sm:$0xff]  }
  0x1a   :  { %v9250_v19 = vld [vmem:[%s13120_s1 + $0x5a4] ss:$40 sps:$4 sm:$0xff]   ;;  %v9248_v21 = vld [vmem:[%s13120_s1 + $0x5a0] ss:$40 sps:$4 sm:$0xff]   ;;  %v9256_v23 = vld [vmem:[%s13120_s1 + $0x5f4] ss:$40 sps:$4 sm:$0xff]  }
  0x1b   :  { %2045 = vmatpush1.bf16.msra.mxu0 %v9180_v26  ;;  %v9253_v20 = vld [vmem:[%s13120_s1 + $0x5ac] ss:$40 sps:$4 sm:$0xff]   ;;  %v9251_v22 = vld [vmem:[%s13120_s1 + $0x5a8] ss:$40 sps:$4 sm:$0xff]   ;;  %v9259_v24 = vld [vmem:[%s13120_s1 + $0x5fc] ss:$40 sps:$4 sm:$0xff]  }
  0x1c   :  { %2127 = vmatpush1.bf16.msra.mxu1 %v9181_v27  ;;  %2046 = vmatprep.subr.bf16.mxu0 %v9182_v28  ;;  %v9254_v25 = vld [vmem:[%s13120_s1 + $0x5f0] ss:$40 sps:$4 sm:$0xff]   ;;  %v9262_v27 = vld [vmem:[%s13120_s1 + $0x644] ss:$40 sps:$4 sm:$0xff]   ;;  %v9280_v39 = vld [vmem:[%s13120_s1 + $0x734] ss:$40 sps:$4 sm:$0xff]  }
  0x1d   :  { %2128 = vmatprep.subr.bf16.mxu1 %v9184_v29  ;;  %v9257_v26 = vld [vmem:[%s13120_s1 + $0x5f8] ss:$40 sps:$4 sm:$0xff]   ;;  %v9265_v28 = vld [vmem:[%s13120_s1 + $0x64c] ss:$40 sps:$4 sm:$0xff]   ;;  %v9275_v38 = vld [vmem:[%s13120_s1 + $0x6e8] ss:$40 sps:$4 sm:$0xff]  }
  0x1e   :  { %v9260_v29 = vld [vmem:[%s13120_s1 + $0x640] ss:$40 sps:$4 sm:$0xff]   ;;  %v9283_v40 = vld [vmem:[%s13120_s1 + $0x73c] ss:$40 sps:$4 sm:$0xff]  }
  0x1f   :  { %2047 = vmatpush1.bf16.msra.mxu0 %v9186_v30  ;;  %v9263_v30 = vld [vmem:[%s13120_s1 + $0x648] ss:$40 sps:$4 sm:$0xff]   ;;  %v9293_v51 = vld [vmem:[%s13120_s1 + $0x7d8] ss:$40 sps:$4 sm:$0xff]   ;;  %v9298_v52 = vld [vmem:[%s13120_s1 + $0x824] ss:$40 sps:$4 sm:$0xff]  }
  0x20   :  { %2129 = vmatpush1.bf16.msra.mxu1 %v9187_v31  ;;  %2048 = vmatprep.subr.bf16.mxu0 %v9188_v32  ;;  %v9268_v31 = vld [vmem:[%s13120_s1 + $0x694] ss:$40 sps:$4 sm:$0xff]   ;;  %v9284_v46 = vld [vmem:[%s13120_s1 + $0x780] ss:$40 sps:$4 sm:$0xff]  }
  0x21   :  { %2130 = vmatprep.subr.bf16.mxu1 %v9190_v33  ;;  %v9271_v32 = vld [vmem:[%s13120_s1 + $0x69c] ss:$40 sps:$4 sm:$0xff]   ;;  %v9266_v33 = vld [vmem:[%s13120_s1 + $0x690] ss:$40 sps:$4 sm:$0xff]  }
  0x22   :  { %v9299_v55 = vld [vmem:[%s13120_s1 + $0x828] ss:$40 sps:$4 sm:$0xff]  }
  0x23   :  { %2049 = vmatpush1.bf16.msra.mxu0 %v9192_v34  ;;  %v9269_v34 = vld [vmem:[%s13120_s1 + $0x698] ss:$40 sps:$4 sm:$0xff]  }
  0x24   :  { %2131 = vmatpush1.bf16.msra.mxu1 %v9193_v35  ;;  %2050 = vmatprep.subr.bf16.mxu0 %v9194_v36  ;;  %v9274_v35 = vld [vmem:[%s13120_s1 + $0x6e4] ss:$40 sps:$4 sm:$0xff]  }
  0x25   :  { %2132 = vmatprep.subr.bf16.mxu1 %v9196_v37  ;;  %v9277_v36 = vld [vmem:[%s13120_s1 + $0x6ec] ss:$40 sps:$4 sm:$0xff]   ;;  %v9272_v37 = vld [vmem:[%s13120_s1 + $0x6e0] ss:$40 sps:$4 sm:$0xff]  }
  0x27   :  { %2051 = vmatpush1.bf16.msra.mxu0 %v9198_v41  ;;  %v9278_v41 = vld [vmem:[%s13120_s1 + $0x730] ss:$40 sps:$4 sm:$0xff]  }
  0x28   :  { %2133 = vmatpush1.bf16.msra.mxu1 %v9199_v42  ;;  %2052 = vmatprep.subr.bf16.mxu0 %v9200_v43  ;;  %v9281_v42 = vld [vmem:[%s13120_s1 + $0x738] ss:$40 sps:$4 sm:$0xff]   ;;  %v9286_v43 = vld [vmem:[%s13120_s1 + $0x784] ss:$40 sps:$4 sm:$0xff]  }
  0x29   :  { %2134 = vmatprep.subr.bf16.mxu1 %v9202_v44  ;;  %v9289_v44 = vld [vmem:[%s13120_s1 + $0x78c] ss:$40 sps:$4 sm:$0xff]  }
  0x2b   :  { %2053 = vmatpush1.bf16.msra.mxu0 %v9204_v47  ;;  %v9287_v47 = vld [vmem:[%s13120_s1 + $0x788] ss:$40 sps:$4 sm:$0xff]  }
  0x2c   :  { %2135 = vmatpush1.bf16.msra.mxu1 %v9205_v48  ;;  %2054 = vmatprep.subr.bf16.mxu0 %v9206_v49  ;;  %v9292_v48 = vld [vmem:[%s13120_s1 + $0x7d4] ss:$40 sps:$4 sm:$0xff]  }
  0x2d   :  { %2136 = vmatprep.subr.bf16.mxu1 %v9208_v50  ;;  %v9295_v49 = vld [vmem:[%s13120_s1 + $0x7dc] ss:$40 sps:$4 sm:$0xff]   ;;  %v9290_v50 = vld [vmem:[%s13120_s1 + $0x7d0] ss:$40 sps:$4 sm:$0xff]  }
  0x2f   :  { %2055 = vmatpush1.bf16.msra.mxu0 %v9210_v53  ;;  %v9301_v53 = vld [vmem:[%s13120_s1 + $0x82c] ss:$40 sps:$4 sm:$0xff]  }
  0x30   :  { %2137 = vmatpush1.bf16.msra.mxu1 %v9211_v54  ;;  %2056 = vmatprep.subr.bf16.mxu0 %v9212_v56  ;;  %v9296_v54 = vld [vmem:[%s13120_s1 + $0x820] ss:$40 sps:$4 sm:$0xff]   ;;  %v9304_v56 = vld [vmem:[%s13120_s1 + $0x874] ss:$40 sps:$4 sm:$0xff]  }
  0x31   :  { %2138 = vmatprep.subr.bf16.mxu1 %v9214_v57  ;;  %v9307_v57 = vld [vmem:[%s13120_s1 + $0x87c] ss:$40 sps:$4 sm:$0xff]  }
  0x33   :  { %2057 = vmatpush1.bf16.msra.mxu0 %v9216_v59  ;;  %v9302_v59 = vld [vmem:[%s13120_s1 + $0x870] ss:$40 sps:$4 sm:$0xff]  }
  0x34   :  { %2139 = vmatpush1.bf16.msra.mxu1 %v9217_v60  ;;  %2058 = vmatprep.subr.bf16.mxu0 %v9218_v61  ;;  %v9305_v60 = vld [vmem:[%s13120_s1 + $0x878] ss:$40 sps:$4 sm:$0xff]   ;;  %v9310_v61 = vld [vmem:[%s13120_s1 + $0x8c4] ss:$40 sps:$4 sm:$0xff]  }
  0x35   :  { %2140 = vmatprep.subr.bf16.mxu1 %v9220_v62  ;;  %v9313_v62 = vld [vmem:[%s13120_s1 + $0x8cc] ss:$40 sps:$4 sm:$0xff]  }
  0x37   :  { %2059 = vmatpush1.bf16.msra.mxu0 %v9222_v63  ;;  %v9308_v63 = vld [vmem:[%s13120_s1 + $0x8c0] ss:$40 sps:$4 sm:$0xff]  }
  0x38   :  { %2141 = vmatpush1.bf16.msra.mxu1 %v9223_v0  ;;  %2060 = vmatprep.subr.bf16.mxu0 %v9224_v1  ;;  %v9311_v0 = vld [vmem:[%s13120_s1 + $0x8c8] ss:$40 sps:$4 sm:$0xff]   ;;  %v9316_v1 = vld [vmem:[%s13120_s1 + $0x914] ss:$40 sps:$4 sm:$0xff]  }
  0x39   :  { %2142 = vmatprep.subr.bf16.mxu1 %v9226_v2  ;;  %v9319_v2 = vld [vmem:[%s13120_s1 + $0x91c] ss:$40 sps:$4 sm:$0xff]  }
  0x3b   :  { %2061 = vmatpush1.bf16.msra.mxu0 %v9228_v3  ;;  %v9314_v3 = vld [vmem:[%s13120_s1 + $0x910] ss:$40 sps:$4 sm:$0xff]  }
  0x3c   :  { %2143 = vmatpush1.bf16.msra.mxu1 %v9229_v4  ;;  %2062 = vmatprep.subr.bf16.mxu0 %v9230_v5  ;;  %v9317_v4 = vld [vmem:[%s13120_s1 + $0x918] ss:$40 sps:$4 sm:$0xff]   ;;  %v9322_v5 = vld [vmem:[%s13120_s1 + $0x964] ss:$40 sps:$4 sm:$0xff]  }
  0x3d   :  { %2144 = vmatprep.subr.bf16.mxu1 %v9232_v6  ;;  %v9325_v6 = vld [vmem:[%s13120_s1 + $0x96c] ss:$40 sps:$4 sm:$0xff]  }
  0x3f   :  { %2063 = vmatpush1.bf16.msra.mxu0 %v9234_v7  ;;  %v9320_v7 = vld [vmem:[%s13120_s1 + $0x960] ss:$40 sps:$4 sm:$0xff]  }
  0x40   :  { %2145 = vmatpush1.bf16.msra.mxu1 %v9235_v8  ;;  %2073 = vmatprep.subr.bf16.mxu0 %v9238_v9  ;;  %v9323_v8 = vld [vmem:[%s13120_s1 + $0x968] ss:$40 sps:$4 sm:$0xff]   ;;  %v9328_v9 = vld [vmem:[%s13120_s1 + $0x9b4] ss:$40 sps:$4 sm:$0xff]  }
  0x41   :  { %2155 = vmatprep.subr.bf16.mxu1 %v9241_v10  ;;  %v9331_v10 = vld [vmem:[%s13120_s1 + $0x9bc] ss:$40 sps:$4 sm:$0xff]  }
  0x42   :  { %2065 = vmatmul.mubr.bf16.vlgmr.msra.gmra.mrb[0].mxu0 %v9998_v12 }
  0x43   :  { %2147 = vmatmul.mubr.bf16.vlgmr.msra.gmra.mrb[0].mxu1 %v9998_v12  ;;  %2074 = vmatpush1.bf16.msra.mxu0 %v9236_v11  ;;  %v9326_v11 = vld [vmem:[%s13120_s1 + $0x9b0] ss:$40 sps:$4 sm:$0xff]  }
  0x44   :  { %2156 = vmatpush1.bf16.msra.mxu1 %v9239_v13  ;;  %2075 = vmatprep.subr.bf16.mxu0 %v9244_v14  ;;  %v9329_v13 = vld [vmem:[%s13120_s1 + $0x9b8] ss:$40 sps:$4 sm:$0xff]   ;;  %v9334_v14 = vld [vmem:[%s13120_s1 + $0x14] ss:$40 sps:$4 sm:$0xff]  }
  0x45   :  { %2157 = vmatprep.subr.bf16.mxu1 %v9247_v15  ;;  %2105 = vmatprep.mubr.bf16.mxu0 %v10011_v16  ;;  %v9337_v15 = vld [vmem:[%s13120_s1 + $0x1c] ss:$40 sps:$4 sm:$0xff]  }
  0x46   :  { %2187 = vmatprep.mubr.bf16.mxu1 %v10011_v16 }
  0x47   :  { %2076 = vmatpush1.bf16.msra.mxu0 %v9242_v17  ;;  %v10199_v17 = vcombine.high %v9998_v12, %v9998_v12 }
  0x48   :  { %2158 = vmatpush1.bf16.msra.mxu1 %v9245_v18  ;;  %2077 = vmatprep.subr.bf16.mxu0 %v9250_v19  ;;  %v9332_v18 = vld [vmem:[%s13120_s1 + $0x10] ss:$40 sps:$4 sm:$0xff]  }
  0x49   :  { %2159 = vmatprep.subr.bf16.mxu1 %v9253_v20  ;;  %v9335_v19 = vld [vmem:[%s13120_s1 + $0x18] ss:$40 sps:$4 sm:$0xff]   ;;  %v9340_v20 = vld [vmem:[%s13120_s1 + $0x64] ss:$40 sps:$4 sm:$0xff]  }
  0x4b   :  { %2078 = vmatpush1.bf16.msra.mxu0 %v9248_v21  ;;  %v9343_v21 = vld [vmem:[%s13120_s1 + $0x6c] ss:$40 sps:$4 sm:$0xff]  }
  0x4c   :  { %2160 = vmatpush1.bf16.msra.mxu1 %v9251_v22  ;;  %2079 = vmatprep.subr.bf16.mxu0 %v9256_v23  ;;  %v9338_v22 = vld [vmem:[%s13120_s1 + $0x60] ss:$40 sps:$4 sm:$0xff]  }
  0x4d   :  { %2161 = vmatprep.subr.bf16.mxu1 %v9259_v24  ;;  %v9341_v23 = vld [vmem:[%s13120_s1 + $0x68] ss:$40 sps:$4 sm:$0xff]   ;;  %v9346_v24 = vld [vmem:[%s13120_s1 + $0xb4] ss:$40 sps:$4 sm:$0xff]  }
  0x4f   :  { %2080 = vmatpush1.bf16.msra.mxu0 %v9254_v25  ;;  %v9349_v25 = vld [vmem:[%s13120_s1 + $0xbc] ss:$40 sps:$4 sm:$0xff]  }
  0x50   :  { %2162 = vmatpush1.bf16.msra.mxu1 %v9257_v26  ;;  %2081 = vmatprep.subr.bf16.mxu0 %v9262_v27  ;;  %v9344_v26 = vld [vmem:[%s13120_s1 + $0xb0] ss:$40 sps:$4 sm:$0xff]  }
  0x51   :  { %2163 = vmatprep.subr.bf16.mxu1 %v9265_v28  ;;  %v9347_v27 = vld [vmem:[%s13120_s1 + $0xb8] ss:$40 sps:$4 sm:$0xff]   ;;  %v9352_v28 = vld [vmem:[%s13120_s1 + $0x104] ss:$40 sps:$4 sm:$0xff]  }
  0x53   :  { %2082 = vmatpush1.bf16.msra.mxu0 %v9260_v29  ;;  %v9355_v29 = vld [vmem:[%s13120_s1 + $0x10c] ss:$40 sps:$4 sm:$0xff]  }
  0x54   :  { %2164 = vmatpush1.bf16.msra.mxu1 %v9263_v30  ;;  %2083 = vmatprep.subr.bf16.mxu0 %v9268_v31  ;;  %v9350_v30 = vld [vmem:[%s13120_s1 + $0x100] ss:$40 sps:$4 sm:$0xff]  }
  0x55   :  { %2165 = vmatprep.subr.bf16.mxu1 %v9271_v32  ;;  %v9353_v31 = vld [vmem:[%s13120_s1 + $0x108] ss:$40 sps:$4 sm:$0xff]   ;;  %v9358_v32 = vld [vmem:[%s13120_s1 + $0x154] ss:$40 sps:$4 sm:$0xff]  }
  0x57   :  { %2084 = vmatpush1.bf16.msra.mxu0 %v9266_v33  ;;  %v9361_v33 = vld [vmem:[%s13120_s1 + $0x15c] ss:$40 sps:$4 sm:$0xff]  }
  0x58   :  { %2166 = vmatpush1.bf16.msra.mxu1 %v9269_v34  ;;  %2085 = vmatprep.subr.bf16.mxu0 %v9274_v35  ;;  %v9356_v34 = vld [vmem:[%s13120_s1 + $0x150] ss:$40 sps:$4 sm:$0xff]  }
  0x59   :  { %2167 = vmatprep.subr.bf16.mxu1 %v9277_v36  ;;  %v9359_v35 = vld [vmem:[%s13120_s1 + $0x158] ss:$40 sps:$4 sm:$0xff]   ;;  %v9364_v36 = vld [vmem:[%s13120_s1 + $0x1a4] ss:$40 sps:$4 sm:$0xff]  }
  0x5b   :  { %2086 = vmatpush1.bf16.msra.mxu0 %v9272_v37  ;;  %v9367_v37 = vld [vmem:[%s13120_s1 + $0x1ac] ss:$40 sps:$4 sm:$0xff]  }
  0x5c   :  { %2168 = vmatpush1.bf16.msra.mxu1 %v9275_v38  ;;  %2087 = vmatprep.subr.bf16.mxu0 %v9280_v39  ;;  %v9362_v38 = vld [vmem:[%s13120_s1 + $0x1a0] ss:$40 sps:$4 sm:$0xff]  }
  0x5d   :  { %2169 = vmatprep.subr.bf16.mxu1 %v9283_v40  ;;  %v9365_v39 = vld [vmem:[%s13120_s1 + $0x1a8] ss:$40 sps:$4 sm:$0xff]   ;;  %v9370_v40 = vld [vmem:[%s13120_s1 + $0x1f4] ss:$40 sps:$4 sm:$0xff]  }
  0x5f   :  { %2088 = vmatpush1.bf16.msra.mxu0 %v9278_v41  ;;  %v9373_v41 = vld [vmem:[%s13120_s1 + $0x1fc] ss:$40 sps:$4 sm:$0xff]  }
  0x60   :  { %2170 = vmatpush1.bf16.msra.mxu1 %v9281_v42  ;;  %2089 = vmatprep.subr.bf16.mxu0 %v9286_v43  ;;  %v9368_v42 = vld [vmem:[%s13120_s1 + $0x1f0] ss:$40 sps:$4 sm:$0xff]  }
  0x61   :  { %2171 = vmatprep.subr.bf16.mxu1 %v9289_v44  ;;  %v9371_v43 = vld [vmem:[%s13120_s1 + $0x1f8] ss:$40 sps:$4 sm:$0xff]   ;;  %v9376_v44 = vld [vmem:[%s13120_s1 + $0x244] ss:$40 sps:$4 sm:$0xff]  }
  0x63   :  { %2090 = vmatpush1.bf16.msra.mxu0 %v9284_v46  ;;  %v9379_v46 = vld [vmem:[%s13120_s1 + $0x24c] ss:$40 sps:$4 sm:$0xff]  }
  0x64   :  { %2172 = vmatpush1.bf16.msra.mxu1 %v9287_v47  ;;  %2091 = vmatprep.subr.bf16.mxu0 %v9292_v48  ;;  %v9374_v47 = vld [vmem:[%s13120_s1 + $0x240] ss:$40 sps:$4 sm:$0xff]  }
  0x65   :  { %2173 = vmatprep.subr.bf16.mxu1 %v9295_v49  ;;  %v9377_v48 = vld [vmem:[%s13120_s1 + $0x248] ss:$40 sps:$4 sm:$0xff]   ;;  %v9382_v49 = vld [vmem:[%s13120_s1 + $0x294] ss:$40 sps:$4 sm:$0xff]  }
  0x67   :  { %2092 = vmatpush1.bf16.msra.mxu0 %v9290_v50  ;;  %v9385_v50 = vld [vmem:[%s13120_s1 + $0x29c] ss:$40 sps:$4 sm:$0xff]  }
  0x68   :  { %2174 = vmatpush1.bf16.msra.mxu1 %v9293_v51  ;;  %2093 = vmatprep.subr.bf16.mxu0 %v9298_v52  ;;  %v9380_v51 = vld [vmem:[%s13120_s1 + $0x290] ss:$40 sps:$4 sm:$0xff]  }
  0x69   :  { %2175 = vmatprep.subr.bf16.mxu1 %v9301_v53  ;;  %v9383_v52 = vld [vmem:[%s13120_s1 + $0x298] ss:$40 sps:$4 sm:$0xff]   ;;  %v9388_v53 = vld [vmem:[%s13120_s1 + $0x2e4] ss:$40 sps:$4 sm:$0xff]  }
  0x6b   :  { %2094 = vmatpush1.bf16.msra.mxu0 %v9296_v54  ;;  %v9391_v54 = vld [vmem:[%s13120_s1 + $0x2ec] ss:$40 sps:$4 sm:$0xff]  }
  0x6c   :  { %2176 = vmatpush1.bf16.msra.mxu1 %v9299_v55  ;;  %2095 = vmatprep.subr.bf16.mxu0 %v9304_v56  ;;  %v9386_v55 = vld [vmem:[%s13120_s1 + $0x2e0] ss:$40 sps:$4 sm:$0xff]  }
  0x6d   :  { %2177 = vmatprep.subr.bf16.mxu1 %v9307_v57  ;;  %v9389_v56 = vld [vmem:[%s13120_s1 + $0x2e8] ss:$40 sps:$4 sm:$0xff]   ;;  %v9394_v57 = vld [vmem:[%s13120_s1 + $0x334] ss:$40 sps:$4 sm:$0xff]  }
  0x6f   :  { %2096 = vmatpush1.bf16.msra.mxu0 %v9302_v59  ;;  %v9397_v59 = vld [vmem:[%s13120_s1 + $0x33c] ss:$40 sps:$4 sm:$0xff]  }
  0x70   :  { %2178 = vmatpush1.bf16.msra.mxu1 %v9305_v60  ;;  %2097 = vmatprep.subr.bf16.mxu0 %v9310_v61  ;;  %v9392_v60 = vld [vmem:[%s13120_s1 + $0x330] ss:$40 sps:$4 sm:$0xff]  }
  0x71   :  { %2179 = vmatprep.subr.bf16.mxu1 %v9313_v62  ;;  %v9395_v61 = vld [vmem:[%s13120_s1 + $0x338] ss:$40 sps:$4 sm:$0xff]   ;;  %v9400_v62 = vld [vmem:[%s13120_s1 + $0x384] ss:$40 sps:$4 sm:$0xff]  }
  0x73   :  { %2098 = vmatpush1.bf16.msra.mxu0 %v9308_v63  ;;  %v9403_v63 = vld [vmem:[%s13120_s1 + $0x38c] ss:$40 sps:$4 sm:$0xff]  }
  0x74   :  { %2180 = vmatpush1.bf16.msra.mxu1 %v9311_v0  ;;  %2099 = vmatprep.subr.bf16.mxu0 %v9316_v1  ;;  %v9398_v0 = vld [vmem:[%s13120_s1 + $0x380] ss:$40 sps:$4 sm:$0xff]  }
  0x75   :  { %2181 = vmatprep.subr.bf16.mxu1 %v9319_v2  ;;  %v9401_v1 = vld [vmem:[%s13120_s1 + $0x388] ss:$40 sps:$4 sm:$0xff]   ;;  %v9406_v2 = vld [vmem:[%s13120_s1 + $0x3d4] ss:$40 sps:$4 sm:$0xff]  }
  0x77   :  { %2100 = vmatpush1.bf16.msra.mxu0 %v9314_v3  ;;  %v9409_v3 = vld [vmem:[%s13120_s1 + $0x3dc] ss:$40 sps:$4 sm:$0xff]  }
  0x78   :  { %2182 = vmatpush1.bf16.msra.mxu1 %v9317_v4  ;;  %2101 = vmatprep.subr.bf16.mxu0 %v9322_v5  ;;  %v9404_v4 = vld [vmem:[%s13120_s1 + $0x3d0] ss:$40 sps:$4 sm:$0xff]  }
  0x79   :  { %2183 = vmatprep.subr.bf16.mxu1 %v9325_v6  ;;  %v9407_v5 = vld [vmem:[%s13120_s1 + $0x3d8] ss:$40 sps:$4 sm:$0xff]   ;;  %v9412_v6 = vld [vmem:[%s13120_s1 + $0x424] ss:$40 sps:$4 sm:$0xff]  }
  0x7b   :  { %2102 = vmatpush1.bf16.msra.mxu0 %v9320_v7  ;;  %v9415_v7 = vld [vmem:[%s13120_s1 + $0x42c] ss:$40 sps:$4 sm:$0xff]  }
  0x7c   :  { %2184 = vmatpush1.bf16.msra.mxu1 %v9323_v8  ;;  %2103 = vmatprep.subr.bf16.mxu0 %v9328_v9  ;;  %v9410_v8 = vld [vmem:[%s13120_s1 + $0x420] ss:$40 sps:$4 sm:$0xff]  }
  0x7d   :  { %2185 = vmatprep.subr.bf16.mxu1 %v9331_v10  ;;  %v9413_v9 = vld [vmem:[%s13120_s1 + $0x428] ss:$40 sps:$4 sm:$0xff]   ;;  %v9418_v10 = vld [vmem:[%s13120_s1 + $0x474] ss:$40 sps:$4 sm:$0xff]  }
  0x7f   :  { %2104 = vmatpush1.bf16.msra.mxu0 %v9326_v11  ;;  %v9421_v11 = vld [vmem:[%s13120_s1 + $0x47c] ss:$40 sps:$4 sm:$0xff]  }
  0x80   :  { %2186 = vmatpush1.bf16.msra.mxu1 %v9329_v13  ;;  %2196 = vmatprep.subr.bf16.mxu0 %v9334_v14  ;;  %v9416_v13 = vld [vmem:[%s13120_s1 + $0x470] ss:$40 sps:$4 sm:$0xff]  }
  0x81   :  { %2278 = vmatprep.subr.bf16.mxu1 %v9337_v15  ;;  %v9419_v14 = vld [vmem:[%s13120_s1 + $0x478] ss:$40 sps:$4 sm:$0xff]   ;;  %v9424_v15 = vld [vmem:[%s13120_s1 + $0x4c4] ss:$40 sps:$4 sm:$0xff]  }
  0x82   :  { %2106 = vmatmul.mubr.bf16.vlgmr.msra.gmra.mrb[0].mxu0 %v10199_v17 }
  0x83   :  { %2188 = vmatmul.mubr.bf16.vlgmr.msra.gmra.mrb[0].mxu1 %v10199_v17  ;;  %2197 = vmatpush1.bf16.msra.mxu0 %v9332_v18  ;;  %v9427_v18 = vld [vmem:[%s13120_s1 + $0x4cc] ss:$40 sps:$4 sm:$0xff]  }
  0x84   :  { %2279 = vmatpush1.bf16.msra.mxu1 %v9335_v19  ;;  %2198 = vmatprep.subr.bf16.mxu0 %v9340_v20  ;;  %v9422_v19 = vld [vmem:[%s13120_s1 + $0x4c0] ss:$40 sps:$4 sm:$0xff]  }
  0x85   :  { %2280 = vmatprep.subr.bf16.mxu1 %v9343_v21  ;;  %2228 = vmatprep.mubr.bf16.mxu0 %v9943_v58  ;;  %v9425_v20 = vld [vmem:[%s13120_s1 + $0x4c8] ss:$40 sps:$4 sm:$0xff]   ;;  %v9430_v21 = vld [vmem:[%s13120_s1 + $0x514] ss:$40 sps:$4 sm:$0xff]  }
  0x86   :  { %2310 = vmatprep.mubr.bf16.mxu1 %v9943_v58 }
  0x87   :  { %2199 = vmatpush1.bf16.msra.mxu0 %v9338_v22  ;;  %v9433_v22 = vld [vmem:[%s13120_s1 + $0x51c] ss:$40 sps:$4 sm:$0xff]  }
  0x88   :  { %2281 = vmatpush1.bf16.msra.mxu1 %v9341_v23  ;;  %2200 = vmatprep.subr.bf16.mxu0 %v9346_v24  ;;  %v9428_v23 = vld [vmem:[%s13120_s1 + $0x510] ss:$40 sps:$4 sm:$0xff]  }
  0x89   :  { %2282 = vmatprep.subr.bf16.mxu1 %v9349_v25  ;;  %v9431_v24 = vld [vmem:[%s13120_s1 + $0x518] ss:$40 sps:$4 sm:$0xff]   ;;  %v9436_v25 = vld [vmem:[%s13120_s1 + $0x564] ss:$40 sps:$4 sm:$0xff]  }
  0x8b   :  { %2201 = vmatpush1.bf16.msra.mxu0 %v9344_v26  ;;  %v9439_v26 = vld [vmem:[%s13120_s1 + $0x56c] ss:$40 sps:$4 sm:$0xff]  }
  0x8c   :  { %2283 = vmatpush1.bf16.msra.mxu1 %v9347_v27  ;;  %2202 = vmatprep.subr.bf16.mxu0 %v9352_v28  ;;  %v9434_v27 = vld [vmem:[%s13120_s1 + $0x560] ss:$40 sps:$4 sm:$0xff]  }
  0x8d   :  { %2284 = vmatprep.subr.bf16.mxu1 %v9355_v29  ;;  %v9437_v28 = vld [vmem:[%s13120_s1 + $0x568] ss:$40 sps:$4 sm:$0xff]   ;;  %v9442_v29 = vld [vmem:[%s13120_s1 + $0x5b4] ss:$40 sps:$4 sm:$0xff]  }
  0x8f   :  { %2203 = vmatpush1.bf16.msra.mxu0 %v9350_v30  ;;  %v9445_v30 = vld [vmem:[%s13120_s1 + $0x5bc] ss:$40 sps:$4 sm:$0xff]  }
  0x90   :  { %2285 = vmatpush1.bf16.msra.mxu1 %v9353_v31  ;;  %2204 = vmatprep.subr.bf16.mxu0 %v9358_v32  ;;  %v9440_v31 = vld [vmem:[%s13120_s1 + $0x5b0] ss:$40 sps:$4 sm:$0xff]  }
  0x91   :  { %2286 = vmatprep.subr.bf16.mxu1 %v9361_v33  ;;  %v9443_v32 = vld [vmem:[%s13120_s1 + $0x5b8] ss:$40 sps:$4 sm:$0xff]   ;;  %v9448_v33 = vld [vmem:[%s13120_s1 + $0x604] ss:$40 sps:$4 sm:$0xff]  }
  0x93   :  { %2205 = vmatpush1.bf16.msra.mxu0 %v9356_v34  ;;  %v9451_v34 = vld [vmem:[%s13120_s1 + $0x60c] ss:$40 sps:$4 sm:$0xff]  }
  0x94   :  { %2287 = vmatpush1.bf16.msra.mxu1 %v9359_v35  ;;  %2206 = vmatprep.subr.bf16.mxu0 %v9364_v36  ;;  %v9446_v35 = vld [vmem:[%s13120_s1 + $0x600] ss:$40 sps:$4 sm:$0xff]  }
  0x95   :  { %2288 = vmatprep.subr.bf16.mxu1 %v9367_v37  ;;  %v9449_v36 = vld [vmem:[%s13120_s1 + $0x608] ss:$40 sps:$4 sm:$0xff]   ;;  %v9454_v37 = vld [vmem:[%s13120_s1 + $0x654] ss:$40 sps:$4 sm:$0xff]  }
  0x97   :  { %2207 = vmatpush1.bf16.msra.mxu0 %v9362_v38  ;;  %v9457_v38 = vld [vmem:[%s13120_s1 + $0x65c] ss:$40 sps:$4 sm:$0xff]  }
  0x98   :  { %2289 = vmatpush1.bf16.msra.mxu1 %v9365_v39  ;;  %2208 = vmatprep.subr.bf16.mxu0 %v9370_v40  ;;  %v9452_v39 = vld [vmem:[%s13120_s1 + $0x650] ss:$40 sps:$4 sm:$0xff]  }
  0x99   :  { %2290 = vmatprep.subr.bf16.mxu1 %v9373_v41  ;;  %v9455_v40 = vld [vmem:[%s13120_s1 + $0x658] ss:$40 sps:$4 sm:$0xff]   ;;  %v9460_v41 = vld [vmem:[%s13120_s1 + $0x6a4] ss:$40 sps:$4 sm:$0xff]  }
  0x9b   :  { %2209 = vmatpush1.bf16.msra.mxu0 %v9368_v42  ;;  %v9463_v42 = vld [vmem:[%s13120_s1 + $0x6ac] ss:$40 sps:$4 sm:$0xff]  }
  0x9c   :  { %2291 = vmatpush1.bf16.msra.mxu1 %v9371_v43  ;;  %2210 = vmatprep.subr.bf16.mxu0 %v9376_v44  ;;  %v9458_v43 = vld [vmem:[%s13120_s1 + $0x6a0] ss:$40 sps:$4 sm:$0xff]  }
  0x9d   :  { %2292 = vmatprep.subr.bf16.mxu1 %v9379_v46  ;;  %v9461_v44 = vld [vmem:[%s13120_s1 + $0x6a8] ss:$40 sps:$4 sm:$0xff]   ;;  %v9466_v46 = vld [vmem:[%s13120_s1 + $0x6f4] ss:$40 sps:$4 sm:$0xff]  }
  0x9f   :  { %2211 = vmatpush1.bf16.msra.mxu0 %v9374_v47  ;;  %v9469_v47 = vld [vmem:[%s13120_s1 + $0x6fc] ss:$40 sps:$4 sm:$0xff]  }
  0xa0   :  { %2293 = vmatpush1.bf16.msra.mxu1 %v9377_v48  ;;  %2212 = vmatprep.subr.bf16.mxu0 %v9382_v49  ;;  %v9464_v48 = vld [vmem:[%s13120_s1 + $0x6f0] ss:$40 sps:$4 sm:$0xff]  }
  0xa1   :  { %2294 = vmatprep.subr.bf16.mxu1 %v9385_v50  ;;  %v9467_v49 = vld [vmem:[%s13120_s1 + $0x6f8] ss:$40 sps:$4 sm:$0xff]   ;;  %v9472_v50 = vld [vmem:[%s13120_s1 + $0x744] ss:$40 sps:$4 sm:$0xff]  }
  0xa3   :  { %2213 = vmatpush1.bf16.msra.mxu0 %v9380_v51  ;;  %v9475_v51 = vld [vmem:[%s13120_s1 + $0x74c] ss:$40 sps:$4 sm:$0xff]  }
  0xa4   :  { %2295 = vmatpush1.bf16.msra.mxu1 %v9383_v52  ;;  %2214 = vmatprep.subr.bf16.mxu0 %v9388_v53  ;;  %v9470_v52 = vld [vmem:[%s13120_s1 + $0x740] ss:$40 sps:$4 sm:$0xff]  }
  0xa5   :  { %2296 = vmatprep.subr.bf16.mxu1 %v9391_v54  ;;  %v9473_v53 = vld [vmem:[%s13120_s1 + $0x748] ss:$40 sps:$4 sm:$0xff]   ;;  %v9478_v54 = vld [vmem:[%s13120_s1 + $0x794] ss:$40 sps:$4 sm:$0xff]  }
  0xa7   :  { %2215 = vmatpush1.bf16.msra.mxu0 %v9386_v55  ;;  %v9481_v55 = vld [vmem:[%s13120_s1 + $0x79c] ss:$40 sps:$4 sm:$0xff]  }
  0xa8   :  { %2297 = vmatpush1.bf16.msra.mxu1 %v9389_v56  ;;  %2216 = vmatprep.subr.bf16.mxu0 %v9394_v57  ;;  %v9476_v56 = vld [vmem:[%s13120_s1 + $0x790] ss:$40 sps:$4 sm:$0xff]  }
  0xa9   :  { %2298 = vmatprep.subr.bf16.mxu1 %v9397_v59  ;;  %v9479_v57 = vld [vmem:[%s13120_s1 + $0x798] ss:$40 sps:$4 sm:$0xff]   ;;  %v9484_v59 = vld [vmem:[%s13120_s1 + $0x7e4] ss:$40 sps:$4 sm:$0xff]  }
  0xab   :  { %2217 = vmatpush1.bf16.msra.mxu0 %v9392_v60  ;;  %v9487_v60 = vld [vmem:[%s13120_s1 + $0x7ec] ss:$40 sps:$4 sm:$0xff]  }
  0xac   :  { %2299 = vmatpush1.bf16.msra.mxu1 %v9395_v61  ;;  %2218 = vmatprep.subr.bf16.mxu0 %v9400_v62  ;;  %v9482_v61 = vld [vmem:[%s13120_s1 + $0x7e0] ss:$40 sps:$4 sm:$0xff]  }
  0xad   :  { %2300 = vmatprep.subr.bf16.mxu1 %v9403_v63  ;;  %v9485_v62 = vld [vmem:[%s13120_s1 + $0x7e8] ss:$40 sps:$4 sm:$0xff]   ;;  %v9490_v63 = vld [vmem:[%s13120_s1 + $0x834] ss:$40 sps:$4 sm:$0xff]  }
  0xaf   :  { %2219 = vmatpush1.bf16.msra.mxu0 %v9398_v0  ;;  %v9493_v0 = vld [vmem:[%s13120_s1 + $0x83c] ss:$40 sps:$4 sm:$0xff]  }
  0xb0   :  { %2301 = vmatpush1.bf16.msra.mxu1 %v9401_v1  ;;  %2220 = vmatprep.subr.bf16.mxu0 %v9406_v2  ;;  %v9488_v1 = vld [vmem:[%s13120_s1 + $0x830] ss:$40 sps:$4 sm:$0xff]  }
  0xb1   :  { %2302 = vmatprep.subr.bf16.mxu1 %v9409_v3  ;;  %v9491_v2 = vld [vmem:[%s13120_s1 + $0x838] ss:$40 sps:$4 sm:$0xff]   ;;  %v9496_v3 = vld [vmem:[%s13120_s1 + $0x884] ss:$40 sps:$4 sm:$0xff]  }
  0xb3   :  { %2221 = vmatpush1.bf16.msra.mxu0 %v9404_v4  ;;  %v9499_v4 = vld [vmem:[%s13120_s1 + $0x88c] ss:$40 sps:$4 sm:$0xff]  }
  0xb4   :  { %2303 = vmatpush1.bf16.msra.mxu1 %v9407_v5  ;;  %2222 = vmatprep.subr.bf16.mxu0 %v9412_v6  ;;  %v9494_v5 = vld [vmem:[%s13120_s1 + $0x880] ss:$40 sps:$4 sm:$0xff]  }
  0xb5   :  { %2304 = vmatprep.subr.bf16.mxu1 %v9415_v7  ;;  %v9497_v6 = vld [vmem:[%s13120_s1 + $0x888] ss:$40 sps:$4 sm:$0xff]   ;;  %v9502_v7 = vld [vmem:[%s13120_s1 + $0x8d4] ss:$40 sps:$4 sm:$0xff]  }
  0xb7   :  { %2223 = vmatpush1.bf16.msra.mxu0 %v9410_v8  ;;  %v9505_v8 = vld [vmem:[%s13120_s1 + $0x8dc] ss:$40 sps:$4 sm:$0xff]  }
  0xb8   :  { %2305 = vmatpush1.bf16.msra.mxu1 %v9413_v9  ;;  %2224 = vmatprep.subr.bf16.mxu0 %v9418_v10  ;;  %v9500_v9 = vld [vmem:[%s13120_s1 + $0x8d0] ss:$40 sps:$4 sm:$0xff]  }
  0xb9   :  { %2306 = vmatprep.subr.bf16.mxu1 %v9421_v11  ;;  %v9503_v10 = vld [vmem:[%s13120_s1 + $0x8d8] ss:$40 sps:$4 sm:$0xff]   ;;  %v9508_v11 = vld [vmem:[%s13120_s1 + $0x924] ss:$40 sps:$4 sm:$0xff]  }
  0xbb   :  { %2225 = vmatpush1.bf16.msra.mxu0 %v9416_v13  ;;  %v9511_v13 = vld [vmem:[%s13120_s1 + $0x92c] ss:$40 sps:$4 sm:$0xff]  }
  0xbc   :  { %2307 = vmatpush1.bf16.msra.mxu1 %v9419_v14  ;;  %2226 = vmatprep.subr.bf16.mxu0 %v9424_v15  ;;  %v9506_v14 = vld [vmem:[%s13120_s1 + $0x920] ss:$40 sps:$4 sm:$0xff]  }
  0xbd   :  { %2308 = vmatprep.subr.bf16.mxu1 %v9427_v18  ;;  %v9509_v15 = vld [vmem:[%s13120_s1 + $0x928] ss:$40 sps:$4 sm:$0xff]   ;;  %v9514_v18 = vld [vmem:[%s13120_s1 + $0x974] ss:$40 sps:$4 sm:$0xff]  }
  0xbf   :  { %2227 = vmatpush1.bf16.msra.mxu0 %v9422_v19  ;;  %v9517_v19 = vld [vmem:[%s13120_s1 + $0x97c] ss:$40 sps:$4 sm:$0xff]  }
  0xc0   :  { %2309 = vmatpush1.bf16.msra.mxu1 %v9425_v20  ;;  %2237 = vmatprep.subr.bf16.mxu0 %v9430_v21  ;;  %v9512_v20 = vld [vmem:[%s13120_s1 + $0x970] ss:$40 sps:$4 sm:$0xff]  }
  0xc1   :  { %2319 = vmatprep.subr.bf16.mxu1 %v9433_v22  ;;  %v9515_v21 = vld [vmem:[%s13120_s1 + $0x978] ss:$40 sps:$4 sm:$0xff]   ;;  %v9520_v22 = vld [vmem:[%s13120_s1 + $0x9c4] ss:$40 sps:$4 sm:$0xff]  }
  0xc2   :  { %2229 = vmatmul.mubr.bf16.vlgmr.msra.gmra.mrb[4].mxu0 %v9998_v12 }
  0xc3   :  { %2311 = vmatmul.mubr.bf16.vlgmr.msra.gmra.mrb[4].mxu1 %v9998_v12  ;;  %2238 = vmatpush1.bf16.msra.mxu0 %v9428_v23  ;;  %v9523_v23 = vld [vmem:[%s13120_s1 + $0x9cc] ss:$40 sps:$4 sm:$0xff]  }
  0xc4   :  { %2320 = vmatpush1.bf16.msra.mxu1 %v9431_v24  ;;  %2239 = vmatprep.subr.bf16.mxu0 %v9436_v25  ;;  %v2502_v24 = vld [vmem:[%s13122_s3] sm:$0xff] }
  0xc5   :  { %2321 = vmatprep.subr.bf16.mxu1 %v9439_v26  ;;  %2269 = vmatprep.mubr.bf16.mxu0 %v10011_v16  ;;  %v2506_v25 = vld [vmem:[%s13122_s3 + $0x20] sm:$0xff] }
  0xc6   :  { %2351 = vmatprep.mubr.bf16.mxu1 %v10011_v16  ;;  %v9518_v26 = vld [vmem:[%s13120_s1 + $0x9c0] ss:$40 sps:$4 sm:$0xff]  }
  0xc7   :  { %2240 = vmatpush1.bf16.msra.mxu0 %v9434_v27  ;;  %v9521_v27 = vld [vmem:[%s13120_s1 + $0x9c8] ss:$40 sps:$4 sm:$0xff]  }
  0xc8   :  { %2322 = vmatpush1.bf16.msra.mxu1 %v9437_v28  ;;  %2241 = vmatprep.subr.bf16.mxu0 %v9442_v29  ;;  %v9526_v28 = vld [vmem:[%s13120_s1 + $0x24] ss:$40 sps:$4 sm:$0xff]  }
  0xc9   :  { %2323 = vmatprep.subr.bf16.mxu1 %v9445_v30  ;;  %v2510_v29 = vld [vmem:[%s13122_s3 + $0x40] sm:$0xff] }
  0xca   :  { %v2514_v30 = vld [vmem:[%s13122_s3 + $0x60] sm:$0xff] }
  0xcb   :  { %2242 = vmatpush1.bf16.msra.mxu0 %v9440_v31  ;;  %v8265_v31 = vcombine.high %v2502_v24, %v2506_v25 }
  0xcc   :  { %2324 = vmatpush1.bf16.msra.mxu1 %v9443_v32  ;;  %2243 = vmatprep.subr.bf16.mxu0 %v9448_v33  ;;  %v9524_v32 = vld [vmem:[%s13120_s1 + $0x20] ss:$40 sps:$4 sm:$0xff]   ;;  %v9529_v33 = vld [vmem:[%s13120_s1 + $0x74] ss:$40 sps:$4 sm:$0xff]  }
  0xcd   :  { %2325 = vmatprep.subr.bf16.mxu1 %v9451_v34  ;;  %v8264_v34 = vcombine.low %v2502_v24, %v2506_v25 }
  0xcf   :  { %2244 = vmatpush1.bf16.msra.mxu0 %v9446_v35  ;;  %v8273_v35 = vcombine.high %v2510_v29, %v2514_v30 }
  0xd0   :  { %2326 = vmatpush1.bf16.msra.mxu1 %v9449_v36  ;;  %2245 = vmatprep.subr.bf16.mxu0 %v9454_v37  ;;  %v2518_v36 = vld [vmem:[%s13122_s3 + $0x80] sm:$0xff] }
  0xd1   :  { %2327 = vmatprep.subr.bf16.mxu1 %v9457_v38  ;;  %v2522_v37 = vld [vmem:[%s13122_s3 + $0xa0] sm:$0xff]  ;;  %v9527_v38 = vld [vmem:[%s13120_s1 + $0x70] ss:$40 sps:$4 sm:$0xff]  }
  0xd3   :  { %2246 = vmatpush1.bf16.msra.mxu0 %v9452_v39  ;;  %v9532_v39 = vld [vmem:[%s13120_s1 + $0xc4] ss:$40 sps:$4 sm:$0xff]  }
  0xd4   :  { %2328 = vmatpush1.bf16.msra.mxu1 %v9455_v40  ;;  %2247 = vmatprep.subr.bf16.mxu0 %v9460_v41  ;;  %v8272_v40 = vcombine.low %v2510_v29, %v2514_v30  ;;  %v8281_v41 = vcombine.high %v2518_v36, %v2522_v37 }
  0xd5   :  { %2329 = vmatprep.subr.bf16.mxu1 %v9463_v42  ;;  %v2526_v42 = vld [vmem:[%s13122_s3 + $0xc0] sm:$0xff] }
  0xd7   :  { %2248 = vmatpush1.bf16.msra.mxu0 %v9458_v43  ;;  %v2530_v43 = vld [vmem:[%s13122_s3 + $0xe0] sm:$0xff] }
  0xd8   :  { %2330 = vmatpush1.bf16.msra.mxu1 %v9461_v44  ;;  %2249 = vmatprep.subr.bf16.mxu0 %v9466_v46  ;;  %v9530_v44 = vld [vmem:[%s13120_s1 + $0xc0] ss:$40 sps:$4 sm:$0xff]   ;;  %v9535_v46 = vld [vmem:[%s13120_s1 + $0x114] ss:$40 sps:$4 sm:$0xff]  }
  0xd9   :  { %2331 = vmatprep.subr.bf16.mxu1 %v9469_v47  ;;  %v8280_v47 = vcombine.low %v2518_v36, %v2522_v37 }
  0xdb   :  { %2250 = vmatpush1.bf16.msra.mxu0 %v9464_v48  ;;  %v8289_v48 = vcombine.high %v2526_v42, %v2530_v43 }
  0xdc   :  { %2332 = vmatpush1.bf16.msra.mxu1 %v9467_v49  ;;  %2251 = vmatprep.subr.bf16.mxu0 %v9472_v50  ;;  %v2534_v49 = vld [vmem:[%s13122_s3 + $0x100] sm:$0xff]  ;;  %v9533_v50 = vld [vmem:[%s13120_s1 + $0x110] ss:$40 sps:$4 sm:$0xff]  }
  0xdd   :  { %2333 = vmatprep.subr.bf16.mxu1 %v9475_v51  ;;  %v9538_v51 = vld [vmem:[%s13120_s1 + $0x164] ss:$40 sps:$4 sm:$0xff]  }
  0xdf   :  { %2252 = vmatpush1.bf16.msra.mxu0 %v9470_v52  ;;  %v8288_v52 = vcombine.low %v2526_v42, %v2530_v43 }
  0xe0   :  { %2334 = vmatpush1.bf16.msra.mxu1 %v9473_v53  ;;  %2253 = vmatprep.subr.bf16.mxu0 %v9478_v54  ;;  %v2542_v54 = vld [vmem:[%s13122_s3 + $0x140] sm:$0xff] }
  0xe1   :  { %2335 = vmatprep.subr.bf16.mxu1 %v9481_v55  ;;  %v2546_v55 = vld [vmem:[%s13122_s3 + $0x160] sm:$0xff] }
  0xe3   :  { %2254 = vmatpush1.bf16.msra.mxu0 %v9476_v56  ;;  %v9536_v56 = vld [vmem:[%s13120_s1 + $0x160] ss:$40 sps:$4 sm:$0xff]  }
  0xe4   :  { %2336 = vmatpush1.bf16.msra.mxu1 %v9479_v57  ;;  %2255 = vmatprep.subr.bf16.mxu0 %v9484_v59  ;;  %v9541_v57 = vld [vmem:[%s13120_s1 + $0x1b4] ss:$40 sps:$4 sm:$0xff]  }
  0xe5   :  { %2337 = vmatprep.subr.bf16.mxu1 %v9487_v60  ;;  %v8305_v60 = vcombine.high %v2542_v54, %v2546_v55 }
  0xe7   :  { %2256 = vmatpush1.bf16.msra.mxu0 %v9482_v61  ;;  %v2550_v61 = vld [vmem:[%s13122_s3 + $0x180] sm:$0xff] }
  0xe8   :  { %2338 = vmatpush1.bf16.msra.mxu1 %v9485_v62  ;;  %2257 = vmatprep.subr.bf16.mxu0 %v9490_v63  ;;  %v2554_v62 = vld [vmem:[%s13122_s3 + $0x1a0] sm:$0xff]  ;;  %v9539_v63 = vld [vmem:[%s13120_s1 + $0x1b0] ss:$40 sps:$4 sm:$0xff]  }
  0xe9   :  { %2339 = vmatprep.subr.bf16.mxu1 %v9493_v0  ;;  %v8304_v0 = vcombine.low %v2542_v54, %v2546_v55 }
  0xeb   :  { %2258 = vmatpush1.bf16.msra.mxu0 %v9488_v1  ;;  %v9544_v1 = vld [vmem:[%s13120_s1 + $0x204] ss:$40 sps:$4 sm:$0xff]  }
  0xec   :  { %2340 = vmatpush1.bf16.msra.mxu1 %v9491_v2  ;;  %2259 = vmatprep.subr.bf16.mxu0 %v9496_v3  ;;  %v8313_v2 = vcombine.high %v2550_v61, %v2554_v62 }
  0xed   :  { %2341 = vmatprep.subr.bf16.mxu1 %v9499_v4 }
  0xef   :  { %2260 = vmatpush1.bf16.msra.mxu0 %v9494_v5 }
  0xf0   :  { %2342 = vmatpush1.bf16.msra.mxu1 %v9497_v6  ;;  %2261 = vmatprep.subr.bf16.mxu0 %v9502_v7 }
  0xf1   :  { %2343 = vmatprep.subr.bf16.mxu1 %v9505_v8 }
  0xf3   :  { %2262 = vmatpush1.bf16.msra.mxu0 %v9500_v9 }
  0xf4   :  { %2344 = vmatpush1.bf16.msra.mxu1 %v9503_v10  ;;  %2263 = vmatprep.subr.bf16.mxu0 %v9508_v11 }
  0xf5   :  { %2345 = vmatprep.subr.bf16.mxu1 %v9511_v13 }
  0xf7   :  { %2264 = vmatpush1.bf16.msra.mxu0 %v9506_v14 }
  0xf8   :  { %2346 = vmatpush1.bf16.msra.mxu1 %v9509_v15  ;;  %2265 = vmatprep.subr.bf16.mxu0 %v9514_v18 }
  0xf9   :  { %2347 = vmatprep.subr.bf16.mxu1 %v9517_v19 }
  0xfb   :  { %2266 = vmatpush1.bf16.msra.mxu0 %v9512_v20 }
  0xfc   :  { %2348 = vmatpush1.bf16.msra.mxu1 %v9515_v21  ;;  %2267 = vmatprep.subr.bf16.mxu0 %v9520_v22 }
  0xfd   :  { %2349 = vmatprep.subr.bf16.mxu1 %v9523_v23 }
  0xff   :  { %2268 = vmatpush1.bf16.msra.mxu0 %v9518_v26 }
 0x100   :  { %2350 = vmatpush1.bf16.msra.mxu1 %v9521_v27  ;;  %2360 = vmatprep.subr.bf16.mxu0 %v9526_v28 }
 0x101   :  { %6384 = vmatprep.subr.bf16.mxu1 %v8265_v31 }
 0x102   :  { %2270 = vmatmul.mubr.bf16.vlgmr.msra.gmra.mrb[4].mxu0 %v10199_v17 }
 0x103   :  { %2352 = vmatmul.mubr.bf16.vlgmr.msra.gmra.mrb[4].mxu1 %v10199_v17  ;;  %2361 = vmatpush1.bf16.msra.mxu0 %v9524_v32 }
 0x104   :  { %6385 = vmatpush1.bf16.msra.mxu1 %v8264_v34  ;;  %2362 = vmatprep.subr.bf16.mxu0 %v9529_v33 }
 0x105   :  { %6386 = vmatprep.subr.bf16.mxu1 %v8273_v35  ;;  %2392 = vmatprep.mubr.bf16.mxu0 %v9943_v58  ;;  %v2538_v58 = vld [vmem:[%s13122_s3 + $0x120] sm:$0xff] }
 0x106   :  { %v8297_v53 = vcombine.high %v2534_v49, %v2538_v58  ;;  %v8296_v59 = vcombine.low %v2534_v49, %v2538_v58 }
 0x107   :  { %2363 = vmatpush1.bf16.msra.mxu0 %v9527_v38 }
 0x108   :  { %6387 = vmatpush1.bf16.msra.mxu1 %v8272_v40  ;;  %2364 = vmatprep.subr.bf16.mxu0 %v9532_v39 }
 0x109   :  { %6388 = vmatprep.subr.bf16.mxu1 %v8281_v41 }
 0x10b   :  { %2365 = vmatpush1.bf16.msra.mxu0 %v9530_v44 }
 0x10c   :  { %6389 = vmatpush1.bf16.msra.mxu1 %v8280_v47  ;;  %2366 = vmatprep.subr.bf16.mxu0 %v9535_v46 }
 0x10d   :  { %6390 = vmatprep.subr.bf16.mxu1 %v8289_v48 }
 0x10f   :  { %2367 = vmatpush1.bf16.msra.mxu0 %v9533_v50 }
 0x110   :  { %6391 = vmatpush1.bf16.msra.mxu1 %v8288_v52  ;;  %2368 = vmatprep.subr.bf16.mxu0 %v9538_v51 }
 0x111   :  { %6392 = vmatprep.subr.bf16.mxu1 %v8297_v53 }
 0x113   :  { %2369 = vmatpush1.bf16.msra.mxu0 %v9536_v56 }
 0x114   :  { %6393 = vmatpush1.bf16.msra.mxu1 %v8296_v59  ;;  %2370 = vmatprep.subr.bf16.mxu0 %v9541_v57 }
 0x115   :  { %6394 = vmatprep.subr.bf16.mxu1 %v8305_v60 }
 0x116   :  { %12 = vsyncpa [#allocation3], 0  ;;  %v2558_v3 = vld [vmem:[%s13122_s3 + $0x1c0] sm:$0xff]  ;;  %v8312_v6 = vcombine.low %v2550_v61, %v2554_v62  ;;  %v9547_v7 = vld [vmem:[%s13120_s1 + $0x254] ss:$40 sps:$4 sm:$0xff]   ;;  %vm7763_vm0 = vcmask 1043456  }
 0x117   :  { %v2562_v4 = vld [vmem:[%s13122_s3 + $0x1e0] sm:$0xff]  ;;  %2371 = vmatpush1.bf16.msra.mxu0 %v9539_v63  ;;  %v9545_v11 = vld [vmem:[%s13120_s1 + $0x250] ss:$40 sps:$4 sm:$0xff]   ;;  %v9553_v22 = vld [vmem:[%s13120_s1 + $0x2f4] ss:$40 sps:$4 sm:$0xff]   ;;  %vm7759_vm1 = vcmask 850944  }
 0x118   :  { %v9542_v5 = vld [vmem:[%s13120_s1 + $0x200] ss:$40 sps:$4 sm:$0xff]   ;;  %6395 = vmatpush1.bf16.msra.mxu1 %v8304_v0  ;;  %2372 = vmatprep.subr.bf16.mxu0 %v9544_v1  ;;  %v8321_v8 = vcombine.high %v2558_v3, %v2562_v4  ;;  %v8320_v13 = vcombine.low %v2558_v3, %v2562_v4  ;;  %v9550_v14 = vld [vmem:[%s13120_s1 + $0x2a4] ss:$40 sps:$4 sm:$0xff]   ;;  %v9551_v26 = vld [vmem:[%s13120_s1 + $0x2f0] ss:$40 sps:$4 sm:$0xff]  }
 0x119   :  { %6396 = vmatprep.subr.bf16.mxu1 %v8313_v2  ;;  %v2566_v9 = vld [vmem:[%s13122_s3 + $0x200] sm:$0xff]  ;;  %v9559_v34 = vld [vmem:[%s13120_s1 + $0x394] ss:$40 sps:$4 sm:$0xff]   ;;  %v9557_v38 = vld [vmem:[%s13120_s1 + $0x390] ss:$40 sps:$4 sm:$0xff]   ;;  %vm7927_vm2 = vcmask 74752  }
 0x11a   :  { %v2570_v10 = vld [vmem:[%s13122_s3 + $0x220] sm:$0xff]  ;;  %v9565_v47 = vld [vmem:[%s13120_s1 + $0x434] ss:$40 sps:$4 sm:$0xff]   ;;  %v9563_v50 = vld [vmem:[%s13120_s1 + $0x430] ss:$40 sps:$4 sm:$0xff]  }
 0x11b   :  { %2373 = vmatpush1.bf16.msra.mxu0 %v9542_v5  ;;  %v8329_v15 = vcombine.high %v2566_v9, %v2570_v10  ;;  %v2574_v18 = vld [vmem:[%s13122_s3 + $0x240] sm:$0xff]  ;;  %v8328_v21 = vcombine.low %v2566_v9, %v2570_v10  ;;  %v9571_v59 = vld [vmem:[%s13120_s1 + $0x4d4] ss:$40 sps:$4 sm:$0xff]   ;;  %v9569_v63 = vld [vmem:[%s13120_s1 + $0x4d0] ss:$40 sps:$4 sm:$0xff]   ;;  %v10824_v9 = vsub.s32 0, %v9913_v45 }
 0x11c   :  { %6397 = vmatpush1.bf16.msra.mxu1 %v8312_v6  ;;  %2374 = vmatprep.subr.bf16.mxu0 %v9547_v7  ;;  %v2578_v19 = vld [vmem:[%s13122_s3 + $0x260] sm:$0xff]  ;;  %v9577_v4 = vld [vmem:[%s13120_s1 + $0x574] ss:$40 sps:$4 sm:$0xff]   ;;  %v9575_v5 = vld [vmem:[%s13120_s1 + $0x570] ss:$40 sps:$4 sm:$0xff]  }
 0x11d   :  { %6398 = vmatprep.subr.bf16.mxu1 %v8321_v8  ;;  %v9548_v20 = vld [vmem:[%s13120_s1 + $0x2a0] ss:$40 sps:$4 sm:$0xff]   ;;  %v8337_v23 = vcombine.high %v2574_v18, %v2578_v19  ;;  %v8336_v27 = vcombine.low %v2574_v18, %v2578_v19  ;;  %v9556_v28 = vld [vmem:[%s13120_s1 + $0x344] ss:$40 sps:$4 sm:$0xff]  }
 0x11e   :  { %v2582_v24 = vld [vmem:[%s13122_s3 + $0x280] sm:$0xff] }
 0x11f   :  { %2375 = vmatpush1.bf16.msra.mxu0 %v9545_v11  ;;  %v2586_v25 = vld [vmem:[%s13122_s3 + $0x2a0] sm:$0xff] }
 0x120   :  { %6399 = vmatpush1.bf16.msra.mxu1 %v8320_v13  ;;  %2376 = vmatprep.subr.bf16.mxu0 %v9550_v14  ;;  %v8345_v29 = vcombine.high %v2582_v24, %v2586_v25  ;;  %v2590_v30 = vld [vmem:[%s13122_s3 + $0x2c0] sm:$0xff]  ;;  %v8344_v33 = vcombine.low %v2582_v24, %v2586_v25  ;;  %v10835_v13 = vsub.s32 1, %v9913_v45  ;;  %v367_v14 = vsub.s32 3, %v9913_v45 }
 0x121   :  { %6400 = vmatprep.subr.bf16.mxu1 %v8329_v15  ;;  %v2594_v31 = vld [vmem:[%s13122_s3 + $0x2e0] sm:$0xff]  ;;  %v9589_v15 = vld [vmem:[%s13120_s1 + $0x6b4] ss:$40 sps:$4 sm:$0xff]  }
 0x122   :  { %v9554_v32 = vld [vmem:[%s13120_s1 + $0x340] ss:$40 sps:$4 sm:$0xff]   ;;  %v8353_v35 = vcombine.high %v2590_v30, %v2594_v31  ;;  %v8352_v39 = vcombine.low %v2590_v30, %v2594_v31  ;;  %v9562_v40 = vld [vmem:[%s13120_s1 + $0x3e4] ss:$40 sps:$4 sm:$0xff]  }
 0x123   :  { %2377 = vmatpush1.bf16.msra.mxu0 %v9548_v20  ;;  %v2598_v36 = vld [vmem:[%s13122_s3 + $0x300] sm:$0xff] }
 0x124   :  { %6401 = vmatpush1.bf16.msra.mxu1 %v8328_v21  ;;  %2378 = vmatprep.subr.bf16.mxu0 %v9553_v22  ;;  %v2602_v37 = vld [vmem:[%s13122_s3 + $0x320] sm:$0xff]  ;;  %v9587_v21 = vld [vmem:[%s13120_s1 + $0x6b0] ss:$40 sps:$4 sm:$0xff]  }
 0x125   :  { %6402 = vmatprep.subr.bf16.mxu1 %v8337_v23  ;;  %v8361_v41 = vcombine.high %v2598_v36, %v2602_v37  ;;  %v2606_v42 = vld [vmem:[%s13122_s3 + $0x340] sm:$0xff]  ;;  %v8360_v46 = vcombine.low %v2598_v36, %v2602_v37 }
 0x126   :  { %v2610_v43 = vld [vmem:[%s13122_s3 + $0x360] sm:$0xff] }
 0x127   :  { %2379 = vmatpush1.bf16.msra.mxu0 %v9551_v26  ;;  %v9560_v44 = vld [vmem:[%s13120_s1 + $0x3e0] ss:$40 sps:$4 sm:$0xff]   ;;  %v8369_v48 = vcombine.high %v2606_v42, %v2610_v43  ;;  %v8368_v51 = vcombine.low %v2606_v42, %v2610_v43  ;;  %v9568_v52 = vld [vmem:[%s13120_s1 + $0x484] ss:$40 sps:$4 sm:$0xff]   ;;  %v9601_v42 = vld [vmem:[%s13120_s1 + $0x7f4] ss:$40 sps:$4 sm:$0xff]  }
 0x128   :  { %6403 = vmatpush1.bf16.msra.mxu1 %v8336_v27  ;;  %2380 = vmatprep.subr.bf16.mxu0 %v9556_v28  ;;  %v2614_v49 = vld [vmem:[%s13122_s3 + $0x380] sm:$0xff]  ;;  %v9599_v43 = vld [vmem:[%s13120_s1 + $0x7f0] ss:$40 sps:$4 sm:$0xff]  }
 0x129   :  { %6404 = vmatprep.subr.bf16.mxu1 %v8345_v29  ;;  %v2618_v58 = vld [vmem:[%s13122_s3 + $0x3a0] sm:$0xff] }
 0x12a   :  { %v8377_v53 = vcombine.high %v2614_v49, %v2618_v58  ;;  %v2622_v54 = vld [vmem:[%s13122_s3 + $0x3c0] sm:$0xff]  ;;  %v8376_v57 = vcombine.low %v2614_v49, %v2618_v58 }
 0x12b   :  { %2381 = vmatpush1.bf16.msra.mxu0 %v9554_v32  ;;  %v2626_v55 = vld [vmem:[%s13122_s3 + $0x3e0] sm:$0xff] }
 0x12c   :  { %6405 = vmatpush1.bf16.msra.mxu1 %v8344_v33  ;;  %2382 = vmatprep.subr.bf16.mxu0 %v9559_v34  ;;  %v9566_v56 = vld [vmem:[%s13120_s1 + $0x480] ss:$40 sps:$4 sm:$0xff]   ;;  %v8385_v60 = vcombine.high %v2622_v54, %v2626_v55  ;;  %v8384_v0 = vcombine.low %v2622_v54, %v2626_v55  ;;  %v9574_v1 = vld [vmem:[%s13120_s1 + $0x524] ss:$40 sps:$4 sm:$0xff]   ;;  %v9595_v34 = vld [vmem:[%s13120_s1 + $0x754] ss:$40 sps:$4 sm:$0xff]  }
 0x12d   :  { %6406 = vmatprep.subr.bf16.mxu1 %v8353_v35  ;;  %v10782_v61 = vld [vmem:[%s13122_s3 + $0x400] sm:$0xff] }
 0x12e   :  { %v10787_v62 = vld [vmem:[%s13122_s3 + $0x420] sm:$0xff] }
 0x12f   :  { %2383 = vmatpush1.bf16.msra.mxu0 %v9557_v38  ;;  %v8393_v2 = vcombine.high %v10782_v61, %v10787_v62  ;;  %v9572_v3 = vld [vmem:[%s13120_s1 + $0x520] ss:$40 sps:$4 sm:$0xff]   ;;  %v9580_v6 = vld [vmem:[%s13120_s1 + $0x5c4] ss:$40 sps:$4 sm:$0xff]  }
 0x130   :  { %6407 = vmatpush1.bf16.msra.mxu1 %v8352_v39  ;;  %2384 = vmatprep.subr.bf16.mxu0 %v9562_v40  ;;  %v9578_v7 = vld [vmem:[%s13120_s1 + $0x5c0] ss:$40 sps:$4 sm:$0xff]   ;;  %v9586_v8 = vld [vmem:[%s13120_s1 + $0x664] ss:$40 sps:$4 sm:$0xff]   ;;  %v9593_v39 = vld [vmem:[%s13120_s1 + $0x750] ss:$40 sps:$4 sm:$0xff]  }
 0x131   :  { %6408 = vmatprep.subr.bf16.mxu1 %v8361_v41  ;;  %v9584_v10 = vld [vmem:[%s13120_s1 + $0x660] ss:$40 sps:$4 sm:$0xff]   ;;  %v9592_v22 = vld [vmem:[%s13120_s1 + $0x704] ss:$40 sps:$4 sm:$0xff]  }
 0x132   :  { %v10832_v11 = vld [vmem:[%s13121_s2] sm:$0xff] }
 0x133   :  { %2385 = vmatpush1.bf16.msra.mxu0 %v9560_v44  ;;  %v356_v18 = vrot.slane %v10832_v11, %v10824_v9  ;;  %v360_v19 = vrot.slane %v10832_v11, %v10835_v13  ;;  %v368_v20 = vrot.slane %v10832_v11, %v367_v14  ;;  %v9590_v32 = vld [vmem:[%s13120_s1 + $0x700] ss:$40 sps:$4 sm:$0xff]   ;;  %v9598_v40 = vld [vmem:[%s13120_s1 + $0x7a4] ss:$40 sps:$4 sm:$0xff]  }
 0x134   :  { %6409 = vmatpush1.bf16.msra.mxu1 %v8360_v46  ;;  %2386 = vmatprep.subr.bf16.mxu0 %v9565_v47  ;;  %v9596_v41 = vld [vmem:[%s13120_s1 + $0x7a0] ss:$40 sps:$4 sm:$0xff]   ;;  %v9604_v46 = vld [vmem:[%s13120_s1 + $0x844] ss:$40 sps:$4 sm:$0xff]  }
 0x135   :  { %6410 = vmatprep.subr.bf16.mxu1 %v8369_v48 }
 0x137   :  { %2387 = vmatpush1.bf16.msra.mxu0 %v9563_v50 }
 0x138   :  { %6411 = vmatpush1.bf16.msra.mxu1 %v8368_v51  ;;  %2388 = vmatprep.subr.bf16.mxu0 %v9568_v52  ;;  %v9602_v52 = vld [vmem:[%s13120_s1 + $0x840] ss:$40 sps:$4 sm:$0xff]  }
 0x139   :  { %6412 = vmatprep.subr.bf16.mxu1 %v8377_v53 }
 0x13b   :  { %2389 = vmatpush1.bf16.msra.mxu0 %v9566_v56  ;;  %v9607_v56 = vld [vmem:[%s13120_s1 + $0x894] ss:$40 sps:$4 sm:$0xff]  }
 0x13c   :  { %6413 = vmatpush1.bf16.msra.mxu1 %v8376_v57  ;;  %2390 = vmatprep.subr.bf16.mxu0 %v9571_v59  ;;  %v2638_v59 = vld [vmem:[%s13122_s3 + $0x440] sm:$0xff] }
 0x13d   :  { %6414 = vmatprep.subr.bf16.mxu1 %v8385_v60  ;;  %v2642_v60 = vld [vmem:[%s13122_s3 + $0x460] sm:$0xff] }
 0x13f   :  { %2391 = vmatpush1.bf16.msra.mxu0 %v9569_v63 }
 0x140   :  { %6415 = vmatpush1.bf16.msra.mxu1 %v8384_v0  ;;  %2401 = vmatprep.subr.bf16.mxu0 %v9574_v1  ;;  %v8392_v1 = vcombine.low %v10782_v61, %v10787_v62  ;;  %v2646_v61 = vld [vmem:[%s13122_s3 + $0x480] sm:$0xff] }
 0x141   :  { %6425 = vmatprep.subr.bf16.mxu1 %v8393_v2  ;;  %v2650_v62 = vld [vmem:[%s13122_s3 + $0x4a0] sm:$0xff] }
 0x142   :  { %2393 = vmatmul.mubr.bf16.vlgmr.msra.gmra.mrb[8].mxu0 %v9998_v12  ;;  %v9583_v12 = vld [vmem:[%s13120_s1 + $0x614] ss:$40 sps:$4 sm:$0xff]  }
 0x143   :  { %2402 = vmatpush1.bf16.msra.mxu0 %v9572_v3  ;;  %2433 = vmatprep.mubr.bf16.mxu0 %v10011_v16  ;;  %v9581_v16 = vld [vmem:[%s13120_s1 + $0x610] ss:$40 sps:$4 sm:$0xff]  }
 0x144   :  { %2403 = vmatprep.subr.bf16.mxu0 %v9577_v4  ;;  %v9605_v3 = vld [vmem:[%s13120_s1 + $0x890] ss:$40 sps:$4 sm:$0xff]   ;;  %v8401_v4 = vcombine.high %v2638_v59, %v2642_v60 }
 0x147   :  { %2404 = vmatpush1.bf16.msra.mxu0 %v9575_v5 }
 0x148   :  { %2405 = vmatprep.subr.bf16.mxu0 %v9580_v6  ;;  %v9610_v6 = vld [vmem:[%s13120_s1 + $0x8e4] ss:$40 sps:$4 sm:$0xff]  }
 0x14b   :  { %2406 = vmatpush1.bf16.msra.mxu0 %v9578_v7  ;;  %v8400_v7 = vcombine.low %v2638_v59, %v2642_v60 }
 0x14c   :  { %2407 = vmatprep.subr.bf16.mxu0 %v9583_v12  ;;  %v9608_v12 = vld [vmem:[%s13120_s1 + $0x8e0] ss:$40 sps:$4 sm:$0xff]  }
 0x14f   :  { %2408 = vmatpush1.bf16.msra.mxu0 %v9581_v16  ;;  %v8409_v16 = vcombine.high %v2646_v61, %v2650_v62 }
 0x150   :  { %2409 = vmatprep.subr.bf16.mxu0 %v9586_v8  ;;  %v9613_v8 = vld [vmem:[%s13120_s1 + $0x934] ss:$40 sps:$4 sm:$0xff]  }
 0x153   :  { %2410 = vmatpush1.bf16.msra.mxu0 %v9584_v10  ;;  %v2654_v10 = vld [vmem:[%s13122_s3 + $0x4c0] sm:$0xff] }
 0x154   :  { %2411 = vmatprep.subr.bf16.mxu0 %v9589_v15  ;;  %v2658_v15 = vld [vmem:[%s13122_s3 + $0x4e0] sm:$0xff] }
 0x155   :  { %v2107_v23 = vpop.f32.mrb[0].mxu0 }
 0x156   :  { %v10854_v24 = vpop.f32.mrb[0].mxu1  ;;  %v9035_v25 = vadd.f32 %v2107_v23, %v356_v18  ;;  %v2109_v26 = vpop.f32.mrb[1].mxu0  ;;  %v8408_v18 = vcombine.low %v2646_v61, %v2650_v62  ;;  %v2666_v23 = vld [vmem:[%s13122_s3 + $0x520] sm:$0xff] }
 0x157   :  { %v2191_v27 = vpop.f32.mrb[1].mxu1  ;;  %v9036_v28 = vadd.f32 %v2109_v26, %v360_v19  ;;  %v2111_v30 = vpop.f32.mrb[2].mxu0  ;;  %2412 = vmatpush1.bf16.msra.mxu0 %v9587_v21  ;;  %v9611_v19 = vld [vmem:[%s13120_s1 + $0x930] ss:$40 sps:$4 sm:$0xff]   ;;  %v9616_v21 = vld [vmem:[%s13120_s1 + $0x984] ss:$40 sps:$4 sm:$0xff]  }
 0x158   :  { %v9038_v29 = vadd.f32 %v2191_v27, %v368_v20  ;;  %v2193_v31 = vpop.f32.mrb[2].mxu1  ;;  %v2452_v33 = vmul.f32 0.70710677, %v9035_v25  ;;  %2413 = vmatprep.subr.bf16.mxu0 %v9592_v22  ;;  %v2112_v37 = vpop.f32.mrb[3].mxu0  ;;  %v2442_v49 = vmul.f32 0.5, %v9035_v25  ;;  %v8417_v20 = vcombine.high %v2654_v10, %v2658_v15  ;;  %v2662_v22 = vld [vmem:[%s13122_s3 + $0x500] sm:$0xff] }
 0x159   :  { %v2453_v35 = vmul.f32 0.70710677, %v9036_v28  ;;  %v2194_v38 = vpop.f32.mrb[3].mxu1  ;;  %v2443_v50 = vmul.f32 0.5, %v9036_v28  ;;  %v8416_v25 = vcombine.low %v2654_v10, %v2658_v15  ;;  %v9614_v26 = vld [vmem:[%s13120_s1 + $0x980] ss:$40 sps:$4 sm:$0xff]   ;;  %v8425_v27 = vcombine.high %v2662_v22, %v2666_v23 }
 0x15a   :  { %v2455_v36 = vmul.f32 0.70710677, %v9038_v29  ;;  %9683 = verf.f32 %v2452_v33  ;;  %v2445_v54 = vmul.f32 0.5, %v9038_v29  ;;  %v9619_v28 = vld [vmem:[%s13120_s1 + $0x9d4] ss:$40 sps:$4 sm:$0xff]   ;;  %v2670_v29 = vld [vmem:[%s13122_s3 + $0x540] sm:$0xff]  ;;  %v8424_v33 = vcombine.low %v2662_v22, %v2666_v23 }
 0x15b   :  { %2414 = vmatpush1.bf16.msra.mxu0 %v9590_v32  ;;  %9685 = verf.f32 %v2453_v35  ;;  %v2674_v30 = vld [vmem:[%s13122_s3 + $0x560] sm:$0xff]  ;;  %v2503_v31 = vld [vmem:[%s13122_s3 + $0x8] sm:$0xff] }
 0x15c   :  { %2415 = vmatprep.subr.bf16.mxu0 %v9595_v34  ;;  %9687 = verf.f32 %v2455_v36  ;;  %v2507_v32 = vld [vmem:[%s13122_s3 + $0x28] sm:$0xff]  ;;  %v9617_v34 = vld [vmem:[%s13120_s1 + $0x9d0] ss:$40 sps:$4 sm:$0xff]   ;;  %v8433_v35 = vcombine.high %v2670_v29, %v2674_v30  ;;  %v2678_v37 = vld [vmem:[%s13122_s3 + $0x580] sm:$0xff] }
 0x15d   :  { %v8267_v36 = vcombine.high %v2503_v31, %v2507_v32  ;;  %v2682_v38 = vld [vmem:[%s13122_s3 + $0x5a0] sm:$0xff]  ;;  %v2543_v15 = vld [vmem:[%s13122_s3 + $0x148] sm:$0xff] }
 0x15e   :  { %v2714_v10 = vld [vmem:[%s13122_s3 + $0x6a0] sm:$0xff] }
 0x15f   :  { %2416 = vmatpush1.bf16.msra.mxu0 %v9593_v39  ;;  %v2511_v39 = vld [vmem:[%s13122_s3 + $0x48] sm:$0xff] }
 0x160   :  { %2417 = vmatprep.subr.bf16.mxu0 %v9598_v40  ;;  %v2515_v40 = vld [vmem:[%s13122_s3 + $0x68] sm:$0xff] }
 0x163   :  { %2418 = vmatpush1.bf16.msra.mxu0 %v9596_v41  ;;  %v8432_v41 = vcombine.low %v2670_v29, %v2674_v30 }
 0x164   :  { %v9684_v44 = vpop.eup %9683  ;;  %2419 = vmatprep.subr.bf16.mxu0 %v9601_v42  ;;  %v8266_v42 = vcombine.low %v2503_v31, %v2507_v32 }
 0x165   :  { %v2472_v47 = vadd.f32 1.0, %v9684_v44  ;;  %v9686_v48 = vpop.eup %9685  ;;  %v8275_v44 = vcombine.high %v2511_v39, %v2515_v40 }
 0x166   :  { %v9688_v58 = vpop.eup %9687  ;;  %v2473_v51 = vadd.f32 1.0, %v9686_v48  ;;  %v2519_v48 = vld [vmem:[%s13122_s3 + $0x88] sm:$0xff] }
 0x167   :  { %2420 = vmatpush1.bf16.msra.mxu0 %v9599_v43  ;;  %v2482_v53 = vmul.f32 %v2472_v47, %v2442_v49  ;;  %v2475_v55 = vadd.f32 1.0, %v9688_v58  ;;  %v8441_v43 = vcombine.high %v2678_v37, %v2682_v38  ;;  %v2690_v47 = vld [vmem:[%s13122_s3 + $0x5e0] sm:$0xff]  ;;  %v2523_v49 = vld [vmem:[%s13122_s3 + $0xa8] sm:$0xff]  ;;  %v8440_v58 = vcombine.low %v2678_v37, %v2682_v38 }
 0x168   :  { %2421 = vmatprep.subr.bf16.mxu0 %v9604_v46  ;;  %v2483_v57 = vmul.f32 %v2473_v51, %v2443_v50  ;;  %v2686_v46 = vld [vmem:[%s13122_s3 + $0x5c0] sm:$0xff]  ;;  %v8274_v50 = vcombine.low %v2511_v39, %v2515_v40  ;;  %v8282_v59 = vcombine.low %v2519_v48, %v2523_v49 }
 0x169   :  { %v2485_v63 = vmul.f32 %v2475_v55, %v2445_v54  ;;  %v10896_v2 = vpack.c.bf16 %v2482_v53, %v2482_v53  ;;  %v8449_v51 = vcombine.high %v2686_v46, %v2690_v47  ;;  %v2694_v53 = vld [vmem:[%s13122_s3 + $0x600] sm:$0xff]  ;;  %v2531_v55 = vld [vmem:[%s13122_s3 + $0xe8] sm:$0xff] }
 0x16a   :  { %v10892_v0 = vpack.c.bf16 %v2483_v57, %v2483_v57  ;;  %v2698_v54 = vld [vmem:[%s13122_s3 + $0x620] sm:$0xff]  ;;  %v8448_v57 = vcombine.low %v2686_v46, %v2690_v47 }
 0x16b   :  { %2422 = vmatpush1.bf16.msra.mxu0 %v9602_v52  ;;  %v10901_v5 = vpack.c.bf16 %v2485_v63, %v2485_v63  ;;  %v8283_v52 = vcombine.high %v2519_v48, %v2523_v49  ;;  %v8457_v60 = vcombine.high %v2694_v53, %v2698_v54  ;;  %v8456_v62 = vcombine.low %v2694_v53, %v2698_v54 }
 0x16c   :  { %2423 = vmatprep.subr.bf16.mxu0 %v9607_v56  ;;  %6416 = vmatprep.mubr.bf16.mxu1 %v10892_v0  ;;  %v363_v56 = vsub.s32 2, %v9913_v45 }
 0x16d   :  { %6417 = vmatmul.mubr.bf16.vlgmr.msra.gmra.mrb[8].mxu1 %v10896_v2 }
 0x16e   :  { %6426 = vmatpush1.bf16.msra.mxu1 %v8392_v1  ;;  %6457 = vmatprep.mubr.bf16.mxu1 %v10901_v5  ;;  %v2702_v1 = vld [vmem:[%s13122_s3 + $0x640] sm:$0xff]  ;;  %v364_v61 = vrot.slane %v10832_v11, %v363_v56 }
 0x16f   :  { %2424 = vmatpush1.bf16.msra.mxu0 %v9605_v3  ;;  %6427 = vmatprep.subr.bf16.mxu1 %v8401_v4  ;;  %v2706_v3 = vld [vmem:[%s13122_s3 + $0x660] sm:$0xff]  ;;  %v2535_v4 = vld [vmem:[%s13122_s3 + $0x108] sm:$0xff] }
 0x170   :  { %2425 = vmatprep.subr.bf16.mxu0 %v9610_v6  ;;  %v2539_v6 = vld [vmem:[%s13122_s3 + $0x128] sm:$0xff] }
 0x172   :  { %6428 = vmatpush1.bf16.msra.mxu1 %v8400_v7 }
 0x173   :  { %2426 = vmatpush1.bf16.msra.mxu0 %v9608_v12  ;;  %6429 = vmatprep.subr.bf16.mxu1 %v8409_v16  ;;  %v8465_v12 = vcombine.high %v2702_v1, %v2706_v3  ;;  %v8299_v16 = vcombine.high %v2535_v4, %v2539_v6 }
 0x174   :  { %2427 = vmatprep.subr.bf16.mxu0 %v9613_v8  ;;  %v2710_v8 = vld [vmem:[%s13122_s3 + $0x680] sm:$0xff] }
 0x175   :  { %v8473_v22 = vcombine.high %v2710_v8, %v2714_v10  ;;  %v8472_v29 = vcombine.low %v2710_v8, %v2714_v10  ;;  %v2591_v8 = vld [vmem:[%s13122_s3 + $0x2c8] sm:$0xff] }
 0x176   :  { %6430 = vmatpush1.bf16.msra.mxu1 %v8408_v18  ;;  %v2547_v18 = vld [vmem:[%s13122_s3 + $0x168] sm:$0xff] }
 0x177   :  { %2428 = vmatpush1.bf16.msra.mxu0 %v9611_v19  ;;  %6431 = vmatprep.subr.bf16.mxu1 %v8417_v20  ;;  %v11027_v19 = vadd.f32 %v10854_v24, %v364_v61  ;;  %v8464_v20 = vcombine.low %v2702_v1, %v2706_v3  ;;  %v8307_v23 = vcombine.high %v2543_v15, %v2547_v18  ;;  %v2551_v24 = vld [vmem:[%s13122_s3 + $0x188] sm:$0xff] }
 0x178   :  { %2429 = vmatprep.subr.bf16.mxu0 %v9616_v21  ;;  %v8298_v21 = vcombine.low %v2535_v4, %v2539_v6  ;;  %v8306_v30 = vcombine.low %v2543_v15, %v2547_v18  ;;  %v2587_v1 = vld [vmem:[%s13122_s3 + $0x2a8] sm:$0xff] }
 0x179   :  { %v2595_v10 = vld [vmem:[%s13122_s3 + $0x2e8] sm:$0xff] }
 0x17a   :  { %6432 = vmatpush1.bf16.msra.mxu1 %v8416_v25  ;;  %v2718_v25 = vld [vmem:[%s13122_s3 + $0x6c0] sm:$0xff] }
 0x17b   :  { %2430 = vmatpush1.bf16.msra.mxu0 %v9614_v26  ;;  %6433 = vmatprep.subr.bf16.mxu1 %v8425_v27  ;;  %v2722_v26 = vld [vmem:[%s13122_s3 + $0x6e0] sm:$0xff]  ;;  %v2555_v27 = vld [vmem:[%s13122_s3 + $0x1a8] sm:$0xff] }
 0x17c   :  { %2431 = vmatprep.subr.bf16.mxu0 %v9619_v28  ;;  %v2454_v28 = vmul.f32 0.70710677, %v11027_v19  ;;  %v8481_v31 = vcombine.high %v2718_v25, %v2722_v26  ;;  %v8315_v32 = vcombine.high %v2551_v24, %v2555_v27  ;;  %v8480_v37 = vcombine.low %v2718_v25, %v2722_v26  ;;  %v2599_v25 = vld [vmem:[%s13122_s3 + $0x308] sm:$0xff] }
 0x17d   :  { %v8314_v38 = vcombine.low %v2551_v24, %v2555_v27  ;;  %v2603_v26 = vld [vmem:[%s13122_s3 + $0x328] sm:$0xff] }
 0x17e   :  { %6434 = vmatpush1.bf16.msra.mxu1 %v8424_v33  ;;  %v2726_v33 = vld [vmem:[%s13122_s3 + $0x700] sm:$0xff]  ;;  %9689 = verf.f32 %v2454_v28  ;;  %v8354_v28 = vcombine.low %v2591_v8, %v2595_v10 }
 0x17f   :  { %2432 = vmatpush1.bf16.msra.mxu0 %v9617_v34  ;;  %6435 = vmatprep.subr.bf16.mxu1 %v8433_v35  ;;  %v2730_v34 = vld [vmem:[%s13122_s3 + $0x720] sm:$0xff]  ;;  %v2559_v35 = vld [vmem:[%s13122_s3 + $0x1c8] sm:$0xff] }
 0x180   :  { %6589 = vmatprep.subr.bf16.mxu0 %v8267_v36  ;;  %v2563_v36 = vld [vmem:[%s13122_s3 + $0x1e8] sm:$0xff]  ;;  %v8489_v39 = vcombine.high %v2726_v33, %v2730_v34  ;;  %v8488_v46 = vcombine.low %v2726_v33, %v2730_v34 }
 0x181   :  { %v8323_v40 = vcombine.high %v2559_v35, %v2563_v36  ;;  %v8322_v47 = vcombine.low %v2559_v35, %v2563_v36  ;;  %v2607_v33 = vld [vmem:[%s13122_s3 + $0x348] sm:$0xff]  ;;  %v8362_v36 = vcombine.low %v2599_v25, %v2603_v26 }
 0x182   :  { %6436 = vmatpush1.bf16.msra.mxu1 %v8432_v41  ;;  %2434 = vmatmul.mubr.bf16.vlgmr.msra.gmra.mrb[8].mxu0 %v10199_v17  ;;  %v2527_v17 = vld [vmem:[%s13122_s3 + $0xc8] sm:$0xff]  ;;  %v2734_v41 = vld [vmem:[%s13122_s3 + $0x740] sm:$0xff] }
 0x183   :  { %6590 = vmatpush1.bf16.msra.mxu0 %v8266_v42  ;;  %6621 = vmatprep.mubr.bf16.mxu0 %v10892_v0  ;;  %v8291_v63 = vcombine.high %v2527_v17, %v2531_v55  ;;  %v8290_v7 = vcombine.low %v2527_v17, %v2531_v55  ;;  %v2738_v42 = vld [vmem:[%s13122_s3 + $0x760] sm:$0xff]  ;;  %v2611_v34 = vld [vmem:[%s13122_s3 + $0x368] sm:$0xff] }
 0x184   :  { %6437 = vmatprep.subr.bf16.mxu1 %v8441_v43  ;;  %6591 = vmatprep.subr.bf16.mxu0 %v8275_v44  ;;  %v2567_v43 = vld [vmem:[%s13122_s3 + $0x208] sm:$0xff]  ;;  %v8497_v48 = vcombine.high %v2734_v41, %v2738_v42  ;;  %v8496_v53 = vcombine.low %v2734_v41, %v2738_v42 }
 0x185   :  { %v2571_v44 = vld [vmem:[%s13122_s3 + $0x228] sm:$0xff] }
 0x186   :  { %6438 = vmatpush1.bf16.msra.mxu1 %v8440_v58  ;;  %v8331_v49 = vcombine.high %v2567_v43, %v2571_v44  ;;  %v2742_v58 = vld [vmem:[%s13122_s3 + $0x780] sm:$0xff]  ;;  %v8330_v54 = vcombine.low %v2567_v43, %v2571_v44  ;;  %v2615_v41 = vld [vmem:[%s13122_s3 + $0x388] sm:$0xff]  ;;  %v8370_v44 = vcombine.low %v2607_v33, %v2611_v34 }
 0x187   :  { %6592 = vmatpush1.bf16.msra.mxu0 %v8274_v50  ;;  %6439 = vmatprep.subr.bf16.mxu1 %v8449_v51  ;;  %v2746_v50 = vld [vmem:[%s13122_s3 + $0x7a0] sm:$0xff]  ;;  %v2575_v51 = vld [vmem:[%s13122_s3 + $0x248] sm:$0xff] }
 0x188   :  { %6593 = vmatprep.subr.bf16.mxu0 %v8283_v52  ;;  %v2579_v52 = vld [vmem:[%s13122_s3 + $0x268] sm:$0xff]  ;;  %v8505_v17 = vcombine.high %v2742_v58, %v2746_v50  ;;  %v9690_v55 = vpop.eup %9689  ;;  %v8504_v3 = vcombine.low %v2742_v58, %v2746_v50 }
 0x189   :  { %v2474_v4 = vadd.f32 1.0, %v9690_v55  ;;  %v8338_v6 = vcombine.low %v2575_v51, %v2579_v52  ;;  %v2619_v42 = vld [vmem:[%s13122_s3 + $0x3a8] sm:$0xff]  ;;  %v2802_v55 = vld [vmem:[%s13122_s3 + $0x960] sm:$0xff] }
 0x18a   :  { %6440 = vmatpush1.bf16.msra.mxu1 %v8448_v57  ;;  %v8339_v57 = vcombine.high %v2575_v51, %v2579_v52  ;;  %v2623_v58 = vld [vmem:[%s13122_s3 + $0x3c8] sm:$0xff]  ;;  %v8378_v52 = vcombine.low %v2615_v41, %v2619_v42 }
 0x18b   :  { %6594 = vmatpush1.bf16.msra.mxu0 %v8282_v59  ;;  %6441 = vmatprep.subr.bf16.mxu1 %v8457_v60  ;;  %v2750_v59 = vld [vmem:[%s13122_s3 + $0x7c0] sm:$0xff]  ;;  %v2627_v50 = vld [vmem:[%s13122_s3 + $0x3e8] sm:$0xff] }
 0x18c   :  { %6595 = vmatprep.subr.bf16.mxu0 %v8291_v63  ;;  %v2754_v60 = vld [vmem:[%s13122_s3 + $0x7e0] sm:$0xff]  ;;  %v2583_v63 = vld [vmem:[%s13122_s3 + $0x288] sm:$0xff] }
 0x18d   :  { %v8513_v61 = vcombine.high %v2750_v59, %v2754_v60  ;;  %v8512_v15 = vcombine.low %v2750_v59, %v2754_v60  ;;  %v2635_v59 = vld [vmem:[%s13122_s3 + $0x428] sm:$0xff] }
 0x18e   :  { %6442 = vmatpush1.bf16.msra.mxu1 %v8456_v62  ;;  %v8347_v62 = vcombine.high %v2583_v63, %v2587_v1 }
 0x18f   :  { %6596 = vmatpush1.bf16.msra.mxu0 %v8290_v7  ;;  %6443 = vmatprep.subr.bf16.mxu1 %v8465_v12  ;;  %v2758_v7 = vld [vmem:[%s13122_s3 + $0x800] sm:$0xff] }
 0x190   :  { %6597 = vmatprep.subr.bf16.mxu0 %v8299_v16  ;;  %v2762_v12 = vld [vmem:[%s13122_s3 + $0x820] sm:$0xff]  ;;  %v2444_v16 = vmul.f32 0.5, %v11027_v19 }
 0x191   :  { %v2766_v19 = vld [vmem:[%s13122_s3 + $0x840] sm:$0xff]  ;;  %v8520_v24 = vcombine.low %v2758_v7, %v2762_v12 }
 0x192   :  { %6444 = vmatpush1.bf16.msra.mxu1 %v8464_v20  ;;  %v2484_v18 = vmul.f32 %v2474_v4, %v2444_v16  ;;  %v8346_v20 = vcombine.low %v2583_v63, %v2587_v1  ;;  %v8386_v63 = vcombine.low %v2623_v58, %v2627_v50  ;;  %v2806_v4 = vld [vmem:[%s13122_s3 + $0x980] sm:$0xff] }
 0x193   :  { %6598 = vmatpush1.bf16.msra.mxu0 %v8298_v21  ;;  %6445 = vmatprep.subr.bf16.mxu1 %v8473_v22  ;;  %v8521_v21 = vcombine.high %v2758_v7, %v2762_v12  ;;  %v8355_v22 = vcombine.high %v2591_v8, %v2595_v10  ;;  %v2814_v10 = vld [vmem:[%s13122_s3 + $0x9c0] sm:$0xff] }
 0x194   :  { %6599 = vmatprep.subr.bf16.mxu0 %v8307_v23  ;;  %v2770_v23 = vld [vmem:[%s13122_s3 + $0x860] sm:$0xff]  ;;  %v11115_v27 = vpack.c.bf16 %v2484_v18, %v2484_v18  ;;  %v2647_v18 = vld [vmem:[%s13122_s3 + $0x488] sm:$0xff] }
 0x195   :  { %v8528_v35 = vcombine.low %v2766_v19, %v2770_v23 }
 0x196   :  { %6446 = vmatpush1.bf16.msra.mxu1 %v8472_v29  ;;  %v8529_v29 = vcombine.high %v2766_v19, %v2770_v23 }
 0x197   :  { %6600 = vmatpush1.bf16.msra.mxu0 %v8306_v30  ;;  %6447 = vmatprep.subr.bf16.mxu1 %v8481_v31  ;;  %v8363_v30 = vcombine.high %v2599_v25, %v2603_v26  ;;  %v2774_v31 = vld [vmem:[%s13122_s3 + $0x880] sm:$0xff] }
 0x198   :  { %6601 = vmatprep.subr.bf16.mxu0 %v8315_v32  ;;  %v2778_v32 = vld [vmem:[%s13122_s3 + $0x8a0] sm:$0xff] }
 0x199   :  { %v8536_v43 = vcombine.low %v2774_v31, %v2778_v32  ;;  %v2822_v25 = vld [vmem:[%s13122_s3 + $0xa00] sm:$0xff] }
 0x19a   :  { %6448 = vmatpush1.bf16.msra.mxu1 %v8480_v37  ;;  %v8537_v37 = vcombine.high %v2774_v31, %v2778_v32  ;;  %v2826_v26 = vld [vmem:[%s13122_s3 + $0xa20] sm:$0xff] }
 0x19b   :  { %6602 = vmatpush1.bf16.msra.mxu0 %v8314_v38  ;;  %6449 = vmatprep.subr.bf16.mxu1 %v8489_v39  ;;  %v8371_v38 = vcombine.high %v2607_v33, %v2611_v34  ;;  %v2782_v39 = vld [vmem:[%s13122_s3 + $0x8c0] sm:$0xff]  ;;  %v8585_v31 = vcombine.high %v2822_v25, %v2826_v26 }
 0x19c   :  { %6603 = vmatprep.subr.bf16.mxu0 %v8323_v40  ;;  %v2786_v40 = vld [vmem:[%s13122_s3 + $0x8e0] sm:$0xff] }
 0x19d   :  { %v8544_v51 = vcombine.low %v2782_v39, %v2786_v40  ;;  %v2830_v33 = vld [vmem:[%s13122_s3 + $0xa40] sm:$0xff] }
 0x19e   :  { %6450 = vmatpush1.bf16.msra.mxu1 %v8488_v46  ;;  %v8545_v46 = vcombine.high %v2782_v39, %v2786_v40  ;;  %v2834_v34 = vld [vmem:[%s13122_s3 + $0xa60] sm:$0xff] }
 0x19f   :  { %6604 = vmatpush1.bf16.msra.mxu0 %v8322_v47  ;;  %6451 = vmatprep.subr.bf16.mxu1 %v8497_v48  ;;  %v8379_v47 = vcombine.high %v2615_v41, %v2619_v42  ;;  %v2790_v48 = vld [vmem:[%s13122_s3 + $0x900] sm:$0xff]  ;;  %v8593_v39 = vcombine.high %v2830_v33, %v2834_v34 }
 0x1a0   :  { %6605 = vmatprep.subr.bf16.mxu0 %v8331_v49  ;;  %v2794_v49 = vld [vmem:[%s13122_s3 + $0x920] sm:$0xff] }
 0x1a1   :  { %v8552_v60 = vcombine.low %v2790_v48, %v2794_v49  ;;  %v2838_v41 = vld [vmem:[%s13122_s3 + $0xa80] sm:$0xff] }
 0x1a2   :  { %6452 = vmatpush1.bf16.msra.mxu1 %v8496_v53  ;;  %v8553_v53 = vcombine.high %v2790_v48, %v2794_v49  ;;  %v2842_v42 = vld [vmem:[%s13122_s3 + $0xaa0] sm:$0xff]  ;;  %v375_v48 = vsub.s32 5, %v9913_v45  ;;  %v383_v49 = vsub.s32 7, %v9913_v45 }
 0x1a3   :  { %6606 = vmatpush1.bf16.msra.mxu0 %v8330_v54  ;;  %6453 = vmatprep.subr.bf16.mxu1 %v8505_v17  ;;  %v8387_v54 = vcombine.high %v2623_v58, %v2627_v50  ;;  %v2798_v17 = vld [vmem:[%s13122_s3 + $0x940] sm:$0xff]  ;;  %v8601_v50 = vcombine.high %v2838_v41, %v2842_v42 }
 0x1a4   :  { %6607 = vmatprep.subr.bf16.mxu0 %v8339_v57  ;;  %v2631_v57 = vld [vmem:[%s13122_s3 + $0x408] sm:$0xff]  ;;  %v8561_v1 = vcombine.high %v2798_v17, %v2802_v55  ;;  %v8560_v7 = vcombine.low %v2798_v17, %v2802_v55 }
 0x1a5   :  { %v8394_v12 = vcombine.low %v2631_v57, %v2635_v59  ;;  %v2679_v17 = vld [vmem:[%s13122_s3 + $0x588] sm:$0xff] }
 0x1a6   :  { %6454 = vmatpush1.bf16.msra.mxu1 %v8504_v3  ;;  %v8395_v3 = vcombine.high %v2631_v57, %v2635_v59  ;;  %v2683_v55 = vld [vmem:[%s13122_s3 + $0x5a8] sm:$0xff]  ;;  %v8600_v57 = vcombine.low %v2838_v41, %v2842_v42  ;;  %v376_v59 = vrot.slane %v10832_v11, %v375_v48 }
 0x1a7   :  { %6608 = vmatpush1.bf16.msra.mxu0 %v8338_v6  ;;  %6455 = vmatprep.subr.bf16.mxu1 %v8513_v61  ;;  %v2810_v6 = vld [vmem:[%s13122_s3 + $0x9a0] sm:$0xff]  ;;  %v2639_v61 = vld [vmem:[%s13122_s3 + $0x448] sm:$0xff] }
 0x1a8   :  { %6609 = vmatprep.subr.bf16.mxu0 %v8347_v62  ;;  %v2643_v62 = vld [vmem:[%s13122_s3 + $0x468] sm:$0xff]  ;;  %v8569_v16 = vcombine.high %v2806_v4, %v2810_v6 }
 0x1a9   :  { %v8403_v8 = vcombine.high %v2639_v61, %v2643_v62  ;;  %v2707_v41 = vld [vmem:[%s13122_s3 + $0x668] sm:$0xff] }
 0x1aa   :  { %6456 = vmatpush1.bf16.msra.mxu1 %v8512_v15  ;;  %v2818_v15 = vld [vmem:[%s13122_s3 + $0x9e0] sm:$0xff] }
 0x1ab   :  { %6610 = vmatpush1.bf16.msra.mxu0 %v8346_v20  ;;  %6466 = vmatprep.subr.bf16.mxu1 %v8521_v21  ;;  %v2651_v20 = vld [vmem:[%s13122_s3 + $0x4a8] sm:$0xff]  ;;  %v8568_v21 = vcombine.low %v2806_v4, %v2810_v6  ;;  %v8577_v19 = vcombine.high %v2814_v10, %v2818_v15  ;;  %v8443_v6 = vcombine.high %v2679_v17, %v2683_v55 }
 0x1ac   :  { %6611 = vmatprep.subr.bf16.mxu0 %v8355_v22  ;;  %v8402_v22 = vcombine.low %v2639_v61, %v2643_v62  ;;  %v8411_v23 = vcombine.high %v2647_v18, %v2651_v20  ;;  %v2854_v61 = vld [vmem:[%s13122_s3 + $0xb00] sm:$0xff] }
 0x1ad   :  { %6458 = vmatmul.mubr.bf16.vlgmr.msra.gmra.mrb[8].mxu1 %v11115_v27  ;;  %v2858_v62 = vld [vmem:[%s13122_s3 + $0xb20] sm:$0xff] }
 0x1ae   :  { %6467 = vmatpush1.bf16.msra.mxu1 %v8520_v24  ;;  %v2655_v24 = vld [vmem:[%s13122_s3 + $0x4c8] sm:$0xff] }
 0x1af   :  { %6612 = vmatpush1.bf16.msra.mxu0 %v8354_v28  ;;  %6468 = vmatprep.subr.bf16.mxu1 %v8529_v29  ;;  %v2659_v28 = vld [vmem:[%s13122_s3 + $0x4e8] sm:$0xff]  ;;  %v8576_v29 = vcombine.low %v2814_v10, %v2818_v15 }
 0x1b0   :  { %6613 = vmatprep.subr.bf16.mxu0 %v8363_v30  ;;  %v8410_v30 = vcombine.low %v2647_v18, %v2651_v20  ;;  %v8419_v32 = vcombine.high %v2655_v24, %v2659_v28 }
 0x1b2   :  { %6469 = vmatpush1.bf16.msra.mxu1 %v8528_v35  ;;  %v2663_v35 = vld [vmem:[%s13122_s3 + $0x508] sm:$0xff] }
 0x1b3   :  { %6614 = vmatpush1.bf16.msra.mxu0 %v8362_v36  ;;  %6470 = vmatprep.subr.bf16.mxu1 %v8537_v37  ;;  %v2667_v36 = vld [vmem:[%s13122_s3 + $0x528] sm:$0xff]  ;;  %v8584_v37 = vcombine.low %v2822_v25, %v2826_v26 }
 0x1b4   :  { %6615 = vmatprep.subr.bf16.mxu0 %v8371_v38  ;;  %v8418_v38 = vcombine.low %v2655_v24, %v2659_v28  ;;  %v8427_v40 = vcombine.high %v2663_v35, %v2667_v36  ;;  %v8426_v58 = vcombine.low %v2663_v35, %v2667_v36  ;;  %v2862_v28 = vld [vmem:[%s13122_s3 + $0xb40] sm:$0xff] }
 0x1b6   :  { %6471 = vmatpush1.bf16.msra.mxu1 %v8536_v43  ;;  %v371_v43 = vsub.s32 4, %v9913_v45 }
 0x1b7   :  { %6616 = vmatpush1.bf16.msra.mxu0 %v8370_v44  ;;  %6472 = vmatprep.subr.bf16.mxu1 %v8545_v46  ;;  %v2671_v44 = vld [vmem:[%s13122_s3 + $0x548] sm:$0xff] }
 0x1b8   :  { %6617 = vmatprep.subr.bf16.mxu0 %v8379_v47  ;;  %v2675_v46 = vld [vmem:[%s13122_s3 + $0x568] sm:$0xff]  ;;  %v8592_v47 = vcombine.low %v2830_v33, %v2834_v34  ;;  %v8616_v34 = vcombine.low %v2854_v61, %v2858_v62 }
 0x1b9   :  { %v2699_v33 = vld [vmem:[%s13122_s3 + $0x628] sm:$0xff] }
 0x1ba   :  { %6473 = vmatpush1.bf16.msra.mxu1 %v8544_v51  ;;  %v8435_v51 = vcombine.high %v2671_v44, %v2675_v46 }
 0x1bb   :  { %6618 = vmatpush1.bf16.msra.mxu0 %v8378_v52  ;;  %6474 = vmatprep.subr.bf16.mxu1 %v8553_v53  ;;  %v2846_v52 = vld [vmem:[%s13122_s3 + $0xac0] sm:$0xff] }
 0x1bc   :  { %6619 = vmatprep.subr.bf16.mxu0 %v8387_v54  ;;  %v2850_v53 = vld [vmem:[%s13122_s3 + $0xae0] sm:$0xff]  ;;  %v372_v54 = vrot.slane %v10832_v11, %v371_v43 }
 0x1bd   :  { %v8608_v20 = vcombine.low %v2846_v52, %v2850_v53 }
 0x1be   :  { %6475 = vmatpush1.bf16.msra.mxu1 %v8552_v60  ;;  %v384_v60 = vrot.slane %v10832_v11, %v383_v49 }
 0x1bf   :  { %6620 = vmatpush1.bf16.msra.mxu0 %v8386_v63  ;;  %6476 = vmatprep.subr.bf16.mxu1 %v8561_v1  ;;  %v8434_v63 = vcombine.low %v2671_v44, %v2675_v46  ;;  %v8609_v1 = vcombine.high %v2846_v52, %v2850_v53  ;;  %v2715_v52 = vld [vmem:[%s13122_s3 + $0x6a8] sm:$0xff] }
 0x1c0   :  { %6630 = vmatprep.subr.bf16.mxu0 %v8395_v3 }
 0x1c2   :  { %6477 = vmatpush1.bf16.msra.mxu1 %v8560_v7  ;;  %6622 = vmatmul.mubr.bf16.vlgmr.msra.gmra.mrb[12].mxu0 %v10896_v2 }
 0x1c3   :  { %6631 = vmatpush1.bf16.msra.mxu0 %v8394_v12  ;;  %6662 = vmatprep.mubr.bf16.mxu0 %v10901_v5 }
 0x1c4   :  { %6478 = vmatprep.subr.bf16.mxu1 %v8569_v16  ;;  %6632 = vmatprep.subr.bf16.mxu0 %v8403_v8  ;;  %v2687_v16 = vld [vmem:[%s13122_s3 + $0x5c8] sm:$0xff] }
 0x1c5   :  { %v2691_v8 = vld [vmem:[%s13122_s3 + $0x5e8] sm:$0xff] }
 0x1c6   :  { %6479 = vmatpush1.bf16.msra.mxu1 %v8568_v21  ;;  %v8451_v24 = vcombine.high %v2687_v16, %v2691_v8  ;;  %v8450_v35 = vcombine.low %v2687_v16, %v2691_v8 }
 0x1c7   :  { %6633 = vmatpush1.bf16.msra.mxu0 %v8402_v22  ;;  %6480 = vmatprep.subr.bf16.mxu1 %v8577_v19  ;;  %v8442_v19 = vcombine.low %v2679_v17, %v2683_v55 }
 0x1c8   :  { %6634 = vmatprep.subr.bf16.mxu0 %v8411_v23  ;;  %v8617_v23 = vcombine.high %v2854_v61, %v2858_v62  ;;  %v2723_v61 = vld [vmem:[%s13122_s3 + $0x6e8] sm:$0xff] }
 0x1ca   :  { %6481 = vmatpush1.bf16.msra.mxu1 %v8576_v29  ;;  %v2866_v29 = vld [vmem:[%s13122_s3 + $0xb60] sm:$0xff] }
 0x1cb   :  { %6635 = vmatpush1.bf16.msra.mxu0 %v8410_v30  ;;  %6482 = vmatprep.subr.bf16.mxu1 %v8585_v31  ;;  %v8625_v36 = vcombine.high %v2862_v28, %v2866_v29  ;;  %v8624_v42 = vcombine.low %v2862_v28, %v2866_v29 }
 0x1cc   :  { %6636 = vmatprep.subr.bf16.mxu0 %v8419_v32  ;;  %v2695_v32 = vld [vmem:[%s13122_s3 + $0x608] sm:$0xff] }
 0x1cd   :  { %v8458_v44 = vcombine.low %v2695_v32, %v2699_v33 }
 0x1ce   :  { %6483 = vmatpush1.bf16.msra.mxu1 %v8584_v37  ;;  %v8459_v37 = vcombine.high %v2695_v32, %v2699_v33 }
 0x1cf   :  { %6637 = vmatpush1.bf16.msra.mxu0 %v8418_v38  ;;  %6484 = vmatprep.subr.bf16.mxu1 %v8593_v39  ;;  %v2870_v38 = vld [vmem:[%s13122_s3 + $0xb80] sm:$0xff] }
 0x1d0   :  { %6638 = vmatprep.subr.bf16.mxu0 %v8427_v40  ;;  %v2874_v39 = vld [vmem:[%s13122_s3 + $0xba0] sm:$0xff]  ;;  %v2703_v40 = vld [vmem:[%s13122_s3 + $0x648] sm:$0xff] }
 0x1d1   :  { %v8633_v46 = vcombine.high %v2870_v38, %v2874_v39  ;;  %v8632_v53 = vcombine.low %v2870_v38, %v2874_v39  ;;  %v8466_v17 = vcombine.low %v2703_v40, %v2707_v41 }
 0x1d2   :  { %6485 = vmatpush1.bf16.msra.mxu1 %v8592_v47  ;;  %v8467_v47 = vcombine.high %v2703_v40, %v2707_v41 }
 0x1d3   :  { %6639 = vmatpush1.bf16.msra.mxu0 %v8426_v58  ;;  %6486 = vmatprep.subr.bf16.mxu1 %v8601_v50  ;;  %v2878_v58 = vld [vmem:[%s13122_s3 + $0xbc0] sm:$0xff] }
 0x1d4   :  { %6640 = vmatprep.subr.bf16.mxu0 %v8435_v51  ;;  %v2882_v50 = vld [vmem:[%s13122_s3 + $0xbe0] sm:$0xff]  ;;  %v2711_v51 = vld [vmem:[%s13122_s3 + $0x688] sm:$0xff] }
 0x1d5   :  { %v2271_v3 = vpop.f32.mrb[4].mxu0  ;;  %v8641_v55 = vcombine.high %v2878_v58, %v2882_v50  ;;  %v8640_v16 = vcombine.low %v2878_v58, %v2882_v50  ;;  %v8474_v8 = vcombine.low %v2711_v51, %v2715_v52 }
 0x1d6   :  { %v11252_v4 = vpop.f32.mrb[4].mxu1  ;;  %v11260_v7 = vadd.f32 %v2271_v3, %v372_v54  ;;  %v2273_v11 = vpop.f32.mrb[5].mxu0  ;;  %6487 = vmatpush1.bf16.msra.mxu1 %v8600_v57 }
 0x1d7   :  { %v2355_v12 = vpop.f32.mrb[5].mxu1  ;;  %v11268_v10 = vadd.f32 %v2273_v11, %v376_v59  ;;  %v2275_v18 = vpop.f32.mrb[6].mxu0  ;;  %6641 = vmatpush1.bf16.msra.mxu0 %v8434_v63  ;;  %6488 = vmatprep.subr.bf16.mxu1 %v8609_v1  ;;  %v8475_v59 = vcombine.high %v2711_v51, %v2715_v52  ;;  %v2890_v63 = vld [vmem:[%s13122_s3 + $0xc20] sm:$0xff] }
 0x1d8   :  { %v11270_v15 = vadd.f32 %v2355_v12, %v384_v60  ;;  %v2357_v21 = vpop.f32.mrb[6].mxu1  ;;  %v2456_v22 = vmul.f32 0.70710677, %v11260_v7  ;;  %6642 = vmatprep.subr.bf16.mxu0 %v8443_v6  ;;  %v2276_v30 = vpop.f32.mrb[7].mxu0  ;;  %v2886_v60 = vld [vmem:[%s13122_s3 + $0xc00] sm:$0xff]  ;;  %v2446_v3 = vmul.f32 0.5, %v11260_v7 }
 0x1d9   :  { %v2457_v25 = vmul.f32 0.70710677, %v11268_v10  ;;  %v2358_v31 = vpop.f32.mrb[7].mxu1  ;;  %v2719_v6 = vld [vmem:[%s13122_s3 + $0x6c8] sm:$0xff]  ;;  %v2447_v11 = vmul.f32 0.5, %v11268_v10  ;;  %v8649_v7 = vcombine.high %v2886_v60, %v2890_v63  ;;  %v2898_v10 = vld [vmem:[%s13122_s3 + $0xc60] sm:$0xff]  ;;  %v8648_v28 = vcombine.low %v2886_v60, %v2890_v63 }
 0x1da   :  { %v2459_v26 = vmul.f32 0.70710677, %v11270_v15  ;;  %9691 = verf.f32 %v2456_v22  ;;  %6489 = vmatpush1.bf16.msra.mxu1 %v8608_v20  ;;  %v2449_v20 = vmul.f32 0.5, %v11270_v15  ;;  %v2727_v15 = vld [vmem:[%s13122_s3 + $0x708] sm:$0xff]  ;;  %v8482_v30 = vcombine.low %v2719_v6, %v2723_v61 }
 0x1db   :  { %9693 = verf.f32 %v2457_v25  ;;  %6643 = vmatpush1.bf16.msra.mxu0 %v8442_v19  ;;  %6490 = vmatprep.subr.bf16.mxu1 %v8617_v23  ;;  %v8483_v19 = vcombine.high %v2719_v6, %v2723_v61  ;;  %v2894_v23 = vld [vmem:[%s13122_s3 + $0xc40] sm:$0xff]  ;;  %v2759_v6 = vld [vmem:[%s13122_s3 + $0x808] sm:$0xff] }
 0x1dc   :  { %9695 = verf.f32 %v2459_v26  ;;  %6644 = vmatprep.subr.bf16.mxu0 %v8451_v24  ;;  %v2731_v26 = vld [vmem:[%s13122_s3 + $0x728] sm:$0xff]  ;;  %v8657_v31 = vcombine.high %v2894_v23, %v2898_v10  ;;  %v8656_v38 = vcombine.low %v2894_v23, %v2898_v10  ;;  %v2942_v10 = vld [vmem:[%s13122_s3 + $0xdc0] sm:$0xff] }
 0x1dd   :  { %v8491_v33 = vcombine.high %v2727_v15, %v2731_v26  ;;  %v8490_v39 = vcombine.low %v2727_v15, %v2731_v26  ;;  %v2763_v61 = vld [vmem:[%s13122_s3 + $0x828] sm:$0xff] }
 0x1de   :  { %6491 = vmatpush1.bf16.msra.mxu1 %v8616_v34  ;;  %v2902_v34 = vld [vmem:[%s13122_s3 + $0xc80] sm:$0xff]  ;;  %v2775_v15 = vld [vmem:[%s13122_s3 + $0x888] sm:$0xff] }
 0x1df   :  { %6645 = vmatpush1.bf16.msra.mxu0 %v8450_v35  ;;  %6492 = vmatprep.subr.bf16.mxu1 %v8625_v36  ;;  %v2906_v35 = vld [vmem:[%s13122_s3 + $0xca0] sm:$0xff]  ;;  %v2735_v36 = vld [vmem:[%s13122_s3 + $0x748] sm:$0xff] }
 0x1e0   :  { %6646 = vmatprep.subr.bf16.mxu0 %v8459_v37  ;;  %v2739_v37 = vld [vmem:[%s13122_s3 + $0x768] sm:$0xff]  ;;  %v8665_v40 = vcombine.high %v2902_v34, %v2906_v35  ;;  %v8664_v58 = vcombine.low %v2902_v34, %v2906_v35  ;;  %v2950_v34 = vld [vmem:[%s13122_s3 + $0xe00] sm:$0xff] }
 0x1e1   :  { %v8499_v41 = vcombine.high %v2735_v36, %v2739_v37  ;;  %v8498_v50 = vcombine.low %v2735_v36, %v2739_v37  ;;  %v2779_v26 = vld [vmem:[%s13122_s3 + $0x8a8] sm:$0xff]  ;;  %v2954_v35 = vld [vmem:[%s13122_s3 + $0xe20] sm:$0xff] }
 0x1e2   :  { %6493 = vmatpush1.bf16.msra.mxu1 %v8624_v42  ;;  %v2910_v42 = vld [vmem:[%s13122_s3 + $0xcc0] sm:$0xff]  ;;  %v2783_v36 = vld [vmem:[%s13122_s3 + $0x8c8] sm:$0xff] }
 0x1e3   :  { %6647 = vmatpush1.bf16.msra.mxu0 %v8458_v44  ;;  %6494 = vmatprep.subr.bf16.mxu1 %v8633_v46  ;;  %v2914_v44 = vld [vmem:[%s13122_s3 + $0xce0] sm:$0xff]  ;;  %v2743_v46 = vld [vmem:[%s13122_s3 + $0x788] sm:$0xff] }
 0x1e4   :  { %v9692_v54 = vpop.eup %9691  ;;  %6648 = vmatprep.subr.bf16.mxu0 %v8467_v47  ;;  %v2747_v47 = vld [vmem:[%s13122_s3 + $0x7a8] sm:$0xff]  ;;  %v8673_v51 = vcombine.high %v2910_v42, %v2914_v44 }
 0x1e5   :  { %v2476_v57 = vadd.f32 1.0, %v9692_v54  ;;  %v9694_v1 = vpop.eup %9693  ;;  %v8507_v52 = vcombine.high %v2743_v46, %v2747_v47  ;;  %v2922_v54 = vld [vmem:[%s13122_s3 + $0xd20] sm:$0xff]  ;;  %v2787_v37 = vld [vmem:[%s13122_s3 + $0x8e8] sm:$0xff] }
 0x1e6   :  { %v9696_v62 = vpop.eup %9695  ;;  %v2477_v12 = vadd.f32 1.0, %v9694_v1  ;;  %6495 = vmatpush1.bf16.msra.mxu1 %v8632_v53  ;;  %v2918_v53 = vld [vmem:[%s13122_s3 + $0xd00] sm:$0xff] }
 0x1e7   :  { %v2486_v18 = vmul.f32 %v2476_v57, %v2446_v3  ;;  %v2479_v21 = vadd.f32 1.0, %v9696_v62  ;;  %6649 = vmatpush1.bf16.msra.mxu0 %v8466_v17  ;;  %6496 = vmatprep.subr.bf16.mxu1 %v8641_v55  ;;  %v2751_v17 = vld [vmem:[%s13122_s3 + $0x7c8] sm:$0xff]  ;;  %v8672_v57 = vcombine.low %v2910_v42, %v2914_v44  ;;  %v8681_v60 = vcombine.high %v2918_v53, %v2922_v54  ;;  %v2926_v1 = vld [vmem:[%s13122_s3 + $0xd40] sm:$0xff] }
 0x1e8   :  { %v2487_v22 = vmul.f32 %v2477_v12, %v2447_v11  ;;  %6650 = vmatprep.subr.bf16.mxu0 %v8475_v59  ;;  %v2755_v55 = vld [vmem:[%s13122_s3 + $0x7e8] sm:$0xff]  ;;  %v8506_v59 = vcombine.low %v2743_v46, %v2747_v47  ;;  %v2930_v3 = vld [vmem:[%s13122_s3 + $0xd60] sm:$0xff]  ;;  %v8680_v62 = vcombine.low %v2918_v53, %v2922_v54  ;;  %v8547_v42 = vcombine.high %v2783_v36, %v2787_v37 }
 0x1e9   :  { %v2489_v25 = vmul.f32 %v2479_v21, %v2449_v20  ;;  %v11340_v29 = vpack.c.bf16 %v2486_v18, %v2486_v18  ;;  %v8515_v63 = vcombine.high %v2751_v17, %v2755_v55  ;;  %v8514_v11 = vcombine.low %v2751_v17, %v2755_v55  ;;  %v2938_v18 = vld [vmem:[%s13122_s3 + $0xda0] sm:$0xff]  ;;  %v2767_v20 = vld [vmem:[%s13122_s3 + $0x848] sm:$0xff] }
 0x1ea   :  { %v11338_v24 = vpack.c.bf16 %v2487_v22, %v2487_v22  ;;  %6497 = vmatpush1.bf16.msra.mxu1 %v8640_v16  ;;  %v8689_v12 = vcombine.high %v2926_v1, %v2930_v3  ;;  %v8523_v16 = vcombine.high %v2759_v6, %v2763_v61  ;;  %v2771_v21 = vld [vmem:[%s13122_s3 + $0x868] sm:$0xff]  ;;  %v8522_v22 = vcombine.low %v2759_v6, %v2763_v61  ;;  %v2958_v44 = vld [vmem:[%s13122_s3 + $0xe40] sm:$0xff] }
 0x1eb   :  { %6651 = vmatpush1.bf16.msra.mxu0 %v8474_v8  ;;  %6507 = vmatprep.subr.bf16.mxu1 %v8649_v7  ;;  %v11342_v32 = vpack.c.bf16 %v2489_v25, %v2489_v25  ;;  %v2934_v8 = vld [vmem:[%s13122_s3 + $0xd80] sm:$0xff]  ;;  %v8688_v7 = vcombine.low %v2926_v1, %v2930_v3  ;;  %v8531_v23 = vcombine.high %v2767_v20, %v2771_v21  ;;  %v2791_v47 = vld [vmem:[%s13122_s3 + $0x908] sm:$0xff] }
 0x1ec   :  { %6498 = vmatprep.mubr.bf16.mxu1 %v11338_v24  ;;  %6652 = vmatprep.subr.bf16.mxu0 %v8483_v19  ;;  %v8697_v19 = vcombine.high %v2934_v8, %v2938_v18  ;;  %v2946_v25 = vld [vmem:[%s13122_s3 + $0xde0] sm:$0xff]  ;;  %v8546_v53 = vcombine.low %v2783_v36, %v2787_v37 }
 0x1ed   :  { %6499 = vmatmul.mubr.bf16.vlgmr.msra.gmra.mrb[8].mxu1 %v11340_v29  ;;  %v2962_v46 = vld [vmem:[%s13122_s3 + $0xe60] sm:$0xff] }
 0x1ee   :  { %6508 = vmatpush1.bf16.msra.mxu1 %v8648_v28  ;;  %6539 = vmatprep.mubr.bf16.mxu1 %v11342_v32  ;;  %v8696_v28 = vcombine.low %v2934_v8, %v2938_v18  ;;  %v8721_v54 = vcombine.high %v2958_v44, %v2962_v46  ;;  %v2966_v55 = vld [vmem:[%s13122_s3 + $0xe80] sm:$0xff]  ;;  %v8720_v1 = vcombine.low %v2958_v44, %v2962_v46 }
 0x1ef   :  { %6653 = vmatpush1.bf16.msra.mxu0 %v8482_v30  ;;  %6509 = vmatprep.subr.bf16.mxu1 %v8657_v31  ;;  %v8530_v30 = vcombine.low %v2767_v20, %v2771_v21  ;;  %v8705_v31 = vcombine.high %v2942_v10, %v2946_v25 }
 0x1f0   :  { %6654 = vmatprep.subr.bf16.mxu0 %v8491_v33  ;;  %v8539_v33 = vcombine.high %v2775_v15, %v2779_v26 }
 0x1f2   :  { %6510 = vmatpush1.bf16.msra.mxu1 %v8656_v38  ;;  %v379_v38 = vsub.s32 6, %v9913_v45 }
 0x1f3   :  { %6655 = vmatpush1.bf16.msra.mxu0 %v8490_v39  ;;  %6511 = vmatprep.subr.bf16.mxu1 %v8665_v40  ;;  %v8704_v39 = vcombine.low %v2942_v10, %v2946_v25  ;;  %v8538_v40 = vcombine.low %v2775_v15, %v2779_v26 }
 0x1f4   :  { %6656 = vmatprep.subr.bf16.mxu0 %v8499_v41  ;;  %v8713_v41 = vcombine.high %v2950_v34, %v2954_v35 }
 0x1f6   :  { %6512 = vmatpush1.bf16.msra.mxu1 %v8664_v58  ;;  %v2795_v58 = vld [vmem:[%s13122_s3 + $0x928] sm:$0xff] }
 0x1f7   :  { %6657 = vmatpush1.bf16.msra.mxu0 %v8498_v50  ;;  %6513 = vmatprep.subr.bf16.mxu1 %v8673_v51  ;;  %v9719_v50 = vld [vmem:[%s13121_s2] sm:$0xff]  ;;  %v8555_v17 = vcombine.high %v2791_v47, %v2795_v58  ;;  %v8554_v3 = vcombine.low %v2791_v47, %v2795_v58 }
 0x1f8   :  { %6658 = vmatprep.subr.bf16.mxu0 %v8507_v52  ;;  %v380_v51 = vrot.slane %v9719_v50, %v379_v38  ;;  %v8712_v52 = vcombine.low %v2950_v34, %v2954_v35 }
 0x1fa   :  { %6514 = vmatpush1.bf16.msra.mxu1 %v8672_v57  ;;  %v2970_v57 = vld [vmem:[%s13122_s3 + $0xea0] sm:$0xff] }
 0x1fb   :  { %6659 = vmatpush1.bf16.msra.mxu0 %v8506_v59  ;;  %6515 = vmatprep.subr.bf16.mxu1 %v8681_v60  ;;  %v2799_v59 = vld [vmem:[%s13122_s3 + $0x948] sm:$0xff]  ;;  %v8729_v6 = vcombine.high %v2966_v55, %v2970_v57  ;;  %v8728_v8 = vcombine.low %v2966_v55, %v2970_v57 }
 0x1fc   :  { %6660 = vmatprep.subr.bf16.mxu0 %v8515_v63  ;;  %v2803_v60 = vld [vmem:[%s13122_s3 + $0x968] sm:$0xff]  ;;  %v11464_v63 = vadd.f32 %v11252_v4, %v380_v51  ;;  %v3006_v51 = vld [vmem:[%s13122_s3 + $0xfc0] sm:$0xff] }
 0x1fd   :  { %v8563_v61 = vcombine.high %v2799_v59, %v2803_v60  ;;  %v2807_v4 = vld [vmem:[%s13122_s3 + $0x988] sm:$0xff]  ;;  %v8562_v18 = vcombine.low %v2799_v59, %v2803_v60 }
 0x1fe   :  { %6516 = vmatpush1.bf16.msra.mxu1 %v8680_v62  ;;  %v2974_v62 = vld [vmem:[%s13122_s3 + $0xec0] sm:$0xff] }
 0x1ff   :  { %6661 = vmatpush1.bf16.msra.mxu0 %v8514_v11  ;;  %6517 = vmatprep.subr.bf16.mxu1 %v8689_v12  ;;  %v2978_v11 = vld [vmem:[%s13122_s3 + $0xee0] sm:$0xff]  ;;  %v2811_v12 = vld [vmem:[%s13122_s3 + $0x9a8] sm:$0xff] }
 0x200   :  { %6671 = vmatprep.subr.bf16.mxu0 %v8523_v16  ;;  %v2458_v16 = vmul.f32 0.70710677, %v11464_v63  ;;  %v8737_v20 = vcombine.high %v2974_v62, %v2978_v11  ;;  %v8571_v21 = vcombine.high %v2807_v4, %v2811_v12  ;;  %v8736_v10 = vcombine.low %v2974_v62, %v2978_v11  ;;  %v2851_v62 = vld [vmem:[%s13122_s3 + $0xae8] sm:$0xff] }
 0x201   :  { %v8570_v25 = vcombine.low %v2807_v4, %v2811_v12 }
 0x202   :  { %6518 = vmatpush1.bf16.msra.mxu1 %v8688_v7  ;;  %6663 = vmatmul.mubr.bf16.vlgmr.msra.gmra.mrb[12].mxu0 %v11115_v27  ;;  %v2982_v7 = vld [vmem:[%s13122_s3 + $0xf00] sm:$0xff]  ;;  %9697 = verf.f32 %v2458_v16 }
 0x203   :  { %6672 = vmatpush1.bf16.msra.mxu0 %v8522_v22  ;;  %6703 = vmatprep.mubr.bf16.mxu0 %v11338_v24  ;;  %v2986_v22 = vld [vmem:[%s13122_s3 + $0xf20] sm:$0xff] }
 0x204   :  { %6519 = vmatprep.subr.bf16.mxu1 %v8697_v19  ;;  %6673 = vmatprep.subr.bf16.mxu0 %v8531_v23  ;;  %v2815_v19 = vld [vmem:[%s13122_s3 + $0x9c8] sm:$0xff]  ;;  %v8745_v15 = vcombine.high %v2982_v7, %v2986_v22  ;;  %v8744_v34 = vcombine.low %v2982_v7, %v2986_v22 }
 0x205   :  { %v2819_v23 = vld [vmem:[%s13122_s3 + $0x9e8] sm:$0xff] }
 0x206   :  { %6520 = vmatpush1.bf16.msra.mxu1 %v8696_v28  ;;  %v8579_v26 = vcombine.high %v2815_v19, %v2819_v23  ;;  %v2990_v28 = vld [vmem:[%s13122_s3 + $0xf40] sm:$0xff]  ;;  %v8578_v35 = vcombine.low %v2815_v19, %v2819_v23 }
 0x207   :  { %6674 = vmatpush1.bf16.msra.mxu0 %v8530_v30  ;;  %6521 = vmatprep.subr.bf16.mxu1 %v8705_v31  ;;  %v2994_v30 = vld [vmem:[%s13122_s3 + $0xf60] sm:$0xff]  ;;  %v2823_v31 = vld [vmem:[%s13122_s3 + $0xa08] sm:$0xff] }
 0x208   :  { %6675 = vmatprep.subr.bf16.mxu0 %v8539_v33  ;;  %v2827_v33 = vld [vmem:[%s13122_s3 + $0xa28] sm:$0xff]  ;;  %v8753_v36 = vcombine.high %v2990_v28, %v2994_v30  ;;  %v8752_v44 = vcombine.low %v2990_v28, %v2994_v30 }
 0x209   :  { %v8587_v37 = vcombine.high %v2823_v31, %v2827_v33  ;;  %v8586_v46 = vcombine.low %v2823_v31, %v2827_v33  ;;  %v2867_v28 = vld [vmem:[%s13122_s3 + $0xb68] sm:$0xff] }
 0x20a   :  { %6522 = vmatpush1.bf16.msra.mxu1 %v8704_v39  ;;  %v2998_v39 = vld [vmem:[%s13122_s3 + $0xf80] sm:$0xff] }
 0x20b   :  { %6676 = vmatpush1.bf16.msra.mxu0 %v8538_v40  ;;  %6523 = vmatprep.subr.bf16.mxu1 %v8713_v41  ;;  %v3002_v40 = vld [vmem:[%s13122_s3 + $0xfa0] sm:$0xff]  ;;  %v2831_v41 = vld [vmem:[%s13122_s3 + $0xa48] sm:$0xff] }
 0x20c   :  { %6677 = vmatprep.subr.bf16.mxu0 %v8547_v42  ;;  %v2835_v42 = vld [vmem:[%s13122_s3 + $0xa68] sm:$0xff]  ;;  %v8761_v47 = vcombine.high %v2998_v39, %v3002_v40  ;;  %v9698_v58 = vpop.eup %9697 }
 0x20d   :  { %v8595_v50 = vcombine.high %v2831_v41, %v2835_v42  ;;  %v2478_v55 = vadd.f32 1.0, %v9698_v58  ;;  %v8594_v57 = vcombine.low %v2831_v41, %v2835_v42  ;;  %v2879_v58 = vld [vmem:[%s13122_s3 + $0xbc8] sm:$0xff] }
 0x20e   :  { %6524 = vmatpush1.bf16.msra.mxu1 %v8712_v52  ;;  %v3010_v52 = vld [vmem:[%s13122_s3 + $0xfe0] sm:$0xff] }
 0x20f   :  { %6678 = vmatpush1.bf16.msra.mxu0 %v8546_v53  ;;  %6525 = vmatprep.subr.bf16.mxu1 %v8721_v54  ;;  %v2839_v53 = vld [vmem:[%s13122_s3 + $0xa88] sm:$0xff]  ;;  %v8769_v59 = vcombine.high %v3006_v51, %v3010_v52  ;;  %v8768_v11 = vcombine.low %v3006_v51, %v3010_v52 }
 0x210   :  { %6679 = vmatprep.subr.bf16.mxu0 %v8555_v17  ;;  %v2843_v54 = vld [vmem:[%s13122_s3 + $0xaa8] sm:$0xff]  ;;  %v8760_v17 = vcombine.low %v2998_v39, %v3002_v40 }
 0x211   :  { %v8603_v60 = vcombine.high %v2839_v53, %v2843_v54  ;;  %v8602_v12 = vcombine.low %v2839_v53, %v2843_v54  ;;  %v2875_v39 = vld [vmem:[%s13122_s3 + $0xba8] sm:$0xff] }
 0x212   :  { %6526 = vmatpush1.bf16.msra.mxu1 %v8720_v1  ;;  %v3014_v1 = vld [vmem:[%s13122_s3 + $0x1000] sm:$0xff] }
 0x213   :  { %6680 = vmatpush1.bf16.msra.mxu0 %v8554_v3  ;;  %6527 = vmatprep.subr.bf16.mxu1 %v8729_v6  ;;  %v3018_v3 = vld [vmem:[%s13122_s3 + $0x1020] sm:$0xff]  ;;  %v2448_v6 = vmul.f32 0.5, %v11464_v63 }
 0x214   :  { %6681 = vmatprep.subr.bf16.mxu0 %v8563_v61  ;;  %v2847_v61 = vld [vmem:[%s13122_s3 + $0xac8] sm:$0xff]  ;;  %v8777_v16 = vcombine.high %v3014_v1, %v3018_v3  ;;  %v3022_v63 = vld [vmem:[%s13122_s3 + $0x1040] sm:$0xff]  ;;  %v8776_v7 = vcombine.low %v3014_v1, %v3018_v3 }
 0x215   :  { %v2488_v4 = vmul.f32 %v2478_v55, %v2448_v6  ;;  %v8610_v19 = vcombine.low %v2847_v61, %v2851_v62  ;;  %v3058_v55 = vld [vmem:[%s13122_s3 + $0x1160] sm:$0xff] }
 0x216   :  { %6528 = vmatpush1.bf16.msra.mxu1 %v8728_v8  ;;  %v8611_v8 = vcombine.high %v2847_v61, %v2851_v62  ;;  %v3062_v61 = vld [vmem:[%s13122_s3 + $0x1180] sm:$0xff] }
 0x217   :  { %6682 = vmatpush1.bf16.msra.mxu0 %v8562_v18  ;;  %6529 = vmatprep.subr.bf16.mxu1 %v8737_v20  ;;  %v3026_v18 = vld [vmem:[%s13122_s3 + $0x1060] sm:$0xff]  ;;  %v2855_v20 = vld [vmem:[%s13122_s3 + $0xb08] sm:$0xff]  ;;  %v11552_v22 = vpack.c.bf16 %v2488_v4, %v2488_v4 }
 0x218   :  { %6683 = vmatprep.subr.bf16.mxu0 %v8571_v21  ;;  %v2859_v21 = vld [vmem:[%s13122_s3 + $0xb28] sm:$0xff]  ;;  %v8785_v23 = vcombine.high %v3022_v63, %v3026_v18  ;;  %v8784_v30 = vcombine.low %v3022_v63, %v3026_v18  ;;  %v3066_v62 = vld [vmem:[%s13122_s3 + $0x11a0] sm:$0xff] }
 0x219   :  { %v8618_v31 = vcombine.low %v2855_v20, %v2859_v21  ;;  %v2899_v4 = vld [vmem:[%s13122_s3 + $0xc68] sm:$0xff]  ;;  %v3070_v18 = vld [vmem:[%s13122_s3 + $0x11c0] sm:$0xff] }
 0x21a   :  { %6530 = vmatpush1.bf16.msra.mxu1 %v8736_v10  ;;  %v8619_v10 = vcombine.high %v2855_v20, %v2859_v21  ;;  %v3074_v20 = vld [vmem:[%s13122_s3 + $0x11e0] sm:$0xff]  ;;  %v2903_v21 = vld [vmem:[%s13122_s3 + $0xc88] sm:$0xff] }
 0x21b   :  { %6684 = vmatpush1.bf16.msra.mxu0 %v8570_v25  ;;  %6531 = vmatprep.subr.bf16.mxu1 %v8745_v15  ;;  %v3030_v25 = vld [vmem:[%s13122_s3 + $0x1080] sm:$0xff] }
 0x21c   :  { %6685 = vmatprep.subr.bf16.mxu0 %v8579_v26  ;;  %v3034_v15 = vld [vmem:[%s13122_s3 + $0x10a0] sm:$0xff]  ;;  %v2863_v26 = vld [vmem:[%s13122_s3 + $0xb48] sm:$0xff] }
 0x21d   :  { %v8793_v33 = vcombine.high %v3030_v25, %v3034_v15  ;;  %v8792_v40 = vcombine.low %v3030_v25, %v3034_v15  ;;  %v8626_v41 = vcombine.low %v2863_v26, %v2867_v28  ;;  %v3078_v15 = vld [vmem:[%s13122_s3 + $0x1200] sm:$0xff] }
 0x21e   :  { %6532 = vmatpush1.bf16.msra.mxu1 %v8744_v34  ;;  %v8627_v34 = vcombine.high %v2863_v26, %v2867_v28  ;;  %v3082_v26 = vld [vmem:[%s13122_s3 + $0x1220] sm:$0xff]  ;;  %v2911_v28 = vld [vmem:[%s13122_s3 + $0xcc8] sm:$0xff] }
 0x21f   :  { %6686 = vmatpush1.bf16.msra.mxu0 %v8578_v35  ;;  %6533 = vmatprep.subr.bf16.mxu1 %v8753_v36  ;;  %v3038_v35 = vld [vmem:[%s13122_s3 + $0x10c0] sm:$0xff] }
 0x220   :  { %6687 = vmatprep.subr.bf16.mxu0 %v8587_v37  ;;  %v3042_v36 = vld [vmem:[%s13122_s3 + $0x10e0] sm:$0xff]  ;;  %v2871_v37 = vld [vmem:[%s13122_s3 + $0xb88] sm:$0xff] }
 0x221   :  { %v8801_v42 = vcombine.high %v3038_v35, %v3042_v36  ;;  %v8800_v51 = vcombine.low %v3038_v35, %v3042_v36  ;;  %v8634_v52 = vcombine.low %v2871_v37, %v2875_v39  ;;  %v3086_v36 = vld [vmem:[%s13122_s3 + $0x1240] sm:$0xff] }
 0x222   :  { %6534 = vmatpush1.bf16.msra.mxu1 %v8752_v44  ;;  %v8635_v44 = vcombine.high %v2871_v37, %v2875_v39  ;;  %v3090_v37 = vld [vmem:[%s13122_s3 + $0x1260] sm:$0xff]  ;;  %v2919_v39 = vld [vmem:[%s13122_s3 + $0xd08] sm:$0xff] }
 0x223   :  { %6688 = vmatpush1.bf16.msra.mxu0 %v8586_v46  ;;  %6535 = vmatprep.subr.bf16.mxu1 %v8761_v47  ;;  %v3046_v46 = vld [vmem:[%s13122_s3 + $0x1100] sm:$0xff] }
 0x224   :  { %6689 = vmatprep.subr.bf16.mxu0 %v8595_v50  ;;  %v3050_v47 = vld [vmem:[%s13122_s3 + $0x1120] sm:$0xff]  ;;  %v2883_v50 = vld [vmem:[%s13122_s3 + $0xbe8] sm:$0xff] }
 0x225   :  { %v8809_v53 = vcombine.high %v3046_v46, %v3050_v47  ;;  %v8643_v54 = vcombine.high %v2879_v58, %v2883_v50  ;;  %v8642_v1 = vcombine.low %v2879_v58, %v2883_v50  ;;  %v3098_v58 = vld [vmem:[%s13122_s3 + $0x12a0] sm:$0xff]  ;;  %v2927_v50 = vld [vmem:[%s13122_s3 + $0xd48] sm:$0xff] }
 0x226   :  { %6536 = vmatpush1.bf16.msra.mxu1 %v8760_v17  ;;  %v3054_v17 = vld [vmem:[%s13122_s3 + $0x1140] sm:$0xff] }
 0x227   :  { %6690 = vmatpush1.bf16.msra.mxu0 %v8594_v57  ;;  %6537 = vmatprep.subr.bf16.mxu1 %v8769_v59  ;;  %v2887_v57 = vld [vmem:[%s13122_s3 + $0xc08] sm:$0xff]  ;;  %v8817_v3 = vcombine.high %v3054_v17, %v3058_v55 }
 0x228   :  { %6691 = vmatprep.subr.bf16.mxu0 %v8603_v60  ;;  %v2891_v59 = vld [vmem:[%s13122_s3 + $0xc28] sm:$0xff]  ;;  %v8808_v60 = vcombine.low %v3046_v46, %v3050_v47  ;;  %v3094_v47 = vld [vmem:[%s13122_s3 + $0x1280] sm:$0xff] }
 0x229   :  { %v8651_v6 = vcombine.high %v2887_v57, %v2891_v59 }
 0x22a   :  { %6538 = vmatpush1.bf16.msra.mxu1 %v8768_v11  ;;  %v2895_v11 = vld [vmem:[%s13122_s3 + $0xc48] sm:$0xff] }
 0x22b   :  { %6692 = vmatpush1.bf16.msra.mxu0 %v8602_v12  ;;  %6548 = vmatprep.subr.bf16.mxu1 %v8777_v16  ;;  %v8816_v12 = vcombine.low %v3054_v17, %v3058_v55  ;;  %v8650_v16 = vcombine.low %v2887_v57, %v2891_v59  ;;  %v8659_v63 = vcombine.high %v2895_v11, %v2899_v4  ;;  %v350_v17 = vld [vmem:[%s13121_s2 + $0x8] sm:$0x3]  ;;  %v3102_v57 = vld [vmem:[%s13122_s3 + $0x12c0] sm:$0xff] }
 0x22c   :  { %6693 = vmatprep.subr.bf16.mxu0 %v8611_v8  ;;  %v8825_v8 = vcombine.high %v3062_v61, %v3066_v62  ;;  %v3106_v59 = vld [vmem:[%s13122_s3 + $0x12e0] sm:$0xff] }
 0x22d   :  { %6540 = vmatmul.mubr.bf16.vlgmr.msra.gmra.mrb[8].mxu1 %v11552_v22 }
 0x22e   :  { %6549 = vmatpush1.bf16.msra.mxu1 %v8776_v7  ;;  %v2907_v7 = vld [vmem:[%s13122_s3 + $0xca8] sm:$0xff] }
 0x22f   :  { %6694 = vmatpush1.bf16.msra.mxu0 %v8610_v19  ;;  %6550 = vmatprep.subr.bf16.mxu1 %v8785_v23  ;;  %v8824_v19 = vcombine.low %v3062_v61, %v3066_v62  ;;  %v8658_v23 = vcombine.low %v2895_v11, %v2899_v4  ;;  %v8667_v25 = vcombine.high %v2903_v21, %v2907_v7 }
 0x230   :  { %6695 = vmatprep.subr.bf16.mxu0 %v8619_v10  ;;  %v8833_v10 = vcombine.high %v3070_v18, %v3074_v20  ;;  %v392_v61 = vrot.slane %v350_v17, %v10835_v13  ;;  %v8865_v11 = vcombine.high %v3102_v57, %v3106_v59 }
 0x232   :  { %6551 = vmatpush1.bf16.msra.mxu1 %v8784_v30  ;;  %v2915_v30 = vld [vmem:[%s13122_s3 + $0xce8] sm:$0xff] }
 0x233   :  { %6696 = vmatpush1.bf16.msra.mxu0 %v8618_v31  ;;  %6552 = vmatprep.subr.bf16.mxu1 %v8793_v33  ;;  %v8832_v31 = vcombine.low %v3070_v18, %v3074_v20  ;;  %v8666_v33 = vcombine.low %v2903_v21, %v2907_v7  ;;  %v8675_v35 = vcombine.high %v2911_v28, %v2915_v30  ;;  %v2947_v18 = vld [vmem:[%s13122_s3 + $0xde8] sm:$0xff] }
 0x234   :  { %6697 = vmatprep.subr.bf16.mxu0 %v8627_v34  ;;  %v8841_v34 = vcombine.high %v3078_v15, %v3082_v26  ;;  %v8864_v7 = vcombine.low %v3102_v57, %v3106_v59 }
 0x236   :  { %6553 = vmatpush1.bf16.msra.mxu1 %v8792_v40  ;;  %v2923_v40 = vld [vmem:[%s13122_s3 + $0xd28] sm:$0xff] }
 0x237   :  { %6698 = vmatpush1.bf16.msra.mxu0 %v8626_v41  ;;  %6554 = vmatprep.subr.bf16.mxu1 %v8801_v42  ;;  %v8840_v41 = vcombine.low %v3078_v15, %v3082_v26  ;;  %v8674_v42 = vcombine.low %v2911_v28, %v2915_v30  ;;  %v8683_v46 = vcombine.high %v2919_v39, %v2923_v40  ;;  %v3118_v30 = vld [vmem:[%s13122_s3 + $0x1340] sm:$0xff] }
 0x238   :  { %6699 = vmatprep.subr.bf16.mxu0 %v8635_v44  ;;  %v8849_v44 = vcombine.high %v3086_v36, %v3090_v37 }
 0x23a   :  { %6555 = vmatpush1.bf16.msra.mxu1 %v8800_v51  ;;  %v2931_v51 = vld [vmem:[%s13122_s3 + $0xd68] sm:$0xff] }
 0x23b   :  { %6700 = vmatpush1.bf16.msra.mxu0 %v8634_v52  ;;  %6556 = vmatprep.subr.bf16.mxu1 %v8809_v53  ;;  %v8848_v52 = vcombine.low %v3086_v36, %v3090_v37  ;;  %v8682_v53 = vcombine.low %v2919_v39, %v2923_v40  ;;  %v8691_v55 = vcombine.high %v2927_v50, %v2931_v51 }
 0x23c   :  { %6701 = vmatprep.subr.bf16.mxu0 %v8643_v54  ;;  %v8857_v54 = vcombine.high %v3094_v47, %v3098_v58  ;;  %v8690_v62 = vcombine.low %v2927_v50, %v2931_v51 }
 0x23e   :  { %6557 = vmatpush1.bf16.msra.mxu1 %v8808_v60  ;;  %v2935_v60 = vld [vmem:[%s13122_s3 + $0xd88] sm:$0xff] }
 0x23f   :  { %6702 = vmatpush1.bf16.msra.mxu0 %v8642_v1  ;;  %6558 = vmatprep.subr.bf16.mxu1 %v8817_v3  ;;  %v2939_v1 = vld [vmem:[%s13122_s3 + $0xda8] sm:$0xff]  ;;  %v8856_v3 = vcombine.low %v3094_v47, %v3098_v58 }
 0x240   :  { %6712 = vmatprep.subr.bf16.mxu0 %v8651_v6  ;;  %v388_v6 = vrot.slane %v350_v17, %v10824_v9  ;;  %v8699_v4 = vcombine.high %v2935_v60, %v2939_v1  ;;  %v2971_v17 = vld [vmem:[%s13122_s3 + $0xea8] sm:$0xff] }
 0x242   :  { %6559 = vmatpush1.bf16.msra.mxu1 %v8816_v12  ;;  %6704 = vmatmul.mubr.bf16.vlgmr.msra.gmra.mrb[12].mxu0 %v11340_v29  ;;  %v3110_v12 = vld [vmem:[%s13122_s3 + $0x1300] sm:$0xff] }
 0x243   :  { %6713 = vmatpush1.bf16.msra.mxu0 %v8650_v16  ;;  %6744 = vmatprep.mubr.bf16.mxu0 %v11342_v32  ;;  %v3114_v16 = vld [vmem:[%s13122_s3 + $0x1320] sm:$0xff] }
 0x244   :  { %6560 = vmatprep.subr.bf16.mxu1 %v8825_v8  ;;  %6714 = vmatprep.subr.bf16.mxu0 %v8659_v63  ;;  %v2943_v63 = vld [vmem:[%s13122_s3 + $0xdc8] sm:$0xff]  ;;  %v8872_v36 = vcombine.low %v3110_v12, %v3114_v16 }
 0x245   :  { %v8707_v28 = vcombine.high %v2943_v63, %v2947_v18  ;;  %v8706_v37 = vcombine.low %v2943_v63, %v2947_v18 }
 0x246   :  { %6561 = vmatpush1.bf16.msra.mxu1 %v8824_v19 }
 0x247   :  { %6715 = vmatpush1.bf16.msra.mxu0 %v8658_v23  ;;  %6562 = vmatprep.subr.bf16.mxu1 %v8833_v10  ;;  %v8698_v10 = vcombine.low %v2935_v60, %v2939_v1 }
 0x248   :  { %6716 = vmatprep.subr.bf16.mxu0 %v8667_v25  ;;  %v8873_v25 = vcombine.high %v3110_v12, %v3114_v16  ;;  %v2979_v12 = vld [vmem:[%s13122_s3 + $0xee8] sm:$0xff] }
 0x24a   :  { %6563 = vmatpush1.bf16.msra.mxu1 %v8832_v31  ;;  %v3122_v31 = vld [vmem:[%s13122_s3 + $0x1360] sm:$0xff] }
 0x24b   :  { %6717 = vmatpush1.bf16.msra.mxu0 %v8666_v33  ;;  %6564 = vmatprep.subr.bf16.mxu1 %v8841_v34  ;;  %v2951_v34 = vld [vmem:[%s13122_s3 + $0xe08] sm:$0xff]  ;;  %v8881_v39 = vcombine.high %v3118_v30, %v3122_v31  ;;  %v8880_v47 = vcombine.low %v3118_v30, %v3122_v31 }
 0x24c   :  { %6718 = vmatprep.subr.bf16.mxu0 %v8675_v35  ;;  %v2955_v35 = vld [vmem:[%s13122_s3 + $0xe28] sm:$0xff] }
 0x24d   :  { %v8715_v40 = vcombine.high %v2951_v34, %v2955_v35  ;;  %v8714_v58 = vcombine.low %v2951_v34, %v2955_v35  ;;  %v2520_v35 = vld [vmem:[%s13122_s3 + $0x90] sm:$0xff] }
 0x24e   :  { %6565 = vmatpush1.bf16.msra.mxu1 %v8840_v41  ;;  %v3126_v41 = vld [vmem:[%s13122_s3 + $0x1380] sm:$0xff] }
 0x24f   :  { %6719 = vmatpush1.bf16.msra.mxu0 %v8674_v42  ;;  %6566 = vmatprep.subr.bf16.mxu1 %v8849_v44  ;;  %v3130_v42 = vld [vmem:[%s13122_s3 + $0x13a0] sm:$0xff]  ;;  %v2959_v44 = vld [vmem:[%s13122_s3 + $0xe48] sm:$0xff] }
 0x250   :  { %6720 = vmatprep.subr.bf16.mxu0 %v8683_v46  ;;  %v2963_v46 = vld [vmem:[%s13122_s3 + $0xe68] sm:$0xff]  ;;  %v8889_v50 = vcombine.high %v3126_v41, %v3130_v42 }
 0x251   :  { %v8723_v51 = vcombine.high %v2959_v44, %v2963_v46  ;;  %v8722_v57 = vcombine.low %v2959_v44, %v2963_v46  ;;  %v2528_v46 = vld [vmem:[%s13122_s3 + $0xd0] sm:$0xff] }
 0x252   :  { %6567 = vmatpush1.bf16.msra.mxu1 %v8848_v52  ;;  %v3134_v52 = vld [vmem:[%s13122_s3 + $0x13c0] sm:$0xff] }
 0x253   :  { %6721 = vmatpush1.bf16.msra.mxu0 %v8682_v53  ;;  %6568 = vmatprep.subr.bf16.mxu1 %v8857_v54  ;;  %v3138_v53 = vld [vmem:[%s13122_s3 + $0x13e0] sm:$0xff]  ;;  %v2967_v54 = vld [vmem:[%s13122_s3 + $0xe88] sm:$0xff] }
 0x254   :  { %6722 = vmatprep.subr.bf16.mxu0 %v8691_v55  ;;  %v8888_v55 = vcombine.low %v3126_v41, %v3130_v42  ;;  %v8897_v59 = vcombine.high %v3134_v52, %v3138_v53  ;;  %v8731_v1 = vcombine.high %v2967_v54, %v2971_v17  ;;  %v8896_v63 = vcombine.low %v3134_v52, %v3138_v53 }
 0x255   :  { %v2435_v8 = vpop.f32.mrb[8].mxu0 }
 0x256   :  { %v9043_v20 = vadd.f32 %v2435_v8, %v388_v6  ;;  %6569 = vmatpush1.bf16.msra.mxu1 %v8856_v3  ;;  %v2437_v21 = vpop.f32.mrb[9].mxu0  ;;  %v2504_v3 = vld [vmem:[%s13122_s3 + $0x10] sm:$0xff] }
 0x257   :  { %v9044_v19 = vadd.f32 %v2437_v21, %v392_v61  ;;  %v2439_v23 = vpop.f32.mrb[10].mxu0  ;;  %6723 = vmatpush1.bf16.msra.mxu0 %v8690_v62  ;;  %6570 = vmatprep.subr.bf16.mxu1 %v8865_v11  ;;  %v2508_v6 = vld [vmem:[%s13122_s3 + $0x30] sm:$0xff]  ;;  %v8730_v21 = vcombine.low %v2967_v54, %v2971_v17 }
 0x258   :  { %v2460_v15 = vmul.f32 0.70710677, %v9043_v20  ;;  %v2440_v26 = vpop.f32.mrb[11].mxu0  ;;  %6724 = vmatprep.subr.bf16.mxu0 %v8699_v4  ;;  %v2450_v62 = vmul.f32 0.5, %v9043_v20  ;;  %v2975_v4 = vld [vmem:[%s13122_s3 + $0xec8] sm:$0xff]  ;;  %v2536_v17 = vld [vmem:[%s13122_s3 + $0x110] sm:$0xff] }
 0x259   :  { %v2461_v33 = vmul.f32 0.70710677, %v9044_v19  ;;  %v2451_v16 = vmul.f32 0.5, %v9044_v19  ;;  %v8739_v20 = vcombine.high %v2975_v4, %v2979_v12  ;;  %v2983_v19 = vld [vmem:[%s13122_s3 + $0xf08] sm:$0xff]  ;;  %v8738_v31 = vcombine.low %v2975_v4, %v2979_v12 }
 0x25a   :  { %9699 = verf.f32 %v2460_v15  ;;  %6571 = vmatpush1.bf16.msra.mxu1 %v8864_v7  ;;  %v8269_v7 = vcombine.high %v2504_v3, %v2508_v6  ;;  %v2987_v15 = vld [vmem:[%s13122_s3 + $0xf28] sm:$0xff] }
 0x25b   :  { %9701 = verf.f32 %v2461_v33  ;;  %6725 = vmatpush1.bf16.msra.mxu0 %v8698_v10  ;;  %6572 = vmatprep.subr.bf16.mxu1 %v8873_v25  ;;  %v2512_v10 = vld [vmem:[%s13122_s3 + $0x50] sm:$0xff]  ;;  %v8747_v34 = vcombine.high %v2983_v19, %v2987_v15  ;;  %v8746_v41 = vcombine.low %v2983_v19, %v2987_v15  ;;  %v3019_v4 = vld [vmem:[%s13122_s3 + $0x1028] sm:$0xff] }
 0x25c   :  { %6726 = vmatprep.subr.bf16.mxu0 %v8707_v28  ;;  %v2516_v25 = vld [vmem:[%s13122_s3 + $0x70] sm:$0xff]  ;;  %v8268_v28 = vcombine.low %v2504_v3, %v2508_v6 }
 0x25d   :  { %v8277_v33 = vcombine.high %v2512_v10, %v2516_v25  ;;  %v2560_v15 = vld [vmem:[%s13122_s3 + $0x1d0] sm:$0xff] }
 0x25e   :  { %6573 = vmatpush1.bf16.msra.mxu1 %v8872_v36  ;;  %v2524_v36 = vld [vmem:[%s13122_s3 + $0xb0] sm:$0xff] }
 0x25f   :  { %6727 = vmatpush1.bf16.msra.mxu0 %v8706_v37  ;;  %6574 = vmatprep.subr.bf16.mxu1 %v8881_v39  ;;  %v2991_v37 = vld [vmem:[%s13122_s3 + $0xf48] sm:$0xff]  ;;  %v8285_v42 = vcombine.high %v2520_v35, %v2524_v36 }
 0x260   :  { %6728 = vmatprep.subr.bf16.mxu0 %v8715_v40  ;;  %v2995_v39 = vld [vmem:[%s13122_s3 + $0xf68] sm:$0xff]  ;;  %v8276_v40 = vcombine.low %v2512_v10, %v2516_v25 }
 0x261   :  { %v8755_v44 = vcombine.high %v2991_v37, %v2995_v39  ;;  %v8754_v52 = vcombine.low %v2991_v37, %v2995_v39  ;;  %v2568_v39 = vld [vmem:[%s13122_s3 + $0x210] sm:$0xff] }
 0x262   :  { %6575 = vmatpush1.bf16.msra.mxu1 %v8880_v47  ;;  %v2532_v47 = vld [vmem:[%s13122_s3 + $0xf0] sm:$0xff] }
 0x263   :  { %6729 = vmatpush1.bf16.msra.mxu0 %v8714_v58  ;;  %6576 = vmatprep.subr.bf16.mxu1 %v8889_v50  ;;  %v2999_v58 = vld [vmem:[%s13122_s3 + $0xf88] sm:$0xff]  ;;  %v8293_v53 = vcombine.high %v2528_v46, %v2532_v47 }
 0x264   :  { %v9700_v60 = vpop.eup %9699  ;;  %6730 = vmatprep.subr.bf16.mxu0 %v8723_v51  ;;  %v3003_v50 = vld [vmem:[%s13122_s3 + $0xfa8] sm:$0xff]  ;;  %v8284_v51 = vcombine.low %v2520_v35, %v2524_v36 }
 0x265   :  { %v9702_v61 = vpop.eup %9701  ;;  %v2480_v11 = vadd.f32 1.0, %v9700_v60  ;;  %v8763_v54 = vcombine.high %v2999_v58, %v3003_v50  ;;  %v8292_v60 = vcombine.low %v2528_v46, %v2532_v47 }
 0x266   :  { %v2481_v8 = vadd.f32 1.0, %v9702_v61  ;;  %6577 = vmatpush1.bf16.msra.mxu1 %v8888_v55  ;;  %v2540_v55 = vld [vmem:[%s13122_s3 + $0x130] sm:$0xff] }
 0x267   :  { %v2490_v18 = vmul.f32 %v2480_v11, %v2450_v62  ;;  %6731 = vmatpush1.bf16.msra.mxu0 %v8722_v57  ;;  %6578 = vmatprep.subr.bf16.mxu1 %v8897_v59  ;;  %v3007_v57 = vld [vmem:[%s13122_s3 + $0xfc8] sm:$0xff]  ;;  %v8301_v3 = vcombine.high %v2536_v17, %v2540_v55  ;;  %v2544_v61 = vld [vmem:[%s13122_s3 + $0x150] sm:$0xff]  ;;  %v8300_v12 = vcombine.low %v2536_v17, %v2540_v55 }
 0x268   :  { %v2491_v23 = vmul.f32 %v2481_v8, %v2451_v16  ;;  %6732 = vmatprep.subr.bf16.mxu0 %v8731_v1  ;;  %v3011_v59 = vld [vmem:[%s13122_s3 + $0xfe8] sm:$0xff]  ;;  %v8762_v1 = vcombine.low %v2999_v58, %v3003_v50  ;;  %v2548_v62 = vld [vmem:[%s13122_s3 + $0x170] sm:$0xff] }
 0x269   :  { %v11756_v30 = vpack.c.bf16 %v2490_v18, %v2490_v18  ;;  %v8771_v6 = vcombine.high %v3007_v57, %v3011_v59  ;;  %v3015_v11 = vld [vmem:[%s13122_s3 + $0x1008] sm:$0xff]  ;;  %v8770_v16 = vcombine.low %v3007_v57, %v3011_v59  ;;  %v8309_v8 = vcombine.high %v2544_v61, %v2548_v62  ;;  %v2552_v18 = vld [vmem:[%s13122_s3 + $0x190] sm:$0xff] }
 0x26a   :  { %v11754_v26 = vpack.c.bf16 %v2491_v23, %v2491_v23  ;;  %6579 = vmatpush1.bf16.msra.mxu1 %v8896_v63  ;;  %v8779_v63 = vcombine.high %v3015_v11, %v3019_v4  ;;  %v3027_v23 = vld [vmem:[%s13122_s3 + $0x1068] sm:$0xff]  ;;  %v8778_v10 = vcombine.low %v3015_v11, %v3019_v4  ;;  %v2576_v50 = vld [vmem:[%s13122_s3 + $0x250] sm:$0xff] }
 0x26b   :  { %6733 = vmatpush1.bf16.msra.mxu0 %v8730_v21  ;;  %6794 = vmatprep.subr.bf16.mxu1 %v8269_v7  ;;  %v2556_v21 = vld [vmem:[%s13122_s3 + $0x1b0] sm:$0xff]  ;;  %v3023_v7 = vld [vmem:[%s13122_s3 + $0x1048] sm:$0xff] }
 0x26c   :  { %6580 = vmatprep.mubr.bf16.mxu1 %v11754_v26  ;;  %6734 = vmatprep.subr.bf16.mxu0 %v8739_v20  ;;  %v8308_v20 = vcombine.low %v2544_v61, %v2548_v62  ;;  %v8317_v25 = vcombine.high %v2552_v18, %v2556_v21  ;;  %v8787_v19 = vcombine.high %v3023_v7, %v3027_v23  ;;  %v2584_v59 = vld [vmem:[%s13122_s3 + $0x290] sm:$0xff] }
 0x26d   :  { %6581 = vmatmul.mubr.bf16.vlgmr.msra.gmra.mrb[8].mxu1 %v11756_v30  ;;  %v8786_v35 = vcombine.low %v3023_v7, %v3027_v23  ;;  %v2592_v4 = vld [vmem:[%s13122_s3 + $0x2d0] sm:$0xff] }
 0x26e   :  { %6795 = vmatpush1.bf16.msra.mxu1 %v8268_v28  ;;  %6826 = vmatprep.mubr.bf16.mxu1 %v10892_v0  ;;  %v2564_v28 = vld [vmem:[%s13122_s3 + $0x1f0] sm:$0xff] }
 0x26f   :  { %6735 = vmatpush1.bf16.msra.mxu0 %v8738_v31  ;;  %6796 = vmatprep.subr.bf16.mxu1 %v8277_v33  ;;  %v3031_v31 = vld [vmem:[%s13122_s3 + $0x1088] sm:$0xff]  ;;  %v8325_v36 = vcombine.high %v2560_v15, %v2564_v28  ;;  %v2600_v23 = vld [vmem:[%s13122_s3 + $0x310] sm:$0xff] }
 0x270   :  { %6736 = vmatprep.subr.bf16.mxu0 %v8747_v34  ;;  %v3035_v33 = vld [vmem:[%s13122_s3 + $0x10a8] sm:$0xff]  ;;  %v8316_v34 = vcombine.low %v2552_v18, %v2556_v21 }
 0x271   :  { %v8795_v37 = vcombine.high %v3031_v31, %v3035_v33  ;;  %v8794_v46 = vcombine.low %v3031_v31, %v3035_v33  ;;  %v2608_v33 = vld [vmem:[%s13122_s3 + $0x350] sm:$0xff] }
 0x272   :  { %6797 = vmatpush1.bf16.msra.mxu1 %v8276_v40  ;;  %v2572_v40 = vld [vmem:[%s13122_s3 + $0x230] sm:$0xff] }
 0x273   :  { %6737 = vmatpush1.bf16.msra.mxu0 %v8746_v41  ;;  %6798 = vmatprep.subr.bf16.mxu1 %v8285_v42  ;;  %v3039_v41 = vld [vmem:[%s13122_s3 + $0x10c8] sm:$0xff]  ;;  %v8333_v47 = vcombine.high %v2568_v39, %v2572_v40 }
 0x274   :  { %6738 = vmatprep.subr.bf16.mxu0 %v8755_v44  ;;  %v3043_v42 = vld [vmem:[%s13122_s3 + $0x10e8] sm:$0xff]  ;;  %v8324_v44 = vcombine.low %v2560_v15, %v2564_v28 }
 0x275   :  { %v8803_v58 = vcombine.high %v3039_v41, %v3043_v42  ;;  %v8802_v17 = vcombine.low %v3039_v41, %v3043_v42  ;;  %v2616_v42 = vld [vmem:[%s13122_s3 + $0x390] sm:$0xff] }
 0x276   :  { %6799 = vmatpush1.bf16.msra.mxu1 %v8284_v51  ;;  %v2580_v51 = vld [vmem:[%s13122_s3 + $0x270] sm:$0xff] }
 0x277   :  { %6739 = vmatpush1.bf16.msra.mxu0 %v8754_v52  ;;  %6800 = vmatprep.subr.bf16.mxu1 %v8293_v53  ;;  %v3047_v52 = vld [vmem:[%s13122_s3 + $0x1108] sm:$0xff]  ;;  %v8341_v55 = vcombine.high %v2576_v50, %v2580_v51 }
 0x278   :  { %6740 = vmatprep.subr.bf16.mxu0 %v8763_v54  ;;  %v3051_v53 = vld [vmem:[%s13122_s3 + $0x1128] sm:$0xff]  ;;  %v8332_v54 = vcombine.low %v2568_v39, %v2572_v40 }
 0x279   :  { %v8811_v57 = vcombine.high %v3047_v52, %v3051_v53  ;;  %v8810_v61 = vcombine.low %v3047_v52, %v3051_v53  ;;  %v2624_v53 = vld [vmem:[%s13122_s3 + $0x3d0] sm:$0xff] }
 0x27a   :  { %6801 = vmatpush1.bf16.msra.mxu1 %v8292_v60  ;;  %v2588_v60 = vld [vmem:[%s13122_s3 + $0x2b0] sm:$0xff] }
 0x27b   :  { %6741 = vmatpush1.bf16.msra.mxu0 %v8762_v1  ;;  %6802 = vmatprep.subr.bf16.mxu1 %v8301_v3  ;;  %v3055_v1 = vld [vmem:[%s13122_s3 + $0x1148] sm:$0xff]  ;;  %v8349_v62 = vcombine.high %v2584_v59, %v2588_v60 }
 0x27c   :  { %6742 = vmatprep.subr.bf16.mxu0 %v8771_v6  ;;  %v3059_v3 = vld [vmem:[%s13122_s3 + $0x1168] sm:$0xff]  ;;  %v8340_v6 = vcombine.low %v2576_v50, %v2580_v51 }
 0x27d   :  { %v8819_v11 = vcombine.high %v3055_v1, %v3059_v3  ;;  %v8818_v18 = vcombine.low %v3055_v1, %v3059_v3  ;;  %v2632_v3 = vld [vmem:[%s13122_s3 + $0x410] sm:$0xff] }
 0x27e   :  { %6803 = vmatpush1.bf16.msra.mxu1 %v8300_v12  ;;  %v2596_v12 = vld [vmem:[%s13122_s3 + $0x2f0] sm:$0xff] }
 0x27f   :  { %6743 = vmatpush1.bf16.msra.mxu0 %v8770_v16  ;;  %6804 = vmatprep.subr.bf16.mxu1 %v8309_v8  ;;  %v3063_v16 = vld [vmem:[%s13122_s3 + $0x1188] sm:$0xff]  ;;  %v8357_v21 = vcombine.high %v2592_v4, %v2596_v12 }
 0x280   :  { %6753 = vmatprep.subr.bf16.mxu0 %v8779_v63  ;;  %v3067_v8 = vld [vmem:[%s13122_s3 + $0x11a8] sm:$0xff]  ;;  %v8348_v63 = vcombine.low %v2584_v59, %v2588_v60 }
 0x281   :  { %v8827_v7 = vcombine.high %v3063_v16, %v3067_v8  ;;  %v8826_v15 = vcombine.low %v3063_v16, %v3067_v8  ;;  %v2640_v8 = vld [vmem:[%s13122_s3 + $0x450] sm:$0xff] }
 0x282   :  { %6805 = vmatpush1.bf16.msra.mxu1 %v8308_v20  ;;  %6745 = vmatmul.mubr.bf16.vlgmr.msra.gmra.mrb[12].mxu0 %v11552_v22  ;;  %v2604_v20 = vld [vmem:[%s13122_s3 + $0x330] sm:$0xff] }
 0x283   :  { %6754 = vmatpush1.bf16.msra.mxu0 %v8778_v10  ;;  %6785 = vmatprep.mubr.bf16.mxu0 %v11754_v26  ;;  %v3071_v10 = vld [vmem:[%s13122_s3 + $0x11c8] sm:$0xff]  ;;  %v8365_v28 = vcombine.high %v2600_v23, %v2604_v20 }
 0x284   :  { %6806 = vmatprep.subr.bf16.mxu1 %v8317_v25  ;;  %6755 = vmatprep.subr.bf16.mxu0 %v8787_v19  ;;  %v3075_v25 = vld [vmem:[%s13122_s3 + $0x11e8] sm:$0xff]  ;;  %v8356_v19 = vcombine.low %v2592_v4, %v2596_v12 }
 0x285   :  { %v8835_v31 = vcombine.high %v3071_v10, %v3075_v25  ;;  %v8834_v39 = vcombine.low %v3071_v10, %v3075_v25  ;;  %v2648_v25 = vld [vmem:[%s13122_s3 + $0x490] sm:$0xff] }
 0x286   :  { %6807 = vmatpush1.bf16.msra.mxu1 %v8316_v34  ;;  %v2612_v34 = vld [vmem:[%s13122_s3 + $0x370] sm:$0xff] }
 0x287   :  { %6756 = vmatpush1.bf16.msra.mxu0 %v8786_v35  ;;  %6808 = vmatprep.subr.bf16.mxu1 %v8325_v36  ;;  %v3079_v35 = vld [vmem:[%s13122_s3 + $0x1208] sm:$0xff]  ;;  %v8373_v40 = vcombine.high %v2608_v33, %v2612_v34 }
 0x288   :  { %6757 = vmatprep.subr.bf16.mxu0 %v8795_v37  ;;  %v3083_v36 = vld [vmem:[%s13122_s3 + $0x1228] sm:$0xff]  ;;  %v8364_v37 = vcombine.low %v2600_v23, %v2604_v20 }
 0x289   :  { %v8843_v41 = vcombine.high %v3079_v35, %v3083_v36  ;;  %v8842_v50 = vcombine.low %v3079_v35, %v3083_v36  ;;  %v2656_v36 = vld [vmem:[%s13122_s3 + $0x4d0] sm:$0xff] }
 0x28a   :  { %6809 = vmatpush1.bf16.msra.mxu1 %v8324_v44  ;;  %v2620_v44 = vld [vmem:[%s13122_s3 + $0x3b0] sm:$0xff] }
 0x28b   :  { %6758 = vmatpush1.bf16.msra.mxu0 %v8794_v46  ;;  %6810 = vmatprep.subr.bf16.mxu1 %v8333_v47  ;;  %v3087_v46 = vld [vmem:[%s13122_s3 + $0x1248] sm:$0xff]  ;;  %v8381_v51 = vcombine.high %v2616_v42, %v2620_v44 }
 0x28c   :  { %6759 = vmatprep.subr.bf16.mxu0 %v8803_v58  ;;  %v3091_v47 = vld [vmem:[%s13122_s3 + $0x1268] sm:$0xff]  ;;  %v8372_v58 = vcombine.low %v2608_v33, %v2612_v34 }
 0x28d   :  { %v8851_v52 = vcombine.high %v3087_v46, %v3091_v47  ;;  %v8850_v59 = vcombine.low %v3087_v46, %v3091_v47  ;;  %v2664_v47 = vld [vmem:[%s13122_s3 + $0x510] sm:$0xff] }
 0x28e   :  { %6811 = vmatpush1.bf16.msra.mxu1 %v8332_v54  ;;  %v2628_v54 = vld [vmem:[%s13122_s3 + $0x3f0] sm:$0xff] }
 0x28f   :  { %6760 = vmatpush1.bf16.msra.mxu0 %v8802_v17  ;;  %6812 = vmatprep.subr.bf16.mxu1 %v8341_v55  ;;  %v3095_v17 = vld [vmem:[%s13122_s3 + $0x1288] sm:$0xff]  ;;  %v8389_v60 = vcombine.high %v2624_v53, %v2628_v54 }
 0x290   :  { %6761 = vmatprep.subr.bf16.mxu0 %v8811_v57  ;;  %v3099_v55 = vld [vmem:[%s13122_s3 + $0x12a8] sm:$0xff]  ;;  %v8380_v57 = vcombine.low %v2616_v42, %v2620_v44 }
 0x291   :  { %v8859_v1 = vcombine.high %v3095_v17, %v3099_v55  ;;  %v8858_v4 = vcombine.low %v3095_v17, %v3099_v55  ;;  %v2672_v55 = vld [vmem:[%s13122_s3 + $0x550] sm:$0xff] }
 0x292   :  { %6813 = vmatpush1.bf16.msra.mxu1 %v8340_v6  ;;  %v2636_v6 = vld [vmem:[%s13122_s3 + $0x430] sm:$0xff] }
 0x293   :  { %6762 = vmatpush1.bf16.msra.mxu0 %v8810_v61  ;;  %6814 = vmatprep.subr.bf16.mxu1 %v8349_v62  ;;  %v3103_v61 = vld [vmem:[%s13122_s3 + $0x12c8] sm:$0xff]  ;;  %v8397_v12 = vcombine.high %v2632_v3, %v2636_v6 }
 0x294   :  { %6763 = vmatprep.subr.bf16.mxu0 %v8819_v11  ;;  %v3107_v62 = vld [vmem:[%s13122_s3 + $0x12e8] sm:$0xff]  ;;  %v8388_v11 = vcombine.low %v2624_v53, %v2628_v54 }
 0x295   :  { %v8867_v16 = vcombine.high %v3103_v61, %v3107_v62  ;;  %v8866_v23 = vcombine.low %v3103_v61, %v3107_v62  ;;  %v2680_v62 = vld [vmem:[%s13122_s3 + $0x590] sm:$0xff] }
 0x296   :  { %6815 = vmatpush1.bf16.msra.mxu1 %v8348_v63  ;;  %v2644_v63 = vld [vmem:[%s13122_s3 + $0x470] sm:$0xff] }
 0x297   :  { %6764 = vmatpush1.bf16.msra.mxu0 %v8818_v18  ;;  %6816 = vmatprep.subr.bf16.mxu1 %v8357_v21  ;;  %v3111_v18 = vld [vmem:[%s13122_s3 + $0x1308] sm:$0xff]  ;;  %v8405_v20 = vcombine.high %v2640_v8, %v2644_v63 }
 0x298   :  { %6765 = vmatprep.subr.bf16.mxu0 %v8827_v7  ;;  %v3115_v21 = vld [vmem:[%s13122_s3 + $0x1328] sm:$0xff]  ;;  %v8396_v7 = vcombine.low %v2632_v3, %v2636_v6 }
 0x299   :  { %v8875_v10 = vcombine.high %v3111_v18, %v3115_v21  ;;  %v8874_v33 = vcombine.low %v3111_v18, %v3115_v21  ;;  %v2688_v21 = vld [vmem:[%s13122_s3 + $0x5d0] sm:$0xff] }
 0x29a   :  { %6817 = vmatpush1.bf16.msra.mxu1 %v8356_v19  ;;  %v2652_v19 = vld [vmem:[%s13122_s3 + $0x4b0] sm:$0xff] }
 0x29b   :  { %6766 = vmatpush1.bf16.msra.mxu0 %v8826_v15  ;;  %6818 = vmatprep.subr.bf16.mxu1 %v8365_v28  ;;  %v3119_v15 = vld [vmem:[%s13122_s3 + $0x1348] sm:$0xff]  ;;  %v8413_v34 = vcombine.high %v2648_v25, %v2652_v19 }
 0x29c   :  { %6767 = vmatprep.subr.bf16.mxu0 %v8835_v31  ;;  %v3123_v28 = vld [vmem:[%s13122_s3 + $0x1368] sm:$0xff]  ;;  %v8404_v31 = vcombine.low %v2640_v8, %v2644_v63 }
 0x29d   :  { %v8883_v35 = vcombine.high %v3119_v15, %v3123_v28  ;;  %v8882_v42 = vcombine.low %v3119_v15, %v3123_v28  ;;  %v2696_v28 = vld [vmem:[%s13122_s3 + $0x610] sm:$0xff] }
 0x29e   :  { %6819 = vmatpush1.bf16.msra.mxu1 %v8364_v37  ;;  %v2660_v37 = vld [vmem:[%s13122_s3 + $0x4f0] sm:$0xff] }
 0x29f   :  { %6768 = vmatpush1.bf16.msra.mxu0 %v8834_v39  ;;  %6820 = vmatprep.subr.bf16.mxu1 %v8373_v40  ;;  %v3127_v39 = vld [vmem:[%s13122_s3 + $0x1388] sm:$0xff]  ;;  %v8421_v44 = vcombine.high %v2656_v36, %v2660_v37 }
 0x2a0   :  { %6769 = vmatprep.subr.bf16.mxu0 %v8843_v41  ;;  %v3131_v40 = vld [vmem:[%s13122_s3 + $0x13a8] sm:$0xff]  ;;  %v8412_v41 = vcombine.low %v2648_v25, %v2652_v19 }
 0x2a1   :  { %v8891_v46 = vcombine.high %v3127_v39, %v3131_v40  ;;  %v8890_v53 = vcombine.low %v3127_v39, %v3131_v40  ;;  %v2704_v39 = vld [vmem:[%s13122_s3 + $0x650] sm:$0xff] }
 0x2a2   :  { %6821 = vmatpush1.bf16.msra.mxu1 %v8372_v58  ;;  %v2668_v58 = vld [vmem:[%s13122_s3 + $0x530] sm:$0xff] }
 0x2a3   :  { %6770 = vmatpush1.bf16.msra.mxu0 %v8842_v50  ;;  %6822 = vmatprep.subr.bf16.mxu1 %v8381_v51  ;;  %v3135_v50 = vld [vmem:[%s13122_s3 + $0x13c8] sm:$0xff]  ;;  %v8429_v54 = vcombine.high %v2664_v47, %v2668_v58  ;;  %v2708_v40 = vld [vmem:[%s13122_s3 + $0x670] sm:$0xff] }
 0x2a4   :  { %6771 = vmatprep.subr.bf16.mxu0 %v8851_v52  ;;  %v3139_v51 = vld [vmem:[%s13122_s3 + $0x13e8] sm:$0xff]  ;;  %v8420_v52 = vcombine.low %v2656_v36, %v2660_v37 }
 0x2a5   :  { %v8899_v17 = vcombine.high %v3135_v50, %v3139_v51  ;;  %v8898_v3 = vcombine.low %v3135_v50, %v3139_v51  ;;  %v2712_v50 = vld [vmem:[%s13122_s3 + $0x690] sm:$0xff] }
 0x2a6   :  { %6823 = vmatpush1.bf16.msra.mxu1 %v8380_v57  ;;  %v2676_v57 = vld [vmem:[%s13122_s3 + $0x570] sm:$0xff] }
 0x2a7   :  { %6772 = vmatpush1.bf16.msra.mxu0 %v8850_v59  ;;  %6824 = vmatprep.subr.bf16.mxu1 %v8389_v60  ;;  %v2505_v59 = vld [vmem:[%s13122_s3 + $0x18] sm:$0xff]  ;;  %v8437_v6 = vcombine.high %v2672_v55, %v2676_v57  ;;  %v2716_v51 = vld [vmem:[%s13122_s3 + $0x6b0] sm:$0xff] }
 0x2a8   :  { %6773 = vmatprep.subr.bf16.mxu0 %v8859_v1  ;;  %v2509_v60 = vld [vmem:[%s13122_s3 + $0x38] sm:$0xff]  ;;  %v8428_v1 = vcombine.low %v2664_v47, %v2668_v58  ;;  %v8469_v47 = vcombine.high %v2704_v39, %v2708_v40 }
 0x2a9   :  { %v8271_v61 = vcombine.high %v2505_v59, %v2509_v60  ;;  %v8270_v8 = vcombine.low %v2505_v59, %v2509_v60  ;;  %v2720_v59 = vld [vmem:[%s13122_s3 + $0x6d0] sm:$0xff] }
 0x2aa   :  { %6825 = vmatpush1.bf16.msra.mxu1 %v8388_v11  ;;  %v2684_v11 = vld [vmem:[%s13122_s3 + $0x5b0] sm:$0xff] }
 0x2ab   :  { %6774 = vmatpush1.bf16.msra.mxu0 %v8858_v4  ;;  %6835 = vmatprep.subr.bf16.mxu1 %v8397_v12  ;;  %v2513_v4 = vld [vmem:[%s13122_s3 + $0x58] sm:$0xff]  ;;  %v8445_v63 = vcombine.high %v2680_v62, %v2684_v11  ;;  %v2724_v60 = vld [vmem:[%s13122_s3 + $0x6f0] sm:$0xff] }
 0x2ac   :  { %6775 = vmatprep.subr.bf16.mxu0 %v8867_v16  ;;  %v2517_v12 = vld [vmem:[%s13122_s3 + $0x78] sm:$0xff]  ;;  %v8436_v16 = vcombine.low %v2672_v55, %v2676_v57  ;;  %v8477_v55 = vcombine.high %v2712_v50, %v2716_v51 }
 0x2ad   :  { %6827 = vmatmul.mubr.bf16.vlgmr.msra.gmra.mrb[12].mxu1 %v10896_v2  ;;  %v8279_v18 = vcombine.high %v2513_v4, %v2517_v12  ;;  %v8278_v25 = vcombine.low %v2513_v4, %v2517_v12  ;;  %v2728_v4 = vld [vmem:[%s13122_s3 + $0x710] sm:$0xff] }
 0x2ae   :  { %6836 = vmatpush1.bf16.msra.mxu1 %v8396_v7  ;;  %6867 = vmatprep.mubr.bf16.mxu1 %v10901_v5  ;;  %v2692_v7 = vld [vmem:[%s13122_s3 + $0x5f0] sm:$0xff] }
 0x2af   :  { %6776 = vmatpush1.bf16.msra.mxu0 %v8866_v23  ;;  %6837 = vmatprep.subr.bf16.mxu1 %v8405_v20  ;;  %v2521_v23 = vld [vmem:[%s13122_s3 + $0x98] sm:$0xff]  ;;  %v8453_v19 = vcombine.high %v2688_v21, %v2692_v7  ;;  %v2732_v12 = vld [vmem:[%s13122_s3 + $0x730] sm:$0xff] }
 0x2b0   :  { %6777 = vmatprep.subr.bf16.mxu0 %v8875_v10  ;;  %v2525_v20 = vld [vmem:[%s13122_s3 + $0xb8] sm:$0xff]  ;;  %v8444_v10 = vcombine.low %v2680_v62, %v2684_v11  ;;  %v8485_v62 = vcombine.high %v2720_v59, %v2724_v60 }
 0x2b1   :  { %v8287_v15 = vcombine.high %v2521_v23, %v2525_v20 }
 0x2b2   :  { %6838 = vmatpush1.bf16.msra.mxu1 %v8404_v31  ;;  %v2700_v31 = vld [vmem:[%s13122_s3 + $0x630] sm:$0xff] }
 0x2b3   :  { %6778 = vmatpush1.bf16.msra.mxu0 %v8874_v33  ;;  %6839 = vmatprep.subr.bf16.mxu1 %v8413_v34  ;;  %v2529_v33 = vld [vmem:[%s13122_s3 + $0xd8] sm:$0xff]  ;;  %v8452_v34 = vcombine.low %v2688_v21, %v2692_v7  ;;  %v8461_v36 = vcombine.high %v2696_v28, %v2700_v31  ;;  %v8493_v21 = vcombine.high %v2728_v4, %v2732_v12 }
 0x2b4   :  { %6779 = vmatprep.subr.bf16.mxu0 %v8883_v35  ;;  %v8286_v35 = vcombine.low %v2521_v23, %v2525_v20  ;;  %v2736_v23 = vld [vmem:[%s13122_s3 + $0x750] sm:$0xff] }
 0x2b5   :  { %v2740_v20 = vld [vmem:[%s13122_s3 + $0x770] sm:$0xff] }
 0x2b6   :  { %6840 = vmatpush1.bf16.msra.mxu1 %v8412_v41  ;;  %v2537_v41 = vld [vmem:[%s13122_s3 + $0x118] sm:$0xff] }
 0x2b7   :  { %6780 = vmatpush1.bf16.msra.mxu0 %v8882_v42  ;;  %6841 = vmatprep.subr.bf16.mxu1 %v8421_v44  ;;  %v2541_v42 = vld [vmem:[%s13122_s3 + $0x138] sm:$0xff]  ;;  %v8460_v44 = vcombine.low %v2696_v28, %v2700_v31  ;;  %v8501_v28 = vcombine.high %v2736_v23, %v2740_v20 }
 0x2b8   :  { %6781 = vmatprep.subr.bf16.mxu0 %v8891_v46  ;;  %v8303_v58 = vcombine.high %v2537_v41, %v2541_v42 }
 0x2ba   :  { %6842 = vmatpush1.bf16.msra.mxu1 %v8420_v52  ;;  %v2545_v52 = vld [vmem:[%s13122_s3 + $0x158] sm:$0xff] }
 0x2bb   :  { %6782 = vmatpush1.bf16.msra.mxu0 %v8890_v53  ;;  %6843 = vmatprep.subr.bf16.mxu1 %v8429_v54  ;;  %v2549_v53 = vld [vmem:[%s13122_s3 + $0x178] sm:$0xff]  ;;  %v8468_v54 = vcombine.low %v2704_v39, %v2708_v40 }
 0x2bc   :  { %6783 = vmatprep.subr.bf16.mxu0 %v8899_v17  ;;  %v8302_v17 = vcombine.low %v2537_v41, %v2541_v42  ;;  %v8311_v57 = vcombine.high %v2545_v52, %v2549_v53  ;;  %v2752_v41 = vld [vmem:[%s13122_s3 + $0x7d0] sm:$0xff] }
 0x2bd   :  { %v2756_v42 = vld [vmem:[%s13122_s3 + $0x7f0] sm:$0xff] }
 0x2be   :  { %6844 = vmatpush1.bf16.msra.mxu1 %v8428_v1  ;;  %v2553_v1 = vld [vmem:[%s13122_s3 + $0x198] sm:$0xff] }
 0x2bf   :  { %6784 = vmatpush1.bf16.msra.mxu0 %v8898_v3  ;;  %6845 = vmatprep.subr.bf16.mxu1 %v8437_v6  ;;  %v2557_v3 = vld [vmem:[%s13122_s3 + $0x1b8] sm:$0xff]  ;;  %v8476_v6 = vcombine.low %v2712_v50, %v2716_v51  ;;  %v8517_v50 = vcombine.high %v2752_v41, %v2756_v42 }
 0x2c0   :  { %6999 = vmatprep.subr.bf16.mxu0 %v8271_v61  ;;  %v8310_v61 = vcombine.low %v2545_v52, %v2549_v53  ;;  %v8319_v11 = vcombine.high %v2553_v1, %v2557_v3  ;;  %v2760_v52 = vld [vmem:[%s13122_s3 + $0x810] sm:$0xff] }
 0x2c1   :  { %v2764_v53 = vld [vmem:[%s13122_s3 + $0x830] sm:$0xff] }
 0x2c2   :  { %6846 = vmatpush1.bf16.msra.mxu1 %v8436_v16  ;;  %6786 = vmatmul.mubr.bf16.vlgmr.msra.gmra.mrb[12].mxu0 %v11756_v30  ;;  %v2561_v16 = vld [vmem:[%s13122_s3 + $0x1d8] sm:$0xff] }
 0x2c3   :  { %7000 = vmatpush1.bf16.msra.mxu0 %v8270_v8  ;;  %7031 = vmatprep.mubr.bf16.mxu0 %v10892_v0  ;;  %v2533_v0 = vld [vmem:[%s13122_s3 + $0xf8] sm:$0xff] }
 0x2c4   :  { %6847 = vmatprep.subr.bf16.mxu1 %v8445_v63  ;;  %7001 = vmatprep.subr.bf16.mxu0 %v8279_v18  ;;  %v8295_v37 = vcombine.high %v2529_v33, %v2533_v0  ;;  %v8294_v46 = vcombine.low %v2529_v33, %v2533_v0  ;;  %v2565_v8 = vld [vmem:[%s13122_s3 + $0x1f8] sm:$0xff]  ;;  %v8484_v63 = vcombine.low %v2720_v59, %v2724_v60  ;;  %v2744_v33 = vld [vmem:[%s13122_s3 + $0x790] sm:$0xff] }
 0x2c5   :  { %v8318_v18 = vcombine.low %v2553_v1, %v2557_v3  ;;  %v8327_v7 = vcombine.high %v2561_v16, %v2565_v8  ;;  %v2748_v0 = vld [vmem:[%s13122_s3 + $0x7b0] sm:$0xff]  ;;  %v8525_v59 = vcombine.high %v2760_v52, %v2764_v53 }
 0x2c6   :  { %6848 = vmatpush1.bf16.msra.mxu1 %v8444_v10  ;;  %v2569_v10 = vld [vmem:[%s13122_s3 + $0x218] sm:$0xff]  ;;  %v8509_v39 = vcombine.high %v2744_v33, %v2748_v0  ;;  %v2768_v1 = vld [vmem:[%s13122_s3 + $0x850] sm:$0xff] }
 0x2c7   :  { %7002 = vmatpush1.bf16.msra.mxu0 %v8278_v25  ;;  %6849 = vmatprep.subr.bf16.mxu1 %v8453_v19  ;;  %v2573_v25 = vld [vmem:[%s13122_s3 + $0x238] sm:$0xff]  ;;  %v8492_v19 = vcombine.low %v2728_v4, %v2732_v12  ;;  %v2772_v3 = vld [vmem:[%s13122_s3 + $0x870] sm:$0xff] }
 0x2c8   :  { %7003 = vmatprep.subr.bf16.mxu0 %v8287_v15  ;;  %v8326_v15 = vcombine.low %v2561_v16, %v2565_v8  ;;  %v8335_v31 = vcombine.high %v2569_v10, %v2573_v25  ;;  %v8533_v4 = vcombine.high %v2768_v1, %v2772_v3  ;;  %v2776_v16 = vld [vmem:[%s13122_s3 + $0x890] sm:$0xff] }
 0x2c9   :  { %v2780_v8 = vld [vmem:[%s13122_s3 + $0x8b0] sm:$0xff] }
 0x2ca   :  { %6850 = vmatpush1.bf16.msra.mxu1 %v8452_v34  ;;  %v2577_v34 = vld [vmem:[%s13122_s3 + $0x258] sm:$0xff] }
 0x2cb   :  { %7004 = vmatpush1.bf16.msra.mxu0 %v8286_v35  ;;  %6851 = vmatprep.subr.bf16.mxu1 %v8461_v36  ;;  %v2581_v35 = vld [vmem:[%s13122_s3 + $0x278] sm:$0xff]  ;;  %v8500_v36 = vcombine.low %v2736_v23, %v2740_v20  ;;  %v8541_v23 = vcombine.high %v2776_v16, %v2780_v8 }
 0x2cc   :  { %7005 = vmatprep.subr.bf16.mxu0 %v8295_v37  ;;  %v8334_v37 = vcombine.low %v2569_v10, %v2573_v25  ;;  %v8343_v40 = vcombine.high %v2577_v34, %v2581_v35  ;;  %v2784_v10 = vld [vmem:[%s13122_s3 + $0x8d0] sm:$0xff] }
 0x2cd   :  { %v2788_v25 = vld [vmem:[%s13122_s3 + $0x8f0] sm:$0xff] }
 0x2ce   :  { %6852 = vmatpush1.bf16.msra.mxu1 %v8460_v44  ;;  %v2585_v44 = vld [vmem:[%s13122_s3 + $0x298] sm:$0xff] }
 0x2cf   :  { %7006 = vmatpush1.bf16.msra.mxu0 %v8294_v46  ;;  %6853 = vmatprep.subr.bf16.mxu1 %v8469_v47  ;;  %v2589_v46 = vld [vmem:[%s13122_s3 + $0x2b8] sm:$0xff]  ;;  %v8508_v47 = vcombine.low %v2744_v33, %v2748_v0  ;;  %v8549_v33 = vcombine.high %v2784_v10, %v2788_v25 }
 0x2d0   :  { %7007 = vmatprep.subr.bf16.mxu0 %v8303_v58  ;;  %v8342_v58 = vcombine.low %v2577_v34, %v2581_v35  ;;  %v8351_v51 = vcombine.high %v2585_v44, %v2589_v46  ;;  %v2792_v34 = vld [vmem:[%s13122_s3 + $0x910] sm:$0xff] }
 0x2d1   :  { %v2796_v35 = vld [vmem:[%s13122_s3 + $0x930] sm:$0xff] }
 0x2d2   :  { %6854 = vmatpush1.bf16.msra.mxu1 %v8468_v54  ;;  %v2593_v54 = vld [vmem:[%s13122_s3 + $0x2d8] sm:$0xff] }
 0x2d3   :  { %7008 = vmatpush1.bf16.msra.mxu0 %v8302_v17  ;;  %6855 = vmatprep.subr.bf16.mxu1 %v8477_v55  ;;  %v2597_v17 = vld [vmem:[%s13122_s3 + $0x2f8] sm:$0xff]  ;;  %v8516_v55 = vcombine.low %v2752_v41, %v2756_v42  ;;  %v8557_v41 = vcombine.high %v2792_v34, %v2796_v35 }
 0x2d4   :  { %7009 = vmatprep.subr.bf16.mxu0 %v8311_v57  ;;  %v8350_v57 = vcombine.low %v2585_v44, %v2589_v46  ;;  %v8359_v60 = vcombine.high %v2593_v54, %v2597_v17  ;;  %v2800_v44 = vld [vmem:[%s13122_s3 + $0x950] sm:$0xff] }
 0x2d5   :  { %v2804_v46 = vld [vmem:[%s13122_s3 + $0x970] sm:$0xff] }
 0x2d6   :  { %6856 = vmatpush1.bf16.msra.mxu1 %v8476_v6  ;;  %v2601_v6 = vld [vmem:[%s13122_s3 + $0x318] sm:$0xff] }
 0x2d7   :  { %7010 = vmatpush1.bf16.msra.mxu0 %v8310_v61  ;;  %6857 = vmatprep.subr.bf16.mxu1 %v8485_v62  ;;  %v2605_v61 = vld [vmem:[%s13122_s3 + $0x338] sm:$0xff]  ;;  %v8524_v62 = vcombine.low %v2760_v52, %v2764_v53  ;;  %v8565_v52 = vcombine.high %v2800_v44, %v2804_v46 }
 0x2d8   :  { %7011 = vmatprep.subr.bf16.mxu0 %v8319_v11  ;;  %v8358_v11 = vcombine.low %v2593_v54, %v2597_v17  ;;  %v8367_v12 = vcombine.high %v2601_v6, %v2605_v61  ;;  %v2808_v54 = vld [vmem:[%s13122_s3 + $0x990] sm:$0xff] }
 0x2d9   :  { %v2812_v17 = vld [vmem:[%s13122_s3 + $0x9b0] sm:$0xff] }
 0x2da   :  { %6858 = vmatpush1.bf16.msra.mxu1 %v8484_v63  ;;  %v2609_v63 = vld [vmem:[%s13122_s3 + $0x358] sm:$0xff] }
 0x2db   :  { %7012 = vmatpush1.bf16.msra.mxu0 %v8318_v18  ;;  %6859 = vmatprep.subr.bf16.mxu1 %v8493_v21  ;;  %v2613_v18 = vld [vmem:[%s13122_s3 + $0x378] sm:$0xff]  ;;  %v8532_v21 = vcombine.low %v2768_v1, %v2772_v3  ;;  %v8573_v1 = vcombine.high %v2808_v54, %v2812_v17 }
 0x2dc   :  { %7013 = vmatprep.subr.bf16.mxu0 %v8327_v7  ;;  %v8366_v7 = vcombine.low %v2601_v6, %v2605_v61  ;;  %v8375_v20 = vcombine.high %v2609_v63, %v2613_v18  ;;  %v2816_v6 = vld [vmem:[%s13122_s3 + $0x9d0] sm:$0xff] }
 0x2dd   :  { %v2820_v61 = vld [vmem:[%s13122_s3 + $0x9f0] sm:$0xff] }
 0x2de   :  { %6860 = vmatpush1.bf16.msra.mxu1 %v8492_v19  ;;  %v2617_v19 = vld [vmem:[%s13122_s3 + $0x398] sm:$0xff] }
 0x2df   :  { %7014 = vmatpush1.bf16.msra.mxu0 %v8326_v15  ;;  %6861 = vmatprep.subr.bf16.mxu1 %v8501_v28  ;;  %v2621_v15 = vld [vmem:[%s13122_s3 + $0x3b8] sm:$0xff]  ;;  %v8540_v28 = vcombine.low %v2776_v16, %v2780_v8  ;;  %v8581_v16 = vcombine.high %v2816_v6, %v2820_v61 }
 0x2e0   :  { %7015 = vmatprep.subr.bf16.mxu0 %v8335_v31  ;;  %v8374_v31 = vcombine.low %v2609_v63, %v2613_v18  ;;  %v8383_v0 = vcombine.high %v2617_v19, %v2621_v15  ;;  %v2824_v63 = vld [vmem:[%s13122_s3 + $0xa10] sm:$0xff] }
 0x2e1   :  { %v2828_v18 = vld [vmem:[%s13122_s3 + $0xa30] sm:$0xff] }
 0x2e2   :  { %6862 = vmatpush1.bf16.msra.mxu1 %v8500_v36  ;;  %v2625_v36 = vld [vmem:[%s13122_s3 + $0x3d8] sm:$0xff] }
 0x2e3   :  { %7016 = vmatpush1.bf16.msra.mxu0 %v8334_v37  ;;  %6863 = vmatprep.subr.bf16.mxu1 %v8509_v39  ;;  %v2629_v37 = vld [vmem:[%s13122_s3 + $0x3f8] sm:$0xff]  ;;  %v8548_v39 = vcombine.low %v2784_v10, %v2788_v25  ;;  %v2832_v10 = vld [vmem:[%s13122_s3 + $0xa50] sm:$0xff] }
 0x2e4   :  { %7017 = vmatprep.subr.bf16.mxu0 %v8343_v40  ;;  %v8382_v40 = vcombine.low %v2617_v19, %v2621_v15  ;;  %v8391_v42 = vcombine.high %v2625_v36, %v2629_v37  ;;  %v2836_v25 = vld [vmem:[%s13122_s3 + $0xa70] sm:$0xff]  ;;  %v2665_v19 = vld [vmem:[%s13122_s3 + $0x518] sm:$0xff] }
 0x2e5   :  { %v2669_v15 = vld [vmem:[%s13122_s3 + $0x538] sm:$0xff] }
 0x2e6   :  { %6864 = vmatpush1.bf16.msra.mxu1 %v8508_v47  ;;  %v2633_v47 = vld [vmem:[%s13122_s3 + $0x418] sm:$0xff] }
 0x2e7   :  { %7018 = vmatpush1.bf16.msra.mxu0 %v8342_v58  ;;  %6865 = vmatprep.subr.bf16.mxu1 %v8517_v50  ;;  %v2637_v58 = vld [vmem:[%s13122_s3 + $0x438] sm:$0xff]  ;;  %v8556_v50 = vcombine.low %v2792_v34, %v2796_v35  ;;  %v2840_v34 = vld [vmem:[%s13122_s3 + $0xa90] sm:$0xff] }
 0x2e8   :  { %7019 = vmatprep.subr.bf16.mxu0 %v8351_v51  ;;  %v8390_v51 = vcombine.low %v2625_v36, %v2629_v37  ;;  %v8399_v53 = vcombine.high %v2633_v47, %v2637_v58  ;;  %v2844_v35 = vld [vmem:[%s13122_s3 + $0xab0] sm:$0xff]  ;;  %v2673_v36 = vld [vmem:[%s13122_s3 + $0x558] sm:$0xff] }
 0x2e9   :  { %v2677_v37 = vld [vmem:[%s13122_s3 + $0x578] sm:$0xff] }
 0x2ea   :  { %6866 = vmatpush1.bf16.msra.mxu1 %v8516_v55  ;;  %v2641_v55 = vld [vmem:[%s13122_s3 + $0x458] sm:$0xff] }
 0x2eb   :  { %7020 = vmatpush1.bf16.msra.mxu0 %v8350_v57  ;;  %6876 = vmatprep.subr.bf16.mxu1 %v8525_v59  ;;  %v2645_v57 = vld [vmem:[%s13122_s3 + $0x478] sm:$0xff]  ;;  %v8564_v59 = vcombine.low %v2800_v44, %v2804_v46  ;;  %v2848_v44 = vld [vmem:[%s13122_s3 + $0xad0] sm:$0xff] }
 0x2ec   :  { %7021 = vmatprep.subr.bf16.mxu0 %v8359_v60  ;;  %v8398_v60 = vcombine.low %v2633_v47, %v2637_v58  ;;  %v8407_v3 = vcombine.high %v2641_v55, %v2645_v57  ;;  %v2852_v46 = vld [vmem:[%s13122_s3 + $0xaf0] sm:$0xff]  ;;  %v2681_v47 = vld [vmem:[%s13122_s3 + $0x598] sm:$0xff] }
 0x2ed   :  { %6868 = vmatmul.mubr.bf16.vlgmr.msra.gmra.mrb[12].mxu1 %v11115_v27  ;;  %v2685_v58 = vld [vmem:[%s13122_s3 + $0x5b8] sm:$0xff] }
 0x2ee   :  { %6877 = vmatpush1.bf16.msra.mxu1 %v8524_v62  ;;  %6908 = vmatprep.mubr.bf16.mxu1 %v11338_v24  ;;  %v2649_v62 = vld [vmem:[%s13122_s3 + $0x498] sm:$0xff] }
 0x2ef   :  { %7022 = vmatpush1.bf16.msra.mxu0 %v8358_v11  ;;  %6878 = vmatprep.subr.bf16.mxu1 %v8533_v4  ;;  %v2653_v11 = vld [vmem:[%s13122_s3 + $0x4b8] sm:$0xff]  ;;  %v8572_v4 = vcombine.low %v2808_v54, %v2812_v17  ;;  %v2856_v54 = vld [vmem:[%s13122_s3 + $0xb10] sm:$0xff] }
 0x2f0   :  { %7023 = vmatprep.subr.bf16.mxu0 %v8367_v12  ;;  %v8406_v12 = vcombine.low %v2641_v55, %v2645_v57  ;;  %v8415_v8 = vcombine.high %v2649_v62, %v2653_v11  ;;  %v2860_v17 = vld [vmem:[%s13122_s3 + $0xb30] sm:$0xff]  ;;  %v2689_v55 = vld [vmem:[%s13122_s3 + $0x5d8] sm:$0xff] }
 0x2f1   :  { %v2693_v57 = vld [vmem:[%s13122_s3 + $0x5f8] sm:$0xff] }
 0x2f2   :  { %6879 = vmatpush1.bf16.msra.mxu1 %v8532_v21  ;;  %v8580_v21 = vcombine.low %v2816_v6, %v2820_v61  ;;  %v2864_v6 = vld [vmem:[%s13122_s3 + $0xb50] sm:$0xff] }
 0x2f3   :  { %7024 = vmatpush1.bf16.msra.mxu0 %v8366_v7  ;;  %6880 = vmatprep.subr.bf16.mxu1 %v8541_v23  ;;  %v8414_v7 = vcombine.low %v2649_v62, %v2653_v11  ;;  %v8589_v23 = vcombine.high %v2824_v63, %v2828_v18  ;;  %v2868_v61 = vld [vmem:[%s13122_s3 + $0xb70] sm:$0xff]  ;;  %v2697_v62 = vld [vmem:[%s13122_s3 + $0x618] sm:$0xff] }
 0x2f4   :  { %7025 = vmatprep.subr.bf16.mxu0 %v8375_v20  ;;  %v2701_v11 = vld [vmem:[%s13122_s3 + $0x638] sm:$0xff] }
 0x2f6   :  { %6881 = vmatpush1.bf16.msra.mxu1 %v8540_v28  ;;  %v8588_v28 = vcombine.low %v2824_v63, %v2828_v18  ;;  %v2872_v63 = vld [vmem:[%s13122_s3 + $0xb90] sm:$0xff] }
 0x2f7   :  { %7026 = vmatpush1.bf16.msra.mxu0 %v8374_v31  ;;  %6882 = vmatprep.subr.bf16.mxu1 %v8549_v33  ;;  %v8597_v33 = vcombine.high %v2832_v10, %v2836_v25  ;;  %v2876_v18 = vld [vmem:[%s13122_s3 + $0xbb0] sm:$0xff] }
 0x2f8   :  { %7027 = vmatprep.subr.bf16.mxu0 %v8383_v0  ;;  %v8431_v0 = vcombine.high %v2665_v19, %v2669_v15 }
 0x2fa   :  { %6883 = vmatpush1.bf16.msra.mxu1 %v8548_v39  ;;  %v8596_v39 = vcombine.low %v2832_v10, %v2836_v25  ;;  %v2880_v10 = vld [vmem:[%s13122_s3 + $0xbd0] sm:$0xff] }
 0x2fb   :  { %7028 = vmatpush1.bf16.msra.mxu0 %v8382_v40  ;;  %6884 = vmatprep.subr.bf16.mxu1 %v8557_v41  ;;  %v8430_v40 = vcombine.low %v2665_v19, %v2669_v15  ;;  %v8605_v41 = vcombine.high %v2840_v34, %v2844_v35  ;;  %v2884_v25 = vld [vmem:[%s13122_s3 + $0xbf0] sm:$0xff]  ;;  %v2713_v19 = vld [vmem:[%s13122_s3 + $0x698] sm:$0xff] }
 0x2fc   :  { %7029 = vmatprep.subr.bf16.mxu0 %v8391_v42  ;;  %v8439_v42 = vcombine.high %v2673_v36, %v2677_v37  ;;  %v2717_v15 = vld [vmem:[%s13122_s3 + $0x6b8] sm:$0xff] }
 0x2fe   :  { %6885 = vmatpush1.bf16.msra.mxu1 %v8556_v50  ;;  %v8604_v50 = vcombine.low %v2840_v34, %v2844_v35  ;;  %v2888_v34 = vld [vmem:[%s13122_s3 + $0xc10] sm:$0xff] }
 0x2ff   :  { %7030 = vmatpush1.bf16.msra.mxu0 %v8390_v51  ;;  %6886 = vmatprep.subr.bf16.mxu1 %v8565_v52  ;;  %v8438_v51 = vcombine.low %v2673_v36, %v2677_v37  ;;  %v8613_v52 = vcombine.high %v2848_v44, %v2852_v46  ;;  %v2892_v35 = vld [vmem:[%s13122_s3 + $0xc30] sm:$0xff]  ;;  %v2721_v36 = vld [vmem:[%s13122_s3 + $0x6d8] sm:$0xff] }
 0x300   :  { %7040 = vmatprep.subr.bf16.mxu0 %v8399_v53  ;;  %v8447_v53 = vcombine.high %v2681_v47, %v2685_v58  ;;  %v2725_v37 = vld [vmem:[%s13122_s3 + $0x6f8] sm:$0xff] }
 0x302   :  { %6887 = vmatpush1.bf16.msra.mxu1 %v8564_v59  ;;  %7032 = vmatmul.mubr.bf16.vlgmr.msra.gmra.mrb[16].mxu0 %v10896_v2  ;;  %v2657_v2 = vld [vmem:[%s13122_s3 + $0x4d8] sm:$0xff]  ;;  %v8612_v59 = vcombine.low %v2848_v44, %v2852_v46  ;;  %v2896_v44 = vld [vmem:[%s13122_s3 + $0xc50] sm:$0xff] }
 0x303   :  { %7041 = vmatpush1.bf16.msra.mxu0 %v8398_v60  ;;  %7072 = vmatprep.mubr.bf16.mxu0 %v10901_v5  ;;  %v2661_v5 = vld [vmem:[%s13122_s3 + $0x4f8] sm:$0xff]  ;;  %v8446_v60 = vcombine.low %v2681_v47, %v2685_v58  ;;  %v2900_v46 = vld [vmem:[%s13122_s3 + $0xc70] sm:$0xff] }
 0x304   :  { %6888 = vmatprep.subr.bf16.mxu1 %v8573_v1  ;;  %7042 = vmatprep.subr.bf16.mxu0 %v8407_v3  ;;  %v8423_v20 = vcombine.high %v2657_v2, %v2661_v5  ;;  %v8422_v31 = vcombine.low %v2657_v2, %v2661_v5  ;;  %v8621_v1 = vcombine.high %v2856_v54, %v2860_v17  ;;  %v2705_v2 = vld [vmem:[%s13122_s3 + $0x658] sm:$0xff] }
 0x305   :  { %v8455_v3 = vcombine.high %v2689_v55, %v2693_v57  ;;  %v2709_v5 = vld [vmem:[%s13122_s3 + $0x678] sm:$0xff] }
 0x306   :  { %6889 = vmatpush1.bf16.msra.mxu1 %v8572_v4  ;;  %v8620_v4 = vcombine.low %v2856_v54, %v2860_v17  ;;  %v2729_v47 = vld [vmem:[%s13122_s3 + $0x718] sm:$0xff]  ;;  %v2904_v54 = vld [vmem:[%s13122_s3 + $0xc90] sm:$0xff] }
 0x307   :  { %7043 = vmatpush1.bf16.msra.mxu0 %v8406_v12  ;;  %6890 = vmatprep.subr.bf16.mxu1 %v8581_v16  ;;  %v8454_v12 = vcombine.low %v2689_v55, %v2693_v57  ;;  %v8629_v16 = vcombine.high %v2864_v6, %v2868_v61  ;;  %v2733_v58 = vld [vmem:[%s13122_s3 + $0x738] sm:$0xff]  ;;  %v2908_v17 = vld [vmem:[%s13122_s3 + $0xcb0] sm:$0xff] }
 0x308   :  { %7044 = vmatprep.subr.bf16.mxu0 %v8415_v8  ;;  %v8463_v8 = vcombine.high %v2697_v62, %v2701_v11  ;;  %v2737_v55 = vld [vmem:[%s13122_s3 + $0x758] sm:$0xff] }
 0x309   :  { %v2741_v57 = vld [vmem:[%s13122_s3 + $0x778] sm:$0xff] }
 0x30a   :  { %6891 = vmatpush1.bf16.msra.mxu1 %v8580_v21  ;;  %v8628_v21 = vcombine.low %v2864_v6, %v2868_v61  ;;  %v2912_v6 = vld [vmem:[%s13122_s3 + $0xcd0] sm:$0xff] }
 0x30b   :  { %7045 = vmatpush1.bf16.msra.mxu0 %v8414_v7  ;;  %6892 = vmatprep.subr.bf16.mxu1 %v8589_v23  ;;  %v8462_v7 = vcombine.low %v2697_v62, %v2701_v11  ;;  %v8637_v23 = vcombine.high %v2872_v63, %v2876_v18  ;;  %v2916_v61 = vld [vmem:[%s13122_s3 + $0xcf0] sm:$0xff]  ;;  %v2745_v62 = vld [vmem:[%s13122_s3 + $0x798] sm:$0xff] }
 0x30c   :  { %7046 = vmatprep.subr.bf16.mxu0 %v8423_v20  ;;  %v8471_v20 = vcombine.high %v2705_v2, %v2709_v5  ;;  %v2749_v11 = vld [vmem:[%s13122_s3 + $0x7b8] sm:$0xff] }
 0x30e   :  { %6893 = vmatpush1.bf16.msra.mxu1 %v8588_v28  ;;  %v8636_v28 = vcombine.low %v2872_v63, %v2876_v18  ;;  %v2920_v63 = vld [vmem:[%s13122_s3 + $0xd10] sm:$0xff] }
 0x30f   :  { %7047 = vmatpush1.bf16.msra.mxu0 %v8422_v31  ;;  %6894 = vmatprep.subr.bf16.mxu1 %v8597_v33  ;;  %v8470_v31 = vcombine.low %v2705_v2, %v2709_v5  ;;  %v8645_v33 = vcombine.high %v2880_v10, %v2884_v25  ;;  %v2924_v18 = vld [vmem:[%s13122_s3 + $0xd30] sm:$0xff]  ;;  %v2753_v2 = vld [vmem:[%s13122_s3 + $0x7d8] sm:$0xff] }
 0x310   :  { %7048 = vmatprep.subr.bf16.mxu0 %v8431_v0  ;;  %v8479_v0 = vcombine.high %v2713_v19, %v2717_v15  ;;  %v2757_v5 = vld [vmem:[%s13122_s3 + $0x7f8] sm:$0xff] }
 0x312   :  { %6895 = vmatpush1.bf16.msra.mxu1 %v8596_v39  ;;  %v8644_v39 = vcombine.low %v2880_v10, %v2884_v25  ;;  %v2928_v10 = vld [vmem:[%s13122_s3 + $0xd50] sm:$0xff] }
 0x313   :  { %7049 = vmatpush1.bf16.msra.mxu0 %v8430_v40  ;;  %6896 = vmatprep.subr.bf16.mxu1 %v8605_v41  ;;  %v8478_v40 = vcombine.low %v2713_v19, %v2717_v15  ;;  %v8653_v41 = vcombine.high %v2888_v34, %v2892_v35  ;;  %v2932_v25 = vld [vmem:[%s13122_s3 + $0xd70] sm:$0xff]  ;;  %v2761_v19 = vld [vmem:[%s13122_s3 + $0x818] sm:$0xff] }
 0x314   :  { %7050 = vmatprep.subr.bf16.mxu0 %v8439_v42  ;;  %v8487_v42 = vcombine.high %v2721_v36, %v2725_v37  ;;  %v2765_v15 = vld [vmem:[%s13122_s3 + $0x838] sm:$0xff] }
 0x316   :  { %6897 = vmatpush1.bf16.msra.mxu1 %v8604_v50  ;;  %v8652_v50 = vcombine.low %v2888_v34, %v2892_v35  ;;  %v2936_v34 = vld [vmem:[%s13122_s3 + $0xd90] sm:$0xff] }
 0x317   :  { %7051 = vmatpush1.bf16.msra.mxu0 %v8438_v51  ;;  %6898 = vmatprep.subr.bf16.mxu1 %v8613_v52  ;;  %v8486_v51 = vcombine.low %v2721_v36, %v2725_v37  ;;  %v8661_v52 = vcombine.high %v2896_v44, %v2900_v46  ;;  %v2940_v35 = vld [vmem:[%s13122_s3 + $0xdb0] sm:$0xff]  ;;  %v2769_v36 = vld [vmem:[%s13122_s3 + $0x858] sm:$0xff] }
 0x318   :  { %7052 = vmatprep.subr.bf16.mxu0 %v8447_v53  ;;  %v8495_v53 = vcombine.high %v2729_v47, %v2733_v58  ;;  %v2773_v37 = vld [vmem:[%s13122_s3 + $0x878] sm:$0xff] }
 0x31a   :  { %6899 = vmatpush1.bf16.msra.mxu1 %v8612_v59  ;;  %v8660_v59 = vcombine.low %v2896_v44, %v2900_v46  ;;  %v8535_v44 = vcombine.high %v2769_v36, %v2773_v37  ;;  %v2944_v46 = vld [vmem:[%s13122_s3 + $0xdd0] sm:$0xff] }
 0x31b   :  { %7053 = vmatpush1.bf16.msra.mxu0 %v8446_v60  ;;  %6900 = vmatprep.subr.bf16.mxu1 %v8621_v1  ;;  %v8494_v60 = vcombine.low %v2729_v47, %v2733_v58  ;;  %v8669_v1 = vcombine.high %v2904_v54, %v2908_v17  ;;  %v2948_v47 = vld [vmem:[%s13122_s3 + $0xdf0] sm:$0xff] }
 0x31c   :  { %7054 = vmatprep.subr.bf16.mxu0 %v8455_v3  ;;  %v8503_v3 = vcombine.high %v2737_v55, %v2741_v57 }
 0x31e   :  { %6901 = vmatpush1.bf16.msra.mxu1 %v8620_v4  ;;  %v8668_v4 = vcombine.low %v2904_v54, %v2908_v17  ;;  %v8534_v17 = vcombine.low %v2769_v36, %v2773_v37  ;;  %v2984_v36 = vld [vmem:[%s13122_s3 + $0xf10] sm:$0xff] }
 0x31f   :  { %7055 = vmatpush1.bf16.msra.mxu0 %v8454_v12  ;;  %6902 = vmatprep.subr.bf16.mxu1 %v8629_v16  ;;  %v8502_v12 = vcombine.low %v2737_v55, %v2741_v57  ;;  %v8677_v16 = vcombine.high %v2912_v6, %v2916_v61  ;;  %v8709_v55 = vcombine.high %v2944_v46, %v2948_v47  ;;  %v2988_v37 = vld [vmem:[%s13122_s3 + $0xf30] sm:$0xff] }
 0x320   :  { %7056 = vmatprep.subr.bf16.mxu0 %v8463_v8  ;;  %v8511_v8 = vcombine.high %v2745_v62, %v2749_v11 }
 0x322   :  { %6903 = vmatpush1.bf16.msra.mxu1 %v8628_v21  ;;  %v8676_v21 = vcombine.low %v2912_v6, %v2916_v61 }
 0x323   :  { %7057 = vmatpush1.bf16.msra.mxu0 %v8462_v7  ;;  %6904 = vmatprep.subr.bf16.mxu1 %v8637_v23  ;;  %v8510_v7 = vcombine.low %v2745_v62, %v2749_v11  ;;  %v8685_v23 = vcombine.high %v2920_v63, %v2924_v18  ;;  %v2960_v62 = vld [vmem:[%s13122_s3 + $0xe50] sm:$0xff] }
 0x324   :  { %7058 = vmatprep.subr.bf16.mxu0 %v8471_v20  ;;  %v8519_v20 = vcombine.high %v2753_v2, %v2757_v5  ;;  %v2964_v11 = vld [vmem:[%s13122_s3 + $0xe70] sm:$0xff] }
 0x326   :  { %6905 = vmatpush1.bf16.msra.mxu1 %v8636_v28  ;;  %v8684_v28 = vcombine.low %v2920_v63, %v2924_v18  ;;  %v8725_v63 = vcombine.high %v2960_v62, %v2964_v11 }
 0x327   :  { %7059 = vmatpush1.bf16.msra.mxu0 %v8470_v31  ;;  %6906 = vmatprep.subr.bf16.mxu1 %v8645_v33  ;;  %v8518_v31 = vcombine.low %v2753_v2, %v2757_v5  ;;  %v8693_v33 = vcombine.high %v2928_v10, %v2932_v25  ;;  %v2968_v2 = vld [vmem:[%s13122_s3 + $0xe90] sm:$0xff] }
 0x328   :  { %7060 = vmatprep.subr.bf16.mxu0 %v8479_v0  ;;  %v8527_v0 = vcombine.high %v2761_v19, %v2765_v15  ;;  %v2972_v5 = vld [vmem:[%s13122_s3 + $0xeb0] sm:$0xff] }
 0x32a   :  { %6907 = vmatpush1.bf16.msra.mxu1 %v8644_v39  ;;  %v8692_v39 = vcombine.low %v2928_v10, %v2932_v25  ;;  %v8733_v10 = vcombine.high %v2968_v2, %v2972_v5 }
 0x32b   :  { %7061 = vmatpush1.bf16.msra.mxu0 %v8478_v40  ;;  %6917 = vmatprep.subr.bf16.mxu1 %v8653_v41  ;;  %v8526_v40 = vcombine.low %v2761_v19, %v2765_v15  ;;  %v2976_v19 = vld [vmem:[%s13122_s3 + $0xed0] sm:$0xff] }
 0x32c   :  { %7062 = vmatprep.subr.bf16.mxu0 %v8487_v42  ;;  %v8701_v42 = vcombine.high %v2936_v34, %v2940_v35  ;;  %v2980_v15 = vld [vmem:[%s13122_s3 + $0xef0] sm:$0xff] }
 0x32d   :  { %6909 = vmatmul.mubr.bf16.vlgmr.msra.gmra.mrb[12].mxu1 %v11340_v29 }
 0x32e   :  { %6918 = vmatpush1.bf16.msra.mxu1 %v8652_v50  ;;  %6949 = vmatprep.mubr.bf16.mxu1 %v11342_v32  ;;  %v2777_v50 = vld [vmem:[%s13122_s3 + $0x898] sm:$0xff] }
 0x32f   :  { %7063 = vmatpush1.bf16.msra.mxu0 %v8486_v51  ;;  %6919 = vmatprep.subr.bf16.mxu1 %v8661_v52  ;;  %v2781_v51 = vld [vmem:[%s13122_s3 + $0x8b8] sm:$0xff] }
 0x330   :  { %7064 = vmatprep.subr.bf16.mxu0 %v8495_v53  ;;  %v8700_v53 = vcombine.low %v2936_v34, %v2940_v35  ;;  %v8543_v57 = vcombine.high %v2777_v50, %v2781_v51  ;;  %v8741_v34 = vcombine.high %v2976_v19, %v2980_v15 }
 0x332   :  { %6920 = vmatpush1.bf16.msra.mxu1 %v8660_v59  ;;  %v2952_v59 = vld [vmem:[%s13122_s3 + $0xe10] sm:$0xff] }
 0x333   :  { %7065 = vmatpush1.bf16.msra.mxu0 %v8494_v60  ;;  %6921 = vmatprep.subr.bf16.mxu1 %v8669_v1  ;;  %v2956_v60 = vld [vmem:[%s13122_s3 + $0xe30] sm:$0xff]  ;;  %v8708_v1 = vcombine.low %v2944_v46, %v2948_v47  ;;  %v8749_v46 = vcombine.high %v2984_v36, %v2988_v37 }
 0x334   :  { %7066 = vmatprep.subr.bf16.mxu0 %v8503_v3  ;;  %v8542_v3 = vcombine.low %v2777_v50, %v2781_v51  ;;  %v8717_v6 = vcombine.high %v2952_v59, %v2956_v60  ;;  %v2992_v50 = vld [vmem:[%s13122_s3 + $0xf50] sm:$0xff] }
 0x335   :  { %v2996_v51 = vld [vmem:[%s13122_s3 + $0xf70] sm:$0xff] }
 0x336   :  { %6922 = vmatpush1.bf16.msra.mxu1 %v8668_v4  ;;  %v2793_v4 = vld [vmem:[%s13122_s3 + $0x918] sm:$0xff] }
 0x337   :  { %7067 = vmatpush1.bf16.msra.mxu0 %v8502_v12  ;;  %6923 = vmatprep.subr.bf16.mxu1 %v8677_v16  ;;  %v2797_v12 = vld [vmem:[%s13122_s3 + $0x938] sm:$0xff]  ;;  %v8716_v16 = vcombine.low %v2952_v59, %v2956_v60  ;;  %v3000_v59 = vld [vmem:[%s13122_s3 + $0xf90] sm:$0xff] }
 0x338   :  { %7068 = vmatprep.subr.bf16.mxu0 %v8511_v8  ;;  %v8559_v18 = vcombine.high %v2793_v4, %v2797_v12  ;;  %v3004_v60 = vld [vmem:[%s13122_s3 + $0xfb0] sm:$0xff] }
 0x33a   :  { %6924 = vmatpush1.bf16.msra.mxu1 %v8676_v21  ;;  %v2801_v21 = vld [vmem:[%s13122_s3 + $0x958] sm:$0xff] }
 0x33b   :  { %7069 = vmatpush1.bf16.msra.mxu0 %v8510_v7  ;;  %6925 = vmatprep.subr.bf16.mxu1 %v8685_v23  ;;  %v2805_v7 = vld [vmem:[%s13122_s3 + $0x978] sm:$0xff]  ;;  %v8724_v23 = vcombine.low %v2960_v62, %v2964_v11  ;;  %v3008_v62 = vld [vmem:[%s13122_s3 + $0xfd0] sm:$0xff] }
 0x33c   :  { %7070 = vmatprep.subr.bf16.mxu0 %v8519_v20  ;;  %v8558_v20 = vcombine.low %v2793_v4, %v2797_v12  ;;  %v8567_v25 = vcombine.high %v2801_v21, %v2805_v7  ;;  %v3012_v11 = vld [vmem:[%s13122_s3 + $0xff0] sm:$0xff]  ;;  %v2841_v4 = vld [vmem:[%s13122_s3 + $0xa98] sm:$0xff] }
 0x33d   :  { %v2845_v12 = vld [vmem:[%s13122_s3 + $0xab8] sm:$0xff] }
 0x33e   :  { %6926 = vmatpush1.bf16.msra.mxu1 %v8684_v28  ;;  %v2809_v28 = vld [vmem:[%s13122_s3 + $0x998] sm:$0xff] }
 0x33f   :  { %7071 = vmatpush1.bf16.msra.mxu0 %v8518_v31  ;;  %6927 = vmatprep.subr.bf16.mxu1 %v8693_v33  ;;  %v2813_v31 = vld [vmem:[%s13122_s3 + $0x9b8] sm:$0xff]  ;;  %v8732_v33 = vcombine.low %v2968_v2, %v2972_v5  ;;  %v3016_v2 = vld [vmem:[%s13122_s3 + $0x1010] sm:$0xff] }
 0x340   :  { %v12409_v41 = vpop.f32.mrb[8].mxu1  ;;  %7081 = vmatprep.subr.bf16.mxu0 %v8527_v0  ;;  %v8566_v0 = vcombine.low %v2801_v21, %v2805_v7  ;;  %v8575_v35 = vcombine.high %v2809_v28, %v2813_v31  ;;  %v3020_v5 = vld [vmem:[%s13122_s3 + $0x1030] sm:$0xff]  ;;  %v2849_v21 = vld [vmem:[%s13122_s3 + $0xad8] sm:$0xff] }
 0x341   :  { %v12417_v58 = vpop.f32.mrb[9].mxu1  ;;  %v2853_v7 = vld [vmem:[%s13122_s3 + $0xaf8] sm:$0xff] }
 0x342   :  { %6928 = vmatpush1.bf16.msra.mxu1 %v8692_v39  ;;  %v6586_v52 = vpop.f32.mrb[10].mxu1  ;;  %7073 = vmatmul.mubr.bf16.vlgmr.msra.gmra.mrb[16].mxu0 %v11115_v27  ;;  %v2785_v27 = vld [vmem:[%s13122_s3 + $0x8d8] sm:$0xff] }
 0x343   :  { %v6587_v54 = vpop.f32.mrb[11].mxu1  ;;  %7082 = vmatpush1.bf16.msra.mxu0 %v8526_v40  ;;  %7113 = vmatprep.mubr.bf16.mxu0 %v11338_v24  ;;  %v2789_v24 = vld [vmem:[%s13122_s3 + $0x8f8] sm:$0xff] }
 0x344   :  { %6929 = vmatprep.subr.bf16.mxu1 %v8701_v42  ;;  %7083 = vmatprep.subr.bf16.mxu0 %v8535_v44  ;;  %v8551_v61 = vcombine.high %v2785_v27, %v2789_v24  ;;  %v8550_v8 = vcombine.low %v2785_v27, %v2789_v24  ;;  %v2817_v39 = vld [vmem:[%s13122_s3 + $0x9d8] sm:$0xff]  ;;  %v8740_v42 = vcombine.low %v2976_v19, %v2980_v15  ;;  %v3024_v19 = vld [vmem:[%s13122_s3 + $0x1050] sm:$0xff] }
 0x345   :  { %v2821_v40 = vld [vmem:[%s13122_s3 + $0x9f8] sm:$0xff]  ;;  %v8574_v44 = vcombine.low %v2809_v28, %v2813_v31  ;;  %v8748_v54 = vcombine.low %v2984_v36, %v2988_v37  ;;  %v3028_v15 = vld [vmem:[%s13122_s3 + $0x1070] sm:$0xff] }
 0x346   :  { %6930 = vmatpush1.bf16.msra.mxu1 %v8700_v53  ;;  %v8583_v47 = vcombine.high %v2817_v39, %v2821_v40  ;;  %v2825_v52 = vld [vmem:[%s13122_s3 + $0xa18] sm:$0xff]  ;;  %v3032_v36 = vld [vmem:[%s13122_s3 + $0x1090] sm:$0xff] }
 0x347   :  { %7084 = vmatpush1.bf16.msra.mxu0 %v8534_v17  ;;  %6931 = vmatprep.subr.bf16.mxu1 %v8709_v55  ;;  %v2829_v53 = vld [vmem:[%s13122_s3 + $0xa38] sm:$0xff]  ;;  %v8582_v17 = vcombine.low %v2817_v39, %v2821_v40  ;;  %v8757_v55 = vcombine.high %v2992_v50, %v2996_v51  ;;  %v3036_v37 = vld [vmem:[%s13122_s3 + $0x10b0] sm:$0xff] }
 0x348   :  { %7085 = vmatprep.subr.bf16.mxu0 %v8543_v57  ;;  %v8591_v57 = vcombine.high %v2825_v52, %v2829_v53  ;;  %v2833_v27 = vld [vmem:[%s13122_s3 + $0xa58] sm:$0xff] }
 0x349   :  { %v2837_v24 = vld [vmem:[%s13122_s3 + $0xa78] sm:$0xff] }
 0x34a   :  { %6932 = vmatpush1.bf16.msra.mxu1 %v8708_v1  ;;  %v8756_v1 = vcombine.low %v2992_v50, %v2996_v51  ;;  %v2857_v28 = vld [vmem:[%s13122_s3 + $0xb18] sm:$0xff]  ;;  %v3040_v50 = vld [vmem:[%s13122_s3 + $0x10d0] sm:$0xff] }
 0x34b   :  { %7086 = vmatpush1.bf16.msra.mxu0 %v8542_v3  ;;  %6933 = vmatprep.subr.bf16.mxu1 %v8717_v6  ;;  %v8590_v3 = vcombine.low %v2825_v52, %v2829_v53  ;;  %v8765_v6 = vcombine.high %v3000_v59, %v3004_v60  ;;  %v2861_v31 = vld [vmem:[%s13122_s3 + $0xb38] sm:$0xff]  ;;  %v3044_v51 = vld [vmem:[%s13122_s3 + $0x10f0] sm:$0xff] }
 0x34c   :  { %7087 = vmatprep.subr.bf16.mxu0 %v8551_v61  ;;  %v8599_v61 = vcombine.high %v2833_v27, %v2837_v24  ;;  %v2865_v39 = vld [vmem:[%s13122_s3 + $0xb58] sm:$0xff] }
 0x34d   :  { %v2869_v40 = vld [vmem:[%s13122_s3 + $0xb78] sm:$0xff] }
 0x34e   :  { %6934 = vmatpush1.bf16.msra.mxu1 %v8716_v16  ;;  %v8764_v16 = vcombine.low %v3000_v59, %v3004_v60  ;;  %v2873_v52 = vld [vmem:[%s13122_s3 + $0xb98] sm:$0xff]  ;;  %v3048_v59 = vld [vmem:[%s13122_s3 + $0x1110] sm:$0xff] }
 0x34f   :  { %7088 = vmatpush1.bf16.msra.mxu0 %v8550_v8  ;;  %6935 = vmatprep.subr.bf16.mxu1 %v8725_v63  ;;  %v8598_v8 = vcombine.low %v2833_v27, %v2837_v24  ;;  %v8773_v63 = vcombine.high %v3008_v62, %v3012_v11  ;;  %v2877_v53 = vld [vmem:[%s13122_s3 + $0xbb8] sm:$0xff]  ;;  %v3052_v60 = vld [vmem:[%s13122_s3 + $0x1130] sm:$0xff] }
 0x350   :  { %7089 = vmatprep.subr.bf16.mxu0 %v8559_v18  ;;  %v8607_v18 = vcombine.high %v2841_v4, %v2845_v12  ;;  %v2881_v27 = vld [vmem:[%s13122_s3 + $0xbd8] sm:$0xff] }
 0x351   :  { %v2885_v24 = vld [vmem:[%s13122_s3 + $0xbf8] sm:$0xff] }
 0x352   :  { %6936 = vmatpush1.bf16.msra.mxu1 %v8724_v23  ;;  %v8772_v23 = vcombine.low %v3008_v62, %v3012_v11  ;;  %v3056_v62 = vld [vmem:[%s13122_s3 + $0x1150] sm:$0xff] }
 0x353   :  { %7090 = vmatpush1.bf16.msra.mxu0 %v8558_v20  ;;  %6937 = vmatprep.subr.bf16.mxu1 %v8733_v10  ;;  %v8606_v20 = vcombine.low %v2841_v4, %v2845_v12  ;;  %v8781_v10 = vcombine.high %v3016_v2, %v3020_v5  ;;  %v3060_v11 = vld [vmem:[%s13122_s3 + $0x1170] sm:$0xff]  ;;  %v2889_v4 = vld [vmem:[%s13122_s3 + $0xc18] sm:$0xff] }
 0x354   :  { %7091 = vmatprep.subr.bf16.mxu0 %v8567_v25  ;;  %v8615_v25 = vcombine.high %v2849_v21, %v2853_v7  ;;  %v2893_v12 = vld [vmem:[%s13122_s3 + $0xc38] sm:$0xff] }
 0x356   :  { %6938 = vmatpush1.bf16.msra.mxu1 %v8732_v33  ;;  %v8780_v33 = vcombine.low %v3016_v2, %v3020_v5  ;;  %v3064_v2 = vld [vmem:[%s13122_s3 + $0x1190] sm:$0xff] }
 0x357   :  { %7092 = vmatpush1.bf16.msra.mxu0 %v8566_v0  ;;  %6939 = vmatprep.subr.bf16.mxu1 %v8741_v34  ;;  %v8614_v0 = vcombine.low %v2849_v21, %v2853_v7  ;;  %v8789_v34 = vcombine.high %v3024_v19, %v3028_v15  ;;  %v3068_v5 = vld [vmem:[%s13122_s3 + $0x11b0] sm:$0xff]  ;;  %v2897_v21 = vld [vmem:[%s13122_s3 + $0xc58] sm:$0xff] }
 0x358   :  { %7093 = vmatprep.subr.bf16.mxu0 %v8575_v35  ;;  %v8623_v35 = vcombine.high %v2857_v28, %v2861_v31  ;;  %v2901_v7 = vld [vmem:[%s13122_s3 + $0xc78] sm:$0xff] }
 0x35a   :  { %6940 = vmatpush1.bf16.msra.mxu1 %v8740_v42  ;;  %v8788_v42 = vcombine.low %v3024_v19, %v3028_v15  ;;  %v3072_v19 = vld [vmem:[%s13122_s3 + $0x11d0] sm:$0xff] }
 0x35b   :  { %7094 = vmatpush1.bf16.msra.mxu0 %v8574_v44  ;;  %6941 = vmatprep.subr.bf16.mxu1 %v8749_v46  ;;  %v8622_v44 = vcombine.low %v2857_v28, %v2861_v31  ;;  %v8797_v46 = vcombine.high %v3032_v36, %v3036_v37  ;;  %v3076_v15 = vld [vmem:[%s13122_s3 + $0x11f0] sm:$0xff]  ;;  %v2905_v28 = vld [vmem:[%s13122_s3 + $0xc98] sm:$0xff] }
 0x35c   :  { %7095 = vmatprep.subr.bf16.mxu0 %v8583_v47  ;;  %v8631_v47 = vcombine.high %v2865_v39, %v2869_v40  ;;  %v2909_v31 = vld [vmem:[%s13122_s3 + $0xcb8] sm:$0xff] }
 0x35e   :  { %6942 = vmatpush1.bf16.msra.mxu1 %v8748_v54  ;;  %v8796_v54 = vcombine.low %v3032_v36, %v3036_v37  ;;  %v3080_v36 = vld [vmem:[%s13122_s3 + $0x1210] sm:$0xff] }
 0x35f   :  { %7096 = vmatpush1.bf16.msra.mxu0 %v8582_v17  ;;  %6943 = vmatprep.subr.bf16.mxu1 %v8757_v55  ;;  %v8630_v17 = vcombine.low %v2865_v39, %v2869_v40  ;;  %v8805_v55 = vcombine.high %v3040_v50, %v3044_v51  ;;  %v3084_v37 = vld [vmem:[%s13122_s3 + $0x1230] sm:$0xff]  ;;  %v8836_v39 = vcombine.low %v3072_v19, %v3076_v15 }
 0x360   :  { %7097 = vmatprep.subr.bf16.mxu0 %v8591_v57  ;;  %v8639_v57 = vcombine.high %v2873_v52, %v2877_v53  ;;  %v8670_v40 = vcombine.low %v2905_v28, %v2909_v31 }
 0x362   :  { %6944 = vmatpush1.bf16.msra.mxu1 %v8756_v1  ;;  %v8804_v1 = vcombine.low %v3040_v50, %v3044_v51  ;;  %v3092_v50 = vld [vmem:[%s13122_s3 + $0x1270] sm:$0xff]  ;;  %v2921_v51 = vld [vmem:[%s13122_s3 + $0xd18] sm:$0xff] }
 0x363   :  { %7098 = vmatpush1.bf16.msra.mxu0 %v8590_v3  ;;  %6945 = vmatprep.subr.bf16.mxu1 %v8765_v6  ;;  %v8638_v3 = vcombine.low %v2873_v52, %v2877_v53  ;;  %v8813_v6 = vcombine.high %v3048_v59, %v3052_v60  ;;  %v2925_v52 = vld [vmem:[%s13122_s3 + $0xd38] sm:$0xff]  ;;  %v8844_v53 = vcombine.low %v3080_v36, %v3084_v37 }
 0x364   :  { %7099 = vmatprep.subr.bf16.mxu0 %v8599_v61  ;;  %v8647_v61 = vcombine.high %v2881_v27, %v2885_v24 }
 0x366   :  { %6946 = vmatpush1.bf16.msra.mxu1 %v8764_v16  ;;  %v8812_v16 = vcombine.low %v3048_v59, %v3052_v60  ;;  %v3096_v59 = vld [vmem:[%s13122_s3 + $0x1290] sm:$0xff] }
 0x367   :  { %7100 = vmatpush1.bf16.msra.mxu0 %v8598_v8  ;;  %6947 = vmatprep.subr.bf16.mxu1 %v8773_v63  ;;  %v8646_v8 = vcombine.low %v2881_v27, %v2885_v24  ;;  %v8821_v63 = vcombine.high %v3056_v62, %v3060_v11  ;;  %v3100_v60 = vld [vmem:[%s13122_s3 + $0x12b0] sm:$0xff]  ;;  %v2929_v27 = vld [vmem:[%s13122_s3 + $0xd58] sm:$0xff] }
 0x368   :  { %7101 = vmatprep.subr.bf16.mxu0 %v8607_v18  ;;  %v8655_v18 = vcombine.high %v2889_v4, %v2893_v12 }
 0x36a   :  { %6948 = vmatpush1.bf16.msra.mxu1 %v8772_v23  ;;  %v8820_v23 = vcombine.low %v3056_v62, %v3060_v11  ;;  %v3104_v62 = vld [vmem:[%s13122_s3 + $0x12d0] sm:$0xff] }
 0x36b   :  { %7102 = vmatpush1.bf16.msra.mxu0 %v8606_v20  ;;  %6958 = vmatprep.subr.bf16.mxu1 %v8781_v10  ;;  %v8654_v20 = vcombine.low %v2889_v4, %v2893_v12  ;;  %v8829_v10 = vcombine.high %v3064_v2, %v3068_v5  ;;  %v3108_v11 = vld [vmem:[%s13122_s3 + $0x12f0] sm:$0xff]  ;;  %v2937_v4 = vld [vmem:[%s13122_s3 + $0xd98] sm:$0xff]  ;;  %v8860_v12 = vcombine.low %v3096_v59, %v3100_v60 }
 0x36c   :  { %7103 = vmatprep.subr.bf16.mxu0 %v8615_v25  ;;  %v8663_v25 = vcombine.high %v2897_v21, %v2901_v7 }
 0x36d   :  { %6950 = vmatmul.mubr.bf16.vlgmr.msra.gmra.mrb[12].mxu1 %v11552_v22 }
 0x36e   :  { %6959 = vmatpush1.bf16.msra.mxu1 %v8780_v33  ;;  %6990 = vmatprep.mubr.bf16.mxu1 %v11754_v26  ;;  %v8828_v33 = vcombine.low %v3064_v2, %v3068_v5  ;;  %v3112_v2 = vld [vmem:[%s13122_s3 + $0x1310] sm:$0xff] }
 0x36f   :  { %7104 = vmatpush1.bf16.msra.mxu0 %v8614_v0  ;;  %6960 = vmatprep.subr.bf16.mxu1 %v8789_v34  ;;  %v8662_v0 = vcombine.low %v2897_v21, %v2901_v7  ;;  %v8837_v34 = vcombine.high %v3072_v19, %v3076_v15  ;;  %v3116_v5 = vld [vmem:[%s13122_s3 + $0x1330] sm:$0xff]  ;;  %v2945_v7 = vld [vmem:[%s13122_s3 + $0xdd8] sm:$0xff] }
 0x370   :  { %7105 = vmatprep.subr.bf16.mxu0 %v8623_v35  ;;  %v8671_v35 = vcombine.high %v2905_v28, %v2909_v31  ;;  %v8877_v15 = vcombine.high %v3112_v2, %v3116_v5 }
 0x372   :  { %6961 = vmatpush1.bf16.msra.mxu1 %v8788_v42  ;;  %v8845_v42 = vcombine.high %v3080_v36, %v3084_v37  ;;  %v8876_v36 = vcombine.low %v3112_v2, %v3116_v5  ;;  %v9622_v5 = vld [vmem:[%s13124_s5 + $0x48] sm:$0xff]  }
 0x373   :  { %7106 = vmatpush1.bf16.msra.mxu0 %v8622_v44  ;;  %6962 = vmatprep.subr.bf16.mxu1 %v8797_v46  ;;  %v12638_v44 = vld [vmem:[%s13123_s4] sm:$0xff] }
 0x374   :  { %7107 = vmatprep.subr.bf16.mxu0 %v8631_v47  ;;  %v3088_v47 = vld [vmem:[%s13122_s3 + $0x1250] sm:$0xff] }
 0x375   :  { %v8852_v24 = vcombine.low %v3088_v47, %v3092_v50 }
 0x376   :  { %6963 = vmatpush1.bf16.msra.mxu1 %v8796_v54  ;;  %v3151_v54 = vrot.slane %v12638_v44, %v10835_v13  ;;  %v2933_v13 = vld [vmem:[%s13122_s3 + $0xd78] sm:$0xff] }
 0x377   :  { %7108 = vmatpush1.bf16.msra.mxu0 %v8630_v17  ;;  %6964 = vmatprep.subr.bf16.mxu1 %v8805_v55  ;;  %v8853_v55 = vcombine.high %v3088_v47, %v3092_v50 }
 0x378   :  { %7109 = vmatprep.subr.bf16.mxu0 %v8639_v57  ;;  %v8687_v57 = vcombine.high %v2921_v51, %v2925_v52 }
 0x37a   :  { %6965 = vmatpush1.bf16.msra.mxu1 %v8804_v1  ;;  %v12667_v1 = vadd.f32 %v12417_v58, %v3151_v54  ;;  %v2941_v58 = vld [vmem:[%s13122_s3 + $0xdb8] sm:$0xff]  ;;  %v3140_v54 = vld [vmem:[%s13122_s3 + $0x13f0] sm:$0xff] }
 0x37b   :  { %7110 = vmatpush1.bf16.msra.mxu0 %v8638_v3  ;;  %6966 = vmatprep.subr.bf16.mxu1 %v8813_v6  ;;  %v8686_v3 = vcombine.low %v2921_v51, %v2925_v52  ;;  %v8861_v6 = vcombine.high %v3096_v59, %v3100_v60  ;;  %v8702_v19 = vcombine.low %v2937_v4, %v2941_v58 }
 0x37c   :  { %7111 = vmatprep.subr.bf16.mxu0 %v8647_v61  ;;  %v8695_v61 = vcombine.high %v2929_v27, %v2933_v13 }
 0x37e   :  { %6967 = vmatpush1.bf16.msra.mxu1 %v8812_v16  ;;  %v7213_v16 = vmul.f32 0.70710677, %v12667_v1 }
 0x37f   :  { %7112 = vmatpush1.bf16.msra.mxu0 %v8646_v8  ;;  %6968 = vmatprep.subr.bf16.mxu1 %v8821_v63  ;;  %v8694_v8 = vcombine.low %v2929_v27, %v2933_v13  ;;  %v8869_v63 = vcombine.high %v3104_v62, %v3108_v11 }
 0x380   :  { %7122 = vmatprep.subr.bf16.mxu0 %v8655_v18  ;;  %v8703_v18 = vcombine.high %v2937_v4, %v2941_v58  ;;  %9703 = verf.f32 %v7213_v16  ;;  %v9620_v4 = vld [vmem:[%s13124_s5 + $0x40] sm:$0xff]   ;;  %v2985_v16 = vld [vmem:[%s13122_s3 + $0xf18] sm:$0xff] }
 0x382   :  { %6969 = vmatpush1.bf16.msra.mxu1 %v8820_v23  ;;  %7114 = vmatmul.mubr.bf16.vlgmr.msra.gmra.mrb[16].mxu0 %v11340_v29  ;;  %v2913_v29 = vld [vmem:[%s13122_s3 + $0xcd8] sm:$0xff] }
 0x383   :  { %7123 = vmatpush1.bf16.msra.mxu0 %v8654_v20  ;;  %7154 = vmatprep.mubr.bf16.mxu0 %v11342_v32  ;;  %v2917_v32 = vld [vmem:[%s13122_s3 + $0xcf8] sm:$0xff] }
 0x384   :  { %6970 = vmatprep.subr.bf16.mxu1 %v8829_v10  ;;  %7124 = vmatprep.subr.bf16.mxu0 %v8663_v25  ;;  %v8679_v46 = vcombine.high %v2913_v29, %v2917_v32  ;;  %v8678_v17 = vcombine.low %v2913_v29, %v2917_v32  ;;  %v2949_v23 = vld [vmem:[%s13122_s3 + $0xdf8] sm:$0xff]  ;;  %v8868_v10 = vcombine.low %v3104_v62, %v3108_v11 }
 0x385   :  { %v8711_v31 = vcombine.high %v2945_v7, %v2949_v23  ;;  %v8710_v37 = vcombine.low %v2945_v7, %v2949_v23 }
 0x386   :  { %6971 = vmatpush1.bf16.msra.mxu1 %v8828_v33  ;;  %v3120_v33 = vld [vmem:[%s13122_s3 + $0x1350] sm:$0xff] }
 0x387   :  { %7125 = vmatpush1.bf16.msra.mxu0 %v8662_v0  ;;  %6972 = vmatprep.subr.bf16.mxu1 %v8837_v34  ;;  %v3124_v0 = vld [vmem:[%s13122_s3 + $0x1370] sm:$0xff]  ;;  %v2953_v34 = vld [vmem:[%s13122_s3 + $0xe18] sm:$0xff] }
 0x388   :  { %7126 = vmatprep.subr.bf16.mxu0 %v8671_v35  ;;  %v2957_v35 = vld [vmem:[%s13122_s3 + $0xe38] sm:$0xff]  ;;  %v8885_v29 = vcombine.high %v3120_v33, %v3124_v0  ;;  %v8884_v47 = vcombine.low %v3120_v33, %v3124_v0  ;;  %v9625_v0 = vld [vmem:[%s13124_s5 + $0x10] sm:$0xff]  }
 0x389   :  { %v8719_v32 = vcombine.high %v2953_v34, %v2957_v35  ;;  %v8718_v50 = vcombine.low %v2953_v34, %v2957_v35  ;;  %v3005_v33 = vld [vmem:[%s13122_s3 + $0xfb8] sm:$0xff] }
 0x38a   :  { %6973 = vmatpush1.bf16.msra.mxu1 %v8836_v39  ;;  %v3128_v39 = vld [vmem:[%s13122_s3 + $0x1390] sm:$0xff] }
 0x38b   :  { %7127 = vmatpush1.bf16.msra.mxu0 %v8670_v40  ;;  %6974 = vmatprep.subr.bf16.mxu1 %v8845_v42  ;;  %v3132_v40 = vld [vmem:[%s13122_s3 + $0x13b0] sm:$0xff]  ;;  %v2961_v42 = vld [vmem:[%s13122_s3 + $0xe58] sm:$0xff] }
 0x38c   :  { %7128 = vmatprep.subr.bf16.mxu0 %v8679_v46  ;;  %v2965_v46 = vld [vmem:[%s13122_s3 + $0xe78] sm:$0xff]  ;;  %v8893_v51 = vcombine.high %v3128_v39, %v3132_v40  ;;  %v8892_v59 = vcombine.low %v3128_v39, %v3132_v40 }
 0x38d   :  { %v8727_v52 = vcombine.high %v2961_v42, %v2965_v46  ;;  %v8726_v60 = vcombine.low %v2961_v42, %v2965_v46  ;;  %v9627_v39 = vld [vmem:[%s13124_s5 + $0x18] sm:$0xff]   ;;  %v9628_v42 = vld [vmem:[%s13124_s5 + $0x60] sm:$0xff]  }
 0x38e   :  { %6975 = vmatpush1.bf16.msra.mxu1 %v8844_v53  ;;  %v3136_v53 = vld [vmem:[%s13122_s3 + $0x13d0] sm:$0xff] }
 0x38f   :  { %7129 = vmatpush1.bf16.msra.mxu0 %v8678_v17  ;;  %6976 = vmatprep.subr.bf16.mxu1 %v8853_v55  ;;  %v9704_v17 = vpop.eup %9703  ;;  %v2969_v55 = vld [vmem:[%s13122_s3 + $0xe98] sm:$0xff]  ;;  %v8901_v27 = vcombine.high %v3136_v53, %v3140_v54  ;;  %v8900_v62 = vcombine.low %v3136_v53, %v3140_v54  ;;  %v9630_v53 = vld [vmem:[%s13124_s5 + $0x68] sm:$0xff]  }
 0x390   :  { %7130 = vmatprep.subr.bf16.mxu0 %v8687_v57  ;;  %v2973_v57 = vld [vmem:[%s13122_s3 + $0xeb8] sm:$0xff]  ;;  %v7229_v13 = vadd.f32 1.0, %v9704_v17 }
 0x391   :  { %v8734_v11 = vcombine.low %v2969_v55, %v2973_v57  ;;  %v3025_v17 = vld [vmem:[%s13122_s3 + $0x1058] sm:$0xff] }
 0x392   :  { %6977 = vmatpush1.bf16.msra.mxu1 %v8852_v24  ;;  %v8735_v24 = vcombine.high %v2969_v55, %v2973_v57  ;;  %v3029_v55 = vld [vmem:[%s13122_s3 + $0x1078] sm:$0xff]  ;;  %v9631_v57 = vld [vmem:[%s13124_s5 + $0x28] sm:$0xff]  }
 0x393   :  { %7131 = vmatpush1.bf16.msra.mxu0 %v8686_v3  ;;  %6978 = vmatprep.subr.bf16.mxu1 %v8861_v6  ;;  %v2977_v3 = vld [vmem:[%s13122_s3 + $0xed8] sm:$0xff] }
 0x394   :  { %7132 = vmatprep.subr.bf16.mxu0 %v8695_v61  ;;  %v2981_v6 = vld [vmem:[%s13122_s3 + $0xef8] sm:$0xff]  ;;  %v7205_v61 = vmul.f32 0.5, %v12667_v1 }
 0x395   :  { %v12688_v21 = vpop.f32.mrb[12].mxu0  ;;  %v2989_v1 = vld [vmem:[%s13122_s3 + $0xf38] sm:$0xff]  ;;  %v8742_v2 = vcombine.low %v2977_v3, %v2981_v6 }
 0x396   :  { %6979 = vmatpush1.bf16.msra.mxu1 %v8860_v12  ;;  %v12696_v20 = vpop.f32.mrb[13].mxu0  ;;  %v7237_v58 = vmul.f32 %v7229_v13, %v7205_v61  ;;  %v8743_v12 = vcombine.high %v2977_v3, %v2981_v6  ;;  %v8751_v23 = vcombine.high %v2985_v16, %v2989_v1  ;;  %v8791_v13 = vcombine.high %v3025_v17, %v3029_v55  ;;  %v3033_v3 = vld [vmem:[%s13122_s3 + $0x1098] sm:$0xff]  ;;  %v9633_v61 = vld [vmem:[%s13124_s5 + $0x30] sm:$0xff]  }
 0x397   :  { %v6791_v25 = vpop.f32.mrb[14].mxu0  ;;  %7133 = vmatpush1.bf16.msra.mxu0 %v8694_v8  ;;  %6980 = vmatprep.subr.bf16.mxu1 %v8869_v63  ;;  %v3147_v8 = vrot.slane %v12638_v44, %v10824_v9  ;;  %v9621_v63 = vld [vmem:[%s13124_s5] sm:$0xff]   ;;  %v2993_v9 = vld [vmem:[%s13122_s3 + $0xf58] sm:$0xff] }
 0x398   :  { %v6792_v28 = vpop.f32.mrb[15].mxu0  ;;  %7134 = vmatprep.subr.bf16.mxu0 %v8703_v18  ;;  %v3159_v18 = vrot.slane %v12638_v44, %v367_v14  ;;  %v7245_v7 = vpack.c.bf16 %v7237_v58, %v7237_v58  ;;  %v2997_v14 = vld [vmem:[%s13122_s3 + $0xf78] sm:$0xff]  ;;  %v9623_v25 = vld [vmem:[%s13124_s5 + $0x8] sm:$0xff]  }
 0x399   :  { %v9624_v28 = vld [vmem:[%s13124_s5 + $0x50] sm:$0xff]   ;;  %v8758_v35 = vcombine.low %v2993_v9, %v2997_v14  ;;  %v3037_v6 = vld [vmem:[%s13122_s3 + $0x10b8] sm:$0xff] }
 0x39a   :  { %6981 = vmatpush1.bf16.msra.mxu1 %v8868_v10  ;;  %v12769_v10 = vadd.f32 %v12409_v41, %v3147_v8  ;;  %v3001_v41 = vld [vmem:[%s13122_s3 + $0xf98] sm:$0xff] }
 0x39b   :  { %7135 = vmatpush1.bf16.msra.mxu0 %v8702_v19  ;;  %6982 = vmatprep.subr.bf16.mxu1 %v8877_v15  ;;  %v12775_v19 = vadd.f32 %v12696_v20, %v3159_v18  ;;  %v8750_v15 = vcombine.low %v2985_v16, %v2989_v1  ;;  %v8766_v40 = vcombine.low %v3001_v41, %v3005_v33  ;;  %v3045_v1 = vld [vmem:[%s13122_s3 + $0x10f8] sm:$0xff] }
 0x39c   :  { %7136 = vmatprep.subr.bf16.mxu0 %v8711_v31  ;;  %v8759_v31 = vcombine.high %v2993_v9, %v2997_v14  ;;  %v7212_v20 = vmul.f32 0.70710677, %v12769_v10  ;;  %v7204_v16 = vmul.f32 0.5, %v12769_v10  ;;  %v9635_v8 = vld [vmem:[%s13124_s5 + $0x38] sm:$0xff]   ;;  %v8798_v18 = vcombine.low %v3033_v3, %v3037_v6  ;;  %v9637_v10 = vld [vmem:[%s13124_s5 + $0x80] sm:$0xff]  }
 0x39d   :  { %v7215_v34 = vmul.f32 0.70710677, %v12775_v19  ;;  %v3053_v9 = vld [vmem:[%s13122_s3 + $0x1138] sm:$0xff]  ;;  %v3155_v14 = vrot.slane %v12638_v44, %v363_v56 }
 0x39e   :  { %6983 = vmatpush1.bf16.msra.mxu1 %v8876_v36  ;;  %v9626_v36 = vld [vmem:[%s13124_s5 + $0x58] sm:$0xff]   ;;  %9705 = verf.f32 %v7212_v20  ;;  %v9639_v20 = vld [vmem:[%s13124_s5 + $0x88] sm:$0xff]  }
 0x39f   :  { %7137 = vmatpush1.bf16.msra.mxu0 %v8710_v37  ;;  %6984 = vmatprep.subr.bf16.mxu1 %v8885_v29  ;;  %v8767_v37 = vcombine.high %v3001_v41, %v3005_v33  ;;  %v3009_v29 = vld [vmem:[%s13122_s3 + $0xfd8] sm:$0xff]  ;;  %9707 = verf.f32 %v7215_v34  ;;  %v12880_v33 = vadd.f32 %v12688_v21, %v3155_v14  ;;  %v9640_v34 = vld [vmem:[%s13124_s5 + $0xd0] sm:$0xff]   ;;  %v9653_v14 = vld [vmem:[%s13124_s5 + $0x100] sm:$0xff]  }
 0x3a0   :  { %7138 = vmatprep.subr.bf16.mxu0 %v8719_v32  ;;  %v3013_v32 = vld [vmem:[%s13122_s3 + $0xff8] sm:$0xff] }
 0x3a1   :  { %v8775_v46 = vcombine.high %v3009_v29, %v3013_v32  ;;  %v3057_v56 = vld [vmem:[%s13122_s3 + $0x1158] sm:$0xff] }
 0x3a2   :  { %6985 = vmatpush1.bf16.msra.mxu1 %v8884_v47  ;;  %v3017_v47 = vld [vmem:[%s13122_s3 + $0x1018] sm:$0xff] }
 0x3a3   :  { %7139 = vmatpush1.bf16.msra.mxu0 %v8718_v50  ;;  %6986 = vmatprep.subr.bf16.mxu1 %v8893_v51  ;;  %v3021_v50 = vld [vmem:[%s13122_s3 + $0x1038] sm:$0xff]  ;;  %v9629_v51 = vld [vmem:[%s13124_s5 + $0x20] sm:$0xff]  }
 0x3a4   :  { %7140 = vmatprep.subr.bf16.mxu0 %v8727_v52  ;;  %v8774_v52 = vcombine.low %v3009_v29, %v3013_v32  ;;  %v8783_v54 = vcombine.high %v3017_v47, %v3021_v50  ;;  %v3061_v41 = vld [vmem:[%s13122_s3 + $0x1178] sm:$0xff]  ;;  %v9641_v29 = vld [vmem:[%s13124_s5 + $0x90] sm:$0xff]  }
 0x3a5   :  { %v3065_v21 = vld [vmem:[%s13122_s3 + $0x1198] sm:$0xff]  ;;  %v8822_v32 = vcombine.low %v3057_v56, %v3061_v41 }
 0x3a6   :  { %6987 = vmatpush1.bf16.msra.mxu1 %v8892_v59  ;;  %v8782_v59 = vcombine.low %v3017_v47, %v3021_v50  ;;  %v9643_v47 = vld [vmem:[%s13124_s5 + $0x98] sm:$0xff]  }
 0x3a7   :  { %7141 = vmatpush1.bf16.msra.mxu0 %v8726_v60  ;;  %6988 = vmatprep.subr.bf16.mxu1 %v8901_v27  ;;  %v9632_v27 = vld [vmem:[%s13124_s5 + $0x70] sm:$0xff]  }
 0x3a8   :  { %7142 = vmatprep.subr.bf16.mxu0 %v8735_v24  ;;  %v9706_v60 = vpop.eup %9705 }
 0x3a9   :  { %v9708_v24 = vpop.eup %9707 }
 0x3aa   :  { %6989 = vmatpush1.bf16.msra.mxu1 %v8900_v62  ;;  %v7228_v62 = vadd.f32 1.0, %v9706_v60  ;;  %v7231_v58 = vadd.f32 1.0, %v9708_v24  ;;  %v3089_v60 = vld [vmem:[%s13122_s3 + $0x1258] sm:$0xff] }
 0x3ab   :  { %7143 = vmatpush1.bf16.msra.mxu0 %v8734_v11  ;;  %8969 = vmatprep.subr.bf16.mxu1 %v9620_v4  ;;  %v8790_v11 = vcombine.low %v3025_v17, %v3029_v55  ;;  %v9634_v4 = vld [vmem:[%s13124_s5 + $0x78] sm:$0xff]   ;;  %v9645_v17 = vld [vmem:[%s13124_s5 + $0xa0] sm:$0xff]  }
 0x3ac   :  { %7144 = vmatprep.subr.bf16.mxu0 %v8743_v12  ;;  %v8799_v12 = vcombine.high %v3033_v3, %v3037_v6  ;;  %v9648_v3 = vld [vmem:[%s13124_s5 + $0xf0] sm:$0xff]  }
 0x3ad   :  { %6991 = vmatmul.mubr.bf16.vlgmr.msra.gmra.mrb[12].mxu1 %v11756_v30 }
 0x3ae   :  { %8970 = vmatpush3.bf16.msra.mxu1 %v9621_v63  ;;  %7799 = vmatprep.mubr.bf16.mxu1 %v7245_v7  ;;  %v7236_v63 = vmul.f32 %v7228_v62, %v7204_v16  ;;  %v3097_v62 = vld [vmem:[%s13122_s3 + $0x1298] sm:$0xff] }
 0x3af   :  { %7145 = vmatpush1.bf16.msra.mxu0 %v8742_v2  ;;  %8971 = vmatprep.subr.bf16.mxu1 %v9622_v5  ;;  %v9636_v2 = vld [vmem:[%s13124_s5 + $0xc0] sm:$0xff]   ;;  %v9650_v16 = vld [vmem:[%s13124_s5 + $0xf8] sm:$0xff]  }
 0x3b0   :  { %7146 = vmatprep.subr.bf16.mxu0 %v8751_v23  ;;  %v3049_v23 = vld [vmem:[%s13122_s3 + $0x1118] sm:$0xff] }
 0x3b2   :  { %8972 = vmatpush3.bf16.msra.mxu1 %v9623_v25  ;;  %v7244_v25 = vpack.c.bf16 %v7236_v63, %v7236_v63  ;;  %v9651_v63 = vld [vmem:[%s13124_s5 + $0xb8] sm:$0xff]  }
 0x3b3   :  { %7147 = vmatpush1.bf16.msra.mxu0 %v8750_v15  ;;  %8973 = vmatprep.subr.bf16.mxu1 %v9624_v28  ;;  %v9638_v15 = vld [vmem:[%s13124_s5 + $0xc8] sm:$0xff]  }
 0x3b4   :  { %7148 = vmatprep.subr.bf16.mxu0 %v8759_v31  ;;  %v8815_v31 = vcombine.high %v3049_v23, %v3053_v9 }
 0x3b6   :  { %8974 = vmatpush3.bf16.msra.mxu1 %v9625_v0  ;;  %v8814_v0 = vcombine.low %v3049_v23, %v3053_v9  ;;  %v3113_v23 = vld [vmem:[%s13122_s3 + $0x1318] sm:$0xff] }
 0x3b7   :  { %7149 = vmatpush1.bf16.msra.mxu0 %v8758_v35  ;;  %8975 = vmatprep.subr.bf16.mxu1 %v9626_v36  ;;  %v8823_v35 = vcombine.high %v3057_v56, %v3061_v41  ;;  %v3069_v36 = vld [vmem:[%s13122_s3 + $0x11b8] sm:$0xff]  ;;  %v9655_v56 = vld [vmem:[%s13124_s5 + $0x108] sm:$0xff]  }
 0x3b8   :  { %7150 = vmatprep.subr.bf16.mxu0 %v8767_v37  ;;  %v7214_v37 = vmul.f32 0.70710677, %v12880_v33  ;;  %v8830_v50 = vcombine.low %v3065_v21, %v3069_v36  ;;  %v3117_v9 = vld [vmem:[%s13122_s3 + $0x1338] sm:$0xff] }
 0x3b9   :  { %v8878_v41 = vcombine.low %v3113_v23, %v3117_v9 }
 0x3ba   :  { %8976 = vmatpush3.bf16.msra.mxu1 %v9627_v39  ;;  %v9642_v39 = vld [vmem:[%s13124_s5 + $0xd8] sm:$0xff]   ;;  %9709 = verf.f32 %v7214_v37 }
 0x3bb   :  { %7151 = vmatpush1.bf16.msra.mxu0 %v8766_v40  ;;  %8977 = vmatprep.subr.bf16.mxu1 %v9628_v42  ;;  %v8831_v40 = vcombine.high %v3065_v21, %v3069_v36  ;;  %v3073_v42 = vld [vmem:[%s13122_s3 + $0x11d8] sm:$0xff] }
 0x3bc   :  { %7152 = vmatprep.subr.bf16.mxu0 %v8775_v46  ;;  %v3077_v46 = vld [vmem:[%s13122_s3 + $0x11f8] sm:$0xff] }
 0x3bd   :  { %v8838_v55 = vcombine.low %v3073_v42, %v3077_v46  ;;  %v3137_v21 = vld [vmem:[%s13122_s3 + $0x13d8] sm:$0xff] }
 0x3be   :  { %8978 = vmatpush3.bf16.msra.mxu1 %v9629_v51  ;;  %v9644_v51 = vld [vmem:[%s13124_s5 + $0xe0] sm:$0xff]   ;;  %v3141_v36 = vld [vmem:[%s13122_s3 + $0x13f8] sm:$0xff] }
 0x3bf   :  { %7153 = vmatpush1.bf16.msra.mxu0 %v8774_v52  ;;  %8979 = vmatprep.subr.bf16.mxu1 %v9630_v53  ;;  %v8839_v52 = vcombine.high %v3073_v42, %v3077_v46  ;;  %v3081_v53 = vld [vmem:[%s13122_s3 + $0x1218] sm:$0xff] }
 0x3c0   :  { %7163 = vmatprep.subr.bf16.mxu0 %v8783_v54  ;;  %v3085_v54 = vld [vmem:[%s13122_s3 + $0x1238] sm:$0xff] }
 0x3c1   :  { %v8846_v24 = vcombine.low %v3081_v53, %v3085_v54  ;;  %v9658_v42 = vld [vmem:[%s13124_s5 + $0x158] sm:$0xff]  }
 0x3c2   :  { %8980 = vmatpush3.bf16.msra.mxu1 %v9631_v57  ;;  %7155 = vmatmul.mubr.bf16.vlgmr.msra.gmra.mrb[16].mxu0 %v11552_v22  ;;  %v3041_v22 = vld [vmem:[%s13122_s3 + $0x10d8] sm:$0xff]  ;;  %v9646_v57 = vld [vmem:[%s13124_s5 + $0xe8] sm:$0xff]  }
 0x3c3   :  { %7164 = vmatpush1.bf16.msra.mxu0 %v8782_v59  ;;  %7195 = vmatprep.mubr.bf16.mxu0 %v11754_v26  ;;  %v7207_v26 = vmul.f32 0.5, %v12775_v19  ;;  %v8807_v7 = vcombine.high %v3041_v22, %v3045_v1  ;;  %v8806_v19 = vcombine.low %v3041_v22, %v3045_v1  ;;  %v8847_v59 = vcombine.high %v3081_v53, %v3085_v54  ;;  %v9659_v46 = vld [vmem:[%s13124_s5 + $0x118] sm:$0xff]   ;;  %v9665_v53 = vld [vmem:[%s13124_s5 + $0x130] sm:$0xff]  }
 0x3c4   :  { %8981 = vmatprep.subr.bf16.mxu1 %v9632_v27  ;;  %7165 = vmatprep.subr.bf16.mxu0 %v8791_v13  ;;  %v3093_v27 = vld [vmem:[%s13122_s3 + $0x1278] sm:$0xff]  ;;  %v9647_v13 = vld [vmem:[%s13124_s5 + $0xa8] sm:$0xff]   ;;  %v9710_v6 = vpop.eup %9709  ;;  %v7206_v1 = vmul.f32 0.5, %v12880_v33 }
 0x3c5   :  { %v7239_v5 = vmul.f32 %v7231_v58, %v7207_v26  ;;  %v7230_v58 = vadd.f32 1.0, %v9710_v6  ;;  %v3105_v26 = vld [vmem:[%s13122_s3 + $0x12d8] sm:$0xff] }
 0x3c6   :  { %8982 = vmatpush3.bf16.msra.mxu1 %v9633_v61  ;;  %v8855_v61 = vcombine.high %v3089_v60, %v3093_v27  ;;  %v9666_v54 = vld [vmem:[%s13124_s5 + $0x178] sm:$0xff]  }
 0x3c7   :  { %7166 = vmatpush1.bf16.msra.mxu0 %v8790_v11  ;;  %8983 = vmatprep.subr.bf16.mxu1 %v9634_v4  ;;  %v7247_v28 = vpack.c.bf16 %v7239_v5, %v7239_v5  ;;  %v3101_v11 = vld [vmem:[%s13122_s3 + $0x12b8] sm:$0xff]  ;;  %v9649_v4 = vld [vmem:[%s13124_s5 + $0xb0] sm:$0xff]   ;;  %v9652_v5 = vld [vmem:[%s13124_s5 + $0x140] sm:$0xff]  }
 0x3c8   :  { %7167 = vmatprep.subr.bf16.mxu0 %v8799_v12  ;;  %v8854_v12 = vcombine.low %v3089_v60, %v3093_v27  ;;  %v8863_v22 = vcombine.high %v3097_v62, %v3101_v11 }
 0x3ca   :  { %8984 = vmatpush3.bf16.msra.mxu1 %v9635_v8  ;;  %v3109_v8 = vld [vmem:[%s13122_s3 + $0x12f8] sm:$0xff] }
 0x3cb   :  { %7168 = vmatpush1.bf16.msra.mxu0 %v8798_v18  ;;  %8991 = vmatprep.subr.bf16.mxu1 %v9636_v2  ;;  %v7238_v18 = vmul.f32 %v7230_v58, %v7206_v1  ;;  %v8862_v2 = vcombine.low %v3097_v62, %v3101_v11 }
 0x3cc   :  { %7169 = vmatprep.subr.bf16.mxu0 %v8807_v7  ;;  %v8871_v7 = vcombine.high %v3105_v26, %v3109_v8 }
 0x3cd   :  { %7800 = vmatmul.mubr.bf16.vlgmr.msra.gmra.mrb[16].mxu1 %v7244_v25  ;;  %v8870_v25 = vcombine.low %v3105_v26, %v3109_v8 }
 0x3ce   :  { %8992 = vmatpush3.bf16.msra.mxu1 %v9637_v10  ;;  %7839 = vmatprep.mubr.bf16.mxu1 %v7247_v28  ;;  %v7246_v10 = vpack.c.bf16 %v7238_v18, %v7238_v18  ;;  %v3121_v28 = vld [vmem:[%s13122_s3 + $0x1358] sm:$0xff]  ;;  %v9670_v18 = vld [vmem:[%s13124_s5 + $0x190] sm:$0xff]  }
 0x3cf   :  { %7170 = vmatpush1.bf16.msra.mxu0 %v8806_v19  ;;  %8993 = vmatprep.subr.bf16.mxu1 %v9638_v15  ;;  %v9654_v19 = vld [vmem:[%s13124_s5 + $0x148] sm:$0xff]   ;;  %v8879_v15 = vcombine.high %v3113_v23, %v3117_v9 }
 0x3d0   :  { %7171 = vmatprep.subr.bf16.mxu0 %v8815_v31  ;;  %v3125_v31 = vld [vmem:[%s13122_s3 + $0x1378] sm:$0xff] }
 0x3d1   :  { %v8887_v33 = vcombine.high %v3121_v28, %v3125_v31 }
 0x3d2   :  { %8994 = vmatpush3.bf16.msra.mxu1 %v9639_v20  ;;  %v3129_v20 = vld [vmem:[%s13122_s3 + $0x1398] sm:$0xff] }
 0x3d3   :  { %7172 = vmatpush1.bf16.msra.mxu0 %v8814_v0  ;;  %8995 = vmatprep.subr.bf16.mxu1 %v9640_v34  ;;  %v3133_v0 = vld [vmem:[%s13122_s3 + $0x13b8] sm:$0xff]  ;;  %v8886_v34 = vcombine.low %v3121_v28, %v3125_v31  ;;  %v9676_v28 = vld [vmem:[%s13124_s5 + $0x1c0] sm:$0xff]   ;;  %v9677_v31 = vld [vmem:[%s13124_s5 + $0x1c8] sm:$0xff]  }
 0x3d4   :  { %7173 = vmatprep.subr.bf16.mxu0 %v8823_v35  ;;  %v8895_v35 = vcombine.high %v3129_v20, %v3133_v0  ;;  %v8894_v37 = vcombine.low %v3129_v20, %v3133_v0  ;;  %v9679_v0 = vld [vmem:[%s13124_s5 + $0x1d8] sm:$0xff]  }
 0x3d6   :  { %8996 = vmatpush3.bf16.msra.mxu1 %v9641_v29  ;;  %v8903_v29 = vcombine.high %v3137_v21, %v3141_v36 }
 0x3d7   :  { %7174 = vmatpush1.bf16.msra.mxu0 %v8822_v32  ;;  %8997 = vmatprep.subr.bf16.mxu1 %v9642_v39  ;;  %v8902_v32 = vcombine.low %v3137_v21, %v3141_v36  ;;  %v9656_v39 = vld [vmem:[%s13124_s5 + $0x150] sm:$0xff]  }
 0x3d8   :  { %7175 = vmatprep.subr.bf16.mxu0 %v8831_v40  ;;  %v9657_v40 = vld [vmem:[%s13124_s5 + $0x110] sm:$0xff]  }
 0x3da   :  { %8998 = vmatpush3.bf16.msra.mxu1 %v9643_v47  ;;  %v9660_v47 = vld [vmem:[%s13124_s5 + $0x160] sm:$0xff]  }
 0x3db   :  { %7176 = vmatpush1.bf16.msra.mxu0 %v8830_v50  ;;  %8999 = vmatprep.subr.bf16.mxu1 %v9644_v51  ;;  %v9661_v50 = vld [vmem:[%s13124_s5 + $0x120] sm:$0xff]   ;;  %v9663_v51 = vld [vmem:[%s13124_s5 + $0x128] sm:$0xff]  }
 0x3dc   :  { %7177 = vmatprep.subr.bf16.mxu0 %v8839_v52  ;;  %v9664_v52 = vld [vmem:[%s13124_s5 + $0x170] sm:$0xff]  }
 0x3de   :  { %9000 = vmatpush3.bf16.msra.mxu1 %v9645_v17  ;;  %v9667_v17 = vld [vmem:[%s13124_s5 + $0x138] sm:$0xff]  }
 0x3df   :  { %7178 = vmatpush1.bf16.msra.mxu0 %v8838_v55  ;;  %9001 = vmatprep.subr.bf16.mxu1 %v9646_v57  ;;  %v9745_v55 = vmov 0   ;;  %v3163_v57 = vrot.slane %v12638_v44, %v371_v43 }
 0x3e0   :  { %7179 = vmatprep.subr.bf16.mxu0 %v8847_v59  ;;  %v3167_v59 = vrot.slane %v12638_v44, %v375_v48  ;;  %v9668_v48 = vld [vmem:[%s13124_s5 + $0x180] sm:$0xff]  }
 0x3e2   :  { %9002 = vmatpush3.bf16.msra.mxu1 %v9647_v13 }
 0x3e3   :  { %7180 = vmatpush1.bf16.msra.mxu0 %v8846_v24  ;;  %9003 = vmatprep.subr.bf16.mxu1 %v9648_v3 }
 0x3e4   :  { %7181 = vmatprep.subr.bf16.mxu0 %v8855_v61 }
 0x3e6   :  { %9004 = vmatpush3.bf16.msra.mxu1 %v9649_v4 }
 0x3e7   :  { %7182 = vmatpush1.bf16.msra.mxu0 %v8854_v12  ;;  %9005 = vmatprep.subr.bf16.mxu1 %v9650_v16 }
 0x3e8   :  { %7183 = vmatprep.subr.bf16.mxu0 %v8863_v22 }
 0x3ea   :  { %9006 = vmatpush3.bf16.msra.mxu1 %v9651_v63  ;;  %v9669_v63 = vld [vmem:[%s13124_s5 + $0x188] sm:$0xff]  }
 0x3eb   :  { %7184 = vmatpush1.bf16.msra.mxu0 %v8862_v2  ;;  %9013 = vmatprep.subr.bf16.mxu1 %v9652_v5 }
 0x3ec   :  { %7185 = vmatprep.subr.bf16.mxu0 %v8871_v7  ;;  %v9671_v7 = vld [vmem:[%s13124_s5 + $0x198] sm:$0xff]  }
 0x3ed   :  { %7840 = vmatmul.mubr.bf16.vlgmr.msra.gmra.mrb[20].mxu1 %v7246_v10  ;;  %v9672_v10 = vld [vmem:[%s13124_s5 + $0x1a0] sm:$0xff]  }
 0x3ee   :  { %9014 = vmatpush3.bf16.msra.mxu1 %v9653_v14 }
 0x3ef   :  { %7186 = vmatpush1.bf16.msra.mxu0 %v8870_v25  ;;  %9015 = vmatprep.subr.bf16.mxu1 %v9654_v19  ;;  %v9673_v25 = vld [vmem:[%s13124_s5 + $0x1a8] sm:$0xff]   ;;  %v9674_v19 = vld [vmem:[%s13124_s5 + $0x1b0] sm:$0xff]  }
 0x3f0   :  { %7187 = vmatprep.subr.bf16.mxu0 %v8879_v15  ;;  %v9675_v15 = vld [vmem:[%s13124_s5 + $0x1b8] sm:$0xff]  }
 0x3f2   :  { %9016 = vmatpush3.bf16.msra.mxu1 %v9655_v56  ;;  %v9678_v56 = vld [vmem:[%s13124_s5 + $0x1d0] sm:$0xff]  }
 0x3f3   :  { %7188 = vmatpush1.bf16.msra.mxu0 %v8878_v41  ;;  %9017 = vmatprep.subr.bf16.mxu1 %v9656_v39  ;;  %v8904_v41 = vld [vmem:[%s13125_s6] ss:$0 sm:$0xff]  ;;  %v9682_v39 = vld [vmem:[%s13124_s5 + $0x1f0] ss:$0 sps:$4 sm:$0xff]  }
 0x3f4   :  { %7189 = vmatprep.subr.bf16.mxu0 %v8887_v33 }
 0x3f6   :  { %9018 = vmatpush3.bf16.msra.mxu1 %v9657_v40  ;;  %v7765_v40 = vsel %vm7763_vm0, %v9682_v39, 0 }
 0x3f7   :  { %7190 = vmatpush1.bf16.msra.mxu0 %v8886_v34  ;;  %9019 = vmatprep.subr.bf16.mxu1 %v9658_v42  ;;  %v3171_v42 = vrot.slane %v12638_v44, %v379_v38 }
 0x3f8   :  { %7191 = vmatprep.subr.bf16.mxu0 %v8895_v35 }
 0x3fa   :  { %9020 = vmatpush3.bf16.msra.mxu1 %v9659_v46  ;;  %v3175_v46 = vrot.slane %v12638_v44, %v383_v49 }
 0x3fb   :  { %7192 = vmatpush1.bf16.msra.mxu0 %v8894_v37  ;;  %9021 = vmatprep.subr.bf16.mxu1 %v9660_v47 }
 0x3fc   :  { %7193 = vmatprep.subr.bf16.mxu0 %v8903_v29  ;;  %v9680_v29 = vld [vmem:[%s13124_s5 + $0x1e0] sm:$0xff]  }
 0x3fe   :  { %9022 = vmatpush3.bf16.msra.mxu1 %v9661_v50 }
 0x3ff   :  { %7194 = vmatpush1.bf16.msra.mxu0 %v8902_v32  ;;  %v9681_v32 = vld [vmem:[%s13124_s5 + $0x1e8] sm:$0xff]  }
 0x402   :  { %7196 = vmatmul.mubr.bf16.vlgmr.msra.gmra.mrb[16].mxu0 %v11756_v30  ;;  %v9662_v30 = vld [vmem:[%s13124_s5 + $0x168] sm:$0xff]   ;;  %s9746_s5 = smov [#allocation2]  }
 0x403   :  { %9023 = vmatprep.subr.bf16.mxu1 %v9662_v30  ;;  %s7935_s20 = sshll.u32 %s9746_s5, 4  ;;  %s7936_s20 = int_to_ptr.vmem [resolvable:$true] %s7935_s20 }
 0x404   :  { %9024 = vmatpush3.bf16.msra.mxu1 %v9663_v51  ;;  %s9720_s21 = scalar_lea.vmem %s7936_s20, 32  ;;  %p9725_p1 = scmp.lt.s32.totalorder %s7936_s20, %s7936_s20 }
 0x405   :  { %9025 = vmatprep.subr.bf16.mxu1 %v9664_v52  ;;  %p9721_p0 = scmp.ne.s32.totalorder %s7936_s20, %s9720_s21  ;;  %p9726_p2 = scmp.lt.s32.totalorder %s9720_s21, %s9720_s21 }
 0x407   :  { %p9727_p3 = por %p9726_p2, %p9725_p1 }
 0x408   :  { %9026 = vmatpush3.bf16.msra.mxu1 %v9665_v53 }
 0x409   :  { %9027 = vmatprep.subr.bf16.mxu1 %v9666_v54  ;;  %p9728_p4 = pnand %p9727_p3, %p9721_p0 }
 0x40c   :  { %9028 = vmatpush3.bf16.msra.mxu1 %v9667_v17 }
 0x40d   :  { %7887 = vmatprep.subr.bf16.mxu1 %v9745_v55 }
 0x480   :  { %v6992_v60 = vpop.f32.mrb[12].mxu1 }
 0x481   :  { %v9049_v27 = vadd.f32 %v6992_v60, %v3163_v57  ;;  %v6994_v13 = vpop.f32.mrb[13].mxu1 }
 0x482   :  { %v9050_v24 = vadd.f32 %v6994_v13, %v3167_v59  ;;  %v6996_v3 = vpop.f32.mrb[14].mxu1 }
 0x483   :  { %v7216_v6 = vmul.f32 0.70710677, %v9049_v27  ;;  %v6997_v61 = vpop.f32.mrb[15].mxu1  ;;  %v7208_v58 = vmul.f32 0.5, %v9049_v27 }
 0x484   :  { %v7217_v62 = vmul.f32 0.70710677, %v9050_v24  ;;  %v7209_v16 = vmul.f32 0.5, %v9050_v24 }
 0x485   :  { %9711 = verf.f32 %v7216_v6 }
 0x486   :  { %9713 = verf.f32 %v7217_v62 }
 0x48f   :  { %v9712_v11 = vpop.eup %9711 }
 0x490   :  { %v9714_v4 = vpop.eup %9713  ;;  %v7232_v12 = vadd.f32 1.0, %v9712_v11 }
 0x491   :  { %v7233_v43 = vadd.f32 1.0, %v9714_v4 }
 0x492   :  { %v7240_v22 = vmul.f32 %v7232_v12, %v7208_v58 }
 0x493   :  { %v7241_v1 = vmul.f32 %v7233_v43, %v7209_v16 }
 0x494   :  { %v7248_v8 = vpack.c.bf16 %v7240_v22, %v7240_v22 }
 0x495   :  { %v7249_v26 = vpack.c.bf16 %v7241_v1, %v7241_v1 }
 0x497   :  { %7879 = vmatprep.mubr.bf16.mxu1 %v7249_v26 }
 0x498   :  { %7880 = vmatmul.mubr.bf16.vlgmr.msra.gmra.mrb[24].mxu1 %v7248_v8 }
 0x499   :  { %7888 = vmatpush1.bf16.msra.mxu1 %v9668_v48 }
 0x49a   :  { %7889 = vmatprep.subr.bf16.mxu1 %v9745_v55 }
 0x49d   :  { %7890 = vmatpush1.bf16.msra.mxu1 %v9669_v63 }
 0x49e   :  { %7891 = vmatprep.subr.bf16.mxu1 %v9745_v55 }
 0x4a0   :  { %v8985_v2 = vpop.f32.mrb[16].mxu1 }
 0x4a1   :  { %v8986_v5 = vpop.f32.mrb[17].mxu1  ;;  %7892 = vmatpush1.bf16.msra.mxu1 %v9670_v18 }
 0x4a2   :  { %v8987_v23 = vadd.f32 %v8986_v5, %v8985_v2  ;;  %v8988_v9 = vpop.f32.mrb[18].mxu1  ;;  %7893 = vmatprep.subr.bf16.mxu1 %v9745_v55 }
 0x4a3   :  { %v8989_v14 = vpop.f32.mrb[19].mxu1 }
 0x4a4   :  { %v7802_v34 = vadd.f32 %v8987_v23, %v8904_v41 }
 0x4a5   :  { %7894 = vmatpush1.bf16.msra.mxu1 %v9671_v7 }
 0x4a6   :  { %7895 = vmatprep.subr.bf16.mxu1 %v9745_v55 }
 0x4a9   :  { %7896 = vmatpush1.bf16.msra.mxu1 %v9672_v10 }
 0x4aa   :  { %7897 = vmatprep.subr.bf16.mxu1 %v9745_v55 }
 0x4ad   :  { %7898 = vmatpush1.bf16.msra.mxu1 %v9673_v25 }
 0x4ae   :  { %7899 = vmatprep.subr.bf16.mxu1 %v9745_v55 }
 0x4b1   :  { %7900 = vmatpush1.bf16.msra.mxu1 %v9674_v19 }
 0x4b2   :  { %7901 = vmatprep.subr.bf16.mxu1 %v9745_v55 }
 0x4b5   :  { %7902 = vmatpush1.bf16.msra.mxu1 %v9675_v15 }
 0x4b6   :  { %7903 = vmatprep.subr.bf16.mxu1 %v9745_v55 }
 0x4b9   :  { %7904 = vmatpush1.bf16.msra.mxu1 %v9676_v28 }
 0x4ba   :  { %7905 = vmatprep.subr.bf16.mxu1 %v9745_v55 }
 0x4bd   :  { %7906 = vmatpush1.bf16.msra.mxu1 %v9677_v31 }
 0x4be   :  { %7907 = vmatprep.subr.bf16.mxu1 %v9745_v55 }
 0x4c0   :  { %v9007_v33 = vpop.f32.mrb[20].mxu1 }
 0x4c1   :  { %v9008_v20 = vpop.f32.mrb[21].mxu1  ;;  %7908 = vmatpush1.bf16.msra.mxu1 %v9678_v56 }
 0x4c2   :  { %v9009_v35 = vadd.f32 %v9008_v20, %v9007_v33  ;;  %v9010_v21 = vpop.f32.mrb[22].mxu1  ;;  %7909 = vmatprep.subr.bf16.mxu1 %v9745_v55 }
 0x4c3   :  { %v9011_v36 = vpop.f32.mrb[23].mxu1 }
 0x4c4   :  { %v7842_v37 = vadd.f32 %v9009_v35, %v7802_v34 }
 0x4c5   :  { %7910 = vmatpush1.bf16.msra.mxu1 %v9679_v0 }
 0x4c6   :  { %7911 = vmatprep.subr.bf16.mxu1 %v9745_v55 }
 0x4c9   :  { %7912 = vmatpush1.bf16.msra.mxu1 %v9680_v29 }
 0x4ca   :  { %7913 = vmatprep.subr.bf16.mxu1 %v9745_v55 }
 0x4cd   :  { %7914 = vmatpush1.bf16.msra.mxu1 %v9681_v32 }
 0x4ce   :  { %7915 = vmatprep.subr.bf16.mxu1 %v9745_v55 }
 0x4d1   :  { %7916 = vmatpush1.bf16.msra.mxu1 %v7765_v40 }
 0x4d5   :  { %v7197_v47 = vpop.f32.mrb[16].mxu0 }
 0x4d6   :  { %v9051_v50 = vadd.f32 %v7197_v47, %v3171_v42  ;;  %v7199_v30 = vpop.f32.mrb[17].mxu0 }
 0x4d7   :  { %v9052_v51 = vadd.f32 %v7199_v30, %v3175_v46  ;;  %v7201_v52 = vpop.f32.mrb[18].mxu0 }
 0x4d8   :  { %v7218_v53 = vmul.f32 0.70710677, %v9051_v50  ;;  %v7202_v54 = vpop.f32.mrb[19].mxu0  ;;  %v7210_v59 = vmul.f32 0.5, %v9051_v50 }
 0x4d9   :  { %v7219_v17 = vmul.f32 0.70710677, %v9052_v51  ;;  %v7211_v27 = vmul.f32 0.5, %v9052_v51 }
 0x4da   :  { %9715 = verf.f32 %v7218_v53 }
 0x4db   :  { %9717 = verf.f32 %v7219_v17 }
 0x4e4   :  { %v9716_v55 = vpop.eup %9715 }
 0x4e5   :  { %v9718_v57 = vpop.eup %9717  ;;  %v7234_v60 = vadd.f32 1.0, %v9716_v55 }
 0x4e6   :  { %v7235_v38 = vadd.f32 1.0, %v9718_v57 }
 0x4e7   :  { %v7242_v13 = vmul.f32 %v7234_v60, %v7210_v59 }
 0x4e8   :  { %v7243_v45 = vmul.f32 %v7235_v38, %v7211_v27 }
 0x4e9   :  { %v7250_v44 = vpack.c.bf16 %v7242_v13, %v7242_v13 }
 0x4ea   :  { %v7251_v49 = vpack.c.bf16 %v7243_v45, %v7243_v45 }
 0x4ec   :  { %8968 = vmatprep.mubr.msk.bf16.mxu1 %vm7759_vm1, %v7251_v49 }
 0x4ed   :  { %7920 = vmatmul.mubr.bf16.vlgmr.msra.gmra.mrb[28].mxu1 %v7250_v44 }
 0x56b   :  { %v9029_v24 = vpop.f32.mrb[24].mxu1 }
 0x56c   :  { %v9030_v3 = vpop.f32.mrb[25].mxu1 }
 0x56d   :  { %v9031_v6 = vadd.f32 %v9030_v3, %v9029_v24  ;;  %v9032_v61 = vpop.f32.mrb[26].mxu1 }
 0x56e   :  { %v9033_v62 = vpop.f32.mrb[27].mxu1 }
 0x56f   :  { %v7882_v11 = vadd.f32 %v9031_v6, %v7842_v37 }
 0x5c0   :  { %v7921_v4 = vpop.f32.mrb[28].mxu1 }
 0x5c1   :  { %v7922_v58 = vadd.f32 %v7921_v4, %v7882_v11  ;;  %v7923_v12 = vpop.f32.mrb[29].mxu1 }
 0x5c2   :  { %v7924_v16 = vpop.f32.mrb[30].mxu1 }
 0x5c3   :  { %v7925_v43 = vpop.f32.mrb[31].mxu1  ;;  %7928 = vst.msk [vmem:[#allocation2] sm:$0x3] %vm7927_vm2, %v7922_v58 }
 0x5c4   :  { %9731 = shalt.err (!%p9728_p4)
}
 0x5c5   :  { %s9732_s24 = scalar_lea.hbm %s13126_s7, 32 }
 0x5c6   :  { %p9733_p5 = scmp.ne.s32.totalorder %s13126_s7, %s9732_s24  ;;  %p9736_p6 = scmp.lt.u32.totalorder %s9732_s24, %s13126_s7 }
 0x5c8   :  { %p9738_p7 = pnand %p9736_p6, %p9733_p5 }
 0x5ca   :  { %9741 = shalt.err (!%p9738_p7)
}
 0x5cb   :  { %7938 = dma.vmem_to_hbm [thread:$0]  %s7936_s20, 32, %s13126_s7, [#allocation3]  }
 0x5cc   :  { %9742 = dma.done.wait [#allocation3], 32  }
 0x5cd   :  { %9743 = vsyncadd [#allocation3], 4294967264 }
 0x5ce   :  { %7942 = vsyncpa [#allocation3], 1 }

</bundles_post_ra>
